<compile_context>
chip_gen: v6e
topology: v6e:2x2x1
jax: 0.10.0
libtpu: 0.0.40
codegen_flags: <defaults>
</compile_context>

<pallas_src>
import functools

import jax
import jax.numpy as jnp
from jax.experimental import pallas as pl
from jax.experimental.pallas import tpu as pltpu


# ---------------------------------------------------------------------------
# Hardware-derived budgets (cached once per process).
# ---------------------------------------------------------------------------
_HW_BUDGET = None


def _hw_budget():
    """Returns (target in+out bytes per grid step, vmem_limit_bytes)."""
    global _HW_BUDGET
    if _HW_BUDGET is None:
        cap = None
        try:
            cap = int(getattr(pltpu.get_tpu_info(), "vmem_capacity_bytes", 0)) or None
        except Exception:
            cap = None
        if cap is None:
            cap = 64 * 1024 * 1024                 # conservative: fits every generation
        block_target = min(16 << 20, cap // 10)    # ~12.8 MiB on 128 MiB VMEM, ~6.4 MiB on v7x
        vmem_limit = min(3 * cap // 4, 96 << 20)   # 96 MiB v5e/v6e, 48 MiB v7x
        _HW_BUDGET = (int(block_target), int(vmem_limit))
    return _HW_BUDGET


def _pick_row_chunk(G, W, in_itemsize, target_bytes):
    """Folded rows (of the C//4*H axis) processed per grid step.

    One folded row moves 4*W*in_itemsize input bytes + 4*W*4 output bytes.
    Returns the full axis G (block == full dim is always legal) or a multiple
    of 8; a ragged tail is handled by the cdiv grid, so no exact-divisor
    requirement (and no giant single-block fallback).
    """
    per_row = 4 * W * in_itemsize + 16 * W
    rg = int(target_bytes // per_row)
    rg -= rg % 8
    if rg >= G or G <= 8:
        return G
    return max(rg, 8)


def _even_out_grid(G, rg, B):
    """If B * num_row_blocks is odd, nudge rg so it becomes even (keeps both
    v7x TensorCores busy); ~0.35us extra per step elsewhere -- negligible."""
    nb = -(-G // rg)
    if (B * nb) % 2 == 0 or G <= 8:
        return rg
    rg2 = ((-(-G // (nb + 1)) + 7) // 8) * 8
    if 8 <= rg2 < G and (-(-G // rg2)) % 2 == 0:
        return rg2
    return rg


# ---------------------------------------------------------------------------
# Kernels.
# ---------------------------------------------------------------------------
def _butterfly(x_ref, a, bh):
    # x_ref: (4, RG, W) in native dtype; math in f32 (v5e has no bf16 VPU).
    # Returns the four output parity planes, already * b + a (/2 folded in bh).
    x1 = x_ref[0].astype(jnp.float32)
    x2 = x_ref[1].astype(jnp.float32)
    x3 = x_ref[2].astype(jnp.float32)
    x4 = x_ref[3].astype(jnp.float32)
    s = (x1 + x4) * bh
    d = (x1 - x4) * bh
    u = (x2 + x3) * bh
    v = (x2 - x3) * bh
    o00 = s - u + a     # h[0::2, 0::2]
    o01 = d + v + a     # h[0::2, 1::2]
    o10 = d - v + a     # h[1::2, 0::2]
    o11 = s + u + a     # h[1::2, 1::2]
    return o00, o01, o10, o11


def _interleave_cols(lo, hi):
    # Lane interleave: out[:, 0::2] = lo, out[:, 1::2] = hi.
    RG, W = lo.shape
    return jnp.stack([lo, hi], axis=-1).reshape(RG, 2 * W)


def _fused_kernel_strided(a_ref, bh_ref, x_ref, o_ref):
    # o_ref: (2RG, 2W). Row interleave via two stride-2 sublane stores
    # (avoids the stack+reshape VMEM relayout on the single vst slot).
    o00, o01, o10, o11 = _butterfly(x_ref, a_ref[0], bh_ref[0])
    RG = o00.shape[0]
    o_ref[pl.ds(0, RG, stride=2), :] = _interleave_cols(o00, o01)
    o_ref[pl.ds(1, RG, stride=2), :] = _interleave_cols(o10, o11)


def _fused_kernel_stack(a_ref, bh_ref, x_ref, o_ref):
    # o_ref: (2RG, 2W). Row interleave via stack+reshape relayout in VMEM.
    o00, o01, o10, o11 = _butterfly(x_ref, a_ref[0], bh_ref[0])
    RG, W = o00.shape
    even = _interleave_cols(o00, o01)
    odd = _interleave_cols(o10, o11)
    o_ref[...] = jnp.stack([even, odd], axis=1).reshape(2 * RG, 2 * W)


def _planes_kernel(a_ref, bh_ref, x_ref, o_ref):
    # o_ref: (2, 2, RG, W) = (row parity, col parity, rows, cols); the pixel
    # shuffle is finished by XLA afterwards (extra HBM pass; last resort).
    o00, o01, o10, o11 = _butterfly(x_ref, a_ref[0], bh_ref[0])
    o_ref[0, 0] = o00
    o_ref[0, 1] = o01
    o_ref[1, 0] = o10
    o_ref[1, 1] = o11


# ---------------------------------------------------------------------------
# pallas_call wrappers.
# ---------------------------------------------------------------------------
@functools.partial(jax.jit, static_argnames=("mode",))
def _niwt_impl(x, a, b, *, mode):
    B, C, H, W = x.shape
    assert C % 4 == 0, "NIWT needs channel count divisible by 4"
    C_out = C // 4
    G = C_out * H
    in_itemsize = jnp.dtype(x.dtype).itemsize

    block_target, vmem_limit = _hw_budget()
    RG = _pick_row_chunk(G, W, in_itemsize, block_target)
    RG = _even_out_grid(G, RG, B)
    nb = pl.cdiv(G, RG)

    xg = x.reshape(B, 4, G, W)                               # contiguous, free
    a_arr = jnp.asarray(a, jnp.float32).reshape(1)
    bh_arr = (0.5 * jnp.asarray(b, jnp.float32)).reshape(1)  # fold the /2 into b

    cost = pl.CostEstimate(
        flops=16 * B * G * W,          # 8 add/sub + 4 mul + 4 bias adds per 4 inputs
        transcendentals=0,
        bytes_accessed=B * 4 * G * W * in_itemsize + B * 4 * G * W * 4,
    )
    cparams = pltpu.CompilerParams(
        dimension_semantics=("parallel", "parallel"),
        vmem_limit_bytes=vmem_limit,
    )
    smem = pl.BlockSpec(memory_space=pltpu.MemorySpace.SMEM)
    in_spec = pl.BlockSpec((pl.Squeezed(), 4, RG, W), lambda bi, gi: (bi, 0, gi, 0))

    if mode == "planes":
        out = pl.pallas_call(
            _planes_kernel,
            out_shape=jax.ShapeDtypeStruct((B, 2, 2, G, W), jnp.float32),
            grid_spec=pltpu.PrefetchScalarGridSpec(
                num_scalar_prefetch=0,
                grid=(B, nb),
                in_specs=[smem, smem, in_spec],
                out_specs=pl.BlockSpec((pl.Squeezed(), 2, 2, RG, W),
                                       lambda bi, gi: (bi, 0, 0, gi, 0)),
            ),
            compiler_params=cparams,
            cost_estimate=cost,
        )(a_arr, bh_arr, xg)
        h = out.reshape(B, 2, 2, C_out, H, W).transpose(0, 3, 4, 1, 5, 2)
        return h.reshape(B, C_out, 2 * H, 2 * W)

    kernel = _fused_kernel_strided if mode == "strided" else _fused_kernel_stack
    out = pl.pallas_call(
        kernel,
        out_shape=jax.ShapeDtypeStruct((B, 2 * G, 2 * W), jnp.float32),
        grid_spec=pltpu.PrefetchScalarGridSpec(
            num_scalar_prefetch=0,
            grid=(B, nb),
            in_specs=[smem, smem, in_spec],
            out_specs=pl.BlockSpec((pl.Squeezed(), 2 * RG, 2 * W),
                                   lambda bi, gi: (bi, gi, 0)),
        ),
        compiler_params=cparams,
        cost_estimate=cost,
    )(a_arr, bh_arr, xg)
    # Only a contiguous regrouping remains -- free under jit.
    return out.reshape(B, C_out, 2 * H, 2 * W)


# ---------------------------------------------------------------------------
# Mode selection: prefer strided stores, fall back to stack, then planes.
# ---------------------------------------------------------------------------
def niwt_ref(x, a, b):
    # Pure-JAX reference mirroring the PyTorch niwt_init + inorm.
    B, C, H, W = x.shape
    Co = C // 4
    xf = x.astype(jnp.float32)
    x1 = xf[:, 0:Co] / 2
    x2 = xf[:, Co:2 * Co] / 2
    x3 = xf[:, 2 * Co:3 * Co] / 2
    x4 = xf[:, 3 * Co:4 * Co] / 2
    h = jnp.zeros((B, Co, 2 * H, 2 * W), jnp.float32)
    h = h.at[:, :, 0::2, 0::2].set(x1 - x2 - x3 + x4)
    h = h.at[:, :, 1::2, 0::2].set(x1 - x2 + x3 - x4)
    h = h.at[:, :, 0::2, 1::2].set(x1 + x2 - x3 - x4)
    h = h.at[:, :, 1::2, 1::2].set(x1 + x2 + x3 + x4)
    return h * b + a


_MODE_CACHE = {}     # (shape, dtype) -> mode that compiled & ran for that key
_STRIDED_OK = None   # one-time numerical validation of the strided-store path


def _strided_self_test():
    """Validate the stride-2 sublane store lowering once on a tiny tensor."""
    global _STRIDED_OK
    if _STRIDED_OK is None:
        try:
            xs = jnp.linspace(-1.0, 1.0, 1 * 4 * 8 * 16,
                              dtype=jnp.float32).reshape(1, 4, 8, 16)
            got = jax.block_until_ready(_niwt_impl(xs, 0.3, 1.7, mode="strided"))
            _STRIDED_OK = bool(jnp.allclose(got, niwt_ref(xs, 0.3, 1.7),
                                            atol=1e-5, rtol=1e-5))
        except Exception:
            _STRIDED_OK = False     # stride-2 sublane store not supported here
    return _STRIDED_OK


def _candidate_modes():
    return (("strided", "stack", "planes") if _strided_self_test()
            else ("stack", "planes"))


def niwt_forward(x, a, b):
    """NIWT forward: (B, C, H, W) -> (B, C//4, 2H, 2W);  h = idwt(x/2) * b + a."""
    key = (tuple(x.shape), jnp.dtype(x.dtype).name)
    mode = _MODE_CACHE.get(key)
    if mode is not None:
        return _niwt_impl(x, a, b, mode=mode)
    last_err = None
    for m in _candidate_modes():
        try:
            out = jax.block_until_ready(_niwt_impl(x, a, b, mode=m))
            _MODE_CACHE[key] = m          # pin per (shape, dtype), not globally
            return out
        except Exception as err:          # lowering / VMEM failure -> next layout
            last_err = err
    raise last_err


if __name__ == "__main__":
    key = jax.random.PRNGKey(0)
    B, C, H, W = 2, 4, 16, 16
    x = jax.random.normal(key, (B, C, H, W), dtype=jnp.float32)

    # deterministic "parameters" for the module's (a, b)
    a, b = 0.1, 1.5

    out = jax.block_until_ready(niwt_forward(x, a, b))
    ref = niwt_ref(x, a, b)
    assert out.shape == (B, C // 4, 2 * H, 2 * W), out.shape
    assert jnp.allclose(out, ref, atol=1e-5, rtol=1e-5), "mismatch vs reference"

    print("KERNEL_OK")
</pallas_src>

<mosaic_0001>
module attributes {stable_mosaic.version = 11 : i64} {
  func.func @_fused_kernel_strided(%arg0: i32, %arg1: i32, %arg2: memref<1xf32, #tpu.memory_space<smem>>, %arg3: memref<1xf32, #tpu.memory_space<smem>>, %arg4: memref<1x4x8x16xf32, #tpu.memory_space<vmem>>, %arg5: memref<1x16x32xf32, #tpu.memory_space<vmem>>) attributes {dimension_semantics = [#tpu.dimension_semantics<parallel>, #tpu.dimension_semantics<parallel>], iteration_bounds = array<i64: 1, 1>, scalar_prefetch = 0 : i64, scratch_operands = 0 : i64, tpu.core_type = #tpu.core_type<tc>, window_params = [{transform_indices = @transform_0, window_bounds = array<i64: 1>}, {transform_indices = @transform_1, window_bounds = array<i64: 1>}, {transform_indices = @transform_2, window_bounds = array<i64: 1, 4, 8, 16>}, {transform_indices = @transform_3, window_bounds = array<i64: 1, 16, 32>}]} {
    %c0 = arith.constant 0 : index
    %0 = memref.load %arg2[%c0] : memref<1xf32, #tpu.memory_space<smem>>
    %c0_0 = arith.constant 0 : index
    %1 = memref.load %arg3[%c0_0] : memref<1xf32, #tpu.memory_space<smem>>
    %c0_1 = arith.constant 0 : index
    %c0_2 = arith.constant 0 : index
    %c0_3 = arith.constant 0 : index
    %c0_4 = arith.constant 0 : index
    %2 = vector.load %arg4[%c0_1, %c0_2, %c0_3, %c0_4] : memref<1x4x8x16xf32, #tpu.memory_space<vmem>>, vector<1x1x8x16xf32>
    %3 = vector.shape_cast %2 : vector<1x1x8x16xf32> to vector<8x16xf32>
    %c0_5 = arith.constant 0 : index
    %c1 = arith.constant 1 : index
    %c0_6 = arith.constant 0 : index
    %c0_7 = arith.constant 0 : index
    %4 = vector.load %arg4[%c0_5, %c1, %c0_6, %c0_7] : memref<1x4x8x16xf32, #tpu.memory_space<vmem>>, vector<1x1x8x16xf32>
    %5 = vector.shape_cast %4 : vector<1x1x8x16xf32> to vector<8x16xf32>
    %c0_8 = arith.constant 0 : index
    %c2 = arith.constant 2 : index
    %c0_9 = arith.constant 0 : index
    %c0_10 = arith.constant 0 : index
    %6 = vector.load %arg4[%c0_8, %c2, %c0_9, %c0_10] : memref<1x4x8x16xf32, #tpu.memory_space<vmem>>, vector<1x1x8x16xf32>
    %7 = vector.shape_cast %6 : vector<1x1x8x16xf32> to vector<8x16xf32>
    %c0_11 = arith.constant 0 : index
    %c3 = arith.constant 3 : index
    %c0_12 = arith.constant 0 : index
    %c0_13 = arith.constant 0 : index
    %8 = vector.load %arg4[%c0_11, %c3, %c0_12, %c0_13] : memref<1x4x8x16xf32, #tpu.memory_space<vmem>>, vector<1x1x8x16xf32>
    %9 = vector.shape_cast %8 : vector<1x1x8x16xf32> to vector<8x16xf32>
    %10 = arith.addf %3, %9 : vector<8x16xf32>
    %11 = vector.broadcast %1 : f32 to vector<8x16xf32>
    %12 = arith.mulf %10, %11 : vector<8x16xf32>
    %13 = arith.subf %3, %9 : vector<8x16xf32>
    %14 = vector.broadcast %1 : f32 to vector<8x16xf32>
    %15 = arith.mulf %13, %14 : vector<8x16xf32>
    %16 = arith.addf %5, %7 : vector<8x16xf32>
    %17 = vector.broadcast %1 : f32 to vector<8x16xf32>
    %18 = arith.mulf %16, %17 : vector<8x16xf32>
    %19 = arith.subf %5, %7 : vector<8x16xf32>
    %20 = vector.broadcast %1 : f32 to vector<8x16xf32>
    %21 = arith.mulf %19, %20 : vector<8x16xf32>
    %22 = arith.subf %12, %18 : vector<8x16xf32>
    %23 = vector.broadcast %0 : f32 to vector<8x16xf32>
    %24 = arith.addf %22, %23 : vector<8x16xf32>
    %25 = arith.addf %15, %21 : vector<8x16xf32>
    %26 = vector.broadcast %0 : f32 to vector<8x16xf32>
    %27 = arith.addf %25, %26 : vector<8x16xf32>
    %28 = arith.subf %15, %21 : vector<8x16xf32>
    %29 = vector.broadcast %0 : f32 to vector<8x16xf32>
    %30 = arith.addf %28, %29 : vector<8x16xf32>
    %31 = arith.addf %12, %18 : vector<8x16xf32>
    %32 = vector.broadcast %0 : f32 to vector<8x16xf32>
    %33 = arith.addf %31, %32 : vector<8x16xf32>
    %34 = vector.shape_cast %24 : vector<8x16xf32> to vector<8x16x1xf32>
    %35 = vector.shape_cast %27 : vector<8x16xf32> to vector<8x16x1xf32>
    %36 = tpu.concatenate %34, %35 in 2 : vector<8x16x1xf32>, vector<8x16x1xf32> -> vector<8x16x2xf32>
    %37 = vector.shape_cast %36 : vector<8x16x2xf32> to vector<8x32xf32>
    %c0_14 = arith.constant 0 : index
    %c0_15 = arith.constant 0 : index
    %c0_16 = arith.constant 0 : index
    %38 = tpu.strided_load %arg5[%c0_14, %c0_15, %c0_16] {strides = array<i32: 1, 2, 1>} : memref<1x16x32xf32, #tpu.memory_space<vmem>>, vector<1x8x32xf32>
    %39 = vector.shape_cast %38 : vector<1x8x32xf32> to vector<8x32xf32>
    %40 = vector.shape_cast %37 : vector<8x32xf32> to vector<1x8x32xf32>
    tpu.strided_store %arg5[%c0_14, %c0_15, %c0_16], %40 {strides = array<i32: 1, 2, 1>} : memref<1x16x32xf32, #tpu.memory_space<vmem>>, vector<1x8x32xf32>
    %41 = vector.shape_cast %30 : vector<8x16xf32> to vector<8x16x1xf32>
    %42 = vector.shape_cast %33 : vector<8x16xf32> to vector<8x16x1xf32>
    %43 = tpu.concatenate %41, %42 in 2 : vector<8x16x1xf32>, vector<8x16x1xf32> -> vector<8x16x2xf32>
    %44 = vector.shape_cast %43 : vector<8x16x2xf32> to vector<8x32xf32>
    %c0_17 = arith.constant 0 : index
    %c1_18 = arith.constant 1 : index
    %c0_19 = arith.constant 0 : index
    %45 = tpu.strided_load %arg5[%c0_17, %c1_18, %c0_19] {strides = array<i32: 1, 2, 1>} : memref<1x16x32xf32, #tpu.memory_space<vmem>>, vector<1x8x32xf32>
    %46 = vector.shape_cast %45 : vector<1x8x32xf32> to vector<8x32xf32>
    %47 = vector.shape_cast %44 : vector<8x32xf32> to vector<1x8x32xf32>
    tpu.strided_store %arg5[%c0_17, %c1_18, %c0_19], %47 {strides = array<i32: 1, 2, 1>} : memref<1x16x32xf32, #tpu.memory_space<vmem>>, vector<1x8x32xf32>
    return
  }
  func.func @transform_0(%arg0: i32, %arg1: i32) -> i32 {
    %c0_i32 = arith.constant 0 : i32
    %c0_i32_0 = arith.constant 0 : i32
    return %c0_i32 : i32
  }
  func.func @transform_1(%arg0: i32, %arg1: i32) -> i32 {
    %c0_i32 = arith.constant 0 : i32
    %c0_i32_0 = arith.constant 0 : i32
    return %c0_i32 : i32
  }
  func.func @transform_2(%arg0: i32, %arg1: i32) -> (i32, i32, i32, i32) {
    %c0_i32 = arith.constant 0 : i32
    %c0_i32_0 = arith.constant 0 : i32
    %c0_i32_1 = arith.constant 0 : i32
    return %arg0, %c0_i32, %arg1, %c0_i32_0 : i32, i32, i32, i32
  }
  func.func @transform_3(%arg0: i32, %arg1: i32) -> (i32, i32, i32) {
    %c0_i32 = arith.constant 0 : i32
    %c0_i32_0 = arith.constant 0 : i32
    return %arg0, %arg1, %c0_i32 : i32, i32, i32
  }
}

module attributes {stable_mosaic.version = 11 : i64} {
  func.func @_fused_kernel_stack(%arg0: i32, %arg1: i32, %arg2: memref<1xf32, #tpu.memory_space<smem>>, %arg3: memref<1xf32, #tpu.memory_space<smem>>, %arg4: memref<1x4x16x16xf32, #tpu.memory_space<vmem>>, %arg5: memref<1x32x32xf32, #tpu.memory_space<vmem>>) attributes {dimension_semantics = [#tpu.dimension_semantics<parallel>, #tpu.dimension_semantics<parallel>], iteration_bounds = array<i64: 2, 1>, scalar_prefetch = 0 : i64, scratch_operands = 0 : i64, tpu.core_type = #tpu.core_type<tc>, window_params = [{transform_indices = @transform_0, window_bounds = array<i64: 1>}, {transform_indices = @transform_1, window_bounds = array<i64: 1>}, {transform_indices = @transform_2, window_bounds = array<i64: 1, 4, 16, 16>}, {transform_indices = @transform_3, window_bounds = array<i64: 1, 32, 32>}]} {
    %c0 = arith.constant 0 : index
    %0 = memref.load %arg2[%c0] : memref<1xf32, #tpu.memory_space<smem>>
    %c0_0 = arith.constant 0 : index
    %1 = memref.load %arg3[%c0_0] : memref<1xf32, #tpu.memory_space<smem>>
    %c0_1 = arith.constant 0 : index
    %c0_2 = arith.constant 0 : index
    %c0_3 = arith.constant 0 : index
    %c0_4 = arith.constant 0 : index
    %2 = vector.load %arg4[%c0_1, %c0_2, %c0_3, %c0_4] : memref<1x4x16x16xf32, #tpu.memory_space<vmem>>, vector<1x1x16x16xf32>
    %3 = vector.shape_cast %2 : vector<1x1x16x16xf32> to vector<16x16xf32>
    %c0_5 = arith.constant 0 : index
    %c1 = arith.constant 1 : index
    %c0_6 = arith.constant 0 : index
    %c0_7 = arith.constant 0 : index
    %4 = vector.load %arg4[%c0_5, %c1, %c0_6, %c0_7] : memref<1x4x16x16xf32, #tpu.memory_space<vmem>>, vector<1x1x16x16xf32>
    %5 = vector.shape_cast %4 : vector<1x1x16x16xf32> to vector<16x16xf32>
    %c0_8 = arith.constant 0 : index
    %c2 = arith.constant 2 : index
    %c0_9 = arith.constant 0 : index
    %c0_10 = arith.constant 0 : index
    %6 = vector.load %arg4[%c0_8, %c2, %c0_9, %c0_10] : memref<1x4x16x16xf32, #tpu.memory_space<vmem>>, vector<1x1x16x16xf32>
    %7 = vector.shape_cast %6 : vector<1x1x16x16xf32> to vector<16x16xf32>
    %c0_11 = arith.constant 0 : index
    %c3 = arith.constant 3 : index
    %c0_12 = arith.constant 0 : index
    %c0_13 = arith.constant 0 : index
    %8 = vector.load %arg4[%c0_11, %c3, %c0_12, %c0_13] : memref<1x4x16x16xf32, #tpu.memory_space<vmem>>, vector<1x1x16x16xf32>
    %9 = vector.shape_cast %8 : vector<1x1x16x16xf32> to vector<16x16xf32>
    %10 = arith.addf %3, %9 : vector<16x16xf32>
    %11 = vector.broadcast %1 : f32 to vector<16x16xf32>
    %12 = arith.mulf %10, %11 : vector<16x16xf32>
    %13 = arith.subf %3, %9 : vector<16x16xf32>
    %14 = vector.broadcast %1 : f32 to vector<16x16xf32>
    %15 = arith.mulf %13, %14 : vector<16x16xf32>
    %16 = arith.addf %5, %7 : vector<16x16xf32>
    %17 = vector.broadcast %1 : f32 to vector<16x16xf32>
    %18 = arith.mulf %16, %17 : vector<16x16xf32>
    %19 = arith.subf %5, %7 : vector<16x16xf32>
    %20 = vector.broadcast %1 : f32 to vector<16x16xf32>
    %21 = arith.mulf %19, %20 : vector<16x16xf32>
    %22 = arith.subf %12, %18 : vector<16x16xf32>
    %23 = vector.broadcast %0 : f32 to vector<16x16xf32>
    %24 = arith.addf %22, %23 : vector<16x16xf32>
    %25 = arith.addf %15, %21 : vector<16x16xf32>
    %26 = vector.broadcast %0 : f32 to vector<16x16xf32>
    %27 = arith.addf %25, %26 : vector<16x16xf32>
    %28 = arith.subf %15, %21 : vector<16x16xf32>
    %29 = vector.broadcast %0 : f32 to vector<16x16xf32>
    %30 = arith.addf %28, %29 : vector<16x16xf32>
    %31 = arith.addf %12, %18 : vector<16x16xf32>
    %32 = vector.broadcast %0 : f32 to vector<16x16xf32>
    %33 = arith.addf %31, %32 : vector<16x16xf32>
    %34 = vector.shape_cast %24 : vector<16x16xf32> to vector<16x16x1xf32>
    %35 = vector.shape_cast %27 : vector<16x16xf32> to vector<16x16x1xf32>
    %36 = tpu.concatenate %34, %35 in 2 : vector<16x16x1xf32>, vector<16x16x1xf32> -> vector<16x16x2xf32>
    %37 = vector.shape_cast %36 : vector<16x16x2xf32> to vector<16x32xf32>
    %38 = vector.shape_cast %30 : vector<16x16xf32> to vector<16x16x1xf32>
    %39 = vector.shape_cast %33 : vector<16x16xf32> to vector<16x16x1xf32>
    %40 = tpu.concatenate %38, %39 in 2 : vector<16x16x1xf32>, vector<16x16x1xf32> -> vector<16x16x2xf32>
    %41 = vector.shape_cast %40 : vector<16x16x2xf32> to vector<16x32xf32>
    %42 = vector.shape_cast %37 : vector<16x32xf32> to vector<16x1x32xf32>
    %43 = vector.shape_cast %41 : vector<16x32xf32> to vector<16x1x32xf32>
    %44 = tpu.concatenate %42, %43 in 1 : vector<16x1x32xf32>, vector<16x1x32xf32> -> vector<16x2x32xf32>
    %45 = vector.shape_cast %44 : vector<16x2x32xf32> to vector<32x32xf32>
    %c0_14 = arith.constant 0 : index
    %c0_15 = arith.constant 0 : index
    %c0_16 = arith.constant 0 : index
    %46 = vector.load %arg5[%c0_14, %c0_15, %c0_16] : memref<1x32x32xf32, #tpu.memory_space<vmem>>, vector<1x32x32xf32>
    %47 = vector.shape_cast %46 : vector<1x32x32xf32> to vector<32x32xf32>
    %48 = vector.shape_cast %45 : vector<32x32xf32> to vector<1x32x32xf32>
    tpu.vector_store %arg5[%c0_14, %c0_15, %c0_16], %48 {strides = array<i32>} : memref<1x32x32xf32, #tpu.memory_space<vmem>>, vector<1x32x32xf32>,
    return
  }
  func.func @transform_0(%arg0: i32, %arg1: i32) -> i32 {
    %c0_i32 = arith.constant 0 : i32
    %c0_i32_0 = arith.constant 0 : i32
    return %c0_i32 : i32
  }
  func.func @transform_1(%arg0: i32, %arg1: i32) -> i32 {
    %c0_i32 = arith.constant 0 : i32
    %c0_i32_0 = arith.constant 0 : i32
    return %c0_i32 : i32
  }
  func.func @transform_2(%arg0: i32, %arg1: i32) -> (i32, i32, i32, i32) {
    %c0_i32 = arith.constant 0 : i32
    %c0_i32_0 = arith.constant 0 : i32
    %c0_i32_1 = arith.constant 0 : i32
    return %arg0, %c0_i32, %arg1, %c0_i32_0 : i32, i32, i32, i32
  }
  func.func @transform_3(%arg0: i32, %arg1: i32) -> (i32, i32, i32) {
    %c0_i32 = arith.constant 0 : i32
    %c0_i32_0 = arith.constant 0 : i32
    return %arg0, %arg1, %c0_i32 : i32, i32, i32
  }
}

module attributes {stable_mosaic.version = 11 : i64} {
  func.func @_planes_kernel(%arg0: i32, %arg1: i32, %arg2: memref<1xf32, #tpu.memory_space<smem>>, %arg3: memref<1xf32, #tpu.memory_space<smem>>, %arg4: memref<1x4x16x16xf32, #tpu.memory_space<vmem>>, %arg5: memref<1x2x2x16x16xf32, #tpu.memory_space<vmem>>) attributes {dimension_semantics = [#tpu.dimension_semantics<parallel>, #tpu.dimension_semantics<parallel>], iteration_bounds = array<i64: 2, 1>, scalar_prefetch = 0 : i64, scratch_operands = 0 : i64, tpu.core_type = #tpu.core_type<tc>, window_params = [{transform_indices = @transform_0, window_bounds = array<i64: 1>}, {transform_indices = @transform_1, window_bounds = array<i64: 1>}, {transform_indices = @transform_2, window_bounds = array<i64: 1, 4, 16, 16>}, {transform_indices = @transform_3, window_bounds = array<i64: 1, 2, 2, 16, 16>}]} {
    %c0 = arith.constant 0 : index
    %0 = memref.load %arg2[%c0] : memref<1xf32, #tpu.memory_space<smem>>
    %c0_0 = arith.constant 0 : index
    %1 = memref.load %arg3[%c0_0] : memref<1xf32, #tpu.memory_space<smem>>
    %c0_1 = arith.constant 0 : index
    %c0_2 = arith.constant 0 : index
    %c0_3 = arith.constant 0 : index
    %c0_4 = arith.constant 0 : index
    %2 = vector.load %arg4[%c0_1, %c0_2, %c0_3, %c0_4] : memref<1x4x16x16xf32, #tpu.memory_space<vmem>>, vector<1x1x16x16xf32>
    %3 = vector.shape_cast %2 : vector<1x1x16x16xf32> to vector<16x16xf32>
    %c0_5 = arith.constant 0 : index
    %c1 = arith.constant 1 : index
    %c0_6 = arith.constant 0 : index
    %c0_7 = arith.constant 0 : index
    %4 = vector.load %arg4[%c0_5, %c1, %c0_6, %c0_7] : memref<1x4x16x16xf32, #tpu.memory_space<vmem>>, vector<1x1x16x16xf32>
    %5 = vector.shape_cast %4 : vector<1x1x16x16xf32> to vector<16x16xf32>
    %c0_8 = arith.constant 0 : index
    %c2 = arith.constant 2 : index
    %c0_9 = arith.constant 0 : index
    %c0_10 = arith.constant 0 : index
    %6 = vector.load %arg4[%c0_8, %c2, %c0_9, %c0_10] : memref<1x4x16x16xf32, #tpu.memory_space<vmem>>, vector<1x1x16x16xf32>
    %7 = vector.shape_cast %6 : vector<1x1x16x16xf32> to vector<16x16xf32>
    %c0_11 = arith.constant 0 : index
    %c3 = arith.constant 3 : index
    %c0_12 = arith.constant 0 : index
    %c0_13 = arith.constant 0 : index
    %8 = vector.load %arg4[%c0_11, %c3, %c0_12, %c0_13] : memref<1x4x16x16xf32, #tpu.memory_space<vmem>>, vector<1x1x16x16xf32>
    %9 = vector.shape_cast %8 : vector<1x1x16x16xf32> to vector<16x16xf32>
    %10 = arith.addf %3, %9 : vector<16x16xf32>
    %11 = vector.broadcast %1 : f32 to vector<16x16xf32>
    %12 = arith.mulf %10, %11 : vector<16x16xf32>
    %13 = arith.subf %3, %9 : vector<16x16xf32>
    %14 = vector.broadcast %1 : f32 to vector<16x16xf32>
    %15 = arith.mulf %13, %14 : vector<16x16xf32>
    %16 = arith.addf %5, %7 : vector<16x16xf32>
    %17 = vector.broadcast %1 : f32 to vector<16x16xf32>
    %18 = arith.mulf %16, %17 : vector<16x16xf32>
    %19 = arith.subf %5, %7 : vector<16x16xf32>
    %20 = vector.broadcast %1 : f32 to vector<16x16xf32>
    %21 = arith.mulf %19, %20 : vector<16x16xf32>
    %22 = arith.subf %12, %18 : vector<16x16xf32>
    %23 = vector.broadcast %0 : f32 to vector<16x16xf32>
    %24 = arith.addf %22, %23 : vector<16x16xf32>
    %25 = arith.addf %15, %21 : vector<16x16xf32>
    %26 = vector.broadcast %0 : f32 to vector<16x16xf32>
    %27 = arith.addf %25, %26 : vector<16x16xf32>
    %28 = arith.subf %15, %21 : vector<16x16xf32>
    %29 = vector.broadcast %0 : f32 to vector<16x16xf32>
    %30 = arith.addf %28, %29 : vector<16x16xf32>
    %31 = arith.addf %12, %18 : vector<16x16xf32>
    %32 = vector.broadcast %0 : f32 to vector<16x16xf32>
    %33 = arith.addf %31, %32 : vector<16x16xf32>
    %c0_14 = arith.constant 0 : index
    %c0_15 = arith.constant 0 : index
    %c0_16 = arith.constant 0 : index
    %c0_17 = arith.constant 0 : index
    %c0_18 = arith.constant 0 : index
    %34 = vector.load %arg5[%c0_14, %c0_15, %c0_16, %c0_17, %c0_18] : memref<1x2x2x16x16xf32, #tpu.memory_space<vmem>>, vector<1x1x1x16x16xf32>
    %35 = vector.shape_cast %34 : vector<1x1x1x16x16xf32> to vector<16x16xf32>
    %36 = vector.shape_cast %24 : vector<16x16xf32> to vector<1x1x1x16x16xf32>
    tpu.vector_store %arg5[%c0_14, %c0_15, %c0_16, %c0_17, %c0_18], %36 {strides = array<i32>} : memref<1x2x2x16x16xf32, #tpu.memory_space<vmem>>, vector<1x1x1x16x16xf32>,
    %c0_19 = arith.constant 0 : index
    %c0_20 = arith.constant 0 : index
    %c1_21 = arith.constant 1 : index
    %c0_22 = arith.constant 0 : index
    %c0_23 = arith.constant 0 : index
    %37 = vector.load %arg5[%c0_19, %c0_20, %c1_21, %c0_22, %c0_23] : memref<1x2x2x16x16xf32, #tpu.memory_space<vmem>>, vector<1x1x1x16x16xf32>
    %38 = vector.shape_cast %37 : vector<1x1x1x16x16xf32> to vector<16x16xf32>
    %39 = vector.shape_cast %27 : vector<16x16xf32> to vector<1x1x1x16x16xf32>
    tpu.vector_store %arg5[%c0_19, %c0_20, %c1_21, %c0_22, %c0_23], %39 {strides = array<i32>} : memref<1x2x2x16x16xf32, #tpu.memory_space<vmem>>, vector<1x1x1x16x16xf32>,
    %c0_24 = arith.constant 0 : index
    %c1_25 = arith.constant 1 : index
    %c0_26 = arith.constant 0 : index
    %c0_27 = arith.constant 0 : index
    %c0_28 = arith.constant 0 : index
    %40 = vector.load %arg5[%c0_24, %c1_25, %c0_26, %c0_27, %c0_28] : memref<1x2x2x16x16xf32, #tpu.memory_space<vmem>>, vector<1x1x1x16x16xf32>
    %41 = vector.shape_cast %40 : vector<1x1x1x16x16xf32> to vector<16x16xf32>
    %42 = vector.shape_cast %30 : vector<16x16xf32> to vector<1x1x1x16x16xf32>
    tpu.vector_store %arg5[%c0_24, %c1_25, %c0_26, %c0_27, %c0_28], %42 {strides = array<i32>} : memref<1x2x2x16x16xf32, #tpu.memory_space<vmem>>, vector<1x1x1x16x16xf32>,
    %c0_29 = arith.constant 0 : index
    %c1_30 = arith.constant 1 : index
    %c1_31 = arith.constant 1 : index
    %c0_32 = arith.constant 0 : index
    %c0_33 = arith.constant 0 : index
    %43 = vector.load %arg5[%c0_29, %c1_30, %c1_31, %c0_32, %c0_33] : memref<1x2x2x16x16xf32, #tpu.memory_space<vmem>>, vector<1x1x1x16x16xf32>
    %44 = vector.shape_cast %43 : vector<1x1x1x16x16xf32> to vector<16x16xf32>
    %45 = vector.shape_cast %33 : vector<16x16xf32> to vector<1x1x1x16x16xf32>
    tpu.vector_store %arg5[%c0_29, %c1_30, %c1_31, %c0_32, %c0_33], %45 {strides = array<i32>} : memref<1x2x2x16x16xf32, #tpu.memory_space<vmem>>, vector<1x1x1x16x16xf32>,
    return
  }
  func.func @transform_0(%arg0: i32, %arg1: i32) -> i32 {
    %c0_i32 = arith.constant 0 : i32
    %c0_i32_0 = arith.constant 0 : i32
    return %c0_i32 : i32
  }
  func.func @transform_1(%arg0: i32, %arg1: i32) -> i32 {
    %c0_i32 = arith.constant 0 : i32
    %c0_i32_0 = arith.constant 0 : i32
    return %c0_i32 : i32
  }
  func.func @transform_2(%arg0: i32, %arg1: i32) -> (i32, i32, i32, i32) {
    %c0_i32 = arith.constant 0 : i32
    %c0_i32_0 = arith.constant 0 : i32
    %c0_i32_1 = arith.constant 0 : i32
    return %arg0, %c0_i32, %arg1, %c0_i32_0 : i32, i32, i32, i32
  }
  func.func @transform_3(%arg0: i32, %arg1: i32) -> (i32, i32, i32, i32, i32) {
    %c0_i32 = arith.constant 0 : i32
    %c0_i32_0 = arith.constant 0 : i32
    %c0_i32_1 = arith.constant 0 : i32
    %c0_i32_2 = arith.constant 0 : i32
    return %arg0, %c0_i32, %c0_i32_0, %arg1, %c0_i32_1 : i32, i32, i32, i32, i32
  }
}

</mosaic_0001>

<bundles_post_ra>
// kernel: _niwt_impl.1
= control target key start
LH: loop header
LB: loop body
LE: loop exit
PB: predicated region body
PF: predicated region fallthrough
CT: control target
= control target key end

     0   :  { %10 = vsyncpa [#allocation5], 0  ;;  %s1635_s0 = inlined_call_operand.<no memory space> [shape: f32[1], index: 0, kind: input, shape index: {}]   ;;  %s1636_s1 = inlined_call_operand.<no memory space> [shape: f32[1], index: 1, kind: input, shape index: {}]   ;;  %s1637_s2 = inlined_call_operand.hbm [shape: f32[1,4,8,16], index: 2, kind: input, shape index: {}]   ;;  %s1638_s3 = inlined_call_operand.hbm [shape: f32[1,16,32], index: 3, kind: output, shape index: {}]  }
   0x1   :  { %11 = vsyncpa [#allocation6], 0  ;;  %s1236_s12 = smov [#allocation4]  }
   0x2   :  { %s21_s13 = sshll.u32 %s1236_s12, 4  ;;  %s22_s13 = int_to_ptr.vmem [resolvable:$true] %s21_s13 }
   0x3   :  { %s1200_s14 = scalar_lea.vmem %s22_s13, 512  ;;  %p1205_p1 = scmp.lt.s32.totalorder %s22_s13, %s22_s13 }
   0x4   :  { %p1201_p0 = scmp.ne.s32.totalorder %s22_s13, %s1200_s14  ;;  %p1206_p2 = scmp.lt.s32.totalorder %s1200_s14, %s1200_s14 }
   0x6   :  { %p1207_p3 = por %p1206_p2, %p1205_p1 }
   0x8   :  { %p1208_p4 = pnand %p1207_p3, %p1201_p0 }
   0xa   :  { %1211 = shalt.err (!%p1208_p4)
}
   0xb   :  { %s1237_s15 = smov 128   ;;  %s1238_s16 = smov 8  }
   0xc   :  { %27 = dma.hbm_to_vmem [thread:$0]  %s1637_s2, 512, %s22_s13, [#allocation5], %s1237_s15, %s1237_s15, %s1238_s16  }
   0xd   :  { %1232 = dma.done.wait [#allocation5], 512  }
   0xe   :  { %1233 = vsyncadd [#allocation5], 4294966784  ;;  %v58_v0 = vlaneseq  ;;  %v33_v1 = vld [vmem:[#allocation4] sm:$0xff]  ;;  %v35_v2 = vld [vmem:[#allocation4 + $0x8] sm:$0xff]  ;;  %v41_v4 = vstv %s1636_s1  ;;  %v1290_v11 = vstv %s1635_s0  ;;  %vm234_vm0 = vcmask 7168   ;;  %s1241_s0 = smov 2  }
   0xf   :  { %v37_v3 = vld [vmem:[#allocation4 + $0x10] sm:$0xff]  ;;  %v39_v5 = vld [vmem:[#allocation4 + $0x18] sm:$0xff]  ;;  %s1242_s1 = smov 4   ;;  %s1243_s2 = smov 6   ;;  %vm583_vm1 = vcmask 15360   ;;  %vm585_vm2 = vcmask 31744  }
  0x10   :  { %v45_v6 = vadd.f32 %v37_v3, %v35_v2  ;;  %v40_v7 = vadd.f32 %v39_v5, %v33_v1  ;;  %v1285_v8 = vshrl.u32 %v58_v0, 7  ;;  %v43_v31 = vsub.f32 %v33_v1, %v39_v5  ;;  %s1244_s23 = smov 10   ;;  %s1245_s24 = smov 12  }
  0x11   :  { %v47_v32 = vsub.f32 %v35_v2, %v37_v3  ;;  %s1246_s25 = smov 14   ;;  %s1247_s26 = smov 16   ;;  %vm587_vm3 = vcmask 48128   ;;  %vm589_vm4 = vcmask 64512   ;;  %vm591_vm5 = vcmask 80896  }
  0x12   :  { %v46_v9 = vmul.f32 %v45_v6, %v41_v4  ;;  %v42_v10 = vmul.f32 %v41_v4, %v40_v7  ;;  %v1293_v13 = vsub.s32 1, %v1285_v8  ;;  %v1296_v14 = vsub.s32 0, %v1285_v8  ;;  %s1248_s27 = smov 18   ;;  %s1249_s28 = smov 20  }
  0x13   :  { %v82_v20 = vsub.s32 2, %v1285_v8  ;;  %v1306_v21 = vsub.s32 3, %v1285_v8  ;;  %v1325_v28 = vsub.s32 4, %v1285_v8  ;;  %v1329_v30 = vsub.s32 5, %v1285_v8  ;;  %s1250_s29 = smov 22   ;;  %s1251_s30 = smov 24  }
  0x14   :  { %v49_v12 = vsub.f32 %v42_v10, %v46_v9  ;;  %v56_v15 = vadd.f32 %v46_v9, %v42_v10  ;;  %v126_v34 = vsub.s32 6, %v1285_v8  ;;  %v44_v35 = vmul.f32 %v43_v31, %v41_v4  ;;  %s1252_s4 = smov 26   ;;  %s1253_s5 = smov 28  }
  0x15   :  { %v48_v36 = vmul.f32 %v47_v32, %v41_v4  ;;  %v137_v38 = vsub.s32 7, %v1285_v8  ;;  %s1254_s6 = smov 30   ;;  %vm593_vm6 = vcmask 97280   ;;  %vm595_vm7 = vcmask 113664   ;;  %s1255_s7 = smov [#allocation7]  }
  0x16   :  { %v51_v16 = vadd.f32 %v1290_v11, %v49_v12  ;;  %v1300_v17 = vadd.f32 %v56_v15, %v1290_v11  ;;  %vm597_vm8 = vcmask 130048   ;;  %vm599_vm9 = vcmask 146432   ;;  %s1160_s8 = sshll.u32 %s1255_s7, 4  ;;  %s1161_s8 = int_to_ptr.vmem [resolvable:$true] %s1160_s8 }
  0x17   :  { %v52_v39 = vadd.f32 %v48_v36, %v44_v35  ;;  %v54_v47 = vsub.f32 %v44_v35, %v48_v36  ;;  %v1240_v35 = vmov 1934713408   ;;  %vm601_vm10 = vcmask 162816   ;;  %s1212_s9 = scalar_lea.vmem %s1161_s8, 256  ;;  %p1217_p6 = scmp.lt.s32.totalorder %s1161_s8, %s1161_s8 }
  0x18   :  { %v72_v18 = vrot.slane %v51_v16, %v1293_v13  ;;  %v61_v19 = vrot.slane %v51_v16, %v1296_v14  ;;  %v83_v22 = vrot.slane %v51_v16, %v82_v20  ;;  %v1310_v23 = vrot.slane %v1300_v17, %v1296_v14  ;;  %p1213_p5 = scmp.ne.s32.totalorder %s1161_s8, %s1212_s9  ;;  %p1218_p7 = scmp.lt.s32.totalorder %s1212_s9, %s1212_s9 }
  0x19   :  { %v1313_v24 = vrot.slane %v1300_v17, %v82_v20  ;;  %v1317_v25 = vrot.slane %v1300_v17, %v1293_v13  ;;  %v1321_v26 = vrot.slane %v1300_v17, %v1306_v21  ;;  %v94_v27 = vrot.slane %v51_v16, %v1306_v21 }
  0x1a   :  { %74 = vbcast.lane.b32.xlu1 %v72_v18, 256  ;;  %63 = vbcast.lane.b32.xlu0 %v61_v19, 256  ;;  %v105_v29 = vrot.slane %v51_v16, %v1325_v28  ;;  %v116_v33 = vrot.slane %v51_v16, %v1329_v30  ;;  %v127_v37 = vrot.slane %v51_v16, %v126_v34  ;;  %v318_v36 = vunpack.c.l.s4 %v1240_v35  ;;  %p1219_p8 = por %p1218_p7, %p1217_p6 }
  0x1b   :  { %v138_v40 = vrot.slane %v51_v16, %v137_v38  ;;  %v53_v41 = vadd.f32 %v52_v39, %v1290_v11  ;;  %v55_v50 = vadd.f32 %v54_v47, %v1290_v11  ;;  %v749_v60 = vrot.slane %v1300_v17, %v1325_v28 }
  0x1c   :  { %v771_v61 = vrot.slane %v1300_v17, %v126_v34  ;;  %v760_v62 = vrot.slane %v1300_v17, %v1329_v30  ;;  %v782_v63 = vrot.slane %v1300_v17, %v137_v38  ;;  %vm603_vm11 = vcmask 179200   ;;  %p1220_p9 = pnand %p1219_p8, %p1213_p5 }
  0x1d   :  { %v149_v42 = vrot.slane %v53_v41, %v1296_v14  ;;  %v160_v43 = vrot.slane %v53_v41, %v1293_v13  ;;  %v171_v44 = vrot.slane %v53_v41, %v82_v20  ;;  %v193_v45 = vrot.slane %v53_v41, %v1325_v28 }
  0x1e   :  { %78 = vbcast.lane.b32.xlu1 %v72_v18, 264  ;;  %67 = vbcast.lane.b32.xlu0 %v61_v19, 264  ;;  %v182_v46 = vrot.slane %v53_v41, %v1306_v21  ;;  %v215_v48 = vrot.slane %v53_v41, %v126_v34  ;;  %v204_v49 = vrot.slane %v53_v41, %v1329_v30  ;;  %vm605_vm12 = vcmask 195584  }
  0x1f   :  { %v617_v51 = vrot.slane %v55_v50, %v1296_v14  ;;  %v226_v52 = vrot.slane %v53_v41, %v137_v38  ;;  %v639_v53 = vrot.slane %v55_v50, %v82_v20  ;;  %v628_v54 = vrot.slane %v55_v50, %v1293_v13 }
  0x20   :  { %v661_v55 = vrot.slane %v55_v50, %v1325_v28  ;;  %v650_v56 = vrot.slane %v55_v50, %v1306_v21  ;;  %v683_v57 = vrot.slane %v55_v50, %v126_v34  ;;  %v672_v58 = vrot.slane %v55_v50, %v1329_v30 }
  0x21   :  { %v694_v59 = vrot.slane %v55_v50, %v137_v38  ;;  %vm607_vm13 = vcmask 211968   ;;  %vm609_vm14 = vcmask 228352   ;;  %vm611_vm15 = vcmask 244736  }
  0x22   :  { %89 = vbcast.lane.b32.xlu1 %v83_v22, 264  ;;  %85 = vbcast.lane.b32.xlu0 %v83_v22, 256 }
  0x26   :  { %100 = vbcast.lane.b32.xlu1 %v94_v27, 264  ;;  %96 = vbcast.lane.b32.xlu0 %v94_v27, 256 }
  0x2a   :  { %111 = vbcast.lane.b32.xlu1 %v105_v29, 264  ;;  %107 = vbcast.lane.b32.xlu0 %v105_v29, 256 }
  0x2e   :  { %122 = vbcast.lane.b32.xlu1 %v116_v33, 264  ;;  %118 = vbcast.lane.b32.xlu0 %v116_v33, 256 }
  0x32   :  { %133 = vbcast.lane.b32.xlu1 %v127_v37, 264  ;;  %129 = vbcast.lane.b32.xlu0 %v127_v37, 256 }
  0x36   :  { %144 = vbcast.lane.b32.xlu1 %v138_v40, 264  ;;  %140 = vbcast.lane.b32.xlu0 %v138_v40, 256 }
  0x3a   :  { %155 = vbcast.lane.b32.xlu1 %v149_v42, 264  ;;  %151 = vbcast.lane.b32.xlu0 %v149_v42, 256 }
  0x3e   :  { %166 = vbcast.lane.b32.xlu1 %v160_v43, 264  ;;  %162 = vbcast.lane.b32.xlu0 %v160_v43, 256 }
  0x42   :  { %177 = vbcast.lane.b32.xlu1 %v171_v44, 264  ;;  %173 = vbcast.lane.b32.xlu0 %v171_v44, 256 }
  0x46   :  { %195 = vbcast.lane.b32.xlu1 %v193_v45, 256  ;;  %184 = vbcast.lane.b32.xlu0 %v182_v46, 256 }
  0x4a   :  { %217 = vbcast.lane.b32.xlu1 %v215_v48, 256  ;;  %206 = vbcast.lane.b32.xlu0 %v204_v49, 256 }
  0x4e   :  { %619 = vbcast.lane.b32.xlu1 %v617_v51, 256  ;;  %228 = vbcast.lane.b32.xlu0 %v226_v52, 256 }
  0x52   :  { %641 = vbcast.lane.b32.xlu1 %v639_v53, 256  ;;  %630 = vbcast.lane.b32.xlu0 %v628_v54, 256 }
  0x56   :  { %663 = vbcast.lane.b32.xlu1 %v661_v55, 256  ;;  %652 = vbcast.lane.b32.xlu0 %v650_v56, 256 }
  0x5a   :  { %685 = vbcast.lane.b32.xlu1 %v683_v57, 256  ;;  %674 = vbcast.lane.b32.xlu0 %v672_v58, 256 }
  0x5e   :  { %707 = vbcast.lane.b32.xlu1 %v1310_v23, 256  ;;  %696 = vbcast.lane.b32.xlu0 %v694_v59, 256 }
  0x62   :  { %729 = vbcast.lane.b32.xlu1 %v1313_v24, 256  ;;  %718 = vbcast.lane.b32.xlu0 %v1317_v25, 256 }
  0x66   :  { %751 = vbcast.lane.b32.xlu1 %v749_v60, 256  ;;  %740 = vbcast.lane.b32.xlu0 %v1321_v26, 256 }
  0x6a   :  { %773 = vbcast.lane.b32.xlu1 %v771_v61, 256  ;;  %762 = vbcast.lane.b32.xlu0 %v760_v62, 256 }
  0x6e   :  { %188 = vbcast.lane.b32.xlu1 %v182_v46, 264  ;;  %784 = vbcast.lane.b32.xlu0 %v782_v63, 256 }
  0x72   :  { %210 = vbcast.lane.b32.xlu1 %v204_v49, 264  ;;  %199 = vbcast.lane.b32.xlu0 %v193_v45, 264  ;;  %v319_v45 = vunpack.c.0.s8 %v318_v36 }
  0x76   :  { %232 = vbcast.lane.b32.xlu1 %v226_v52, 264  ;;  %221 = vbcast.lane.b32.xlu0 %v215_v48, 264 }
  0x7a   :  { %634 = vbcast.lane.b32.xlu1 %v628_v54, 264  ;;  %623 = vbcast.lane.b32.xlu0 %v617_v51, 264  ;;  %v1398_v54 = vsub.s32 %v319_v45, %v1285_v8 }
  0x7e   :  { %656 = vbcast.lane.b32.xlu1 %v650_v56, 264  ;;  %645 = vbcast.lane.b32.xlu0 %v639_v53, 264 }
  0x82   :  { %678 = vbcast.lane.b32.xlu1 %v672_v58, 264  ;;  %667 = vbcast.lane.b32.xlu0 %v661_v55, 264 }
  0x86   :  { %700 = vbcast.lane.b32.xlu1 %v694_v59, 264  ;;  %689 = vbcast.lane.b32.xlu0 %v683_v57, 264 }
  0x8a   :  { %722 = vbcast.lane.b32.xlu1 %v1317_v25, 264  ;;  %711 = vbcast.lane.b32.xlu0 %v1310_v23, 264  ;;  %v1239_v25 = vmov 1983009808  }
  0x8c   :  { %v75_v0 = vpop.permute.xlu1 %74  ;;  %v64_v1 = vpop.permute.xlu0 %63 }
  0x8e   :  { %744 = vbcast.lane.b32.xlu1 %v1321_v26, 264  ;;  %733 = vbcast.lane.b32.xlu0 %v1313_v24, 264  ;;  %v254_v26 = vunpack.c.l.s4 %v1239_v25 }
  0x90   :  { %v1360_v2 = vpop.permute.xlu1 %78  ;;  %v68_v3 = vpop.permute.xlu0 %67  ;;  %v255_v32 = vunpack.c.0.s8 %v254_v26 }
  0x92   :  { %766 = vbcast.lane.b32.xlu1 %v760_v62, 264  ;;  %755 = vbcast.lane.b32.xlu0 %v749_v60, 264  ;;  %v1390_v42 = vsub.s32 %v255_v32, %v1285_v8 }
  0x94   :  { %v90_v4 = vpop.permute.xlu1 %89  ;;  %v86_v5 = vpop.permute.xlu0 %85 }
  0x96   :  { %788 = vbcast.lane.b32.xlu1 %v782_v63, 264  ;;  %777 = vbcast.lane.b32.xlu0 %v771_v61, 264 }
  0x98   :  { %v1362_v6 = vpop.permute.xlu1 %100  ;;  %v97_v7 = vpop.permute.xlu0 %96 }
  0x9c   :  { %v1364_v9 = vpop.permute.xlu1 %111  ;;  %v108_v10 = vpop.permute.xlu0 %107 }
  0xa0   :  { %v1366_v11 = vpop.permute.xlu1 %122  ;;  %v119_v12 = vpop.permute.xlu0 %118 }
  0xa4   :  { %v1368_v13 = vpop.permute.xlu1 %133  ;;  %v130_v14 = vpop.permute.xlu0 %129 }
  0xa8   :  { %v1370_v15 = vpop.permute.xlu1 %144  ;;  %v141_v16 = vpop.permute.xlu0 %140 }
  0xac   :  { %v156_v17 = vpop.permute.xlu1 %155  ;;  %v152_v18 = vpop.permute.xlu0 %151 }
  0xad   :  { %v1375_v23 = vsel %vm234_vm0, %v68_v3, %v156_v17  ;;  %v235_v40 = vsel %vm234_vm0, %v64_v1, %v152_v18 }
  0xb0   :  { %v1372_v19 = vpop.permute.xlu1 %166  ;;  %v163_v20 = vpop.permute.xlu0 %162 }
  0xb1   :  { %v237_v33 = vsel %vm234_vm0, %v75_v0, %v163_v20 }
  0xb4   :  { %v178_v21 = vpop.permute.xlu1 %177  ;;  %v174_v22 = vpop.permute.xlu0 %173 }
  0xb5   :  { %v1378_v24 = vsel %vm234_vm0, %v90_v4, %v178_v21  ;;  %v239_v34 = vsel %vm234_vm0, %v86_v5, %v174_v22 }
  0xb6   :  { %v387_v27 = vcombine.low %v1375_v23, %v1378_v24  ;;  %v388_v28 = vcombine.high %v1375_v23, %v1378_v24  ;;  %v251_v43 = vcombine.low %v235_v40, %v239_v34 }
  0xb8   :  { %v196_v29 = vpop.permute.xlu1 %195  ;;  %v185_v30 = vpop.permute.xlu0 %184  ;;  %v259_v52 = vrot.slane %v251_v43, %v1390_v42 }
  0xb9   :  { %v241_v31 = vsel %vm234_vm0, %v97_v7, %v185_v30  ;;  %v243_v44 = vsel %vm234_vm0, %v108_v10, %v196_v29  ;;  %v252_v7 = vcombine.high %v235_v40, %v239_v34 }
  0xba   :  { %v267_v37 = vcombine.low %v237_v33, %v241_v31  ;;  %v268_v63 = vcombine.high %v237_v33, %v241_v31 }
  0xbb   :  { %v266_v25 = vrot.slane %v252_v7, %v1390_v42 }
  0xbc   :  { %v218_v38 = vpop.permute.xlu1 %217  ;;  %v207_v39 = vpop.permute.xlu0 %206  ;;  %v275_v46 = vrot.slane %v267_v37, %v1390_v42  ;;  %v282_v17 = vrot.slane %v268_v63, %v1390_v42 }
  0xbd   :  { %v247_v41 = vsel %vm234_vm0, %v130_v14, %v218_v38  ;;  %v245_v50 = vsel %vm234_vm0, %v119_v12, %v207_v39 }
  0xbe   :  { %v283_v47 = vcombine.low %v243_v44, %v247_v41  ;;  %v315_v55 = vcombine.low %v259_v52, %v275_v46  ;;  %v316_v0 = vcombine.high %v259_v52, %v275_v46  ;;  %v284_v1 = vcombine.high %v243_v44, %v247_v41 }
  0xbf   :  { %v331_v32 = vcombine.low %v266_v25, %v282_v17  ;;  %v332_v40 = vcombine.high %v266_v25, %v282_v17 }
  0xc0   :  { %v620_v48 = vpop.permute.xlu1 %619  ;;  %v229_v49 = vpop.permute.xlu0 %228  ;;  %v291_v56 = vrot.slane %v283_v47, %v1390_v42  ;;  %v1403_v5 = vrot.slane %v315_v55, %v1398_v54  ;;  %v298_v18 = vrot.slane %v284_v1, %v1390_v42  ;;  %v330_v22 = vrot.slane %v316_v0, %v1398_v54 }
  0xc1   :  { %v249_v51 = vsel %vm234_vm0, %v141_v16, %v229_v49  ;;  %v339_v37 = vrot.slane %v331_v32, %v1398_v54 }
  0xc2   :  { %v299_v53 = vcombine.low %v245_v50, %v249_v51  ;;  %v300_v60 = vcombine.high %v245_v50, %v249_v51 }
  0xc4   :  { %v307_v57 = vrot.slane %v299_v53, %v1390_v42  ;;  %v642_v58 = vpop.permute.xlu1 %641  ;;  %v631_v59 = vpop.permute.xlu0 %630  ;;  %v314_v10 = vrot.slane %v300_v60, %v1390_v42 }
  0xc6   :  { %v347_v61 = vcombine.low %v291_v56, %v307_v57  ;;  %v348_v62 = vcombine.high %v291_v56, %v307_v57  ;;  %v363_v29 = vcombine.low %v298_v18, %v314_v10  ;;  %v364_v38 = vcombine.high %v298_v18, %v314_v10 }
  0xc7   :  { %v346_v56 = vrot.slane %v332_v40, %v1398_v54 }
  0xc8   :  { %v664_v3 = vpop.permute.xlu1 %663  ;;  %v653_v4 = vpop.permute.xlu0 %652  ;;  %v1406_v8 = vrot.slane %v347_v61, %v1398_v54  ;;  %v362_v14 = vrot.slane %v348_v62, %v1398_v54  ;;  %v371_v34 = vrot.slane %v363_v29, %v1398_v54  ;;  %v378_v49 = vrot.slane %v364_v38, %v1398_v54 }
  0xca   :  { %v380_v12 = vcombine.high %v1403_v5, %v1406_v8  ;;  %v379_v16 = vcombine.low %v1403_v5, %v1406_v8  ;;  %v381_v26 = vcombine.low %v330_v22, %v362_v14  ;;  %v382_v33 = vcombine.high %v330_v22, %v362_v14 }
  0xcb   :  { %v383_v39 = vcombine.low %v339_v37, %v371_v34  ;;  %v384_v47 = vcombine.high %v339_v37, %v371_v34  ;;  %v1465_v14 = vrot.slane %v388_v28, %v1390_v42 }
  0xcc   :  { %v686_v20 = vpop.permute.xlu1 %685  ;;  %524 = vrot.lane.b32.xlu0 %v380_v12, %s1241_s0  ;;  %v675_v21 = vpop.permute.xlu0 %674 }
  0xd0   :  { %v708_v30 = vpop.permute.xlu1 %707  ;;  %528 = vrot.lane.b32.xlu0 %v381_v26, %s1242_s1  ;;  %v697_v31 = vpop.permute.xlu0 %696 }
  0xd1   :  { %v1435_v50 = vsel %vm234_vm0, %v620_v48, %v708_v30  ;;  %v238_v48 = vsel %vm234_vm0, %v1360_v2, %v1372_v19  ;;  %v386_v19 = vcombine.high %v346_v56, %v378_v49 }
  0xd4   :  { %v730_v35 = vpop.permute.xlu1 %729  ;;  %532 = vrot.lane.b32.xlu0 %v382_v33, %s1243_s2  ;;  %v719_v36 = vpop.permute.xlu0 %718 }
  0xd5   :  { %v1425_v44 = vsel %vm234_vm0, %v642_v58, %v730_v35  ;;  %v1431_v46 = vsel %vm234_vm0, %v631_v59, %v719_v36  ;;  %v385_v58 = vcombine.low %v346_v56, %v378_v49 }
  0xd6   :  { %v806_v52 = vcombine.low %v1435_v50, %v1425_v44  ;;  %v807_v23 = vcombine.high %v1435_v50, %v1425_v44 }
  0xd8   :  { %v752_v41 = vpop.permute.xlu1 %751  ;;  %536 = vrot.lane.b32.xlu0 %v383_v39, %s1238_s16  ;;  %v741_v43 = vpop.permute.xlu0 %740  ;;  %v814_v60 = vrot.slane %v806_v52, %v1390_v42 }
  0xd9   :  { %v1428_v45 = vsel %vm234_vm0, %v653_v4, %v741_v43  ;;  %v798_v61 = vsel %vm234_vm0, %v664_v3, %v752_v41  ;;  %v395_v3 = vrot.slane %v387_v27, %v1390_v42 }
  0xda   :  { %v822_v51 = vcombine.low %v1431_v46, %v1428_v45  ;;  %v823_v30 = vcombine.high %v1431_v46, %v1428_v45 }
  0xdc   :  { %v774_v53 = vpop.permute.xlu1 %773  ;;  %540 = vrot.lane.b32.xlu0 %v384_v47, %s1244_s23  ;;  %v763_v55 = vpop.permute.xlu0 %762  ;;  %v1445_v59 = vrot.slane %v822_v51, %v1390_v42  ;;  %v1502_v49 = vrot.slane %v823_v30, %v1390_v42 }
  0xdd   :  { %v802_v57 = vsel %vm234_vm0, %v686_v20, %v774_v53  ;;  %v800_v1 = vsel %vm234_vm0, %v675_v21, %v763_v55 }
  0xde   :  { %v838_v0 = vcombine.low %v798_v61, %v802_v57  ;;  %v870_v17 = vcombine.low %v814_v60, %v1445_v59  ;;  %v871_v34 = vcombine.high %v814_v60, %v1445_v59 }
  0xe0   :  { %v189_v62 = vpop.permute.xlu1 %188  ;;  %544 = vrot.lane.b32.xlu0 %v385_v58, %s1245_s24  ;;  %v785_v63 = vpop.permute.xlu0 %784  ;;  %v846_v24 = vrot.slane %v838_v0, %v1390_v42  ;;  %v1490_v39 = vrot.slane %v870_v17, %v1398_v54  ;;  %v885_v58 = vrot.slane %v871_v34, %v1398_v54 }
  0xe1   :  { %v242_v4 = vsel %vm234_vm0, %v1362_v6, %v189_v62  ;;  %v804_v7 = vsel %vm234_vm0, %v697_v31, %v785_v63  ;;  %v839_v31 = vcombine.high %v798_v61, %v802_v57  ;;  %v821_v57 = vrot.slane %v807_v23, %v1390_v42 }
  0xe2   :  { %v403_v10 = vcombine.low %v238_v48, %v242_v4  ;;  %v404_v12 = vcombine.high %v238_v48, %v242_v4  ;;  %v854_v2 = vcombine.low %v800_v1, %v804_v7  ;;  %v855_v20 = vcombine.high %v800_v1, %v804_v7 }
  0xe3   :  { %v853_v50 = vrot.slane %v839_v31, %v1390_v42  ;;  %v886_v4 = vcombine.low %v821_v57, %v1502_v49 }
  0xe4   :  { %v411_v6 = vrot.slane %v403_v10, %v1390_v42  ;;  %v1470_v18 = vrot.slane %v404_v12, %v1390_v42  ;;  %v862_v21 = vrot.slane %v854_v2, %v1390_v42  ;;  %v211_v22 = vpop.permute.xlu1 %210  ;;  %548 = vrot.lane.b32.xlu0 %v386_v19, %s1246_s25  ;;  %v200_v27 = vpop.permute.xlu0 %199  ;;  %v1485_v35 = vrot.slane %v855_v20, %v1390_v42 }
  0xe5   :  { %v246_v36 = vsel %vm234_vm0, %v1366_v11, %v211_v22  ;;  %v244_v40 = vsel %vm234_vm0, %v1364_v9, %v200_v27 }
  0xe6   :  { %v451_v28 = vcombine.low %v395_v3, %v411_v6  ;;  %v452_v25 = vcombine.high %v395_v3, %v411_v6  ;;  %v467_v26 = vcombine.low %v1465_v14, %v1470_v18  ;;  %v468_v29 = vcombine.high %v1465_v14, %v1470_v18 }
  0xe7   :  { %v902_v32 = vcombine.low %v846_v24, %v862_v21  ;;  %v903_v33 = vcombine.high %v846_v24, %v862_v21  ;;  %v918_v59 = vcombine.low %v853_v50, %v1485_v35 }
  0xe8   :  { %v233_v37 = vpop.permute.xlu1 %232  ;;  %v222_v38 = vpop.permute.xlu0 %221  ;;  %v459_v1 = vrot.slane %v451_v28, %v1398_v54  ;;  %v466_v7 = vrot.slane %v452_v25, %v1398_v54  ;;  %v475_v18 = vrot.slane %v467_v26, %v1398_v54  ;;  %v1535_v20 = vrot.slane %v468_v29, %v1398_v54 }
  0xe9   :  { %v250_v41 = vsel %vm234_vm0, %v1370_v15, %v233_v37  ;;  %v248_v43 = vsel %vm234_vm0, %v1368_v13, %v222_v38  ;;  %v1499_v44 = vrot.slane %v902_v32, %v1398_v54  ;;  %v917_v15 = vrot.slane %v903_v33, %v1398_v54 }
  0xea   :  { %v435_v45 = vcombine.low %v246_v36, %v250_v41  ;;  %v436_v46 = vcombine.high %v246_v36, %v250_v41  ;;  %v419_v11 = vcombine.low %v244_v40, %v248_v43  ;;  %v420_v47 = vcombine.high %v244_v40, %v248_v43 }
  0xeb   :  { %v935_v9 = vcombine.high %v1490_v39, %v1499_v44  ;;  %v934_v48 = vcombine.low %v1490_v39, %v1499_v44  ;;  %v936_v0 = vcombine.low %v885_v58, %v917_v15  ;;  %v937_v17 = vcombine.high %v885_v58, %v917_v15 }
  0xec   :  { %v443_v51 = vrot.slane %v435_v45, %v1390_v42  ;;  %v450_v13 = vrot.slane %v436_v46, %v1390_v42  ;;  %v427_v52 = vrot.slane %v419_v11, %v1390_v42  ;;  %v434_v53 = vrot.slane %v420_v47, %v1390_v42  ;;  %v1512_v55 = vpop.permute.xlu1 %634  ;;  %v1514_v56 = vpop.permute.xlu0 %623 }
  0xed   :  { %1079 = vrot.lane.b32.xlu1 %v935_v9, %s1241_s0  ;;  %v926_v6 = vrot.slane %v918_v59, %v1398_v54  ;;  %v894_v29 = vrot.slane %v886_v4, %v1398_v54  ;;  %v919_v32 = vcombine.high %v853_v50, %v1485_v35  ;;  %v887_v37 = vcombine.high %v821_v57, %v1502_v49 }
  0xee   :  { %v483_v60 = vcombine.low %v427_v52, %v443_v51  ;;  %v484_v61 = vcombine.high %v427_v52, %v443_v51  ;;  %v499_v62 = vcombine.low %v434_v53, %v450_v13  ;;  %v500_v63 = vcombine.high %v434_v53, %v450_v13 }
  0xef   :  { %v938_v33 = vcombine.low %v894_v29, %v926_v6  ;;  %v939_v38 = vcombine.high %v894_v29, %v926_v6  ;;  %v933_v40 = vrot.slane %v919_v32, %v1398_v54  ;;  %v901_v35 = vrot.slane %v887_v37, %v1398_v54 }
  0xf0   :  { %v657_v10 = vpop.permute.xlu1 %656  ;;  %v646_v12 = vpop.permute.xlu0 %645  ;;  %v491_v2 = vrot.slane %v483_v60, %v1398_v54  ;;  %v498_v19 = vrot.slane %v484_v61, %v1398_v54  ;;  %v507_v3 = vrot.slane %v499_v62, %v1398_v54  ;;  %v1529_v14 = vrot.slane %v500_v63, %v1398_v54 }
  0xf1   :  { %1083 = vrot.lane.b32.xlu1 %v936_v0, %s1242_s1  ;;  %v940_v45 = vcombine.low %v901_v35, %v933_v40  ;;  %v941_v15 = vcombine.high %v901_v35, %v933_v40 }
  0xf2   :  { %v515_v21 = vcombine.low %v459_v1, %v491_v2  ;;  %v516_v22 = vcombine.high %v459_v1, %v491_v2  ;;  %v517_v27 = vcombine.low %v466_v7, %v498_v19  ;;  %v518_v23 = vcombine.high %v466_v7, %v498_v19 }
  0xf3   :  { %v519_v24 = vcombine.low %v475_v18, %v507_v3  ;;  %v520_v28 = vcombine.high %v475_v18, %v507_v3  ;;  %v521_v25 = vcombine.low %v1535_v20, %v1529_v14  ;;  %v522_v30 = vcombine.high %v1535_v20, %v1529_v14 }
  0xf4   :  { %v679_v31 = vpop.permute.xlu1 %678  ;;  %552 = vrot.lane.b32.xlu0 %v515_v21, %s1247_s26  ;;  %v668_v26 = vpop.permute.xlu0 %667 }
  0xf5   :  { %1087 = vrot.lane.b32.xlu1 %v937_v17, %s1243_s2 }
  0xf8   :  { %v701_v34 = vpop.permute.xlu1 %700  ;;  %556 = vrot.lane.b32.xlu0 %v516_v22, %s1248_s27  ;;  %v690_v36 = vpop.permute.xlu0 %689 }
  0xf9   :  { %1091 = vrot.lane.b32.xlu1 %v938_v33, %s1238_s16 }
  0xfc   :  { %v723_v41 = vpop.permute.xlu1 %722  ;;  %560 = vrot.lane.b32.xlu0 %v517_v27, %s1249_s28  ;;  %v712_v43 = vpop.permute.xlu0 %711 }
  0xfd   :  { %1095 = vrot.lane.b32.xlu1 %v939_v38, %s1244_s23  ;;  %v793_v50 = vsel %vm234_vm0, %v1512_v55, %v723_v41  ;;  %v791_v9 = vsel %vm234_vm0, %v1514_v56, %v712_v43 }
 0x100   :  { %v745_v46 = vpop.permute.xlu1 %744  ;;  %564 = vrot.lane.b32.xlu0 %v518_v23, %s1250_s29  ;;  %v734_v11 = vpop.permute.xlu0 %733 }
 0x101   :  { %v797_v47 = vsel %vm234_vm0, %v657_v10, %v745_v46  ;;  %1099 = vrot.lane.b32.xlu1 %v940_v45, %s1245_s24  ;;  %v795_v49 = vsel %vm234_vm0, %v646_v12, %v734_v11 }
 0x102   :  { %v958_v51 = vcombine.low %v793_v50, %v797_v47  ;;  %v942_v13 = vcombine.low %v791_v9, %v795_v49  ;;  %v959_v6 = vcombine.high %v793_v50, %v797_v47  ;;  %v943_v18 = vcombine.high %v791_v9, %v795_v49 }
 0x104   :  { %v767_v52 = vpop.permute.xlu1 %766  ;;  %568 = vrot.lane.b32.xlu0 %v519_v24, %s1251_s30  ;;  %v756_v53 = vpop.permute.xlu0 %755  ;;  %v966_v57 = vrot.slane %v958_v51, %v1390_v42  ;;  %v950_v58 = vrot.slane %v942_v13, %v1390_v42  ;;  %v973_v24 = vrot.slane %v959_v6, %v1390_v42 }
 0x105   :  { %1103 = vrot.lane.b32.xlu1 %v941_v15, %s1246_s25  ;;  %v801_v56 = vsel %vm234_vm0, %v679_v31, %v767_v52  ;;  %v799_v60 = vsel %vm234_vm0, %v668_v26, %v756_v53 }
 0x106   :  { %v1006_v1 = vcombine.low %v950_v58, %v966_v57  ;;  %v1007_v20 = vcombine.high %v950_v58, %v966_v57 }
 0x108   :  { %v789_v59 = vpop.permute.xlu1 %788  ;;  %572 = vrot.lane.b32.xlu0 %v520_v28, %s1252_s4  ;;  %v778_v55 = vpop.permute.xlu0 %777  ;;  %v1014_v12 = vrot.slane %v1006_v1, %v1398_v54  ;;  %v957_v28 = vrot.slane %v943_v18, %v1390_v42 }
 0x109   :  { %v805_v61 = vsel %vm234_vm0, %v701_v34, %v789_v59  ;;  %v803_v62 = vsel %vm234_vm0, %v690_v36, %v778_v55 }
 0x10a   :  { %v990_v63 = vcombine.low %v801_v56, %v805_v61  ;;  %v974_v0 = vcombine.low %v799_v60, %v803_v62  ;;  %v991_v19 = vcombine.high %v801_v56, %v805_v61  ;;  %v975_v3 = vcombine.high %v799_v60, %v803_v62 }
 0x10b   :  { %v1022_v26 = vcombine.low %v957_v28, %v973_v24  ;;  %v1023_v37 = vcombine.high %v957_v28, %v973_v24 }
 0x10c   :  { %v998_v4 = vrot.slane %v990_v63, %v1390_v42  ;;  %v982_v7 = vrot.slane %v974_v0, %v1390_v42  ;;  %576 = vrot.lane.b32.xlu0 %v521_v25, %s1253_s5  ;;  %v1005_v21 = vrot.slane %v991_v19, %v1390_v42  ;;  %v989_v22 = vrot.slane %v975_v3, %v1390_v42 }
 0x10d   :  { %v1021_v25 = vrot.slane %v1007_v20, %v1398_v54  ;;  %v1030_v33 = vrot.slane %v1022_v26, %v1398_v54  ;;  %v1037_v40 = vrot.slane %v1023_v37, %v1398_v54 }
 0x10e   :  { %v1038_v10 = vcombine.low %v982_v7, %v998_v4  ;;  %v1039_v14 = vcombine.high %v982_v7, %v998_v4  ;;  %v1055_v34 = vcombine.high %v989_v22, %v1005_v21 }
 0x110   :  { %580 = vrot.lane.b32.xlu0 %v522_v30, %s1254_s6  ;;  %v1046_v2 = vrot.slane %v1038_v10, %v1398_v54  ;;  %v1053_v23 = vrot.slane %v1039_v14, %v1398_v54  ;;  %v1054_v30 = vcombine.low %v989_v22, %v1005_v21  ;;  %v1069_v38 = vrot.slane %v1055_v34, %v1398_v54 }
 0x112   :  { %v1070_v17 = vcombine.low %v1014_v12, %v1046_v2  ;;  %v1071_v27 = vcombine.high %v1014_v12, %v1046_v2  ;;  %v1072_v31 = vcombine.low %v1021_v25, %v1053_v23  ;;  %v1073_v29 = vcombine.high %v1021_v25, %v1053_v23 }
 0x113   :  { %v1062_v32 = vrot.slane %v1054_v30, %v1398_v54  ;;  %v1076_v41 = vcombine.low %v1037_v40, %v1069_v38  ;;  %v1077_v43 = vcombine.high %v1037_v40, %v1069_v38 }
 0x114   :  { %1107 = vrot.lane.b32.xlu1 %v1070_v17, %s1247_s26 }
 0x115   :  { %v1074_v36 = vcombine.low %v1030_v33, %v1062_v32  ;;  %v1075_v42 = vcombine.high %v1030_v33, %v1062_v32 }
 0x118   :  { %1111 = vrot.lane.b32.xlu1 %v1071_v27, %s1248_s27 }
 0x11c   :  { %1115 = vrot.lane.b32.xlu1 %v1072_v31, %s1249_s28 }
 0x120   :  { %1119 = vrot.lane.b32.xlu1 %v1073_v29, %s1250_s29 }
 0x124   :  { %1123 = vrot.lane.b32.xlu1 %v1074_v36, %s1251_s30 }
 0x128   :  { %1127 = vrot.lane.b32.xlu1 %v1075_v42, %s1252_s4 }
 0x12c   :  { %1131 = vrot.lane.b32.xlu1 %v1076_v41, %s1253_s5 }
 0x130   :  { %1135 = vrot.lane.b32.xlu1 %v1077_v43, %s1254_s6 }
 0x13e   :  { %v525_v35 = vpop.permute.xlu0 %524 }
 0x13f   :  { %v584_v58 = vsel %vm583_vm1, %v379_v16, %v525_v35 }
 0x142   :  { %v529_v45 = vpop.permute.xlu0 %528 }
 0x143   :  { %v586_v59 = vsel %vm585_vm2, %v584_v58, %v529_v45 }
 0x146   :  { %v533_v46 = vpop.permute.xlu0 %532 }
 0x147   :  { %v588_v60 = vsel %vm587_vm3, %v586_v59, %v533_v46 }
 0x14a   :  { %v537_v11 = vpop.permute.xlu0 %536 }
 0x14b   :  { %v590_v61 = vsel %vm589_vm4, %v588_v60, %v537_v11 }
 0x14e   :  { %v541_v47 = vpop.permute.xlu0 %540 }
 0x14f   :  { %v592_v62 = vsel %vm591_vm5, %v590_v61, %v541_v47 }
 0x152   :  { %v545_v49 = vpop.permute.xlu0 %544 }
 0x153   :  { %v594_v63 = vsel %vm593_vm6, %v592_v62, %v545_v49 }
 0x156   :  { %v549_v9 = vpop.permute.xlu0 %548 }
 0x157   :  { %v596_v8 = vsel %vm595_vm7, %v594_v63, %v549_v9 }
 0x15f   :  { %v1080_v50 = vpop.permute.xlu1 %1079 }
 0x160   :  { %v1138_v22 = vsel %vm583_vm1, %v934_v48, %v1080_v50 }
 0x163   :  { %v1084_v15 = vpop.permute.xlu1 %1083 }
 0x164   :  { %v1139_v27 = vsel %vm585_vm2, %v1138_v22, %v1084_v15 }
 0x166   :  { %v553_v51 = vpop.permute.xlu0 %552 }
 0x167   :  { %v1088_v13 = vpop.permute.xlu1 %1087  ;;  %v598_v16 = vsel %vm597_vm8, %v596_v8, %v553_v51 }
 0x168   :  { %v1140_v24 = vsel %vm587_vm3, %v1139_v27, %v1088_v13 }
 0x16a   :  { %v557_v52 = vpop.permute.xlu0 %556 }
 0x16b   :  { %v1092_v54 = vpop.permute.xlu1 %1091  ;;  %v600_v1 = vsel %vm599_vm9, %v598_v16, %v557_v52 }
 0x16c   :  { %v1141_v28 = vsel %vm589_vm4, %v1140_v24, %v1092_v54 }
 0x16e   :  { %v561_v53 = vpop.permute.xlu0 %560 }
 0x16f   :  { %v1096_v55 = vpop.permute.xlu1 %1095  ;;  %v602_v4 = vsel %vm601_vm10, %v600_v1, %v561_v53 }
 0x170   :  { %v1142_v25 = vsel %vm591_vm5, %v1141_v28, %v1096_v55 }
 0x172   :  { %v565_v57 = vpop.permute.xlu0 %564 }
 0x173   :  { %v1100_v0 = vpop.permute.xlu1 %1099  ;;  %v604_v10 = vsel %vm603_vm11, %v602_v4, %v565_v57 }
 0x174   :  { %v1143_v30 = vsel %vm593_vm6, %v1142_v25, %v1100_v0 }
 0x176   :  { %v569_v56 = vpop.permute.xlu0 %568 }
 0x177   :  { %v606_v12 = vsel %vm605_vm12, %v604_v10, %v569_v56  ;;  %v1104_v19 = vpop.permute.xlu1 %1103 }
 0x178   :  { %v1144_v26 = vsel %vm595_vm7, %v1143_v30, %v1104_v19 }
 0x17a   :  { %v573_v5 = vpop.permute.xlu0 %572 }
 0x17b   :  { %v608_v2 = vsel %vm607_vm13, %v606_v12, %v573_v5 }
 0x17e   :  { %v577_v7 = vpop.permute.xlu0 %576 }
 0x17f   :  { %v610_v3 = vsel %vm609_vm14, %v608_v2, %v577_v7 }
 0x182   :  { %v581_v14 = vpop.permute.xlu0 %580 }
 0x183   :  { %v612_v17 = vsel %vm611_vm15, %v610_v3, %v581_v14 }
 0x184   :  { %613 = vst [vmem:[#allocation7] ss:$2 sm:$0xff] %v612_v17 }
 0x186   :  { %v1108_v6 = vpop.permute.xlu1 %1107 }
 0x187   :  { %v1145_v29 = vsel %vm597_vm8, %v1144_v26, %v1108_v6 }
 0x18a   :  { %v1112_v18 = vpop.permute.xlu1 %1111 }
 0x18b   :  { %v1146_v39 = vsel %vm599_vm9, %v1145_v29, %v1112_v18 }
 0x18e   :  { %v1116_v20 = vpop.permute.xlu1 %1115 }
 0x18f   :  { %v1147_v44 = vsel %vm601_vm10, %v1146_v39, %v1116_v20 }
 0x192   :  { %v1120_v21 = vpop.permute.xlu1 %1119 }
 0x193   :  { %v1148_v32 = vsel %vm603_vm11, %v1147_v44, %v1120_v21 }
 0x196   :  { %v1124_v23 = vpop.permute.xlu1 %1123 }
 0x197   :  { %v1149_v33 = vsel %vm605_vm12, %v1148_v32, %v1124_v23 }
 0x19a   :  { %v1128_v31 = vpop.permute.xlu1 %1127 }
 0x19b   :  { %v1150_v34 = vsel %vm607_vm13, %v1149_v33, %v1128_v31 }
 0x19e   :  { %v1132_v48 = vpop.permute.xlu1 %1131 }
 0x19f   :  { %v1151_v36 = vsel %vm609_vm14, %v1150_v34, %v1132_v48 }
 0x1a2   :  { %v1136_v37 = vpop.permute.xlu1 %1135 }
 0x1a3   :  { %v1152_v42 = vsel %vm611_vm15, %v1151_v36, %v1136_v37 }
 0x1a4   :  { %1154 = vst [vmem:[#allocation7 + $0x1] ss:$2 sm:$0xff] %v1152_v42 }
 0x1a5   :  { %1223 = shalt.err (!%p1220_p9)
}
 0x1a6   :  { %1166 = dma.vmem_to_hbm [thread:$0]  %s1161_s8, 256, %s1638_s3, [#allocation6], %s1237_s15, %s1237_s15, %s1238_s16  }
 0x1a7   :  { %1234 = dma.done.wait [#allocation6], 256  }
 0x1a8   :  { %1235 = vsyncadd [#allocation6], 4294967040 }
 0x1a9   :  { %1170 = vsyncpa [#allocation5], 1 }
 0x1aa   :  { %1171 = vsyncpa [#allocation6], 1 }

// kernel: _niwt_impl.1
= control target key start
LH: loop header
LB: loop body
LE: loop exit
PB: predicated region body
PF: predicated region fallthrough
CT: control target
= control target key end

     0   :  { %s12255_s0 = inlined_call_operand.<no memory space> [shape: f32[1], index: 0, kind: input, shape index: {}]   ;;  %s12256_s1 = inlined_call_operand.<no memory space> [shape: f32[1], index: 1, kind: input, shape index: {}]   ;;  %s12257_s2 = inlined_call_operand.hbm [shape: f32[2,4,16,16], index: 2, kind: input, shape index: {}]   ;;  %s12258_s3 = inlined_call_operand.hbm [shape: f32[2,32,32], index: 3, kind: output, shape index: {}]  }
   0x1   :  { %8 = sst [smem:[#allocation2]] %s12255_s0 }
   0x2   :  { %9 = sst [smem:[#allocation3]] %s12256_s1 }
   0x3   :  { %10 = vsyncpa [#allocation5], 0 }
   0x4   :  { %12 = vsyncpa [#allocation5 + $0x1], 0 }
   0x5   :  { %13 = vsyncpa [#allocation6], 0 }
   0x6   :  { %15 = vsyncpa [#allocation6 + $0x1], 0  ;;  %s7104_s16 = smov 0   ;;  %s7106_s17 = smov 0  }
   0x7   :  { %s7108_s18 = smov 0   ;;  %s7110_s19 = smov 0  }
   0x8   :  { %s7112_s20 = smov 0   ;;  %s7114_s21 = smov 0  }
   0x9 LB: > { %s6839_s0 = sadd.s32 4294967295, %s7053_s21   ;;  %s6840_s1 = sadd.s32 4294967294, %s7053_s21   ;;  %s7053_s21 = sphi %s7114_s21, %s21_s21   ;;  %s7049_s20 = sphi %s7112_s20, %s13282_s20   ;;  %s7045_s19 = sphi %s7110_s19, %s13281_s19   ;;  %s7041_s18 = sphi %s7108_s18, %s13280_s18   ;;  %s7037_s17 = sphi %s7106_s17, %s13279_s17   ;;  %s7033_s16 = sphi %s7104_s16, %s13278_s16  }
   0xa   : > { %s33_s22 = sadd.s32 1, %s7049_s20  ;;  %s84_s23 = sadd.s32 1, %s7041_s18 }
   0xb   : > { %p35_p0 = scmp.ge.s32.totalorder %s33_s22, 2  ;;  %p91_p1 = scmp.ne.s32.totalorder %s7041_s18, %s7037_s17 }
   0xc   : > { %p92_p2 = scmp.eq.s32.totalorder %s7053_s21, 0  ;;  %p97_p3 = scmp.ne.s32.totalorder %s7037_s17, %s7033_s16 }
   0xd   : > { %s13284_s22 = smov (%p35_p0, %s33_s22), 0  ;;  %p98_p5 = scmp.eq.s32.totalorder %s6839_s0, 0 }
   0xe   : > { %p7145_p4 = por %p92_p2, %p91_p1  ;;  %s79_s25 = ssub.s32 %s7049_s20, %s13284_s22 }
   0xf   : > { %p123_p6 = scmp.eq.s32.totalorder %s6839_s0, 1  ;;  %p82_p7 = scmp.eq.s32.totalorder %s79_s25, 0 }
  0x10   : > { %p7151_p8 = por %p98_p5, %p97_p3  ;;  %p129_p10 = scmp.eq.s32.totalorder %s6840_s1, 1 }
  0x11   : > { %p7155_p9 = por %p123_p6, %p91_p1  ;;  %p6874_p13 = scmp.lt.s32.totalorder %s7053_s21, 2 }
  0x12   : > { %s7160_s28 = scalar_select %p82_p7, %s7041_s18, %s84_s23  }
  0x13   : > { %p7162_p11 = por %p129_p10, %p97_p3  ;;  %s155_s30 = sand.u32 1, %s7041_s18  }
  0x14   : > { %s6843_s4 = sshll.u32 %s155_s30, 6  ;;  %s6860_s5 = sshll.u32 %s7049_s20, 10 }
  0x15   : > { %s167_s8 = scalar_lea.hbm %s12257_s2, %s6860_s5  ;;  %s159_s9 = scalar_lea.vmem [#allocation4], %s6843_s4 }
  0x16   : > { %s168_s10 = sshll.u32 %s159_s9, 4  ;;  %p7175_p0 = pnand %p6874_p13, %p7145_p4  ;;  %s169_s10 = int_to_ptr.vmem [resolvable:$true] %s168_s10 }
  0x17   : > { %p6846_p1 = scmp.ge.s32.totalorder %s7053_s21, 1  ;;  %s156_s12 = scalar_lea.sflag [#allocation5], %s155_s30 }
  0x18   : > { %p6947_p2 = pneg %p7175_p0  ;;  %s6958_s13 = scalar_lea.vmem %s169_s10, 1024 }
  0x19   : > { %p6959_p3 = scmp.ne.s32.totalorder %s169_s10, %s6958_s13  ;;  %s7055_s14 = smov [#allocation4]  }
  0x1a   : > { %s6963_s15 = sshll.u32 %s7055_s14, 4  ;;  %s6964_s15 = int_to_ptr.vmem [resolvable:$false] %s6963_s15 }
  0x1b   : > { %p6961_p5 = pnand %p6959_p3, %p6947_p2  ;;  %s6965_s0 = scalar_lea.vmem %s6964_s15, 2048 }
  0x1c   : > { %p6966_p7 = scmp.lt.s32.totalorder %s169_s10, %s6964_s15  ;;  %p6967_p10 = scmp.lt.s32.totalorder %s6965_s0, %s6958_s13 }
  0x1d   : > { %p6962_p6 = pneg %p6961_p5 }
  0x1e   : > { %p6968_p12 = por %p6967_p10, %p6966_p7 }
  0x20   : > { %p6969_p4 = pnand %p6968_p12, %p6962_p6 }
  0x22   : > { %6972 = shalt.err (!%p6969_p4)
}
  0x23   : > { %s7056_s1 = smov 128   ;;  %s7057_s23 = smov 8  }
  0x24   : > { %6869 = dma.hbm_to_vmem [thread:$0]  (!%p7175_p0), %s167_s8, 1024, %s169_s10, %s156_s12, %s7056_s1, %s7056_s1, %s7057_s23  }
  0x25   : > { %p176_p13 = scmp.lt.s32.totalorder %s7053_s21, 3 }
  0x27   : > { %p177_p2 = pnand %p6846_p1, %p176_p13 }
  0x29   : > { %180 = sbr.rel (%p177_p2) target bundleno = 1424 (0x590), region = 32 }
  0x2e   : > { %s7188_s24 = sand.u32 1, %s7037_s17  }
  0x2f   : > { %s6847_s25 = sshll.u32 %s7188_s24, 6  ;;  %s183_s30 = scalar_lea.sflag [#allocation5], %s7188_s24 }
  0x30   : > { %s186_s4 = scalar_lea.vmem [#allocation4], %s6847_s25 }
  0x31   : > { %7024 = dma.done.wait (%p7151_p8), %s183_s30, 1024  }
  0x32   : > { %7026 = vsyncadd (%p7151_p8), %s183_s30, 4294966272  ;;  %s212_s5 = sld [smem:[#allocation3]]  ;;  %v258_v0 = vlaneseq  ;;  %v213_v1 = vld [vmem:[%s186_s4] sm:$0xff]  ;;  %v6849_v2 = vld [vmem:[%s186_s4 + $0x10] sm:$0xff]  ;;  %vm610_vm0 = vcmask 7168   ;;  %s7061_s26 = smov 2  }
  0x33   : > { %s211_s6 = sld [smem:[#allocation2]]  ;;  %v6851_v3 = vld [vmem:[%s186_s4 + $0x20] sm:$0xff]  ;;  %v6853_v4 = vld [vmem:[%s186_s4 + $0x30] sm:$0xff]  ;;  %v214_v10 = vld [vmem:[%s186_s4 + $0x8] sm:$0xff]  ;;  %s7062_s7 = smov 4   ;;  %vm3555_vm1 = vcmask 15360  }
  0x34   : > { %v233_v6 = vadd.f32 %v6851_v3, %v6849_v2  ;;  %v7196_v7 = vshrl.u32 %v258_v0, 7  ;;  %v237_v8 = vsub.f32 %v6849_v2, %v6851_v3  ;;  %v224_v9 = vadd.f32 %v6853_v4, %v213_v1  ;;  %v6850_v13 = vld [vmem:[%s186_s4 + $0x18] sm:$0xff]  ;;  %v6852_v14 = vld [vmem:[%s186_s4 + $0x28] sm:$0xff]  ;;  %s7063_s8 = smov 6   ;;  %s7064_s9 = smov 8  }
  0x35   : > { %v229_v11 = vsub.f32 %v213_v1, %v6853_v4  ;;  %v6854_v15 = vld [vmem:[%s186_s4 + $0x38] sm:$0xff]  ;;  %v238_v20 = vsub.f32 %v6850_v13, %v6852_v14  ;;  %v234_v41 = vadd.f32 %v6852_v14, %v6850_v13  ;;  %s7065_s10 = smov 10   ;;  %s7066_s11 = smov 12   ;;  %vm3572_vm2 = vcmask 31744  }
  0x36   : > { %v230_v19 = vsub.f32 %v214_v10, %v6854_v15  ;;  %v7209_v22 = vsub.s32 1, %v7196_v7  ;;  %v7212_v23 = vsub.s32 0, %v7196_v7  ;;  %v7234_v33 = vsub.s32 2, %v7196_v7  ;;  %s7067_s12 = smov 14   ;;  %s7068_s13 = smov 16  }
  0x37   : > { %v7238_v35 = vsub.s32 3, %v7196_v7  ;;  %v7242_v37 = vsub.s32 4, %v7196_v7  ;;  %v7246_v39 = vsub.s32 5, %v7196_v7  ;;  %v225_v40 = vadd.f32 %v6854_v15, %v214_v10  ;;  %s7069_s14 = smov 18   ;;  %s7070_s15 = smov 20  }
  0x38   : > { %v226_v5 = vstv %s212_s5  ;;  %v7250_v43 = vsub.s32 6, %v7196_v7  ;;  %v7258_v47 = vsub.s32 7, %v7196_v7  ;;  %s7071_s0 = smov 22   ;;  %s7072_s1 = smov 24   ;;  %vm3589_vm3 = vcmask 48128  }
  0x39   : > { %v7198_v12 = vmul.f32 %v233_v6, %v226_v5  ;;  %v7200_v16 = vmul.f32 %v237_v8, %v226_v5  ;;  %v7202_v17 = vmul.f32 %v226_v5, %v224_v9  ;;  %v7204_v18 = vmul.f32 %v229_v11, %v226_v5  ;;  %s7073_s23 = smov 26   ;;  %s7074_s25 = smov 28  }
  0x3a   : > { %v7206_v21 = vstv %s211_s6  ;;  %v7220_v26 = vmul.f32 %v230_v19, %v226_v5  ;;  %v7222_v27 = vmul.f32 %v238_v20, %v226_v5  ;;  %v7252_v44 = vmul.f32 %v226_v5, %v225_v40  ;;  %s7075_s30 = smov 30   ;;  %s6848_s4 = sshll.u32 %s7188_s24, 5 }
  0x3b   : > { %v241_v24 = vsub.f32 %v7202_v17, %v7198_v12  ;;  %v7218_v25 = vadd.f32 %v7200_v16, %v7204_v18  ;;  %v250_v28 = vsub.f32 %v7204_v18, %v7200_v16  ;;  %v7254_v45 = vmul.f32 %v234_v41, %v226_v5  ;;  %s12097_s5 = scalar_lea.vmem [#allocation7], %s6848_s4  ;;  %s6861_s6 = sshll.u32 %s7045_s19, 9 }
  0x3c   : > { %v7229_v30 = vadd.f32 %v7222_v27, %v7220_v26  ;;  %v251_v51 = vsub.f32 %v7220_v26, %v7222_v27  ;;  %vm3606_vm4 = vcmask 64512   ;;  %vm3623_vm5 = vcmask 80896  }
  0x3d   : > { %v244_v29 = vadd.f32 %v7206_v21, %v241_v24  ;;  %v242_v48 = vsub.f32 %v7252_v44, %v7254_v45  ;;  %v248_v60 = vadd.f32 %v7218_v25, %v7206_v21  ;;  %vm3640_vm6 = vcmask 97280  }
  0x3e   : > { %v249_v5 = vadd.f32 %v7229_v30, %v7206_v21  ;;  %vm3657_vm7 = vcmask 113664   ;;  %vm3674_vm8 = vcmask 130048   ;;  %vm3691_vm9 = vcmask 146432  }
  0x3f   : > { %v272_v31 = vrot.slane %v244_v29, %v7209_v22  ;;  %v261_v32 = vrot.slane %v244_v29, %v7212_v23  ;;  %v283_v34 = vrot.slane %v244_v29, %v7234_v33  ;;  %v294_v36 = vrot.slane %v244_v29, %v7238_v35 }
  0x40   : > { %v305_v38 = vrot.slane %v244_v29, %v7242_v37  ;;  %v316_v42 = vrot.slane %v244_v29, %v7246_v39  ;;  %v327_v46 = vrot.slane %v244_v29, %v7250_v43  ;;  %v338_v49 = vrot.slane %v244_v29, %v7258_v47 }
  0x41   : > { %274 = vbcast.lane.b32.xlu1 %v272_v31, 256  ;;  %263 = vbcast.lane.b32.xlu0 %v261_v32, 256  ;;  %v245_v50 = vadd.f32 %v7206_v21, %v242_v48  ;;  %v437_v61 = vrot.slane %v248_v60, %v7212_v23  ;;  %v448_v62 = vrot.slane %v248_v60, %v7209_v22  ;;  %vm3708_vm10 = vcmask 162816  }
  0x42   : > { %v459_v63 = vrot.slane %v248_v60, %v7234_v33  ;;  %v470_v0 = vrot.slane %v248_v60, %v7238_v35  ;;  %v481_v1 = vrot.slane %v248_v60, %v7242_v37  ;;  %v492_v2 = vrot.slane %v248_v60, %v7246_v39 }
  0x43   : > { %v349_v52 = vrot.slane %v245_v50, %v7212_v23  ;;  %v360_v53 = vrot.slane %v245_v50, %v7209_v22  ;;  %v371_v54 = vrot.slane %v245_v50, %v7234_v33  ;;  %v382_v55 = vrot.slane %v245_v50, %v7238_v35 }
  0x44   : > { %v393_v56 = vrot.slane %v245_v50, %v7242_v37  ;;  %v404_v57 = vrot.slane %v245_v50, %v7246_v39  ;;  %v415_v58 = vrot.slane %v245_v50, %v7250_v43  ;;  %v426_v59 = vrot.slane %v245_v50, %v7258_v47 }
  0x45   : > { %278 = vbcast.lane.b32.xlu1 %v272_v31, 264  ;;  %267 = vbcast.lane.b32.xlu0 %v261_v32, 264  ;;  %v503_v3 = vrot.slane %v248_v60, %v7250_v43  ;;  %v514_v4 = vrot.slane %v248_v60, %v7258_v47  ;;  %v525_v6 = vrot.slane %v249_v5, %v7212_v23  ;;  %vm3725_vm11 = vcmask 179200  }
  0x46   : > { %v536_v8 = vrot.slane %v249_v5, %v7209_v22  ;;  %v547_v9 = vrot.slane %v249_v5, %v7234_v33  ;;  %v558_v10 = vrot.slane %v249_v5, %v7238_v35  ;;  %v569_v11 = vrot.slane %v249_v5, %v7242_v37 }
  0x47   : > { %v580_v13 = vrot.slane %v249_v5, %v7246_v39  ;;  %v591_v19 = vrot.slane %v249_v5, %v7250_v43  ;;  %v602_v25 = vrot.slane %v249_v5, %v7258_v47  ;;  %v252_v29 = vadd.f32 %v250_v28, %v7206_v21 }
  0x48   : > { %v253_v60 = vadd.f32 %v251_v51, %v7206_v21  ;;  %vm3742_vm12 = vcmask 195584   ;;  %vm3759_vm13 = vcmask 211968   ;;  %vm3776_vm14 = vcmask 228352  }
  0x49   : > { %289 = vbcast.lane.b32.xlu1 %v283_v34, 264  ;;  %285 = vbcast.lane.b32.xlu0 %v283_v34, 256  ;;  %v646_v32 = vrot.slane %v252_v29, %v7212_v23  ;;  %v668_v18 = vrot.slane %v252_v29, %v7234_v33  ;;  %vm3793_vm15 = vcmask 244736  }
  0x4a   : > { %v756_v27 = vrot.slane %v253_v60, %v7234_v33  ;;  %v767_v5 = vrot.slane %v253_v60, %v7238_v35 }
  0x4d   : > { %300 = vbcast.lane.b32.xlu1 %v294_v36, 264  ;;  %296 = vbcast.lane.b32.xlu0 %v294_v36, 256 }
  0x51   : > { %311 = vbcast.lane.b32.xlu1 %v305_v38, 264  ;;  %307 = vbcast.lane.b32.xlu0 %v305_v38, 256  ;;  %v657_v38 = vrot.slane %v252_v29, %v7209_v22 }
  0x55   : > { %322 = vbcast.lane.b32.xlu1 %v316_v42, 264  ;;  %318 = vbcast.lane.b32.xlu0 %v316_v42, 256  ;;  %v679_v42 = vrot.slane %v252_v29, %v7238_v35 }
  0x59   : > { %333 = vbcast.lane.b32.xlu1 %v327_v46, 264  ;;  %329 = vbcast.lane.b32.xlu0 %v327_v46, 256 }
  0x5d   : > { %344 = vbcast.lane.b32.xlu1 %v338_v49, 264  ;;  %340 = vbcast.lane.b32.xlu0 %v338_v49, 256  ;;  %v690_v49 = vrot.slane %v252_v29, %v7242_v37 }
  0x61   : > { %355 = vbcast.lane.b32.xlu1 %v349_v52, 264  ;;  %351 = vbcast.lane.b32.xlu0 %v349_v52, 256 }
  0x65   : > { %366 = vbcast.lane.b32.xlu1 %v360_v53, 264  ;;  %362 = vbcast.lane.b32.xlu0 %v360_v53, 256  ;;  %v701_v53 = vrot.slane %v252_v29, %v7246_v39 }
  0x69   : > { %377 = vbcast.lane.b32.xlu1 %v371_v54, 264  ;;  %373 = vbcast.lane.b32.xlu0 %v371_v54, 256 }
  0x6d   : > { %388 = vbcast.lane.b32.xlu1 %v382_v55, 264  ;;  %384 = vbcast.lane.b32.xlu0 %v382_v55, 256 }
  0x71   : > { %399 = vbcast.lane.b32.xlu1 %v393_v56, 264  ;;  %395 = vbcast.lane.b32.xlu0 %v393_v56, 256  ;;  %v712_v56 = vrot.slane %v252_v29, %v7250_v43 }
  0x75   : > { %410 = vbcast.lane.b32.xlu1 %v404_v57, 264  ;;  %406 = vbcast.lane.b32.xlu0 %v404_v57, 256 }
  0x79   : > { %421 = vbcast.lane.b32.xlu1 %v415_v58, 264  ;;  %417 = vbcast.lane.b32.xlu0 %v415_v58, 256 }
  0x7d   : > { %432 = vbcast.lane.b32.xlu1 %v426_v59, 264  ;;  %428 = vbcast.lane.b32.xlu0 %v426_v59, 256  ;;  %v723_v59 = vrot.slane %v252_v29, %v7258_v47  ;;  %v800_v29 = vrot.slane %v253_v60, %v7250_v43 }
  0x81   : > { %443 = vbcast.lane.b32.xlu1 %v437_v61, 264  ;;  %439 = vbcast.lane.b32.xlu0 %v437_v61, 256 }
  0x85   : > { %454 = vbcast.lane.b32.xlu1 %v448_v62, 264  ;;  %450 = vbcast.lane.b32.xlu0 %v448_v62, 256 }
  0x89   : > { %465 = vbcast.lane.b32.xlu1 %v459_v63, 264  ;;  %461 = vbcast.lane.b32.xlu0 %v459_v63, 256  ;;  %v734_v63 = vrot.slane %v253_v60, %v7212_v23 }
  0x8d   : > { %476 = vbcast.lane.b32.xlu1 %v470_v0, 264  ;;  %472 = vbcast.lane.b32.xlu0 %v470_v0, 256 }
  0x91   : > { %487 = vbcast.lane.b32.xlu1 %v481_v1, 264  ;;  %483 = vbcast.lane.b32.xlu0 %v481_v1, 256 }
  0x95   : > { %498 = vbcast.lane.b32.xlu1 %v492_v2, 264  ;;  %494 = vbcast.lane.b32.xlu0 %v492_v2, 256  ;;  %v745_v2 = vrot.slane %v253_v60, %v7209_v22 }
  0x99   : > { %509 = vbcast.lane.b32.xlu1 %v503_v3, 264  ;;  %505 = vbcast.lane.b32.xlu0 %v503_v3, 256 }
  0x9d   : > { %520 = vbcast.lane.b32.xlu1 %v514_v4, 264  ;;  %516 = vbcast.lane.b32.xlu0 %v514_v4, 256 }
  0xa1   : > { %531 = vbcast.lane.b32.xlu1 %v525_v6, 264  ;;  %527 = vbcast.lane.b32.xlu0 %v525_v6, 256 }
  0xa5   : > { %542 = vbcast.lane.b32.xlu1 %v536_v8, 264  ;;  %538 = vbcast.lane.b32.xlu0 %v536_v8, 256 }
  0xa9   : > { %553 = vbcast.lane.b32.xlu1 %v547_v9, 264  ;;  %549 = vbcast.lane.b32.xlu0 %v547_v9, 256  ;;  %v778_v9 = vrot.slane %v253_v60, %v7242_v37 }
  0xad   : > { %564 = vbcast.lane.b32.xlu1 %v558_v10, 264  ;;  %560 = vbcast.lane.b32.xlu0 %v558_v10, 256 }
  0xb1   : > { %575 = vbcast.lane.b32.xlu1 %v569_v11, 264  ;;  %571 = vbcast.lane.b32.xlu0 %v569_v11, 256 }
  0xb3   : > { %v7292_v14 = vpop.permute.xlu1 %274  ;;  %v7294_v15 = vpop.permute.xlu0 %263 }
  0xb5   : > { %586 = vbcast.lane.b32.xlu1 %v580_v13, 264  ;;  %582 = vbcast.lane.b32.xlu0 %v580_v13, 256  ;;  %v789_v13 = vrot.slane %v253_v60, %v7246_v39 }
  0xb7   : > { %v7297_v20 = vpop.permute.xlu1 %278  ;;  %v7299_v24 = vpop.permute.xlu0 %267 }
  0xb9   : > { %597 = vbcast.lane.b32.xlu1 %v591_v19, 264  ;;  %593 = vbcast.lane.b32.xlu0 %v591_v19, 256 }
  0xbb   : > { %v7306_v30 = vpop.permute.xlu1 %289  ;;  %v7308_v31 = vpop.permute.xlu0 %285 }
  0xbd   : > { %608 = vbcast.lane.b32.xlu1 %v602_v25, 264  ;;  %604 = vbcast.lane.b32.xlu0 %v602_v25, 256 }
  0xbf   : > { %v7311_v34 = vpop.permute.xlu1 %300  ;;  %v7313_v36 = vpop.permute.xlu0 %296 }
  0xc1   : > { %652 = vbcast.lane.b32.xlu1 %v646_v32, 264  ;;  %648 = vbcast.lane.b32.xlu0 %v646_v32, 256  ;;  %v254_v32 = vadd.f32 %v7198_v12, %v7202_v17 }
  0xc3   : > { %v7316_v40 = vpop.permute.xlu1 %311  ;;  %v7318_v16 = vpop.permute.xlu0 %307 }
  0xc5   : > { %663 = vbcast.lane.b32.xlu1 %v657_v38, 264  ;;  %659 = vbcast.lane.b32.xlu0 %v657_v38, 256 }
  0xc7   : > { %v7321_v28 = vpop.permute.xlu1 %322  ;;  %v7323_v41 = vpop.permute.xlu0 %318 }
  0xc9   : > { %674 = vbcast.lane.b32.xlu1 %v668_v18, 264  ;;  %670 = vbcast.lane.b32.xlu0 %v668_v18, 256 }
  0xcb   : > { %v7326_v46 = vpop.permute.xlu1 %333  ;;  %v7328_v48 = vpop.permute.xlu0 %329 }
  0xcc   : > { %12301 = vst [vmem:[#allocation10_spill] sm:$0xff] %v7326_v46 }
  0xcd   : > { %685 = vbcast.lane.b32.xlu1 %v679_v42, 264  ;;  %681 = vbcast.lane.b32.xlu0 %v679_v42, 256  ;;  %v811_v42 = vrot.slane %v253_v60, %v7258_v47 }
  0xcf   : > { %v7331_v50 = vpop.permute.xlu1 %344  ;;  %v7333_v52 = vpop.permute.xlu0 %340 }
  0xd1   : > { %696 = vbcast.lane.b32.xlu1 %v690_v49, 264  ;;  %692 = vbcast.lane.b32.xlu0 %v690_v49, 256  ;;  %v256_v49 = vadd.f32 %v254_v32, %v7206_v21 }
  0xd3   : > { %v7336_v54 = vpop.permute.xlu1 %355  ;;  %v7338_v55 = vpop.permute.xlu0 %351 }
  0xd4   : > { %12302 = vst [vmem:[#allocation11_spill] sm:$0xff] %v7336_v54 }
  0xd5   : > { %707 = vbcast.lane.b32.xlu1 %v701_v53, 264  ;;  %703 = vbcast.lane.b32.xlu0 %v701_v53, 256 }
  0xd7   : > { %v7341_v57 = vpop.permute.xlu1 %366  ;;  %v7343_v58 = vpop.permute.xlu0 %362 }
  0xd8   : > { %12303 = vst [vmem:[#allocation12_spill] sm:$0xff] %v7341_v57 }
  0xd9   : > { %718 = vbcast.lane.b32.xlu1 %v712_v56, 264  ;;  %714 = vbcast.lane.b32.xlu0 %v712_v56, 256 }
  0xdb   : > { %v7350_v61 = vpop.permute.xlu1 %377  ;;  %v7352_v62 = vpop.permute.xlu0 %373 }
  0xdc   : > { %12304 = vst [vmem:[#allocation13_spill] sm:$0xff] %v7350_v61 }
  0xdd   : > { %729 = vbcast.lane.b32.xlu1 %v723_v59, 264  ;;  %725 = vbcast.lane.b32.xlu0 %v723_v59, 256  ;;  %v822_v59 = vrot.slane %v256_v49, %v7212_v23 }
  0xdf   : > { %v7355_v0 = vpop.permute.xlu1 %388  ;;  %v7357_v1 = vpop.permute.xlu0 %384 }
  0xe0   : > { %12305 = vst [vmem:[#allocation14_spill] sm:$0xff] %v7355_v0  ;;  %v899_v0 = vrot.slane %v256_v49, %v7258_v47 }
  0xe1   : > { %740 = vbcast.lane.b32.xlu1 %v734_v63, 264  ;;  %736 = vbcast.lane.b32.xlu0 %v734_v63, 256  ;;  %v833_v63 = vrot.slane %v256_v49, %v7209_v22 }
  0xe3   : > { %v7360_v3 = vpop.permute.xlu1 %399  ;;  %v7362_v26 = vpop.permute.xlu0 %395 }
  0xe4   : > { %12306 = vst [vmem:[#allocation15_spill] sm:$0xff] %v7360_v3 }
  0xe5   : > { %751 = vbcast.lane.b32.xlu1 %v745_v2, 264  ;;  %747 = vbcast.lane.b32.xlu0 %v745_v2, 256 }
  0xe7   : > { %v7365_v51 = vpop.permute.xlu1 %410  ;;  %v7367_v4 = vpop.permute.xlu0 %406 }
  0xe8   : > { %12307 = vst [vmem:[#allocation16_spill] sm:$0xff] %v7365_v51  ;;  %v255_v51 = vadd.f32 %v7254_v45, %v7252_v44 }
  0xe9   : > { %762 = vbcast.lane.b32.xlu1 %v756_v27, 264  ;;  %758 = vbcast.lane.b32.xlu0 %v756_v27, 256  ;;  %v844_v27 = vrot.slane %v256_v49, %v7234_v33 }
  0xeb   : > { %v7370_v6 = vpop.permute.xlu1 %421  ;;  %v7372_v8 = vpop.permute.xlu0 %417 }
  0xec   : > { %12308 = vst [vmem:[#allocation17_spill] sm:$0xff] %v7370_v6 }
  0xed   : > { %773 = vbcast.lane.b32.xlu1 %v767_v5, 264  ;;  %769 = vbcast.lane.b32.xlu0 %v767_v5, 256 }
  0xef   : > { %v7375_v10 = vpop.permute.xlu1 %432  ;;  %v7377_v11 = vpop.permute.xlu0 %428 }
  0xf0   : > { %12309 = vst [vmem:[#allocation18_spill] sm:$0xff] %v7375_v10 }
  0xf1   : > { %784 = vbcast.lane.b32.xlu1 %v778_v9, 264  ;;  %780 = vbcast.lane.b32.xlu0 %v778_v9, 256 }
  0xf3   : > { %v7380_v19 = vpop.permute.xlu1 %443  ;;  %v7382_v25 = vpop.permute.xlu0 %439 }
  0xf5   : > { %795 = vbcast.lane.b32.xlu1 %v789_v13, 264  ;;  %791 = vbcast.lane.b32.xlu0 %v789_v13, 256  ;;  %v855_v13 = vrot.slane %v256_v49, %v7238_v35 }
  0xf7   : > { %v7387_v38 = vpop.permute.xlu1 %454  ;;  %v7389_v18 = vpop.permute.xlu0 %450 }
  0xf9   : > { %806 = vbcast.lane.b32.xlu1 %v800_v29, 264  ;;  %802 = vbcast.lane.b32.xlu0 %v800_v29, 256 }
  0xfb   : > { %v7393_v53 = vpop.permute.xlu1 %465  ;;  %v7395_v56 = vpop.permute.xlu0 %461 }
  0xfd   : > { %817 = vbcast.lane.b32.xlu1 %v811_v42, 264  ;;  %813 = vbcast.lane.b32.xlu0 %v811_v42, 256  ;;  %v866_v42 = vrot.slane %v256_v49, %v7242_v37 }
  0xff   : > { %v7398_v12 = vpop.permute.xlu1 %476  ;;  %v7400_v17 = vpop.permute.xlu0 %472 }
 0x101   : > { %828 = vbcast.lane.b32.xlu1 %v822_v59, 264  ;;  %824 = vbcast.lane.b32.xlu0 %v822_v59, 256 }
 0x103   : > { %v7403_v60 = vpop.permute.xlu1 %487  ;;  %v7405_v2 = vpop.permute.xlu0 %483 }
 0x105   : > { %839 = vbcast.lane.b32.xlu1 %v833_v63, 264  ;;  %835 = vbcast.lane.b32.xlu0 %v833_v63, 256  ;;  %v877_v63 = vrot.slane %v256_v49, %v7246_v39 }
 0x107   : > { %v7408_v5 = vpop.permute.xlu1 %498  ;;  %v7410_v9 = vpop.permute.xlu0 %494 }
 0x109   : > { %850 = vbcast.lane.b32.xlu1 %v844_v27, 264  ;;  %846 = vbcast.lane.b32.xlu0 %v844_v27, 256  ;;  %v888_v27 = vrot.slane %v256_v49, %v7250_v43 }
 0x10b   : > { %v7413_v29 = vpop.permute.xlu1 %509  ;;  %v7415_v32 = vpop.permute.xlu0 %505 }
 0x10d   : > { %861 = vbcast.lane.b32.xlu1 %v855_v13, 264  ;;  %857 = vbcast.lane.b32.xlu0 %v855_v13, 256 }
 0x10f   : > { %v7418_v59 = vpop.permute.xlu1 %520  ;;  %v7420_v6 = vpop.permute.xlu0 %516 }
 0x111   : > { %872 = vbcast.lane.b32.xlu1 %v866_v42, 264  ;;  %868 = vbcast.lane.b32.xlu0 %v866_v42, 256  ;;  %v257_v42 = vadd.f32 %v255_v51, %v7206_v21 }
 0x113   : > { %v7423_v10 = vpop.permute.xlu1 %531  ;;  %v7425_v3 = vpop.permute.xlu0 %527  ;;  %v910_v57 = vrot.slane %v257_v42, %v7212_v23  ;;  %v932_v51 = vrot.slane %v257_v42, %v7234_v33 }
 0x114   : > { %12310 = vst [vmem:[#allocation19_spill] sm:$0xff] %v7423_v10 }
 0x115   : > { %883 = vbcast.lane.b32.xlu1 %v877_v63, 264  ;;  %879 = vbcast.lane.b32.xlu0 %v877_v63, 256  ;;  %v921_v63 = vrot.slane %v257_v42, %v7209_v22 }
 0x117   : > { %v7430_v13 = vpop.permute.xlu1 %542  ;;  %v7432_v61 = vpop.permute.xlu0 %538 }
 0x118   : > { %12311 = vst [vmem:[#allocation20_spill] sm:$0xff] %v7430_v13  ;;  %v7059_v13 = vmov 1934713408  }
 0x119   : > { %894 = vbcast.lane.b32.xlu1 %v888_v27, 264  ;;  %890 = vbcast.lane.b32.xlu0 %v888_v27, 256  ;;  %v1044_v46 = vunpack.c.l.s4 %v7059_v13  ;;  %v7481_v13 = vsel %vm610_vm0, %v7294_v15, %v7382_v25  ;;  %v7507_v15 = vsel %vm610_vm0, %v7308_v31, %v7395_v56  ;;  %v987_v25 = vrot.slane %v257_v42, %v7258_v47 }
 0x11a   : > { %v7533_v56 = vsel %vm610_vm0, %v7323_v41, %v7410_v9 }
 0x11b   : > { %v7436_v54 = vpop.permute.xlu1 %553  ;;  %v7438_v10 = vpop.permute.xlu0 %549 }
 0x11c   : > { %12312 = vst [vmem:[#allocation21_spill] sm:$0xff] %v7436_v54 }
 0x11d   : > { %905 = vbcast.lane.b32.xlu1 %v899_v0, 264  ;;  %901 = vbcast.lane.b32.xlu0 %v899_v0, 256  ;;  %v943_v0 = vrot.slane %v257_v42, %v7238_v35  ;;  %v965_v35 = vrot.slane %v257_v42, %v7246_v39  ;;  %v976_v39 = vrot.slane %v257_v42, %v7250_v43 }
 0x11e   : > { %v7502_v43 = vsel %vm610_vm0, %v7313_v36, %v7400_v17  ;;  %v7538_v17 = vsel %vm610_vm0, %v7318_v16, %v7405_v2 }
 0x11f   : > { %v7441_v44 = vpop.permute.xlu1 %564  ;;  %v7443_v45 = vpop.permute.xlu0 %560 }
 0x120   : > { %12313 = vst [vmem:[#allocation22_spill] sm:$0xff] %v7441_v44  ;;  %v954_v44 = vrot.slane %v257_v42, %v7242_v37  ;;  %v1045_v37 = vunpack.c.0.s8 %v1044_v46  ;;  %v12275_v42 = vmov 0.0  }
 0x121   : > { %916 = vbcast.lane.b32.xlu1 %v910_v57, 264  ;;  %912 = vbcast.lane.b32.xlu0 %v910_v57, 256  ;;  %v7058_v57 = vmov 1983009808  }
 0x123   : > { %v7446_v49 = vpop.permute.xlu1 %575  ;;  %v7448_v21 = vpop.permute.xlu0 %571 }
 0x124   : > { %12314 = vst [vmem:[#allocation23_spill] sm:$0xff] %v7446_v49  ;;  %v1029_v49 = vunpack.c.l.s4 %v7058_v57 }
 0x125   : > { %927 = vbcast.lane.b32.xlu1 %v921_v63, 264  ;;  %923 = vbcast.lane.b32.xlu0 %v921_v63, 256 }
 0x127   : > { %v7451_v27 = vpop.permute.xlu1 %586  ;;  %v7453_v23 = vpop.permute.xlu0 %582 }
 0x128   : > { %12315 = vst [vmem:[#allocation24_spill] sm:$0xff] %v7451_v27  ;;  %v1030_v27 = vunpack.c.0.s8 %v1029_v49 }
 0x129   : > { %938 = vbcast.lane.b32.xlu1 %v932_v51, 264  ;;  %934 = vbcast.lane.b32.xlu0 %v932_v51, 256 }
 0x12a   : > { %v7471_v57 = vsub.s32 %v1030_v27, %v7196_v7 }
 0x12b   : > { %v7456_v54 = vpop.permute.xlu1 %597  ;;  %v7458_v22 = vpop.permute.xlu0 %593 }
 0x12c   : > { %12316 = vst [vmem:[#allocation25_spill] sm:$0xff] %v7456_v54  ;;  %12318 = vst [vmem:[#allocation27_spill] sm:$0xff] %v7471_v57  ;;  %v7516_v27 = vrot.slane %v7502_v43, %v7471_v57  ;;  %v7528_v47 = vrot.slane %v7507_v15, %v7471_v57 }
 0x12d   : > { %949 = vbcast.lane.b32.xlu1 %v943_v0, 264  ;;  %945 = vbcast.lane.b32.xlu0 %v943_v0, 256  ;;  %v7476_v0 = vsel %vm610_vm0, %v7292_v14, %v7389_v18  ;;  %v7493_v14 = vsub.s32 %v1045_v37, %v7196_v7  ;;  %v7497_v18 = vrot.slane %v7481_v13, %v7471_v57 }
 0x12f   : > { %v7461_v33 = vpop.permute.xlu1 %608  ;;  %v7463_v63 = vpop.permute.xlu0 %604  ;;  %v7524_v31 = vrot.slane %v7497_v18, %v7493_v14  ;;  %v7558_v2 = vrot.slane %v7528_v47, %v7493_v14 }
 0x131   : > { %960 = vbcast.lane.b32.xlu1 %v954_v44, 264  ;;  %956 = vbcast.lane.b32.xlu0 %v954_v44, 256  ;;  %v7486_v44 = vrot.slane %v7476_v0, %v7471_v57  ;;  %12323 = vst [vmem:[#allocation32_spill] sm:$0xff] %v7524_v31  ;;  %v1072_v16 = vcombine.high %v7524_v31, %v12275_v42  ;;  %12326 = vst [vmem:[#allocation35_spill] sm:$0xff] %v7558_v2 }
 0x133   : > { %v7466_v51 = vpop.permute.xlu1 %652  ;;  %v7468_v54 = vpop.permute.xlu0 %648  ;;  %v7512_v7 = vrot.slane %v7486_v44, %v7493_v14 }
 0x134   : > { %12317 = vst [vmem:[#allocation26_spill] sm:$0xff] %v7466_v51 }
 0x135   : > { %971 = vbcast.lane.b32.xlu1 %v965_v35, 264  ;;  %967 = vbcast.lane.b32.xlu0 %v965_v35, 256  ;;  %12320 = vst [vmem:[#allocation29_spill] sm:$0xff] %v7512_v7  ;;  %v1170_v37 = vcombine.high %v7512_v7, %v12275_v42  ;;  %v7567_v7 = vsel %vm610_vm0, %v7333_v52, %v7420_v6 }
 0x136   : > { %v7584_v52 = vrot.slane %v7567_v7, %v7471_v57 }
 0x137   : > { %v7488_v49 = vpop.permute.xlu1 %663  ;;  %v7490_v46 = vpop.permute.xlu0 %659 }
 0x138   : > { %12319 = vst [vmem:[#allocation28_spill] sm:$0xff] %v7488_v49  ;;  %v7616_v49 = vrot.slane %v7584_v52, %v7493_v14 }
 0x139   : > { %982 = vbcast.lane.b32.xlu1 %v976_v39, 264  ;;  %978 = vbcast.lane.b32.xlu0 %v976_v39, 256  ;;  %v7544_v39 = vrot.slane %v7516_v27, %v7493_v14 }
 0x13a   : > { %12331 = vst [vmem:[#allocation40_spill] sm:$0xff] %v7616_v49 }
 0x13b   : > { %v7518_v35 = vpop.permute.xlu1 %674  ;;  %v7520_v36 = vpop.permute.xlu0 %670  ;;  %12324 = vst [vmem:[#allocation33_spill] sm:$0xff] %v7544_v39  ;;  %v1366_v31 = vcombine.high %v7544_v39, %v12275_v42  ;;  %v7603_v39 = vsel %vm610_vm0, %v7343_v58, %v7432_v61 }
 0x13c   : > { %12321 = vst [vmem:[#allocation30_spill] sm:$0xff] %v7518_v35  ;;  %12322 = vst [vmem:[#allocation31_spill] sm:$0xff] %v7520_v36  ;;  %v7548_v35 = vrot.slane %v7533_v56, %v7471_v57  ;;  %v7620_v58 = vrot.slane %v7603_v39, %v7471_v57 }
 0x13d   : > { %993 = vbcast.lane.b32.xlu1 %v987_v25, 264  ;;  %989 = vbcast.lane.b32.xlu0 %v987_v25, 256  ;;  %v7562_v25 = vrot.slane %v7538_v17, %v7471_v57 }
 0x13e   : > { %v7580_v51 = vrot.slane %v7548_v35, %v7493_v14 }
 0x13f   : > { %v7550_v41 = vpop.permute.xlu1 %685  ;;  %v7552_v9 = vpop.permute.xlu0 %681 }
 0x140   : > { %12325 = vst [vmem:[#allocation34_spill] sm:$0xff] %v7550_v41  ;;  %v7572_v41 = vsel %vm610_vm0, %v7328_v48, %v7415_v32  ;;  %12327 = vst [vmem:[#allocation36_spill] sm:$0xff] %v7580_v51  ;;  %v1268_v32 = vcombine.high %v7558_v2, %v12275_v42  ;;  %v1562_v2 = vcombine.high %v7580_v51, %v12275_v42 }
 0x141   : > { %2613 = vrot.lane.b32.xlu1 %v1170_v37, %s7061_s26  ;;  %2611 = vrot.lane.b32.xlu0 %v1072_v16, %s7061_s26  ;;  %v7594_v37 = vrot.slane %v7562_v25, %v7493_v14  ;;  %v7598_v16 = vrot.slane %v7572_v41, %v7471_v57  ;;  %v7644_v51 = vsel %vm610_vm0, %v7352_v62, %v7438_v10 }
 0x143   : > { %v7586_v6 = vpop.permute.xlu1 %696  ;;  %v7588_v48 = vpop.permute.xlu0 %692  ;;  %12330 = vst [vmem:[#allocation39_spill] sm:$0xff] %v7594_v37 }
 0x144   : > { %12328 = vst [vmem:[#allocation37_spill] sm:$0xff] %v7586_v6  ;;  %12329 = vst [vmem:[#allocation38_spill] sm:$0xff] %v7588_v48  ;;  %v7608_v6 = vsel %vm610_vm0, %v7338_v55, %v7425_v3  ;;  %v1464_v55 = vcombine.high %v7594_v37, %v12275_v42  ;;  %v7630_v3 = vrot.slane %v7598_v16, %v7493_v14 }
 0x145   : > { %2617 = vrot.lane.b32.xlu1 %v1366_v31, %s7061_s26  ;;  %2615 = vrot.lane.b32.xlu0 %v1268_v32, %s7061_s26  ;;  %v7634_v31 = vrot.slane %v7608_v6, %v7471_v57  ;;  %v7639_v32 = vsel %vm610_vm0, %v7357_v1, %v7443_v45  ;;  %v1758_v37 = vcombine.high %v7616_v49, %v12275_v42 }
 0x146   : > { %12334 = vst [vmem:[#allocation43_spill] sm:$0xff] %v7630_v3  ;;  %v7656_v1 = vrot.slane %v7639_v32, %v7471_v57  ;;  %v1660_v62 = vcombine.high %v7630_v3, %v12275_v42  ;;  %v7680_v49 = vsel %vm610_vm0, %v7362_v26, %v7448_v21 }
 0x147   : > { %v7622_v61 = vpop.permute.xlu1 %707  ;;  %v7624_v48 = vpop.permute.xlu0 %703  ;;  %v7666_v10 = vrot.slane %v7634_v31, %v7493_v14 }
 0x148   : > { %12332 = vst [vmem:[#allocation41_spill] sm:$0xff] %v7622_v61  ;;  %12333 = vst [vmem:[#allocation42_spill] sm:$0xff] %v7624_v48  ;;  %v7652_v61 = vrot.slane %v7620_v58, %v7493_v14 }
 0x149   : > { %2621 = vrot.lane.b32.xlu1 %v1562_v2, %s7061_s26  ;;  %2619 = vrot.lane.b32.xlu0 %v1464_v55, %s7061_s26  ;;  %12338 = vst [vmem:[#allocation47_spill] sm:$0xff] %v7666_v10  ;;  %v7670_v2 = vrot.slane %v7644_v51, %v7471_v57  ;;  %v7675_v55 = vsel %vm610_vm0, %v7367_v4, %v7453_v23 }
 0x14a   : > { %12335 = vst [vmem:[#allocation44_spill] sm:$0xff] %v7652_v61  ;;  %v1954_v3 = vcombine.high %v7652_v61, %v12275_v42  ;;  %v7692_v4 = vrot.slane %v7675_v55, %v7471_v57  ;;  %v1856_v26 = vcombine.high %v7666_v10, %v12275_v42  ;;  %v7716_v61 = vsel %vm610_vm0, %v7372_v8, %v7458_v22 }
 0x14b   : > { %v7658_v45 = vpop.permute.xlu1 %718  ;;  %v7660_v48 = vpop.permute.xlu0 %714  ;;  %v7702_v21 = vrot.slane %v7670_v2, %v7493_v14 }
 0x14c   : > { %12336 = vst [vmem:[#allocation45_spill] sm:$0xff] %v7658_v45  ;;  %12337 = vst [vmem:[#allocation46_spill] sm:$0xff] %v7660_v48  ;;  %v7688_v45 = vrot.slane %v7656_v1, %v7493_v14 }
 0x14d   : > { %2625 = vrot.lane.b32.xlu1 %v1758_v37, %s7061_s26  ;;  %2623 = vrot.lane.b32.xlu0 %v1660_v62, %s7061_s26  ;;  %12342 = vst [vmem:[#allocation51_spill] sm:$0xff] %v7702_v21  ;;  %v7706_v37 = vrot.slane %v7680_v49, %v7471_v57  ;;  %v7711_v62 = vsel %vm610_vm0, %v7377_v11, %v7463_v63 }
 0x14e   : > { %12339 = vst [vmem:[#allocation48_spill] sm:$0xff] %v7688_v45  ;;  %v2150_v10 = vcombine.high %v7688_v45, %v12275_v42  ;;  %v7728_v11 = vrot.slane %v7711_v62, %v7471_v57  ;;  %v2052_v8 = vcombine.high %v7702_v21, %v12275_v42 }
 0x14f   : > { %v7694_v23 = vpop.permute.xlu1 %729  ;;  %v7696_v48 = vpop.permute.xlu0 %725  ;;  %v7738_v22 = vrot.slane %v7706_v37, %v7493_v14 }
 0x150   : > { %12340 = vst [vmem:[#allocation49_spill] sm:$0xff] %v7694_v23  ;;  %12341 = vst [vmem:[#allocation50_spill] sm:$0xff] %v7696_v48  ;;  %v7724_v23 = vrot.slane %v7692_v4, %v7493_v14  ;;  %v7750_v45 = vrot.slane %v7728_v11, %v7493_v14 }
 0x151   : > { %2629 = vrot.lane.b32.xlu1 %v1954_v3, %s7061_s26  ;;  %2627 = vrot.lane.b32.xlu0 %v1856_v26, %s7061_s26  ;;  %12346 = vst [vmem:[#allocation55_spill] sm:$0xff] %v7738_v22  ;;  %v7742_v3 = vrot.slane %v7716_v61, %v7471_v57 }
 0x152   : > { %12343 = vst [vmem:[#allocation52_spill] sm:$0xff] %v7724_v23  ;;  %v2346_v26 = vcombine.high %v7724_v23, %v12275_v42  ;;  %12347 = vst [vmem:[#allocation56_spill] sm:$0xff] %v7750_v45 }
 0x153   : > { %v7730_v63 = vpop.permute.xlu1 %740  ;;  %v7732_v48 = vpop.permute.xlu0 %736  ;;  %v7760_v36 = vrot.slane %v7742_v3, %v7493_v14 }
 0x154   : > { %12344 = vst [vmem:[#allocation53_spill] sm:$0xff] %v7730_v63  ;;  %12345 = vst [vmem:[#allocation54_spill] sm:$0xff] %v7732_v48  ;;  %v2248_v48 = vcombine.high %v7738_v22, %v12275_v42  ;;  %v1042_v22 = vcombine.high %v7497_v18, %v12275_v42  ;;  %v1238_v18 = vcombine.high %v7528_v47, %v12275_v42 }
 0x155   : > { %2633 = vrot.lane.b32.xlu1 %v2150_v10, %s7061_s26  ;;  %2631 = vrot.lane.b32.xlu0 %v2052_v8, %s7061_s26  ;;  %12350 = vst [vmem:[#allocation59_spill] sm:$0xff] %v7760_v36  ;;  %v1140_v10 = vcombine.high %v7486_v44, %v12275_v42  ;;  %v2542_v8 = vcombine.high %v7750_v45, %v12275_v42 }
 0x156   : > { %v1336_v44 = vcombine.high %v7516_v27, %v12275_v42  ;;  %v1532_v27 = vcombine.high %v7548_v35, %v12275_v42  ;;  %v1434_v47 = vcombine.high %v7562_v25, %v12275_v42 }
 0x157   : > { %v7752_v21 = vpop.permute.xlu1 %751  ;;  %v7754_v63 = vpop.permute.xlu0 %747 }
 0x158   : > { %12348 = vst [vmem:[#allocation57_spill] sm:$0xff] %v7752_v21  ;;  %12349 = vst [vmem:[#allocation58_spill] sm:$0xff] %v7754_v63  ;;  %v2444_v63 = vcombine.high %v7760_v36, %v12275_v42  ;;  %v1546_v36 = vrot.slane %v1532_v27, %v7493_v14  ;;  %v1448_v35 = vrot.slane %v1434_v47, %v7493_v14 }
 0x159   : > { %2637 = vrot.lane.b32.xlu1 %v2346_v26, %s7061_s26  ;;  %2635 = vrot.lane.b32.xlu0 %v2248_v48, %s7061_s26  ;;  %v7779_v48 = vrot.slane %v1140_v10, %v7493_v14  ;;  %v1924_v27 = vcombine.high %v7620_v58, %v12275_v42  ;;  %v1826_v47 = vcombine.high %v7634_v31, %v12275_v42 }
 0x15b   : > { %v7768_v23 = vpop.permute.xlu1 %762  ;;  %v7770_v21 = vpop.permute.xlu0 %758  ;;  %v1840_v58 = vrot.slane %v1826_v47, %v7493_v14  ;;  %v2218_v47 = vcombine.high %v7706_v37, %v12275_v42 }
 0x15c   : > { %12351 = vst [vmem:[#allocation60_spill] sm:$0xff] %v7768_v23  ;;  %12352 = vst [vmem:[#allocation61_spill] sm:$0xff] %v7770_v21  ;;  %v1056_v23 = vrot.slane %v1042_v22, %v7493_v14  ;;  %v1252_v22 = vrot.slane %v1238_v18, %v7493_v14 }
 0x15d   : > { %2641 = vrot.lane.b32.xlu1 %v2542_v8, %s7061_s26  ;;  %2639 = vrot.lane.b32.xlu0 %v2444_v63, %s7061_s26  ;;  %v1350_v63 = vrot.slane %v1336_v44, %v7493_v14  ;;  %v1728_v44 = vcombine.high %v7584_v52, %v12275_v42 }
 0x15f   : > { %v7783_v26 = vpop.permute.xlu1 %773  ;;  %v7785_v45 = vpop.permute.xlu0 %769  ;;  %v1742_v25 = vrot.slane %v1728_v44, %v7493_v14  ;;  %v2120_v44 = vcombine.high %v7656_v1, %v12275_v42 }
 0x160   : > { %12353 = vst [vmem:[#allocation62_spill] sm:$0xff] %v7783_v26  ;;  %12354 = vst [vmem:[#allocation63_spill] sm:$0xff] %v7785_v45  ;;  %v1073_v45 = vcombine.high %v1056_v23, %v12275_v42 }
 0x161   : > { %2677 = vrot.lane.b32.xlu1 %v7779_v48, %s7062_s7  ;;  %2675 = vrot.lane.b32.xlu0 %v1056_v23, %s7062_s7  ;;  %v2134_v31 = vrot.slane %v2120_v44, %v7493_v14  ;;  %v2512_v44 = vcombine.high %v7728_v11, %v12275_v42  ;;  %v1563_v23 = vcombine.high %v1546_v36, %v12275_v42 }
 0x163   : > { %v7796_v10 = vpop.permute.xlu1 %784  ;;  %v7798_v8 = vpop.permute.xlu0 %780  ;;  %v2526_v37 = vrot.slane %v2512_v44, %v7493_v14 }
 0x164   : > { %12355 = vst [vmem:[#allocation64_spill] sm:$0xff] %v7796_v10  ;;  %12356 = vst [vmem:[#allocation65_spill] sm:$0xff] %v7798_v8  ;;  %v1630_v10 = vcombine.high %v7598_v16, %v12275_v42  ;;  %v1938_v16 = vrot.slane %v1924_v27, %v7493_v14  ;;  %v2316_v27 = vcombine.high %v7692_v4, %v12275_v42 }
 0x165   : > { %2681 = vrot.lane.b32.xlu1 %v1350_v63, %s7062_s7  ;;  %2679 = vrot.lane.b32.xlu0 %v1252_v22, %s7062_s7  ;;  %v2232_v4 = vrot.slane %v2218_v47, %v7493_v14 }
 0x166   : > { %v1644_v52 = vrot.slane %v1630_v10, %v7493_v14  ;;  %v2022_v10 = vcombine.high %v7670_v2, %v12275_v42  ;;  %v2330_v2 = vrot.slane %v2316_v27, %v7493_v14 }
 0x167   : > { %v7808_v26 = vpop.permute.xlu1 %795  ;;  %v7813_v18 = vpop.permute.xlu0 %791 }
 0x168   : > { %12357 = vst [vmem:[#allocation66_spill] sm:$0xff] %v7808_v26  ;;  %12358 = vst [vmem:[#allocation67_spill] sm:$0xff] %v7813_v18  ;;  %v2036_v1 = vrot.slane %v2022_v10, %v7493_v14  ;;  %v2414_v10 = vcombine.high %v7742_v3, %v12275_v42  ;;  %v1171_v3 = vcombine.high %v7779_v48, %v12275_v42 }
 0x169   : > { %2685 = vrot.lane.b32.xlu1 %v1546_v36, %s7062_s7  ;;  %2683 = vrot.lane.b32.xlu0 %v1448_v35, %s7062_s7 }
 0x16a   : > { %v2428_v27 = vrot.slane %v2414_v10, %v7493_v14  ;;  %v1367_v10 = vcombine.high %v1350_v63, %v12275_v42 }
 0x16b   : > { %v7820_v8 = vpop.permute.xlu1 %806  ;;  %v7825_v26 = vpop.permute.xlu0 %802 }
 0x16c   : > { %12359 = vst [vmem:[#allocation68_spill] sm:$0xff] %v7820_v8  ;;  %12360 = vst [vmem:[#allocation69_spill] sm:$0xff] %v7825_v26 }
 0x16d   : > { %2689 = vrot.lane.b32.xlu1 %v1742_v25, %s7062_s7  ;;  %2687 = vrot.lane.b32.xlu0 %v1644_v52, %s7062_s7 }
 0x16f   : > { %v7832_v18 = vpop.permute.xlu1 %817  ;;  %v7837_v8 = vpop.permute.xlu0 %813 }
 0x170   : > { %12361 = vst [vmem:[#allocation70_spill] sm:$0xff] %v7832_v18  ;;  %12362 = vst [vmem:[#allocation71_spill] sm:$0xff] %v7837_v8 }
 0x171   : > { %2693 = vrot.lane.b32.xlu1 %v1938_v16, %s7062_s7  ;;  %2691 = vrot.lane.b32.xlu0 %v1840_v58, %s7062_s7 }
 0x173   : > { %v7844_v26 = vpop.permute.xlu1 %828  ;;  %v7849_v18 = vpop.permute.xlu0 %824 }
 0x174   : > { %12363 = vst [vmem:[#allocation72_spill] sm:$0xff] %v7844_v26 }
 0x175   : > { %2697 = vrot.lane.b32.xlu1 %v2134_v31, %s7062_s7  ;;  %2695 = vrot.lane.b32.xlu0 %v2036_v1, %s7062_s7 }
 0x177   : > { %v7856_v8 = vpop.permute.xlu1 %839  ;;  %v7861_v26 = vpop.permute.xlu0 %835 }
 0x178   : > { %12364 = vst [vmem:[#allocation73_spill] sm:$0xff] %v7856_v8 }
 0x179   : > { %2701 = vrot.lane.b32.xlu1 %v2330_v2, %s7062_s7  ;;  %2699 = vrot.lane.b32.xlu0 %v2232_v4, %s7062_s7 }
 0x17b   : > { %v7866_v21 = vpop.permute.xlu1 %850  ;;  %v7869_v11 = vpop.permute.xlu0 %846 }
 0x17c   : > { %12365 = vst [vmem:[#allocation74_spill] sm:$0xff] %v7866_v21  ;;  %12366 = vst [vmem:[#allocation75_spill] sm:$0xff] %v7869_v11 }
 0x17d   : > { %2705 = vrot.lane.b32.xlu1 %v2526_v37, %s7062_s7  ;;  %2703 = vrot.lane.b32.xlu0 %v2428_v27, %s7062_s7 }
 0x17f   : > { %v7873_v47 = vpop.permute.xlu1 %861  ;;  %v7877_v8 = vpop.permute.xlu0 %857 }
 0x180   : > { %12367 = vst [vmem:[#allocation76_spill] sm:$0xff] %v7873_v47  ;;  %v1269_v47 = vcombine.high %v1252_v22, %v12275_v42  ;;  %v1759_v22 = vcombine.high %v1742_v25, %v12275_v42 }
 0x181   : > { %2741 = vrot.lane.b32.xlu1 %v1171_v3, %s7063_s8  ;;  %2739 = vrot.lane.b32.xlu0 %v1073_v45, %s7063_s8  ;;  %v1465_v45 = vcombine.high %v1448_v35, %v12275_v42  ;;  %v1955_v35 = vcombine.high %v1938_v16, %v12275_v42  ;;  %v1125_v16 = vcombine.high %v7476_v0, %v12275_v42 }
 0x182   : > { %v1321_v0 = vcombine.high %v7502_v43, %v12275_v42 }
 0x183   : > { %v7882_v44 = vpop.permute.xlu1 %872  ;;  %v7885_v21 = vpop.permute.xlu0 %868 }
 0x184   : > { %12368 = vst [vmem:[#allocation77_spill] sm:$0xff] %v7882_v44  ;;  %12369 = vst [vmem:[#allocation78_spill] sm:$0xff] %v7885_v21 }
 0x185   : > { %2745 = vrot.lane.b32.xlu1 %v1367_v10, %s7063_s8  ;;  %2743 = vrot.lane.b32.xlu0 %v1269_v47, %s7063_s8  ;;  %v1661_v47 = vcombine.high %v1644_v52, %v12275_v42  ;;  %v2151_v52 = vcombine.high %v2134_v31, %v12275_v42  ;;  %v2249_v31 = vcombine.high %v2232_v4, %v12275_v42 }
 0x186   : > { %v1223_v4 = vcombine.high %v7507_v15, %v12275_v42 }
 0x187   : > { %v7890_v48 = vpop.permute.xlu1 %883  ;;  %v7893_v11 = vpop.permute.xlu0 %879 }
 0x188   : > { %12370 = vst [vmem:[#allocation79_spill] sm:$0xff] %v7890_v48  ;;  %12371 = vst [vmem:[#allocation80_spill] sm:$0xff] %v7893_v11  ;;  %v2007_v48 = vcombine.high %v7644_v51, %v12275_v42 }
 0x189   : > { %2749 = vrot.lane.b32.xlu1 %v1563_v23, %s7063_s8  ;;  %2747 = vrot.lane.b32.xlu0 %v1465_v45, %s7063_s8  ;;  %v1857_v23 = vcombine.high %v1840_v58, %v12275_v42 }
 0x18b   : > { %v7898_v63 = vpop.permute.xlu1 %894  ;;  %v7901_v3 = vpop.permute.xlu0 %890 }
 0x18c   : > { %12372 = vst [vmem:[#allocation81_spill] sm:$0xff] %v7898_v63  ;;  %12373 = vst [vmem:[#allocation82_spill] sm:$0xff] %v7901_v3  ;;  %v1811_v63 = vcombine.high %v7608_v6, %v12275_v42 }
 0x18d   : > { %2753 = vrot.lane.b32.xlu1 %v1759_v22, %s7063_s8  ;;  %2751 = vrot.lane.b32.xlu0 %v1661_v47, %s7063_s8  ;;  %v2053_v22 = vcombine.high %v2036_v1, %v12275_v42  ;;  %v2347_v47 = vcombine.high %v2330_v2, %v12275_v42  ;;  %v7935_v1 = vrot.slane %v1125_v16, %v7471_v57 }
 0x18e   : > { %v2543_v2 = vcombine.high %v2526_v37, %v12275_v42  ;;  %v7957_v37 = vrot.slane %v1321_v0, %v7471_v57  ;;  %v1517_v16 = vcombine.high %v7533_v56, %v12275_v42  ;;  %v8044_v44 = vrot.slane %v1811_v63, %v7471_v57 }
 0x18f   : > { %v7906_v36 = vpop.permute.xlu1 %905  ;;  %v7909_v10 = vpop.permute.xlu0 %901  ;;  %v7954_v43 = vrot.slane %v7935_v1, %v7493_v14  ;;  %v2301_v63 = vcombine.high %v7675_v55, %v12275_v42 }
 0x190   : > { %12374 = vst [vmem:[#allocation83_spill] sm:$0xff] %v7906_v36  ;;  %12375 = vst [vmem:[#allocation84_spill] sm:$0xff] %v7909_v10  ;;  %v7980_v56 = vrot.slane %v7957_v37, %v7493_v14  ;;  %v7983_v0 = vrot.slane %v1517_v16, %v7471_v57  ;;  %v1848_v51 = vrot.slane %v8044_v44, %v7493_v14 }
 0x191   : > { %2757 = vrot.lane.b32.xlu1 %v1955_v35, %s7063_s8  ;;  %2755 = vrot.lane.b32.xlu0 %v1857_v23, %s7063_s8  ;;  %v1027_v35 = vcombine.high %v7481_v13, %v12275_v42 }
 0x193   : > { %v7914_v25 = vpop.permute.xlu1 %916  ;;  %v7917_v45 = vpop.permute.xlu0 %912  ;;  %v7943_v13 = vrot.slane %v1027_v35, %v7471_v57 }
 0x194   : > { %12376 = vst [vmem:[#allocation85_spill] sm:$0xff] %v7914_v25  ;;  %12377 = vst [vmem:[#allocation86_spill] sm:$0xff] %v7917_v45 }
 0x195   : > { %2761 = vrot.lane.b32.xlu1 %v2151_v52, %s7063_s8  ;;  %2759 = vrot.lane.b32.xlu0 %v2053_v22, %s7063_s8  ;;  %v7965_v15 = vrot.slane %v7943_v13, %v7493_v14 }
 0x197   : > { %v7924_v58 = vpop.permute.xlu1 %927  ;;  %v7929_v23 = vpop.permute.xlu0 %923 }
 0x198   : > { %12378 = vst [vmem:[#allocation87_spill] sm:$0xff] %v7924_v58  ;;  %12379 = vst [vmem:[#allocation88_spill] sm:$0xff] %v7929_v23 }
 0x199   : > { %2765 = vrot.lane.b32.xlu1 %v2347_v47, %s7063_s8  ;;  %2763 = vrot.lane.b32.xlu0 %v2249_v31, %s7063_s8  ;;  %v2445_v47 = vcombine.high %v2428_v27, %v12275_v42  ;;  %v7968_v27 = vrot.slane %v1223_v4, %v7471_v57  ;;  %v1419_v31 = vcombine.high %v7538_v17, %v12275_v42 }
 0x19a   : > { %v1713_v4 = vcombine.high %v7567_v7, %v12275_v42  ;;  %v8006_v7 = vrot.slane %v7983_v0, %v7493_v14 }
 0x19b   : > { %v7939_v52 = vpop.permute.xlu1 %938  ;;  %v7947_v22 = vpop.permute.xlu0 %934 }
 0x19c   : > { %12380 = vst [vmem:[#allocation89_spill] sm:$0xff] %v7939_v52  ;;  %12381 = vst [vmem:[#allocation90_spill] sm:$0xff] %v7947_v22  ;;  %v7994_v52 = vrot.slane %v1419_v31, %v7471_v57  ;;  %v8009_v16 = vrot.slane %v1713_v4, %v7471_v57  ;;  %v1909_v31 = vcombine.high %v7603_v39, %v12275_v42 }
 0x19d   : > { %2769 = vrot.lane.b32.xlu1 %v2543_v2, %s7063_s8  ;;  %2767 = vrot.lane.b32.xlu0 %v2445_v47, %s7063_s8  ;;  %v7991_v47 = vrot.slane %v7968_v27, %v7493_v14 }
 0x19e   : > { %v8032_v39 = vrot.slane %v8009_v16, %v7493_v14  ;;  %v8035_v4 = vrot.slane %v1909_v31, %v7471_v57 }
 0x19f   : > { %v7961_v35 = vpop.permute.xlu1 %949  ;;  %v7972_v2 = vpop.permute.xlu0 %945 }
 0x1a0   : > { %12382 = vst [vmem:[#allocation91_spill] sm:$0xff] %v7961_v35  ;;  %12383 = vst [vmem:[#allocation92_spill] sm:$0xff] %v7972_v2  ;;  %v1615_v35 = vcombine.high %v7572_v41, %v12275_v42  ;;  %v8017_v41 = vrot.slane %v7994_v52, %v7493_v14  ;;  %v2399_v2 = vcombine.high %v7716_v61, %v12275_v42 }
 0x1a1   : > { %2805 = vrot.lane.b32.xlu1 %v7954_v43, %s7064_s9  ;;  %2803 = vrot.lane.b32.xlu0 %v7965_v15, %s7064_s9 }
 0x1a2   : > { %v8020_v58 = vrot.slane %v1615_v35, %v7471_v57  ;;  %v2105_v35 = vcombine.high %v7639_v32, %v12275_v42  ;;  %v1946_v32 = vrot.slane %v8035_v4, %v7493_v14  ;;  %v8103_v23 = vrot.slane %v2399_v2, %v7471_v57 }
 0x1a3   : > { %v7987_v17 = vpop.permute.xlu1 %960  ;;  %v7998_v25 = vpop.permute.xlu0 %956 }
 0x1a4   : > { %12384 = vst [vmem:[#allocation93_spill] sm:$0xff] %v7987_v17  ;;  %12385 = vst [vmem:[#allocation94_spill] sm:$0xff] %v7998_v25  ;;  %v1652_v6 = vrot.slane %v8020_v58, %v7493_v14  ;;  %v8056_v31 = vrot.slane %v2105_v35, %v7471_v57  ;;  %v8076_v35 = vrot.slane %v2301_v63, %v7471_v57 }
 0x1a5   : > { %2809 = vrot.lane.b32.xlu1 %v7980_v56, %s7064_s9  ;;  %2807 = vrot.lane.b32.xlu0 %v7991_v47, %s7064_s9 }
 0x1a6   : > { %v2142_v55 = vrot.slane %v8056_v31, %v7493_v14 }
 0x1a7   : > { %v8013_v17 = vpop.permute.xlu1 %971  ;;  %v8024_v36 = vpop.permute.xlu0 %967 }
 0x1a8   : > { %12386 = vst [vmem:[#allocation95_spill] sm:$0xff] %v8013_v17  ;;  %12387 = vst [vmem:[#allocation96_spill] sm:$0xff] %v8024_v36  ;;  %v2203_v36 = vcombine.high %v7680_v49, %v12275_v42 }
 0x1a9   : > { %2813 = vrot.lane.b32.xlu1 %v8006_v7, %s7064_s9  ;;  %2811 = vrot.lane.b32.xlu0 %v8017_v41, %s7064_s9 }
 0x1ab   : > { %v8039_v17 = vpop.permute.xlu1 %982  ;;  %v8048_v25 = vpop.permute.xlu0 %978 }
 0x1ac   : > { %12388 = vst [vmem:[#allocation97_spill] sm:$0xff] %v8039_v17  ;;  %12389 = vst [vmem:[#allocation98_spill] sm:$0xff] %v8048_v25  ;;  %v8065_v25 = vrot.slane %v2007_v48, %v7471_v57 }
 0x1ad   : > { %2817 = vrot.lane.b32.xlu1 %v8032_v39, %s7064_s9  ;;  %2815 = vrot.lane.b32.xlu0 %v1652_v6, %s7064_s9 }
 0x1ae   : > { %v2044_v49 = vrot.slane %v8065_v25, %v7493_v14 }
 0x1af   : > { %v8060_v17 = vpop.permute.xlu1 %993  ;;  %v8069_v22 = vpop.permute.xlu0 %989 }
 0x1b0   : > { %12390 = vst [vmem:[#allocation99_spill] sm:$0xff] %v8060_v17  ;;  %12391 = vst [vmem:[#allocation100_spill] sm:$0xff] %v8069_v22  ;;  %v2497_v17 = vcombine.high %v7711_v62, %v12275_v42  ;;  %v8085_v22 = vrot.slane %v2203_v36, %v7471_v57  ;;  %v2338_v62 = vrot.slane %v8076_v35, %v7493_v14 }
 0x1b1   : > { %2821 = vrot.lane.b32.xlu1 %v1946_v32, %s7064_s9  ;;  %2819 = vrot.lane.b32.xlu0 %v1848_v51, %s7064_s9 }
 0x1b2   : > { %v8096_v63 = vrot.slane %v2497_v17, %v7471_v57  ;;  %v2240_v36 = vrot.slane %v8085_v22, %v7493_v14  ;;  %v2436_v17 = vrot.slane %v8103_v23, %v7493_v14 }
 0x1b3   : > { %v8080_v48 = vpop.permute.xlu1 %2613  ;;  %v8089_v45 = vpop.permute.xlu0 %2611 }
 0x1b4   : > { %12392 = vst [vmem:[#allocation101_spill] sm:$0xff] %v8080_v48  ;;  %12393 = vst [vmem:[#allocation102_spill] sm:$0xff] %v8089_v45  ;;  %v2534_v42 = vrot.slane %v8096_v63, %v7493_v14 }
 0x1b5   : > { %2825 = vrot.lane.b32.xlu1 %v2142_v55, %s7064_s9  ;;  %2823 = vrot.lane.b32.xlu0 %v2044_v49, %s7064_s9 }
 0x1b7   : > { %v8098_v48 = vpop.permute.xlu1 %2617  ;;  %v8105_v61 = vpop.permute.xlu0 %2615 }
 0x1b8   : > { %12394 = vst [vmem:[#allocation103_spill] sm:$0xff] %v8098_v48  ;;  %12395 = vst [vmem:[#allocation104_spill] sm:$0xff] %v8105_v61  ;;  %v12399_v61 = vmov 0.0  }
 0x1b9   : > { %2829 = vrot.lane.b32.xlu1 %v2338_v62, %s7064_s9  ;;  %2827 = vrot.lane.b32.xlu0 %v2240_v36, %s7064_s9  ;;  %v1172_v3 = vcombine.high %v7954_v43, %v12399_v61  ;;  %v1074_v21 = vcombine.high %v7965_v15, %v12399_v61  ;;  %v1270_v43 = vcombine.high %v7991_v47, %v12399_v61 }
 0x1bb   : > { %v8111_v45 = vpop.permute.xlu1 %2621  ;;  %v8115_v48 = vpop.permute.xlu0 %2619 }
 0x1bc   : > { %12396 = vst [vmem:[#allocation105_spill] sm:$0xff] %v8111_v45  ;;  %12397 = vst [vmem:[#allocation106_spill] sm:$0xff] %v8115_v48  ;;  %v1368_v45 = vcombine.high %v7980_v56, %v12399_v61 }
 0x1bd   : > { %2833 = vrot.lane.b32.xlu1 %v2534_v42, %s7064_s9  ;;  %2831 = vrot.lane.b32.xlu0 %v2436_v17, %s7064_s9 }
 0x1bf   : > { %v8119_v2 = vpop.permute.xlu1 %2625  ;;  %v8123_v10 = vpop.permute.xlu0 %2623 }
 0x1c0   : > { %12398 = vst [vmem:[#allocation107_spill] sm:$0xff] %v8119_v2  ;;  %12400 = vst [vmem:[#allocation108_spill] sm:$0xff] %v8123_v10 }
 0x1c1   : > { %2869 = vrot.lane.b32.xlu1 %v1172_v3, %s7065_s10  ;;  %2867 = vrot.lane.b32.xlu0 %v1074_v21, %s7065_s10  ;;  %v1564_v3 = vcombine.high %v8006_v7, %v12399_v61 }
 0x1c3   : > { %v8129_v48 = vpop.permute.xlu1 %2629  ;;  %v8133_v11 = vpop.permute.xlu0 %2627 }
 0x1c4   : > { %12401 = vst [vmem:[#allocation109_spill] sm:$0xff] %v8129_v48  ;;  %12402 = vst [vmem:[#allocation110_spill] sm:$0xff] %v8133_v11  ;;  %v1466_v48 = vcombine.high %v8017_v41, %v12399_v61  ;;  %v1956_v41 = vcombine.high %v1946_v32, %v12399_v61 }
 0x1c5   : > { %2873 = vrot.lane.b32.xlu1 %v1368_v45, %s7065_s10  ;;  %2871 = vrot.lane.b32.xlu0 %v1270_v43, %s7065_s10  ;;  %v1760_v45 = vcombine.high %v8032_v39, %v12399_v61  ;;  %v1662_v43 = vcombine.high %v1652_v6, %v12399_v61  ;;  %v2152_v6 = vcombine.high %v2142_v55, %v12399_v61 }
 0x1c6   : > { %v1155_v55 = vcombine.high %v7935_v1, %v12399_v61 }
 0x1c7   : > { %v8139_v15 = vpop.permute.xlu1 %2633  ;;  %v8143_v21 = vpop.permute.xlu0 %2631 }
 0x1c8   : > { %12403 = vst [vmem:[#allocation111_spill] sm:$0xff] %v8139_v15  ;;  %12404 = vst [vmem:[#allocation112_spill] sm:$0xff] %v8143_v21  ;;  %v1169_v1 = vrot.slane %v1155_v55, %v7493_v14  ;;  %v1449_v55 = vcombine.high %v7994_v52, %v12399_v61 }
 0x1c9   : > { %2877 = vrot.lane.b32.xlu1 %v1564_v3, %s7065_s10  ;;  %2875 = vrot.lane.b32.xlu0 %v1466_v48, %s7065_s10  ;;  %v1858_v48 = vcombine.high %v1848_v51, %v12399_v61  ;;  %v2348_v51 = vcombine.high %v2338_v62, %v12399_v61  ;;  %v2446_v62 = vcombine.high %v2436_v17, %v12399_v61 }
 0x1ca   : > { %v1547_v17 = vcombine.high %v7983_v0, %v12399_v61  ;;  %v1463_v52 = vrot.slane %v1449_v55, %v7493_v14  ;;  %v2135_v55 = vcombine.high %v8056_v31, %v12399_v61 }
 0x1cb   : > { %v8149_v56 = vpop.permute.xlu1 %2637  ;;  %v8153_v47 = vpop.permute.xlu0 %2635 }
 0x1cc   : > { %12405 = vst [vmem:[#allocation113_spill] sm:$0xff] %v8149_v56  ;;  %12406 = vst [vmem:[#allocation114_spill] sm:$0xff] %v8153_v47  ;;  %v1561_v0 = vrot.slane %v1547_v17, %v7493_v14  ;;  %v1841_v17 = vcombine.high %v8044_v44, %v12399_v61  ;;  %v2149_v31 = vrot.slane %v2135_v55, %v7493_v14 }
 0x1cd   : > { %2881 = vrot.lane.b32.xlu1 %v1760_v45, %s7065_s10  ;;  %2879 = vrot.lane.b32.xlu0 %v1662_v43, %s7065_s10  ;;  %v2054_v45 = vcombine.high %v2044_v49, %v12399_v61  ;;  %v2429_v55 = vcombine.high %v8103_v23, %v12399_v61 }
 0x1ce   : > { %v1855_v44 = vrot.slane %v1841_v17, %v7493_v14  ;;  %v2527_v17 = vcombine.high %v8096_v63, %v12399_v61 }
 0x1cf   : > { %v8158_v7 = vpop.permute.xlu1 %2641  ;;  %v8161_v3 = vpop.permute.xlu0 %2639 }
 0x1d0   : > { %12407 = vst [vmem:[#allocation115_spill] sm:$0xff] %v8158_v7  ;;  %12408 = vst [vmem:[#allocation116_spill] sm:$0xff] %v8161_v3 }
 0x1d1   : > { %2885 = vrot.lane.b32.xlu1 %v1956_v41, %s7065_s10  ;;  %2883 = vrot.lane.b32.xlu0 %v1858_v48, %s7065_s10  ;;  %v2250_v41 = vcombine.high %v2240_v36, %v12399_v61  ;;  %v2544_v48 = vcombine.high %v2534_v42, %v12399_v61  ;;  %v1351_v36 = vcombine.high %v7957_v37, %v12399_v61 }
 0x1d2   : > { %v1253_v42 = vcombine.high %v7968_v27, %v12399_v61 }
 0x1d3   : > { %v8166_v39 = vpop.permute.xlu1 %2677  ;;  %v8169_v47 = vpop.permute.xlu0 %2675 }
 0x1d4   : > { %12409 = vst [vmem:[#allocation117_spill] sm:$0xff] %v8166_v39  ;;  %12410 = vst [vmem:[#allocation118_spill] sm:$0xff] %v8169_v47  ;;  %v12473_v47 = vld [vmem:[#allocation25_spill] sm:$0xff] }
 0x1d5   : > { %2889 = vrot.lane.b32.xlu1 %v2152_v6, %s7065_s10  ;;  %2887 = vrot.lane.b32.xlu0 %v2054_v45, %s7065_s10  ;;  %v1057_v6 = vcombine.high %v7943_v13, %v12399_v61  ;;  %v12474_v39 = vld [vmem:[#allocation17_spill] sm:$0xff] }
 0x1d6   : > { %v8563_v3 = vsel %vm610_vm0, %v12474_v39, %v12473_v47 }
 0x1d7   : > { %v8174_v32 = vpop.permute.xlu1 %2681  ;;  %v8177_v43 = vpop.permute.xlu0 %2679  ;;  %v1071_v13 = vrot.slane %v1057_v6, %v7493_v14  ;;  %v1743_v6 = vcombine.high %v8009_v16, %v12399_v61  ;;  %v8579_v47 = vrot.slane %v8563_v3, %v7471_v57 }
 0x1d8   : > { %12411 = vst [vmem:[#allocation119_spill] sm:$0xff] %v8174_v32  ;;  %12412 = vst [vmem:[#allocation120_spill] sm:$0xff] %v8177_v43 }
 0x1d9   : > { %2893 = vrot.lane.b32.xlu1 %v2348_v51, %s7065_s10  ;;  %2891 = vrot.lane.b32.xlu0 %v2250_v41, %s7065_s10  ;;  %v1757_v16 = vrot.slane %v1743_v6, %v7493_v14  ;;  %v2037_v6 = vcombine.high %v8065_v25, %v12399_v61 }
 0x1db   : > { %v8184_v49 = vpop.permute.xlu1 %2685  ;;  %v8189_v45 = vpop.permute.xlu0 %2683  ;;  %v2051_v25 = vrot.slane %v2037_v6, %v7493_v14 }
 0x1dc   : > { %12413 = vst [vmem:[#allocation121_spill] sm:$0xff] %v8184_v49  ;;  %12414 = vst [vmem:[#allocation122_spill] sm:$0xff] %v8189_v45  ;;  %v12469_v45 = vld [vmem:[#allocation15_spill] sm:$0xff] }
 0x1dd   : > { %2897 = vrot.lane.b32.xlu1 %v2544_v48, %s7065_s10  ;;  %2895 = vrot.lane.b32.xlu0 %v2446_v62, %s7065_s10  ;;  %v1365_v48 = vrot.slane %v1351_v36, %v7493_v14  ;;  %v1267_v62 = vrot.slane %v1253_v42, %v7493_v14  ;;  %v1645_v36 = vcombine.high %v8020_v58, %v12399_v61 }
 0x1de   : > { %v1939_v42 = vcombine.high %v8035_v4, %v12399_v61 }
 0x1df   : > { %v8196_v51 = vpop.permute.xlu1 %2689  ;;  %v8201_v41 = vpop.permute.xlu0 %2687  ;;  %v1659_v58 = vrot.slane %v1645_v36, %v7493_v14  ;;  %v2331_v36 = vcombine.high %v8076_v35, %v12399_v61 }
 0x1e0   : > { %12415 = vst [vmem:[#allocation123_spill] sm:$0xff] %v8196_v51  ;;  %12416 = vst [vmem:[#allocation124_spill] sm:$0xff] %v8201_v41  ;;  %v1953_v4 = vrot.slane %v1939_v42, %v7493_v14  ;;  %v2233_v42 = vcombine.high %v8085_v22, %v12399_v61  ;;  %v12468_v51 = vld [vmem:[#allocation23_spill] sm:$0xff] }
 0x1e1   : > { %2933 = vrot.lane.b32.xlu1 %v1169_v1, %s7066_s11  ;;  %2931 = vrot.lane.b32.xlu0 %v1071_v13, %s7066_s11  ;;  %v2345_v35 = vrot.slane %v2331_v36, %v7493_v14  ;;  %v1173_v36 = vcombine.high %v1169_v1, %v12399_v61  ;;  %v8535_v49 = vsel %vm610_vm0, %v12469_v45, %v12468_v51  ;;  %v12471_v51 = vld [vmem:[#allocation18_spill] sm:$0xff] }
 0x1e2   : > { %v2247_v22 = vrot.slane %v2233_v42, %v7493_v14  ;;  %v8551_v45 = vrot.slane %v8535_v49, %v7471_v57 }
 0x1e3   : > { %v8208_v37 = vpop.permute.xlu1 %2693  ;;  %v8213_v27 = vpop.permute.xlu0 %2691 }
 0x1e4   : > { %12417 = vst [vmem:[#allocation125_spill] sm:$0xff] %v8208_v37  ;;  %12418 = vst [vmem:[#allocation126_spill] sm:$0xff] %v8213_v27 }
 0x1e5   : > { %2937 = vrot.lane.b32.xlu1 %v1365_v48, %s7066_s11  ;;  %2935 = vrot.lane.b32.xlu0 %v1267_v62, %s7066_s11 }
 0x1e7   : > { %v8220_v41 = vpop.permute.xlu1 %2697  ;;  %v8225_v37 = vpop.permute.xlu0 %2695 }
 0x1e8   : > { %12419 = vst [vmem:[#allocation127_spill] sm:$0xff] %v8220_v41  ;;  %12420 = vst [vmem:[#allocation128_spill] sm:$0xff] %v8225_v37 }
 0x1e9   : > { %2941 = vrot.lane.b32.xlu1 %v1561_v0, %s7066_s11  ;;  %2939 = vrot.lane.b32.xlu0 %v1463_v52, %s7066_s11 }
 0x1eb   : > { %v8232_v27 = vpop.permute.xlu1 %2701  ;;  %v8237_v41 = vpop.permute.xlu0 %2699 }
 0x1ec   : > { %12421 = vst [vmem:[#allocation129_spill] sm:$0xff] %v8232_v27  ;;  %12422 = vst [vmem:[#allocation130_spill] sm:$0xff] %v8237_v41 }
 0x1ed   : > { %2945 = vrot.lane.b32.xlu1 %v1757_v16, %s7066_s11  ;;  %2943 = vrot.lane.b32.xlu0 %v1659_v58, %s7066_s11 }
 0x1ef   : > { %v8244_v37 = vpop.permute.xlu1 %2705  ;;  %v8249_v27 = vpop.permute.xlu0 %2703 }
 0x1f0   : > { %12423 = vst [vmem:[#allocation131_spill] sm:$0xff] %v8244_v37  ;;  %12424 = vst [vmem:[#allocation132_spill] sm:$0xff] %v8249_v27 }
 0x1f1   : > { %2949 = vrot.lane.b32.xlu1 %v1953_v4, %s7066_s11  ;;  %2947 = vrot.lane.b32.xlu0 %v1855_v44, %s7066_s11 }
 0x1f3   : > { %v8256_v41 = vpop.permute.xlu1 %2741  ;;  %v8261_v37 = vpop.permute.xlu0 %2739 }
 0x1f4   : > { %12425 = vst [vmem:[#allocation133_spill] sm:$0xff] %v8256_v41  ;;  %12426 = vst [vmem:[#allocation134_spill] sm:$0xff] %v8261_v37  ;;  %v2541_v37 = vrot.slane %v2527_v17, %v7493_v14 }
 0x1f5   : > { %2953 = vrot.lane.b32.xlu1 %v2149_v31, %s7066_s11  ;;  %2951 = vrot.lane.b32.xlu0 %v2051_v25, %s7066_s11 }
 0x1f7   : > { %v8268_v27 = vpop.permute.xlu1 %2745  ;;  %v8273_v41 = vpop.permute.xlu0 %2743 }
 0x1f8   : > { %12427 = vst [vmem:[#allocation135_spill] sm:$0xff] %v8268_v27  ;;  %12428 = vst [vmem:[#allocation136_spill] sm:$0xff] %v8273_v41  ;;  %v2443_v27 = vrot.slane %v2429_v55, %v7493_v14  ;;  %v1075_v41 = vcombine.high %v1071_v13, %v12399_v61  ;;  %v1369_v55 = vcombine.high %v1365_v48, %v12399_v61 }
 0x1f9   : > { %2957 = vrot.lane.b32.xlu1 %v2345_v35, %s7066_s11  ;;  %2955 = vrot.lane.b32.xlu0 %v2247_v22, %s7066_s11  ;;  %v1565_v13 = vcombine.high %v1561_v0, %v12399_v61 }
 0x1fb   : > { %v8278_v6 = vpop.permute.xlu1 %2749  ;;  %v8281_v63 = vpop.permute.xlu0 %2747 }
 0x1fc   : > { %12429 = vst [vmem:[#allocation137_spill] sm:$0xff] %v8278_v6  ;;  %12430 = vst [vmem:[#allocation138_spill] sm:$0xff] %v8281_v63  ;;  %v1271_v6 = vcombine.high %v1267_v62, %v12399_v61  ;;  %v1761_v62 = vcombine.high %v1757_v16, %v12399_v61 }
 0x1fd   : > { %2961 = vrot.lane.b32.xlu1 %v2541_v37, %s7066_s11  ;;  %2959 = vrot.lane.b32.xlu0 %v2443_v27, %s7066_s11 }
 0x1ff   : > { %v8286_v23 = vpop.permute.xlu1 %2753  ;;  %v8289_v42 = vpop.permute.xlu0 %2751 }
 0x200   : > { %12431 = vst [vmem:[#allocation139_spill] sm:$0xff] %v8286_v23  ;;  %12432 = vst [vmem:[#allocation140_spill] sm:$0xff] %v8289_v42 }
 0x201   : > { %2997 = vrot.lane.b32.xlu1 %v1173_v36, %s7067_s12  ;;  %2995 = vrot.lane.b32.xlu0 %v1075_v41, %s7067_s12  ;;  %v1467_v41 = vcombine.high %v1463_v52, %v12399_v61  ;;  %v1957_v52 = vcombine.high %v1953_v4, %v12399_v61 }
 0x203   : > { %v8294_v17 = vpop.permute.xlu1 %2757  ;;  %v8297_v63 = vpop.permute.xlu0 %2755 }
 0x204   : > { %12433 = vst [vmem:[#allocation141_spill] sm:$0xff] %v8294_v17  ;;  %12434 = vst [vmem:[#allocation142_spill] sm:$0xff] %v8297_v63 }
 0x205   : > { %3001 = vrot.lane.b32.xlu1 %v1369_v55, %s7067_s12  ;;  %2999 = vrot.lane.b32.xlu0 %v1271_v6, %s7067_s12  ;;  %v1663_v6 = vcombine.high %v1659_v58, %v12399_v61  ;;  %v2153_v58 = vcombine.high %v2149_v31, %v12399_v61  ;;  %v2251_v31 = vcombine.high %v2247_v22, %v12399_v61 }
 0x206   : > { %v2447_v22 = vcombine.high %v2443_v27, %v12399_v61 }
 0x207   : > { %v8302_v1 = vpop.permute.xlu1 %2761  ;;  %v8305_v42 = vpop.permute.xlu0 %2759 }
 0x208   : > { %12435 = vst [vmem:[#allocation143_spill] sm:$0xff] %v8302_v1  ;;  %12436 = vst [vmem:[#allocation144_spill] sm:$0xff] %v8305_v42  ;;  %v12463_v42 = vld [vmem:[#allocation13_spill] sm:$0xff] }
 0x209   : > { %3005 = vrot.lane.b32.xlu1 %v1565_v13, %s7067_s12  ;;  %3003 = vrot.lane.b32.xlu0 %v1467_v41, %s7067_s12  ;;  %v1859_v13 = vcombine.high %v1855_v44, %v12399_v61  ;;  %v2349_v44 = vcombine.high %v2345_v35, %v12399_v61 }
 0x20b   : > { %v8310_v48 = vpop.permute.xlu1 %2765  ;;  %v8313_v36 = vpop.permute.xlu0 %2763 }
 0x20c   : > { %12437 = vst [vmem:[#allocation145_spill] sm:$0xff] %v8310_v48  ;;  %12438 = vst [vmem:[#allocation146_spill] sm:$0xff] %v8313_v36  ;;  %v12462_v48 = vld [vmem:[#allocation21_spill] sm:$0xff] }
 0x20d   : > { %3009 = vrot.lane.b32.xlu1 %v1761_v62, %s7067_s12  ;;  %3007 = vrot.lane.b32.xlu0 %v1663_v6, %s7067_s12  ;;  %v2055_v62 = vcombine.high %v2051_v25, %v12399_v61  ;;  %v8340_v6 = vsel %vm610_vm0, %v7297_v20, %v7387_v38  ;;  %v8348_v25 = vsel %vm610_vm0, %v7299_v24, %v7380_v19 }
 0x20e   : > { %v8354_v35 = vrot.slane %v8340_v6, %v7471_v57  ;;  %v2545_v20 = vcombine.high %v2541_v37, %v12399_v61  ;;  %v8361_v38 = vrot.slane %v8348_v25, %v7471_v57  ;;  %v8366_v24 = vsel %vm610_vm0, %v7311_v34, %v7398_v12 }
 0x20f   : > { %v8318_v0 = vpop.permute.xlu1 %2769  ;;  %v8321_v55 = vpop.permute.xlu0 %2767  ;;  %v8384_v34 = vrot.slane %v8366_v24, %v7471_v57  ;;  %v8506_v1 = vsel %vm610_vm0, %v12463_v42, %v12462_v48  ;;  %v12465_v48 = vld [vmem:[#allocation24_spill] sm:$0xff] }
 0x210   : > { %12439 = vst [vmem:[#allocation147_spill] sm:$0xff] %v8318_v0  ;;  %12440 = vst [vmem:[#allocation148_spill] sm:$0xff] %v8321_v55  ;;  %v8380_v37 = vrot.slane %v8354_v35, %v7493_v14  ;;  %v8390_v27 = vrot.slane %v8361_v38, %v7493_v14  ;;  %v12460_v55 = vld [vmem:[#allocation14_spill] sm:$0xff]  ;;  %v8523_v42 = vrot.slane %v8506_v1, %v7471_v57 }
 0x211   : > { %3013 = vrot.lane.b32.xlu1 %v1957_v52, %s7067_s12  ;;  %3011 = vrot.lane.b32.xlu0 %v1859_v13, %s7067_s12 }
 0x212   : > { %v1121_v11 = vcombine.high %v8390_v27, %v12399_v61 }
 0x213   : > { %v8326_v16 = vpop.permute.xlu1 %2805  ;;  %v8329_v41 = vpop.permute.xlu0 %2803 }
 0x214   : > { %12441 = vst [vmem:[#allocation149_spill] sm:$0xff] %v8326_v16  ;;  %12442 = vst [vmem:[#allocation150_spill] sm:$0xff] %v8329_v41  ;;  %v12457_v41 = vld [vmem:[#allocation11_spill] sm:$0xff] }
 0x215   : > { %3017 = vrot.lane.b32.xlu1 %v2153_v58, %s7067_s12  ;;  %3015 = vrot.lane.b32.xlu0 %v2055_v62, %s7067_s12  ;;  %v8374_v58 = vsel %vm610_vm0, %v7306_v30, %v7393_v53  ;;  %v8399_v53 = vsel %vm610_vm0, %v7321_v28, %v7408_v5 }
 0x216   : > { %v8394_v30 = vrot.slane %v8374_v58, %v7471_v57  ;;  %v8418_v28 = vrot.slane %v8399_v53, %v7471_v57 }
 0x217   : > { %v8334_v4 = vpop.permute.xlu1 %2809  ;;  %v8342_v52 = vpop.permute.xlu0 %2807 }
 0x218   : > { %12443 = vst [vmem:[#allocation151_spill] sm:$0xff] %v8334_v4  ;;  %12444 = vst [vmem:[#allocation152_spill] sm:$0xff] %v8342_v52  ;;  %v12456_v4 = vld [vmem:[#allocation19_spill] sm:$0xff] }
 0x219   : > { %3021 = vrot.lane.b32.xlu1 %v2349_v44, %s7067_s12  ;;  %3019 = vrot.lane.b32.xlu0 %v2251_v31, %s7067_s12  ;;  %v8406_v44 = vsel %vm610_vm0, %v7316_v40, %v7403_v60  ;;  %v8414_v31 = vrot.slane %v8384_v34, %v7493_v14  ;;  %v8424_v40 = vrot.slane %v8394_v30, %v7493_v14 }
 0x21a   : > { %v8428_v60 = vrot.slane %v8406_v44, %v7471_v57  ;;  %v8474_v16 = vsel %vm610_vm0, %v12457_v41, %v12456_v4 }
 0x21b   : > { %v8356_v13 = vpop.permute.xlu1 %2813  ;;  %v8368_v19 = vpop.permute.xlu0 %2811  ;;  %v8494_v4 = vrot.slane %v8474_v16, %v7471_v57 }
 0x21c   : > { %12445 = vst [vmem:[#allocation153_spill] sm:$0xff] %v8356_v13  ;;  %12446 = vst [vmem:[#allocation154_spill] sm:$0xff] %v8368_v19  ;;  %v12454_v19 = vld [vmem:[#allocation12_spill] sm:$0xff] }
 0x21d   : > { %3025 = vrot.lane.b32.xlu1 %v2545_v20, %s7067_s12  ;;  %3023 = vrot.lane.b32.xlu0 %v2447_v22, %s7067_s12  ;;  %v8433_v20 = vsel %vm610_vm0, %v7331_v50, %v7418_v59 }
 0x21e   : > { %v8452_v50 = vrot.slane %v8433_v20, %v7471_v57 }
 0x21f   : > { %v8386_v12 = vpop.permute.xlu1 %2817  ;;  %v8401_v62 = vpop.permute.xlu0 %2815 }
 0x220   : > { %12447 = vst [vmem:[#allocation155_spill] sm:$0xff] %v8386_v12  ;;  %12448 = vst [vmem:[#allocation156_spill] sm:$0xff] %v8401_v62  ;;  %v12451_v62 = vld [vmem:[#allocation10_spill] sm:$0xff] }
 0x221   : > { %3061 = vrot.lane.b32.xlu1 %v8380_v37, %s7068_s13  ;;  %3059 = vrot.lane.b32.xlu0 %v8390_v27, %s7068_s13  ;;  %v8440_v12 = vsel %vm610_vm0, %v12451_v62, %v7413_v29  ;;  %v8458_v29 = vrot.slane %v8428_v60, %v7493_v14 }
 0x222   : > { %v8462_v62 = vrot.slane %v8440_v12, %v7471_v57 }
 0x223   : > { %v8420_v5 = vpop.permute.xlu1 %2821  ;;  %v8435_v22 = vpop.permute.xlu0 %2819 }
 0x224   : > { %12449 = vst [vmem:[#allocation157_spill] sm:$0xff] %v8420_v5  ;;  %12450 = vst [vmem:[#allocation158_spill] sm:$0xff] %v8435_v22  ;;  %v8448_v5 = vrot.slane %v8418_v28, %v7493_v14  ;;  %v12453_v22 = vld [vmem:[#allocation20_spill] sm:$0xff]  ;;  %v1686_v41 = vrot.slane %v8462_v62, %v7493_v14 }
 0x225   : > { %3065 = vrot.lane.b32.xlu1 %v8414_v31, %s7068_s13  ;;  %3063 = vrot.lane.b32.xlu0 %v8424_v40, %s7068_s13  ;;  %v8467_v13 = vsel %vm610_vm0, %v12454_v19, %v12453_v22 }
 0x226   : > { %v8486_v19 = vrot.slane %v8467_v13, %v7471_v57  ;;  %v1611_v27 = vcombine.high %v8448_v5, %v12399_v61 }
 0x227   : > { %v8454_v59 = vpop.permute.xlu1 %2825  ;;  %v8469_v52 = vpop.permute.xlu0 %2823 }
 0x228   : > { %12452 = vst [vmem:[#allocation10_spill] sm:$0xff] %v8454_v59  ;;  %12455 = vst [vmem:[#allocation20_spill] sm:$0xff] %v8469_v52  ;;  %v8482_v59 = vrot.slane %v8452_v50, %v7493_v14  ;;  %v12459_v52 = vld [vmem:[#allocation22_spill] sm:$0xff] }
 0x229   : > { %3069 = vrot.lane.b32.xlu1 %v8448_v5, %s7068_s13  ;;  %3067 = vrot.lane.b32.xlu0 %v8458_v29, %s7068_s13  ;;  %v8499_v0 = vsel %vm610_vm0, %v12460_v55, %v12459_v52  ;;  %v1882_v52 = vrot.slane %v8494_v4, %v7493_v14 }
 0x22a   : > { %v8515_v63 = vrot.slane %v8499_v0, %v7471_v57 }
 0x22b   : > { %v8488_v22 = vpop.permute.xlu1 %2829  ;;  %v8501_v36 = vpop.permute.xlu0 %2827 }
 0x22c   : > { %12458 = vst [vmem:[#allocation12_spill] sm:$0xff] %v8488_v22  ;;  %12461 = vst [vmem:[#allocation19_spill] sm:$0xff] %v8501_v36  ;;  %v1980_v22 = vrot.slane %v8486_v19, %v7493_v14  ;;  %v12466_v36 = vld [vmem:[#allocation16_spill] sm:$0xff] }
 0x22d   : > { %3073 = vrot.lane.b32.xlu1 %v8482_v59, %s7068_s13  ;;  %3071 = vrot.lane.b32.xlu0 %v1686_v41, %s7068_s13  ;;  %v8528_v17 = vsel %vm610_vm0, %v12466_v36, %v12465_v48  ;;  %v2078_v48 = vrot.slane %v8523_v42, %v7493_v14 }
 0x22e   : > { %v8543_v43 = vrot.slane %v8528_v17, %v7471_v57  ;;  %v2003_v5 = vcombine.high %v1980_v22, %v12399_v61 }
 0x22f   : > { %v8517_v55 = vpop.permute.xlu1 %2833  ;;  %v8530_v23 = vpop.permute.xlu0 %2831 }
 0x230   : > { %12464 = vst [vmem:[#allocation11_spill] sm:$0xff] %v8517_v55  ;;  %12467 = vst [vmem:[#allocation22_spill] sm:$0xff] %v8530_v23  ;;  %v2176_v55 = vrot.slane %v8515_v63, %v7493_v14  ;;  %v8556_v23 = vsel %vm610_vm0, %v12471_v51, %v7461_v33  ;;  %v2274_v51 = vrot.slane %v8551_v45, %v7493_v14 }
 0x231   : > { %3077 = vrot.lane.b32.xlu1 %v1980_v22, %s7068_s13  ;;  %3075 = vrot.lane.b32.xlu0 %v1882_v52, %s7068_s13  ;;  %v8571_v7 = vrot.slane %v8556_v23, %v7471_v57 }
 0x233   : > { %v8545_v36 = vpop.permute.xlu1 %2869  ;;  %v8558_v32 = vpop.permute.xlu0 %2867 }
 0x234   : > { %12470 = vst [vmem:[#allocation14_spill] sm:$0xff] %v8545_v36  ;;  %12472 = vst [vmem:[#allocation21_spill] sm:$0xff] %v8558_v32  ;;  %v2372_v36 = vrot.slane %v8543_v43, %v7493_v14  ;;  %v2568_v32 = vrot.slane %v8571_v7, %v7493_v14 }
 0x235   : > { %3081 = vrot.lane.b32.xlu1 %v2176_v55, %s7068_s13  ;;  %3079 = vrot.lane.b32.xlu0 %v2078_v48, %s7068_s13 }
 0x236   : > { %v2395_v22 = vcombine.high %v2372_v36, %v12399_v61 }
 0x237   : > { %v8573_v33 = vpop.permute.xlu1 %2873  ;;  %v8581_v39 = vpop.permute.xlu0 %2871 }
 0x238   : > { %12475 = vst [vmem:[#allocation13_spill] sm:$0xff] %v8573_v33  ;;  %12476 = vst [vmem:[#allocation24_spill] sm:$0xff] %v8581_v39  ;;  %v2470_v33 = vrot.slane %v8579_v47, %v7493_v14  ;;  %v1219_v39 = vcombine.high %v8380_v37, %v12399_v61  ;;  %v1317_v37 = vcombine.high %v8424_v40, %v12399_v61 }
 0x239   : > { %3085 = vrot.lane.b32.xlu1 %v2372_v36, %s7068_s13  ;;  %3083 = vrot.lane.b32.xlu0 %v2274_v51, %s7068_s13  ;;  %v1807_v40 = vcombine.high %v8482_v59, %v12399_v61  ;;  %v2199_v59 = vcombine.high %v2176_v55, %v12399_v61  ;;  %v1189_v55 = vcombine.high %v8354_v35, %v12399_v61 }
 0x23a   : > { %v1091_v36 = vcombine.high %v8361_v38, %v12399_v61  ;;  %v1385_v35 = vcombine.high %v8384_v34, %v12399_v61  ;;  %v1287_v38 = vcombine.high %v8394_v30, %v12399_v61  ;;  %v1581_v34 = vcombine.high %v8418_v28, %v12399_v61 }
 0x23b   : > { %v8587_v56 = vpop.permute.xlu1 %2877  ;;  %v8591_v21 = vpop.permute.xlu0 %2875  ;;  %v1483_v30 = vcombine.high %v8428_v60, %v12399_v61 }
 0x23c   : > { %12477 = vst [vmem:[#allocation16_spill] sm:$0xff] %v8587_v56  ;;  %12478 = vst [vmem:[#allocation23_spill] sm:$0xff] %v8591_v21  ;;  %v1415_v21 = vcombine.high %v8414_v31, %v12399_v61 }
 0x23d   : > { %3089 = vrot.lane.b32.xlu1 %v2568_v32, %s7068_s13  ;;  %3087 = vrot.lane.b32.xlu0 %v2470_v33, %s7068_s13  ;;  %v1497_v28 = vrot.slane %v1483_v30, %v7493_v14  ;;  %v1875_v30 = vcombine.high %v8494_v4, %v12399_v61 }
 0x23f   : > { %v8597_v15 = vpop.permute.xlu1 %2881  ;;  %v8601_v10 = vpop.permute.xlu0 %2879 }
 0x240   : > { %12479 = vst [vmem:[#allocation15_spill] sm:$0xff] %v8597_v15  ;;  %12480 = vst [vmem:[#allocation18_spill] sm:$0xff] %v8601_v10 }
 0x241   : > { %3125 = vrot.lane.b32.xlu1 %v1219_v39, %s7069_s14  ;;  %3123 = vrot.lane.b32.xlu0 %v1121_v11, %s7069_s14  ;;  %v1513_v11 = vcombine.high %v8458_v29, %v12399_v61 }
 0x243   : > { %v8607_v56 = vpop.permute.xlu1 %2885  ;;  %v8611_v2 = vpop.permute.xlu0 %2883 }
 0x244   : > { %12481 = vst [vmem:[#allocation25_spill] sm:$0xff] %v8607_v56  ;;  %12482 = vst [vmem:[#allocation17_spill] sm:$0xff] %v8611_v2 }
 0x245   : > { %3129 = vrot.lane.b32.xlu1 %v1415_v21, %s7069_s14  ;;  %3127 = vrot.lane.b32.xlu0 %v1317_v37, %s7069_s14  ;;  %v1709_v37 = vcombine.high %v1686_v41, %v12399_v61 }
 0x247   : > { %v8617_v39 = vpop.permute.xlu1 %2889  ;;  %v8621_v31 = vpop.permute.xlu0 %2887 }
 0x248   : > { %12483 = vst [vmem:[#allocation159_spill] sm:$0xff] %v8617_v39  ;;  %12484 = vst [vmem:[#allocation160_spill] sm:$0xff] %v8621_v31 }
 0x249   : > { %3133 = vrot.lane.b32.xlu1 %v1611_v27, %s7069_s14  ;;  %3131 = vrot.lane.b32.xlu0 %v1513_v11, %s7069_s14  ;;  %v1905_v27 = vcombine.high %v1882_v52, %v12399_v61 }
 0x24b   : > { %v8627_v21 = vpop.permute.xlu1 %2893  ;;  %v8630_v2 = vpop.permute.xlu0 %2891 }
 0x24c   : > { %12485 = vst [vmem:[#allocation161_spill] sm:$0xff] %v8627_v21  ;;  %12486 = vst [vmem:[#allocation162_spill] sm:$0xff] %v8630_v2 }
 0x24d   : > { %3137 = vrot.lane.b32.xlu1 %v1807_v40, %s7069_s14  ;;  %3135 = vrot.lane.b32.xlu0 %v1709_v37, %s7069_s14  ;;  %v2101_v40 = vcombine.high %v2078_v48, %v12399_v61  ;;  %v2297_v37 = vcombine.high %v2274_v51, %v12399_v61  ;;  %v2591_v48 = vcombine.high %v2568_v32, %v12399_v61 }
 0x24e   : > { %v8671_v51 = vrot.slane %v1189_v55, %v7493_v14 }
 0x24f   : > { %v8635_v29 = vpop.permute.xlu1 %2897  ;;  %v8638_v11 = vpop.permute.xlu0 %2895 }
 0x250   : > { %12487 = vst [vmem:[#allocation163_spill] sm:$0xff] %v8635_v29  ;;  %12488 = vst [vmem:[#allocation164_spill] sm:$0xff] %v8638_v11 }
 0x251   : > { %3141 = vrot.lane.b32.xlu1 %v2003_v5, %s7069_s14  ;;  %3139 = vrot.lane.b32.xlu0 %v1905_v27, %s7069_s14 }
 0x253   : > { %v8643_v41 = vpop.permute.xlu1 %2933  ;;  %v8646_v2 = vpop.permute.xlu0 %2931 }
 0x254   : > { %12489 = vst [vmem:[#allocation165_spill] sm:$0xff] %v8643_v41  ;;  %12490 = vst [vmem:[#allocation166_spill] sm:$0xff] %v8646_v2 }
 0x255   : > { %3145 = vrot.lane.b32.xlu1 %v2199_v59, %s7069_s14  ;;  %3143 = vrot.lane.b32.xlu0 %v2101_v40, %s7069_s14  ;;  %v2493_v59 = vcombine.high %v2470_v33, %v12399_v61 }
 0x257   : > { %v8651_v52 = vpop.permute.xlu1 %2937  ;;  %v8654_v5 = vpop.permute.xlu0 %2935 }
 0x258   : > { %12491 = vst [vmem:[#allocation167_spill] sm:$0xff] %v8651_v52  ;;  %12492 = vst [vmem:[#allocation168_spill] sm:$0xff] %v8654_v5 }
 0x259   : > { %3149 = vrot.lane.b32.xlu1 %v2395_v22, %s7069_s14  ;;  %3147 = vrot.lane.b32.xlu0 %v2297_v37, %s7069_s14  ;;  %v8678_v22 = vrot.slane %v1091_v36, %v7493_v14  ;;  %v1399_v37 = vrot.slane %v1385_v35, %v7493_v14  ;;  %v1777_v35 = vcombine.high %v8452_v50, %v12399_v61 }
 0x25b   : > { %v8661_v27 = vpop.permute.xlu1 %2941  ;;  %v8666_v40 = vpop.permute.xlu0 %2939  ;;  %v1791_v60 = vrot.slane %v1777_v35, %v7493_v14  ;;  %v2169_v35 = vcombine.high %v8515_v63, %v12399_v61 }
 0x25c   : > { %12493 = vst [vmem:[#allocation169_spill] sm:$0xff] %v8661_v27  ;;  %12494 = vst [vmem:[#allocation170_spill] sm:$0xff] %v8666_v40  ;;  %v12634_v40 = vld [vmem:[#allocation98_spill] sm:$0xff] }
 0x25d   : > { %3153 = vrot.lane.b32.xlu1 %v2591_v48, %s7069_s14  ;;  %3151 = vrot.lane.b32.xlu0 %v2493_v59, %s7069_s14  ;;  %v1301_v48 = vrot.slane %v1287_v38, %v7493_v14  ;;  %v1595_v59 = vrot.slane %v1581_v34, %v7493_v14  ;;  %v1679_v38 = vcombine.high %v8462_v62, %v12399_v61 }
 0x25e   : > { %v1973_v34 = vcombine.high %v8486_v19, %v12399_v61  ;;  %v1889_v19 = vrot.slane %v1875_v30, %v7493_v14  ;;  %v2183_v4 = vrot.slane %v2169_v35, %v7493_v14  ;;  %v2267_v30 = vcombine.high %v8551_v45, %v12399_v61 }
 0x25f   : > { %v8675_v32 = vpop.permute.xlu1 %2945  ;;  %v8682_v33 = vpop.permute.xlu0 %2943  ;;  %v1693_v50 = vrot.slane %v1679_v38, %v7493_v14  ;;  %v2071_v38 = vcombine.high %v8523_v42, %v12399_v61  ;;  %v2561_v35 = vcombine.high %v8571_v7, %v12399_v61 }
 0x260   : > { %12495 = vst [vmem:[#allocation171_spill] sm:$0xff] %v8675_v32  ;;  %12496 = vst [vmem:[#allocation172_spill] sm:$0xff] %v8682_v33  ;;  %v1987_v62 = vrot.slane %v1973_v34, %v7493_v14  ;;  %v2365_v34 = vcombine.high %v8543_v43, %v12399_v61  ;;  %v2281_v43 = vrot.slane %v2267_v30, %v7493_v14 }
 0x261   : > { %3189 = vrot.lane.b32.xlu1 %v8671_v51, %s7070_s15  ;;  %3187 = vrot.lane.b32.xlu0 %v8678_v22, %s7070_s15  ;;  %v2085_v63 = vrot.slane %v2071_v38, %v7493_v14  ;;  %v2463_v38 = vcombine.high %v8579_v47, %v12399_v61  ;;  %v2575_v45 = vrot.slane %v2561_v35, %v7493_v14 }
 0x262   : > { %v2379_v42 = vrot.slane %v2365_v34, %v7493_v14  ;;  %v1220_v47 = vcombine.high %v8671_v51, %v12399_v61  ;;  %v1122_v35 = vcombine.high %v8678_v22, %v12399_v61  ;;  %v1612_v22 = vcombine.high %v1595_v59, %v12399_v61 }
 0x263   : > { %v8691_v55 = vpop.permute.xlu1 %2949  ;;  %v8696_v36 = vpop.permute.xlu0 %2947  ;;  %v2477_v34 = vrot.slane %v2463_v38, %v7493_v14 }
 0x264   : > { %12497 = vst [vmem:[#allocation173_spill] sm:$0xff] %v8691_v55  ;;  %12498 = vst [vmem:[#allocation174_spill] sm:$0xff] %v8696_v36 }
 0x265   : > { %3193 = vrot.lane.b32.xlu1 %v1399_v37, %s7070_s15  ;;  %3191 = vrot.lane.b32.xlu0 %v1301_v48, %s7070_s15 }
 0x267   : > { %v8703_v33 = vpop.permute.xlu1 %2953  ;;  %v8708_v55 = vpop.permute.xlu0 %2951 }
 0x268   : > { %12499 = vst [vmem:[#allocation175_spill] sm:$0xff] %v8703_v33  ;;  %12500 = vst [vmem:[#allocation176_spill] sm:$0xff] %v8708_v55 }
 0x269   : > { %3197 = vrot.lane.b32.xlu1 %v1595_v59, %s7070_s15  ;;  %3195 = vrot.lane.b32.xlu0 %v1497_v28, %s7070_s15 }
 0x26b   : > { %v8715_v36 = vpop.permute.xlu1 %2957  ;;  %v8720_v33 = vpop.permute.xlu0 %2955 }
 0x26c   : > { %12501 = vst [vmem:[#allocation177_spill] sm:$0xff] %v8715_v36  ;;  %12502 = vst [vmem:[#allocation178_spill] sm:$0xff] %v8720_v33 }
 0x26d   : > { %3201 = vrot.lane.b32.xlu1 %v1791_v60, %s7070_s15  ;;  %3199 = vrot.lane.b32.xlu0 %v1693_v50, %s7070_s15 }
 0x26f   : > { %v8727_v55 = vpop.permute.xlu1 %2961  ;;  %v8732_v36 = vpop.permute.xlu0 %2959 }
 0x270   : > { %12503 = vst [vmem:[#allocation179_spill] sm:$0xff] %v8727_v55  ;;  %12504 = vst [vmem:[#allocation180_spill] sm:$0xff] %v8732_v36 }
 0x271   : > { %3205 = vrot.lane.b32.xlu1 %v1987_v62, %s7070_s15  ;;  %3203 = vrot.lane.b32.xlu0 %v1889_v19, %s7070_s15 }
 0x273   : > { %v8739_v33 = vpop.permute.xlu1 %2997  ;;  %v8744_v55 = vpop.permute.xlu0 %2995 }
 0x274   : > { %12505 = vst [vmem:[#allocation181_spill] sm:$0xff] %v8739_v33  ;;  %12506 = vst [vmem:[#allocation182_spill] sm:$0xff] %v8744_v55 }
 0x275   : > { %3209 = vrot.lane.b32.xlu1 %v2183_v4, %s7070_s15  ;;  %3207 = vrot.lane.b32.xlu0 %v2085_v63, %s7070_s15 }
 0x277   : > { %v8751_v36 = vpop.permute.xlu1 %3001  ;;  %v8756_v33 = vpop.permute.xlu0 %2999 }
 0x278   : > { %12507 = vst [vmem:[#allocation183_spill] sm:$0xff] %v8751_v36  ;;  %12508 = vst [vmem:[#allocation184_spill] sm:$0xff] %v8756_v33 }
 0x279   : > { %3213 = vrot.lane.b32.xlu1 %v2379_v42, %s7070_s15  ;;  %3211 = vrot.lane.b32.xlu0 %v2281_v43, %s7070_s15 }
 0x27b   : > { %v8761_v55 = vpop.permute.xlu1 %3005  ;;  %v8764_v7 = vpop.permute.xlu0 %3003 }
 0x27c   : > { %12509 = vst [vmem:[#allocation185_spill] sm:$0xff] %v8761_v55  ;;  %12510 = vst [vmem:[#allocation186_spill] sm:$0xff] %v8764_v7  ;;  %v1416_v7 = vcombine.high %v1399_v37, %v12399_v61 }
 0x27d   : > { %3217 = vrot.lane.b32.xlu1 %v2575_v45, %s7070_s15  ;;  %3215 = vrot.lane.b32.xlu0 %v2477_v34, %s7070_s15 }
 0x27f   : > { %v8768_v30 = vpop.permute.xlu1 %3009  ;;  %v8772_v33 = vpop.permute.xlu0 %3007 }
 0x280   : > { %12511 = vst [vmem:[#allocation187_spill] sm:$0xff] %v8768_v30  ;;  %12512 = vst [vmem:[#allocation188_spill] sm:$0xff] %v8772_v33  ;;  %v1318_v30 = vcombine.high %v1301_v48, %v12399_v61  ;;  %v1808_v48 = vcombine.high %v1791_v60, %v12399_v61 }
 0x281   : > { %3253 = vrot.lane.b32.xlu1 %v1220_v47, %s7071_s0  ;;  %3251 = vrot.lane.b32.xlu0 %v1122_v35, %s7071_s0  ;;  %v1514_v47 = vcombine.high %v1497_v28, %v12399_v61  ;;  %v2004_v28 = vcombine.high %v1987_v62, %v12399_v61  ;;  %v1174_v62 = vcombine.high %v8340_v6, %v12399_v61 }
 0x282   : > { %v1370_v6 = vcombine.high %v8366_v24, %v12399_v61 }
 0x283   : > { %v8778_v38 = vpop.permute.xlu1 %3013  ;;  %v8781_v55 = vpop.permute.xlu0 %3011 }
 0x284   : > { %12513 = vst [vmem:[#allocation189_spill] sm:$0xff] %v8778_v38  ;;  %12514 = vst [vmem:[#allocation190_spill] sm:$0xff] %v8781_v55 }
 0x285   : > { %3257 = vrot.lane.b32.xlu1 %v1416_v7, %s7071_s0  ;;  %3255 = vrot.lane.b32.xlu0 %v1318_v30, %s7071_s0  ;;  %v1710_v7 = vcombine.high %v1693_v50, %v12399_v61  ;;  %v2200_v50 = vcombine.high %v2183_v4, %v12399_v61  ;;  %v2298_v4 = vcombine.high %v2281_v43, %v12399_v61 }
 0x286   : > { %v1272_v43 = vcombine.high %v8374_v58, %v12399_v61 }
 0x287   : > { %v8786_v51 = vpop.permute.xlu1 %3017  ;;  %v8789_v33 = vpop.permute.xlu0 %3015 }
 0x288   : > { %12515 = vst [vmem:[#allocation191_spill] sm:$0xff] %v8786_v51  ;;  %12516 = vst [vmem:[#allocation192_spill] sm:$0xff] %v8789_v33 }
 0x289   : > { %3261 = vrot.lane.b32.xlu1 %v1612_v22, %s7071_s0  ;;  %3259 = vrot.lane.b32.xlu0 %v1514_v47, %s7071_s0  ;;  %v1906_v22 = vcombine.high %v1889_v19, %v12399_v61 }
 0x28b   : > { %v8794_v37 = vpop.permute.xlu1 %3021  ;;  %v8797_v35 = vpop.permute.xlu0 %3019 }
 0x28c   : > { %12517 = vst [vmem:[#allocation193_spill] sm:$0xff] %v8794_v37  ;;  %12518 = vst [vmem:[#allocation194_spill] sm:$0xff] %v8797_v35 }
 0x28d   : > { %3265 = vrot.lane.b32.xlu1 %v1808_v48, %s7071_s0  ;;  %3263 = vrot.lane.b32.xlu0 %v1710_v7, %s7071_s0  ;;  %v2102_v48 = vcombine.high %v2085_v63, %v12399_v61  ;;  %v2396_v7 = vcombine.high %v2379_v42, %v12399_v61  ;;  %v8831_v63 = vrot.slane %v1174_v62, %v7471_v57 }
 0x28e   : > { %v2592_v42 = vcombine.high %v2575_v45, %v12399_v61  ;;  %v8853_v45 = vrot.slane %v1370_v6, %v7471_v57  ;;  %v1566_v62 = vcombine.high %v8399_v53, %v12399_v61 }
 0x28f   : > { %v8802_v59 = vpop.permute.xlu1 %3025  ;;  %v8805_v30 = vpop.permute.xlu0 %3023  ;;  %v8850_v24 = vrot.slane %v8831_v63, %v7493_v14 }
 0x290   : > { %12519 = vst [vmem:[#allocation195_spill] sm:$0xff] %v8802_v59  ;;  %12520 = vst [vmem:[#allocation196_spill] sm:$0xff] %v8805_v30  ;;  %v8876_v53 = vrot.slane %v8853_v45, %v7493_v14  ;;  %v8879_v6 = vrot.slane %v1566_v62, %v7471_v57  ;;  %v2448_v59 = vcombine.high %v8563_v3, %v12399_v61 }
 0x291   : > { %3269 = vrot.lane.b32.xlu1 %v2004_v28, %s7071_s0  ;;  %3267 = vrot.lane.b32.xlu0 %v1906_v22, %s7071_s0  ;;  %v1076_v28 = vcombine.high %v8348_v25, %v12399_v61 }
 0x292   : > { %v8999_v37 = vrot.slane %v2448_v59, %v7471_v57 }
 0x293   : > { %v8810_v60 = vpop.permute.xlu1 %3061  ;;  %v8813_v47 = vpop.permute.xlu0 %3059  ;;  %v8839_v25 = vrot.slane %v1076_v28, %v7471_v57 }
 0x294   : > { %12521 = vst [vmem:[#allocation197_spill] sm:$0xff] %v8810_v60  ;;  %12522 = vst [vmem:[#allocation198_spill] sm:$0xff] %v8813_v47  ;;  %v2252_v60 = vcombine.high %v8535_v49, %v12399_v61 }
 0x295   : > { %3273 = vrot.lane.b32.xlu1 %v2200_v50, %s7071_s0  ;;  %3271 = vrot.lane.b32.xlu0 %v2102_v48, %s7071_s0  ;;  %v8861_v58 = vrot.slane %v8839_v25, %v7493_v14 }
 0x297   : > { %v8820_v19 = vpop.permute.xlu1 %3065  ;;  %v8825_v22 = vpop.permute.xlu0 %3063  ;;  %v1123_v55 = vcombine.high %v8861_v58, %v12399_v61 }
 0x298   : > { %12523 = vst [vmem:[#allocation199_spill] sm:$0xff] %v8820_v19  ;;  %12524 = vst [vmem:[#allocation200_spill] sm:$0xff] %v8825_v22  ;;  %v2056_v19 = vcombine.high %v8506_v1, %v12399_v61 }
 0x299   : > { %3277 = vrot.lane.b32.xlu1 %v2396_v7, %s7071_s0  ;;  %3275 = vrot.lane.b32.xlu0 %v2298_v4, %s7071_s0  ;;  %v2494_v7 = vcombine.high %v2477_v34, %v12399_v61  ;;  %v8864_v34 = vrot.slane %v1272_v43, %v7471_v57  ;;  %v1468_v4 = vcombine.high %v8406_v44, %v12399_v61 }
 0x29a   : > { %v1762_v43 = vcombine.high %v8433_v20, %v12399_v61  ;;  %v8902_v20 = vrot.slane %v8879_v6, %v7493_v14 }
 0x29b   : > { %v8835_v50 = vpop.permute.xlu1 %3069  ;;  %v8843_v48 = vpop.permute.xlu0 %3067 }
 0x29c   : > { %12525 = vst [vmem:[#allocation201_spill] sm:$0xff] %v8835_v50  ;;  %12526 = vst [vmem:[#allocation202_spill] sm:$0xff] %v8843_v48  ;;  %v8905_v62 = vrot.slane %v1762_v43, %v7471_v57  ;;  %v1860_v50 = vcombine.high %v8474_v16, %v12399_v61 }
 0x29d   : > { %3281 = vrot.lane.b32.xlu1 %v2592_v42, %s7071_s0  ;;  %3279 = vrot.lane.b32.xlu0 %v2494_v7, %s7071_s0  ;;  %v8887_v7 = vrot.slane %v8864_v34, %v7493_v14 }
 0x29f   : > { %v8857_v28 = vpop.permute.xlu1 %3073  ;;  %v8868_v42 = vpop.permute.xlu0 %3071 }
 0x2a0   : > { %12527 = vst [vmem:[#allocation203_spill] sm:$0xff] %v8857_v28  ;;  %12528 = vst [vmem:[#allocation204_spill] sm:$0xff] %v8868_v42  ;;  %v8890_v42 = vrot.slane %v1468_v4, %v7471_v57  ;;  %v1664_v28 = vcombine.high %v8440_v12, %v12399_v61  ;;  %v1958_v4 = vcombine.high %v8467_v13, %v12399_v61 }
 0x2a1   : > { %3317 = vrot.lane.b32.xlu1 %v8850_v24, %s7072_s1  ;;  %3315 = vrot.lane.b32.xlu0 %v8861_v58, %s7072_s1  ;;  %v8928_v13 = vrot.slane %v8905_v62, %v7493_v14 }
 0x2a2   : > { %v8913_v12 = vrot.slane %v8890_v42, %v7493_v14  ;;  %v8931_v43 = vrot.slane %v1958_v4, %v7471_v57 }
 0x2a3   : > { %v8883_v44 = vpop.permute.xlu1 %3077  ;;  %v8894_v48 = vpop.permute.xlu0 %3075 }
 0x2a4   : > { %12529 = vst [vmem:[#allocation205_spill] sm:$0xff] %v8883_v44  ;;  %12530 = vst [vmem:[#allocation206_spill] sm:$0xff] %v8894_v48  ;;  %v8916_v48 = vrot.slane %v1664_v28, %v7471_v57  ;;  %v2154_v28 = vcombine.high %v8499_v0, %v12399_v61  ;;  %v1995_v0 = vrot.slane %v8931_v43, %v7493_v14 }
 0x2a5   : > { %3321 = vrot.lane.b32.xlu1 %v8876_v53, %s7072_s1  ;;  %3319 = vrot.lane.b32.xlu0 %v8887_v7, %s7072_s1 }
 0x2a6   : > { %v1701_v16 = vrot.slane %v8916_v48, %v7493_v14  ;;  %v8952_v4 = vrot.slane %v2154_v28, %v7471_v57 }
 0x2a7   : > { %v8909_v44 = vpop.permute.xlu1 %3081  ;;  %v8920_v22 = vpop.permute.xlu0 %3079 }
 0x2a8   : > { %12531 = vst [vmem:[#allocation207_spill] sm:$0xff] %v8909_v44  ;;  %12532 = vst [vmem:[#allocation208_spill] sm:$0xff] %v8920_v22  ;;  %v8940_v22 = vrot.slane %v1860_v50, %v7471_v57  ;;  %v2350_v50 = vcombine.high %v8528_v17, %v12399_v61  ;;  %v2191_v17 = vrot.slane %v8952_v4, %v7493_v14 }
 0x2a9   : > { %3325 = vrot.lane.b32.xlu1 %v8902_v20, %s7072_s1  ;;  %3323 = vrot.lane.b32.xlu0 %v8913_v12, %s7072_s1 }
 0x2aa   : > { %v1897_v1 = vrot.slane %v8940_v22, %v7493_v14  ;;  %v8972_v28 = vrot.slane %v2350_v50, %v7471_v57 }
 0x2ab   : > { %v8935_v44 = vpop.permute.xlu1 %3085  ;;  %v8944_v47 = vpop.permute.xlu0 %3083 }
 0x2ac   : > { %12533 = vst [vmem:[#allocation209_spill] sm:$0xff] %v8935_v44  ;;  %12534 = vst [vmem:[#allocation210_spill] sm:$0xff] %v8944_v47  ;;  %v8961_v47 = vrot.slane %v2056_v19, %v7471_v57 }
 0x2ad   : > { %3329 = vrot.lane.b32.xlu1 %v8928_v13, %s7072_s1  ;;  %3327 = vrot.lane.b32.xlu0 %v1701_v16, %s7072_s1 }
 0x2ae   : > { %v2093_v49 = vrot.slane %v8961_v47, %v7493_v14 }
 0x2af   : > { %v8956_v44 = vpop.permute.xlu1 %3089  ;;  %v8965_v30 = vpop.permute.xlu0 %3087 }
 0x2b0   : > { %12535 = vst [vmem:[#allocation211_spill] sm:$0xff] %v8956_v44  ;;  %12536 = vst [vmem:[#allocation212_spill] sm:$0xff] %v8965_v30  ;;  %v2546_v44 = vcombine.high %v8556_v23, %v12399_v61  ;;  %v8981_v30 = vrot.slane %v2252_v60, %v7471_v57  ;;  %v2387_v23 = vrot.slane %v8972_v28, %v7493_v14 }
 0x2b1   : > { %3333 = vrot.lane.b32.xlu1 %v1995_v0, %s7072_s1  ;;  %3331 = vrot.lane.b32.xlu0 %v1897_v1, %s7072_s1 }
 0x2b2   : > { %v8992_v50 = vrot.slane %v2546_v44, %v7471_v57  ;;  %v2289_v60 = vrot.slane %v8981_v30, %v7493_v14  ;;  %v2485_v44 = vrot.slane %v8999_v37, %v7493_v14 }
 0x2b3   : > { %v8976_v19 = vpop.permute.xlu1 %3125  ;;  %v8985_v35 = vpop.permute.xlu0 %3123 }
 0x2b4   : > { %12537 = vst [vmem:[#allocation213_spill] sm:$0xff] %v8976_v19  ;;  %12538 = vst [vmem:[#allocation214_spill] sm:$0xff] %v8985_v35  ;;  %v2583_v35 = vrot.slane %v8992_v50, %v7493_v14 }
 0x2b5   : > { %3337 = vrot.lane.b32.xlu1 %v2191_v17, %s7072_s1  ;;  %3335 = vrot.lane.b32.xlu0 %v2093_v49, %s7072_s1 }
 0x2b7   : > { %v8994_v19 = vpop.permute.xlu1 %3129  ;;  %v9001_v3 = vpop.permute.xlu0 %3127 }
 0x2b8   : > { %12539 = vst [vmem:[#allocation215_spill] sm:$0xff] %v8994_v19  ;;  %12540 = vst [vmem:[#allocation216_spill] sm:$0xff] %v9001_v3  ;;  %v1221_v3 = vcombine.high %v8850_v24, %v12399_v61  ;;  %v1319_v24 = vcombine.high %v8887_v7, %v12399_v61 }
 0x2b9   : > { %3341 = vrot.lane.b32.xlu1 %v2387_v23, %s7072_s1  ;;  %3339 = vrot.lane.b32.xlu0 %v2289_v60, %s7072_s1 }
 0x2bb   : > { %v9007_v33 = vpop.permute.xlu1 %3133  ;;  %v9011_v19 = vpop.permute.xlu0 %3131 }
 0x2bc   : > { %12541 = vst [vmem:[#allocation217_spill] sm:$0xff] %v9007_v33  ;;  %12542 = vst [vmem:[#allocation218_spill] sm:$0xff] %v9011_v19  ;;  %v1417_v33 = vcombine.high %v8876_v53, %v12399_v61 }
 0x2bd   : > { %3345 = vrot.lane.b32.xlu1 %v2583_v35, %s7072_s1  ;;  %3343 = vrot.lane.b32.xlu0 %v2485_v44, %s7072_s1 }
 0x2bf   : > { %v9015_v59 = vpop.permute.xlu1 %3137  ;;  %v9019_v51 = vpop.permute.xlu0 %3135 }
 0x2c0   : > { %12543 = vst [vmem:[#allocation219_spill] sm:$0xff] %v9015_v59  ;;  %12544 = vst [vmem:[#allocation220_spill] sm:$0xff] %v9019_v51 }
 0x2c1   : > { %3381 = vrot.lane.b32.xlu1 %v1221_v3, %s7073_s23  ;;  %3379 = vrot.lane.b32.xlu0 %v1123_v55, %s7073_s23  ;;  %v1613_v3 = vcombine.high %v8902_v20, %v12399_v61 }
 0x2c3   : > { %v9025_v19 = vpop.permute.xlu1 %3141  ;;  %v9029_v38 = vpop.permute.xlu0 %3139 }
 0x2c4   : > { %12545 = vst [vmem:[#allocation221_spill] sm:$0xff] %v9025_v19  ;;  %12546 = vst [vmem:[#allocation222_spill] sm:$0xff] %v9029_v38  ;;  %v1515_v19 = vcombine.high %v8913_v12, %v12399_v61  ;;  %v2005_v12 = vcombine.high %v1995_v0, %v12399_v61 }
 0x2c5   : > { %3385 = vrot.lane.b32.xlu1 %v1417_v33, %s7073_s23  ;;  %3383 = vrot.lane.b32.xlu0 %v1319_v24, %s7073_s23  ;;  %v1809_v33 = vcombine.high %v8928_v13, %v12399_v61  ;;  %v1711_v24 = vcombine.high %v1701_v16, %v12399_v61  ;;  %v2201_v16 = vcombine.high %v2191_v17, %v12399_v61 }
 0x2c6   : > { %v1204_v17 = vcombine.high %v8831_v63, %v12399_v61 }
 0x2c7   : > { %v9035_v58 = vpop.permute.xlu1 %3145  ;;  %v9039_v55 = vpop.permute.xlu0 %3143 }
 0x2c8   : > { %12547 = vst [vmem:[#allocation223_spill] sm:$0xff] %v9035_v58  ;;  %12548 = vst [vmem:[#allocation224_spill] sm:$0xff] %v9039_v55  ;;  %v1218_v63 = vrot.slane %v1204_v17, %v7493_v14  ;;  %v1498_v17 = vcombine.high %v8890_v42, %v12399_v61  ;;  %v12626_v58 = vld [vmem:[#allocation94_spill] sm:$0xff] }
 0x2c9   : > { %3389 = vrot.lane.b32.xlu1 %v1613_v3, %s7073_s23  ;;  %3387 = vrot.lane.b32.xlu0 %v1515_v19, %s7073_s23  ;;  %v1907_v19 = vcombine.high %v1897_v1, %v12399_v61  ;;  %v2397_v1 = vcombine.high %v2387_v23, %v12399_v61  ;;  %v2495_v23 = vcombine.high %v2485_v44, %v12399_v61 }
 0x2ca   : > { %v1596_v44 = vcombine.high %v8879_v6, %v12399_v61  ;;  %v1512_v42 = vrot.slane %v1498_v17, %v7493_v14  ;;  %v2184_v17 = vcombine.high %v8952_v4, %v12399_v61 }
 0x2cb   : > { %v9045_v53 = vpop.permute.xlu1 %3149  ;;  %v9049_v7 = vpop.permute.xlu0 %3147 }
 0x2cc   : > { %12549 = vst [vmem:[#allocation225_spill] sm:$0xff] %v9045_v53  ;;  %12550 = vst [vmem:[#allocation226_spill] sm:$0xff] %v9049_v7  ;;  %v1610_v6 = vrot.slane %v1596_v44, %v7493_v14  ;;  %v1890_v44 = vcombine.high %v8940_v22, %v12399_v61  ;;  %v2198_v4 = vrot.slane %v2184_v17, %v7493_v14 }
 0x2cd   : > { %3393 = vrot.lane.b32.xlu1 %v1809_v33, %s7073_s23  ;;  %3391 = vrot.lane.b32.xlu0 %v1711_v24, %s7073_s23  ;;  %v2103_v33 = vcombine.high %v2093_v49, %v12399_v61  ;;  %v2478_v17 = vcombine.high %v8999_v37, %v12399_v61 }
 0x2ce   : > { %v1904_v22 = vrot.slane %v1890_v44, %v7493_v14  ;;  %v2576_v44 = vcombine.high %v8992_v50, %v12399_v61 }
 0x2cf   : > { %v9054_v20 = vpop.permute.xlu1 %3153  ;;  %v9057_v3 = vpop.permute.xlu0 %3151 }
 0x2d0   : > { %12551 = vst [vmem:[#allocation227_spill] sm:$0xff] %v9054_v20  ;;  %12552 = vst [vmem:[#allocation228_spill] sm:$0xff] %v9057_v3 }
 0x2d1   : > { %3397 = vrot.lane.b32.xlu1 %v2005_v12, %s7073_s23  ;;  %3395 = vrot.lane.b32.xlu0 %v1907_v19, %s7073_s23  ;;  %v2299_v12 = vcombine.high %v2289_v60, %v12399_v61  ;;  %v2593_v19 = vcombine.high %v2583_v35, %v12399_v61  ;;  %v1400_v60 = vcombine.high %v8853_v45, %v12399_v61 }
 0x2d2   : > { %v1302_v35 = vcombine.high %v8864_v34, %v12399_v61 }
 0x2d3   : > { %v9062_v13 = vpop.permute.xlu1 %3189  ;;  %v9065_v7 = vpop.permute.xlu0 %3187 }
 0x2d4   : > { %12553 = vst [vmem:[#allocation229_spill] sm:$0xff] %v9062_v13  ;;  %12554 = vst [vmem:[#allocation230_spill] sm:$0xff] %v9065_v7  ;;  %v12618_v7 = vld [vmem:[#allocation90_spill] sm:$0xff] }
 0x2d5   : > { %3401 = vrot.lane.b32.xlu1 %v2201_v16, %s7073_s23  ;;  %3399 = vrot.lane.b32.xlu0 %v2103_v33, %s7073_s23  ;;  %v1106_v16 = vcombine.high %v8839_v25, %v12399_v61 }
 0x2d7   : > { %v9070_v0 = vpop.permute.xlu1 %3193  ;;  %v9073_v24 = vpop.permute.xlu0 %3191  ;;  %v1120_v25 = vrot.slane %v1106_v16, %v7493_v14  ;;  %v1792_v16 = vcombine.high %v8905_v62, %v12399_v61 }
 0x2d8   : > { %12555 = vst [vmem:[#allocation231_spill] sm:$0xff] %v9070_v0  ;;  %12556 = vst [vmem:[#allocation232_spill] sm:$0xff] %v9073_v24 }
 0x2d9   : > { %3405 = vrot.lane.b32.xlu1 %v2397_v1, %s7073_s23  ;;  %3403 = vrot.lane.b32.xlu0 %v2299_v12, %s7073_s23  ;;  %v1806_v62 = vrot.slane %v1792_v16, %v7493_v14  ;;  %v2086_v16 = vcombine.high %v8961_v47, %v12399_v61 }
 0x2db   : > { %v9080_v49 = vpop.permute.xlu1 %3197  ;;  %v9085_v33 = vpop.permute.xlu0 %3195  ;;  %v2100_v47 = vrot.slane %v2086_v16, %v7493_v14 }
 0x2dc   : > { %12557 = vst [vmem:[#allocation233_spill] sm:$0xff] %v9080_v49  ;;  %12558 = vst [vmem:[#allocation234_spill] sm:$0xff] %v9085_v33 }
 0x2dd   : > { %3409 = vrot.lane.b32.xlu1 %v2593_v19, %s7073_s23  ;;  %3407 = vrot.lane.b32.xlu0 %v2495_v23, %s7073_s23  ;;  %v1414_v19 = vrot.slane %v1400_v60, %v7493_v14  ;;  %v1316_v23 = vrot.slane %v1302_v35, %v7493_v14  ;;  %v1694_v60 = vcombine.high %v8916_v48, %v12399_v61 }
 0x2de   : > { %v1988_v35 = vcombine.high %v8931_v43, %v12399_v61 }
 0x2df   : > { %v9092_v1 = vpop.permute.xlu1 %3201  ;;  %v9097_v12 = vpop.permute.xlu0 %3199  ;;  %v1708_v48 = vrot.slane %v1694_v60, %v7493_v14  ;;  %v2380_v60 = vcombine.high %v8972_v28, %v12399_v61 }
 0x2e0   : > { %12559 = vst [vmem:[#allocation235_spill] sm:$0xff] %v9092_v1  ;;  %12560 = vst [vmem:[#allocation236_spill] sm:$0xff] %v9097_v12  ;;  %v2002_v43 = vrot.slane %v1988_v35, %v7493_v14  ;;  %v2282_v35 = vcombine.high %v8981_v30, %v12399_v61 }
 0x2e1   : > { %3445 = vrot.lane.b32.xlu1 %v1218_v63, %s7074_s25  ;;  %3443 = vrot.lane.b32.xlu0 %v1120_v25, %s7074_s25  ;;  %v2394_v28 = vrot.slane %v2380_v60, %v7493_v14  ;;  %v1222_v60 = vcombine.high %v1218_v63, %v12399_v61 }
 0x2e2   : > { %v2296_v30 = vrot.slane %v2282_v35, %v7493_v14 }
 0x2e3   : > { %v9104_v45 = vpop.permute.xlu1 %3205  ;;  %v9109_v34 = vpop.permute.xlu0 %3203 }
 0x2e4   : > { %12561 = vst [vmem:[#allocation237_spill] sm:$0xff] %v9104_v45  ;;  %12562 = vst [vmem:[#allocation238_spill] sm:$0xff] %v9109_v34 }
 0x2e5   : > { %3449 = vrot.lane.b32.xlu1 %v1414_v19, %s7074_s25  ;;  %3447 = vrot.lane.b32.xlu0 %v1316_v23, %s7074_s25 }
 0x2e7   : > { %v9116_v12 = vpop.permute.xlu1 %3209  ;;  %v9121_v45 = vpop.permute.xlu0 %3207 }
 0x2e8   : > { %12563 = vst [vmem:[#allocation239_spill] sm:$0xff] %v9116_v12  ;;  %12564 = vst [vmem:[#allocation240_spill] sm:$0xff] %v9121_v45 }
 0x2e9   : > { %3453 = vrot.lane.b32.xlu1 %v1610_v6, %s7074_s25  ;;  %3451 = vrot.lane.b32.xlu0 %v1512_v42, %s7074_s25 }
 0x2eb   : > { %v9128_v34 = vpop.permute.xlu1 %3213  ;;  %v9133_v12 = vpop.permute.xlu0 %3211 }
 0x2ec   : > { %12565 = vst [vmem:[#allocation241_spill] sm:$0xff] %v9128_v34  ;;  %12566 = vst [vmem:[#allocation242_spill] sm:$0xff] %v9133_v12 }
 0x2ed   : > { %3457 = vrot.lane.b32.xlu1 %v1806_v62, %s7074_s25  ;;  %3455 = vrot.lane.b32.xlu0 %v1708_v48, %s7074_s25 }
 0x2ef   : > { %v9140_v45 = vpop.permute.xlu1 %3217  ;;  %v9145_v34 = vpop.permute.xlu0 %3215 }
 0x2f0   : > { %12567 = vst [vmem:[#allocation243_spill] sm:$0xff] %v9140_v45  ;;  %12568 = vst [vmem:[#allocation244_spill] sm:$0xff] %v9145_v34 }
 0x2f1   : > { %3461 = vrot.lane.b32.xlu1 %v2002_v43, %s7074_s25  ;;  %3459 = vrot.lane.b32.xlu0 %v1904_v22, %s7074_s25 }
 0x2f3   : > { %v9152_v12 = vpop.permute.xlu1 %3253  ;;  %v9157_v45 = vpop.permute.xlu0 %3251 }
 0x2f4   : > { %12569 = vst [vmem:[#allocation245_spill] sm:$0xff] %v9152_v12  ;;  %12570 = vst [vmem:[#allocation246_spill] sm:$0xff] %v9157_v45  ;;  %v2590_v45 = vrot.slane %v2576_v44, %v7493_v14 }
 0x2f5   : > { %3465 = vrot.lane.b32.xlu1 %v2198_v4, %s7074_s25  ;;  %3463 = vrot.lane.b32.xlu0 %v2100_v47, %s7074_s25 }
 0x2f7   : > { %v9164_v34 = vpop.permute.xlu1 %3257  ;;  %v9169_v12 = vpop.permute.xlu0 %3255 }
 0x2f8   : > { %12571 = vst [vmem:[#allocation247_spill] sm:$0xff] %v9164_v34  ;;  %12572 = vst [vmem:[#allocation248_spill] sm:$0xff] %v9169_v12  ;;  %v2492_v34 = vrot.slane %v2478_v17, %v7493_v14  ;;  %v1124_v12 = vcombine.high %v1120_v25, %v12399_v61  ;;  %v1418_v17 = vcombine.high %v1414_v19, %v12399_v61 }
 0x2f9   : > { %3469 = vrot.lane.b32.xlu1 %v2394_v28, %s7074_s25  ;;  %3467 = vrot.lane.b32.xlu0 %v2296_v30, %s7074_s25  ;;  %v1614_v25 = vcombine.high %v1610_v6, %v12399_v61 }
 0x2fb   : > { %v9174_v16 = vpop.permute.xlu1 %3261  ;;  %v9177_v50 = vpop.permute.xlu0 %3259 }
 0x2fc   : > { %12573 = vst [vmem:[#allocation249_spill] sm:$0xff] %v9174_v16  ;;  %12574 = vst [vmem:[#allocation250_spill] sm:$0xff] %v9177_v50  ;;  %v1320_v16 = vcombine.high %v1316_v23, %v12399_v61  ;;  %v1810_v23 = vcombine.high %v1806_v62, %v12399_v61 }
 0x2fd   : > { %3473 = vrot.lane.b32.xlu1 %v2590_v45, %s7074_s25  ;;  %3471 = vrot.lane.b32.xlu0 %v2492_v34, %s7074_s25 }
 0x2ff   : > { %v9182_v37 = vpop.permute.xlu1 %3265  ;;  %v9185_v35 = vpop.permute.xlu0 %3263 }
 0x300   : > { %12575 = vst [vmem:[#allocation251_spill] sm:$0xff] %v9182_v37  ;;  %12576 = vst [vmem:[#allocation252_spill] sm:$0xff] %v9185_v35  ;;  %v12610_v37 = vld [vmem:[#allocation86_spill] sm:$0xff] }
 0x301   : > { %3509 = vrot.lane.b32.xlu1 %v1222_v60, %s7075_s30  ;;  %3507 = vrot.lane.b32.xlu0 %v1124_v12, %s7075_s30  ;;  %v1516_v12 = vcombine.high %v1512_v42, %v12399_v61  ;;  %v2006_v42 = vcombine.high %v2002_v43, %v12399_v61  ;;  %v2104_v43 = vcombine.high %v2100_v47, %v12399_v61 }
 0x302   : > { %v2300_v47 = vcombine.high %v2296_v30, %v12399_v61  ;;  %v2594_v30 = vcombine.high %v2590_v45, %v12399_v61 }
 0x303   : > { %v9190_v44 = vpop.permute.xlu1 %3269  ;;  %v9193_v50 = vpop.permute.xlu0 %3267 }
 0x304   : > { %12577 = vst [vmem:[#allocation253_spill] sm:$0xff] %v9190_v44  ;;  %12578 = vst [vmem:[#allocation254_spill] sm:$0xff] %v9193_v50 }
 0x305   : > { %3513 = vrot.lane.b32.xlu1 %v1418_v17, %s7075_s30  ;;  %3511 = vrot.lane.b32.xlu0 %v1320_v16, %s7075_s30  ;;  %v1712_v16 = vcombine.high %v1708_v48, %v12399_v61  ;;  %v2202_v48 = vcombine.high %v2198_v4, %v12399_v61 }
 0x307   : > { %v9198_v63 = vpop.permute.xlu1 %3273  ;;  %v9201_v35 = vpop.permute.xlu0 %3271 }
 0x308   : > { %12579 = vst [vmem:[#allocation255_spill] sm:$0xff] %v9198_v63  ;;  %12580 = vst [vmem:[#allocation256_spill] sm:$0xff] %v9201_v35 }
 0x309   : > { %3517 = vrot.lane.b32.xlu1 %v1614_v25, %s7075_s30  ;;  %3515 = vrot.lane.b32.xlu0 %v1516_v12, %s7075_s30  ;;  %v1908_v25 = vcombine.high %v1904_v22, %v12399_v61  ;;  %v9228_v12 = vsel %vm610_vm0, %v7490_v46, %v7861_v26  ;;  %v9236_v22 = vsel %vm610_vm0, %v7468_v54, %v7849_v18 }
 0x30a   : > { %v9242_v4 = vrot.slane %v9228_v12, %v7471_v57  ;;  %v2398_v46 = vcombine.high %v2394_v28, %v12399_v61  ;;  %v9249_v26 = vrot.slane %v9236_v22, %v7471_v57  ;;  %v9254_v54 = vsel %vm610_vm0, %v7552_v9, %v7877_v8 }
 0x30b   : > { %v9206_v19 = vpop.permute.xlu1 %3277  ;;  %v9209_v60 = vpop.permute.xlu0 %3275  ;;  %v9272_v9 = vrot.slane %v9254_v54, %v7471_v57 }
 0x30c   : > { %12581 = vst [vmem:[#allocation257_spill] sm:$0xff] %v9206_v19  ;;  %12582 = vst [vmem:[#allocation258_spill] sm:$0xff] %v9209_v60  ;;  %v9268_v28 = vrot.slane %v9242_v4, %v7493_v14  ;;  %v12602_v60 = vld [vmem:[#allocation82_spill] sm:$0xff]  ;;  %v3825_v29 = vcombine.high %v9249_v26, %v12399_v61 }
 0x30d   : > { %3521 = vrot.lane.b32.xlu1 %v1810_v23, %s7075_s30  ;;  %3519 = vrot.lane.b32.xlu0 %v1712_v16, %s7075_s30 }
 0x30f   : > { %v9214_v6 = vpop.permute.xlu1 %3281  ;;  %v9217_v17 = vpop.permute.xlu0 %3279 }
 0x310   : > { %12583 = vst [vmem:[#allocation259_spill] sm:$0xff] %v9214_v6  ;;  %12584 = vst [vmem:[#allocation260_spill] sm:$0xff] %v9217_v17 }
 0x311   : > { %3525 = vrot.lane.b32.xlu1 %v2006_v42, %s7075_s30  ;;  %3523 = vrot.lane.b32.xlu0 %v1908_v25, %s7075_s30  ;;  %v12589_v42 = vld [vmem:[#allocation75_spill] sm:$0xff] }
 0x312   : > { %v12590_v25 = vld [vmem:[#allocation31_spill] sm:$0xff] }
 0x313   : > { %v9222_v62 = vpop.permute.xlu1 %3317  ;;  %v9230_v23 = vpop.permute.xlu0 %3315 }
 0x314   : > { %12585 = vst [vmem:[#allocation261_spill] sm:$0xff] %v9222_v62  ;;  %12586 = vst [vmem:[#allocation262_spill] sm:$0xff] %v9230_v23  ;;  %v12596_v23 = vld [vmem:[#allocation38_spill] sm:$0xff]  ;;  %v3953_v62 = vcombine.high %v9268_v28, %v12399_v61 }
 0x315   : > { %3529 = vrot.lane.b32.xlu1 %v2202_v48, %s7075_s30  ;;  %3527 = vrot.lane.b32.xlu0 %v2104_v43, %s7075_s30  ;;  %v9262_v48 = vsel %vm610_vm0, %v12590_v25, %v12589_v42  ;;  %v9279_v43 = vrot.slane %v9249_v26, %v7493_v14  ;;  %v12593_v42 = vld [vmem:[#allocation42_spill] sm:$0xff] }
 0x317   : > { %v9244_v16 = vpop.permute.xlu1 %3321  ;;  %v9256_v18 = vpop.permute.xlu0 %3319 }
 0x318   : > { %12587 = vst [vmem:[#allocation263_spill] sm:$0xff] %v9244_v16  ;;  %12588 = vst [vmem:[#allocation264_spill] sm:$0xff] %v9256_v18  ;;  %v2496_v16 = vcombine.high %v2492_v34, %v12399_v61 }
 0x319   : > { %3533 = vrot.lane.b32.xlu1 %v2398_v46, %s7075_s30  ;;  %3531 = vrot.lane.b32.xlu0 %v2300_v47, %s7075_s30  ;;  %v9283_v46 = vrot.slane %v9262_v48, %v7471_v57  ;;  %v12592_v47 = vld [vmem:[#allocation80_spill] sm:$0xff] }
 0x31a   : > { %v9288_v25 = vsel %vm610_vm0, %v12593_v42, %v12592_v47  ;;  %v9304_v47 = vrot.slane %v9272_v9, %v7493_v14 }
 0x31b   : > { %v9274_v8 = vpop.permute.xlu1 %3325  ;;  %v9290_v18 = vpop.permute.xlu0 %3323  ;;  %v9308_v42 = vrot.slane %v9288_v25, %v7471_v57  ;;  %v4021_v26 = vcombine.high %v9283_v46, %v12399_v61 }
 0x31c   : > { %12591 = vst [vmem:[#allocation75_spill] sm:$0xff] %v9274_v8  ;;  %12594 = vst [vmem:[#allocation31_spill] sm:$0xff] %v9290_v18  ;;  %v12595_v8 = vld [vmem:[#allocation78_spill] sm:$0xff]  ;;  %v4149_v35 = vcombine.high %v9304_v47, %v12399_v61 }
 0x31d   : > { %v9296_v45 = vsel %vm610_vm0, %v12596_v23, %v12595_v8  ;;  %3537 = vrot.lane.b32.xlu1 %v2594_v30, %s7075_s30  ;;  %3535 = vrot.lane.b32.xlu0 %v2496_v16, %s7075_s30  ;;  %v3855_v23 = vcombine.high %v9279_v43, %v12399_v61  ;;  %v9316_v8 = vrot.slane %v9283_v46, %v7493_v14  ;;  %v12599_v30 = vld [vmem:[#allocation84_spill] sm:$0xff]  ;;  %v12600_v18 = vld [vmem:[#allocation50_spill] sm:$0xff] }
 0x31e   : > { %v9320_v16 = vrot.slane %v9296_v45, %v7471_v57  ;;  %v9325_v17 = vsel %vm610_vm0, %v12600_v18, %v12599_v30  ;;  %v9340_v63 = vrot.slane %v9308_v42, %v7493_v14 }
 0x31f   : > { %v9310_v34 = vpop.permute.xlu1 %3329  ;;  %12598 = vst [vmem:[#allocation42_spill] sm:$0xff] %v9316_v8  ;;  %v9327_v6 = vpop.permute.xlu0 %3327  ;;  %v9344_v18 = vrot.slane %v9325_v17, %v7471_v57 }
 0x320   : > { %12597 = vst [vmem:[#allocation80_spill] sm:$0xff] %v9310_v34  ;;  %12601 = vst [vmem:[#allocation78_spill] sm:$0xff] %v9327_v6  ;;  %v12603_v34 = vld [vmem:[#allocation46_spill] sm:$0xff]  ;;  %v4345_v33 = vcombine.high %v9340_v63, %v12399_v61 }
 0x321   : > { %v9332_v19 = vsel %vm610_vm0, %v12603_v34, %v12602_v60  ;;  %5396 = vrot.lane.b32.xlu1 %v3953_v62, %s7061_s26  ;;  %5394 = vrot.lane.b32.xlu0 %v3855_v23, %s7061_s26  ;;  %12604 = vst [vmem:[#allocation38_spill] sm:$0xff] %v9340_v63  ;;  %v4051_v60 = vcombine.high %v9316_v8, %v12399_v61  ;;  %v12607_v23 = vld [vmem:[#allocation88_spill] sm:$0xff]  ;;  %v12608_v6 = vld [vmem:[#allocation58_spill] sm:$0xff] }
 0x322   : > { %v9352_v62 = vrot.slane %v9320_v16, %v7493_v14  ;;  %v9356_v34 = vrot.slane %v9332_v19, %v7471_v57  ;;  %v9361_v50 = vsel %vm610_vm0, %v12608_v6, %v12607_v23  ;;  %v9376_v49 = vrot.slane %v9344_v18, %v7493_v14 }
 0x323   : > { %v9346_v30 = vpop.permute.xlu1 %3333  ;;  %v9363_v44 = vpop.permute.xlu0 %3331  ;;  %v9380_v6 = vrot.slane %v9361_v50, %v7471_v57 }
 0x324   : > { %12605 = vst [vmem:[#allocation84_spill] sm:$0xff] %v9346_v30  ;;  %12606 = vst [vmem:[#allocation50_spill] sm:$0xff] %v9352_v62  ;;  %v12611_v30 = vld [vmem:[#allocation54_spill] sm:$0xff]  ;;  %v4541_v3 = vcombine.high %v9376_v49, %v12399_v61 }
 0x325   : > { %12609 = vst [vmem:[#allocation82_spill] sm:$0xff] %v9363_v44  ;;  %v9368_v1 = vsel %vm610_vm0, %v12611_v30, %v12610_v37  ;;  %5400 = vrot.lane.b32.xlu1 %v4149_v35, %s7061_s26  ;;  %5398 = vrot.lane.b32.xlu0 %v4051_v60, %s7061_s26  ;;  %12612 = vst [vmem:[#allocation46_spill] sm:$0xff] %v9376_v49  ;;  %v4247_v37 = vcombine.high %v9352_v62, %v12399_v61  ;;  %v12615_v60 = vld [vmem:[#allocation92_spill] sm:$0xff]  ;;  %v12616_v44 = vld [vmem:[#allocation63_spill] sm:$0xff] }
 0x326   : > { %v9388_v35 = vrot.slane %v9356_v34, %v7493_v14  ;;  %v9392_v30 = vrot.slane %v9368_v1, %v7471_v57  ;;  %v9397_v24 = vsel %vm610_vm0, %v12616_v44, %v12615_v60  ;;  %v9412_v20 = vrot.slane %v9380_v6, %v7493_v14 }
 0x327   : > { %v9382_v23 = vpop.permute.xlu1 %3337  ;;  %v9399_v0 = vpop.permute.xlu0 %3335  ;;  %v9416_v44 = vrot.slane %v9397_v24, %v7471_v57 }
 0x328   : > { %12613 = vst [vmem:[#allocation88_spill] sm:$0xff] %v9382_v23  ;;  %12614 = vst [vmem:[#allocation58_spill] sm:$0xff] %v9388_v35  ;;  %v12619_v23 = vld [vmem:[#allocation61_spill] sm:$0xff]  ;;  %v4737_v51 = vcombine.high %v9412_v20, %v12399_v61 }
 0x329   : > { %12617 = vst [vmem:[#allocation86_spill] sm:$0xff] %v9399_v0  ;;  %v9404_v13 = vsel %vm610_vm0, %v12619_v23, %v12618_v7  ;;  %5404 = vrot.lane.b32.xlu1 %v4345_v33, %s7061_s26  ;;  %5402 = vrot.lane.b32.xlu0 %v4247_v37, %s7061_s26  ;;  %12620 = vst [vmem:[#allocation54_spill] sm:$0xff] %v9412_v20  ;;  %v4443_v7 = vcombine.high %v9388_v35, %v12399_v61  ;;  %v12623_v37 = vld [vmem:[#allocation96_spill] sm:$0xff]  ;;  %v12624_v0 = vld [vmem:[#allocation67_spill] sm:$0xff] }
 0x32a   : > { %v9424_v33 = vrot.slane %v9392_v30, %v7493_v14  ;;  %v9428_v23 = vrot.slane %v9404_v13, %v7471_v57  ;;  %v9433_v53 = vsel %vm610_vm0, %v12624_v0, %v12623_v37  ;;  %v9448_v59 = vrot.slane %v9416_v44, %v7493_v14  ;;  %v12781_v35 = vld [vmem:[#allocation97_spill] sm:$0xff] }
 0x32b   : > { %v9418_v60 = vpop.permute.xlu1 %3341  ;;  %v9435_v55 = vpop.permute.xlu0 %3339  ;;  %v9452_v0 = vrot.slane %v9433_v53, %v7471_v57 }
 0x32c   : > { %12621 = vst [vmem:[#allocation92_spill] sm:$0xff] %v9418_v60  ;;  %12622 = vst [vmem:[#allocation63_spill] sm:$0xff] %v9424_v33  ;;  %v12627_v60 = vld [vmem:[#allocation65_spill] sm:$0xff]  ;;  %v4933_v5 = vcombine.high %v9448_v59, %v12399_v61 }
 0x32d   : > { %12625 = vst [vmem:[#allocation90_spill] sm:$0xff] %v9435_v55  ;;  %v9440_v38 = vsel %vm610_vm0, %v12627_v60, %v12626_v58  ;;  %5408 = vrot.lane.b32.xlu1 %v4541_v3, %s7061_s26  ;;  %5406 = vrot.lane.b32.xlu0 %v4443_v7, %s7061_s26  ;;  %12628 = vst [vmem:[#allocation61_spill] sm:$0xff] %v9448_v59  ;;  %v4639_v58 = vcombine.high %v9424_v33, %v12399_v61  ;;  %v12631_v7 = vld [vmem:[#allocation100_spill] sm:$0xff]  ;;  %v12632_v55 = vld [vmem:[#allocation71_spill] sm:$0xff] }
 0x32e   : > { %v9460_v3 = vrot.slane %v9428_v23, %v7493_v14  ;;  %v9464_v60 = vrot.slane %v9440_v38, %v7471_v57  ;;  %v9469_v36 = vsel %vm610_vm0, %v12632_v55, %v12631_v7  ;;  %v9484_v52 = vrot.slane %v9452_v0, %v7493_v14  ;;  %v12775_v59 = vld [vmem:[#allocation93_spill] sm:$0xff] }
 0x32f   : > { %v9454_v37 = vpop.permute.xlu1 %3345  ;;  %v9471_v32 = vpop.permute.xlu0 %3343  ;;  %v9488_v55 = vrot.slane %v9469_v36, %v7471_v57 }
 0x330   : > { %12629 = vst [vmem:[#allocation96_spill] sm:$0xff] %v9454_v37  ;;  %12630 = vst [vmem:[#allocation67_spill] sm:$0xff] %v9460_v3  ;;  %v12635_v37 = vld [vmem:[#allocation69_spill] sm:$0xff] }
 0x331   : > { %12633 = vst [vmem:[#allocation94_spill] sm:$0xff] %v9471_v32  ;;  %v9476_v27 = vsel %vm610_vm0, %v12635_v37, %v12634_v40  ;;  %5412 = vrot.lane.b32.xlu1 %v4737_v51, %s7061_s26  ;;  %5410 = vrot.lane.b32.xlu0 %v4639_v58, %s7061_s26  ;;  %12636 = vst [vmem:[#allocation65_spill] sm:$0xff] %v9484_v52  ;;  %v4835_v40 = vcombine.high %v9460_v3, %v12399_v61 }
 0x332   : > { %v9496_v51 = vrot.slane %v9464_v60, %v7493_v14  ;;  %v9500_v37 = vrot.slane %v9476_v27, %v7471_v57  ;;  %v9510_v32 = vrot.slane %v9488_v55, %v7493_v14 }
 0x333   : > { %v9490_v7 = vpop.permute.xlu1 %3381  ;;  %v9502_v58 = vpop.permute.xlu0 %3379 }
 0x334   : > { %12637 = vst [vmem:[#allocation100_spill] sm:$0xff] %v9490_v7  ;;  %12638 = vst [vmem:[#allocation71_spill] sm:$0xff] %v9496_v51  ;;  %v5129_v7 = vcombine.high %v9484_v52, %v12399_v61  ;;  %v5031_v41 = vcombine.high %v9496_v51, %v12399_v61  ;;  %v9518_v11 = vrot.slane %v9500_v37, %v7493_v14  ;;  %v12769_v51 = vld [vmem:[#allocation89_spill] sm:$0xff] }
 0x335   : > { %12639 = vst [vmem:[#allocation98_spill] sm:$0xff] %v9502_v58  ;;  %5416 = vrot.lane.b32.xlu1 %v4933_v5, %s7061_s26  ;;  %5414 = vrot.lane.b32.xlu0 %v4835_v40, %s7061_s26  ;;  %12640 = vst [vmem:[#allocation69_spill] sm:$0xff] %v9510_v32  ;;  %v3923_v5 = vcombine.high %v9242_v4, %v12399_v61  ;;  %v5325_v40 = vcombine.high %v9510_v32, %v12399_v61 }
 0x336   : > { %12642 = vst [vmem:[#allocation266_spill] sm:$0xff] %v9518_v11  ;;  %v5227_v21 = vcombine.high %v9518_v11, %v12399_v61  ;;  %v4119_v4 = vcombine.high %v9272_v9, %v12399_v61 }
 0x337   : > { %v9512_v2 = vpop.permute.xlu1 %3385  ;;  %v9520_v58 = vpop.permute.xlu0 %3383 }
 0x338   : > { %12641 = vst [vmem:[#allocation265_spill] sm:$0xff] %v9512_v2  ;;  %12643 = vst [vmem:[#allocation267_spill] sm:$0xff] %v9520_v58 }
 0x339   : > { %5420 = vrot.lane.b32.xlu1 %v5129_v7, %s7061_s26  ;;  %5418 = vrot.lane.b32.xlu0 %v5031_v41, %s7061_s26  ;;  %v9539_v41 = vrot.slane %v3923_v5, %v7493_v14  ;;  %v4315_v5 = vcombine.high %v9308_v42, %v12399_v61 }
 0x33b   : > { %v9528_v2 = vpop.permute.xlu1 %3389  ;;  %v9534_v31 = vpop.permute.xlu0 %3387 }
 0x33c   : > { %12644 = vst [vmem:[#allocation268_spill] sm:$0xff] %v9528_v2  ;;  %12645 = vst [vmem:[#allocation269_spill] sm:$0xff] %v9534_v31  ;;  %v3839_v2 = vrot.slane %v3825_v29, %v7493_v14  ;;  %v4217_v29 = vcombine.high %v9320_v16, %v12399_v61 }
 0x33d   : > { %5424 = vrot.lane.b32.xlu1 %v5325_v40, %s7061_s26  ;;  %5422 = vrot.lane.b32.xlu0 %v5227_v21, %s7061_s26  ;;  %v4133_v21 = vrot.slane %v4119_v4, %v7493_v14  ;;  %v4035_v40 = vrot.slane %v4021_v26, %v7493_v14  ;;  %v4511_v4 = vcombine.high %v9344_v18, %v12399_v61  ;;  %s6752_s26 = sshll.u32 %s12097_s5, 4  ;;  %s12204_s26 = int_to_ptr.vmem [resolvable:$true] %s6752_s26 }
 0x33e   : > { %v4231_v42 = vrot.slane %v4217_v29, %v7493_v14  ;;  %v4413_v26 = vcombine.high %v9356_v34, %v12399_v61  ;;  %v4609_v29 = vcombine.high %v9392_v30, %v12399_v61  ;;  %s6973_s19 = scalar_lea.vmem %s12204_s26, 512 }
 0x33f   : > { %v9543_v7 = vpop.permute.xlu1 %3393  ;;  %v9548_v58 = vpop.permute.xlu0 %3391  ;;  %v4525_v16 = vrot.slane %v4511_v4, %v7493_v14  ;;  %v4903_v4 = vcombine.high %v9416_v44, %v12399_v61  ;;  %p6974_p8 = scmp.ne.s32.totalorder %s12204_s26, %s6973_s19 }
 0x340   : > { %12646 = vst [vmem:[#allocation270_spill] sm:$0xff] %v9543_v7  ;;  %12647 = vst [vmem:[#allocation271_spill] sm:$0xff] %v9548_v58  ;;  %v4329_v58 = vrot.slane %v4315_v5, %v7493_v14  ;;  %v4707_v5 = vcombine.high %v9380_v6, %v12399_v61  ;;  %v4427_v18 = vrot.slane %v4413_v26, %v7493_v14 }
 0x341   : > { %5460 = vrot.lane.b32.xlu1 %v9539_v41, %s7062_s7  ;;  %5458 = vrot.lane.b32.xlu0 %v3839_v2, %s7062_s7  ;;  %v4623_v6 = vrot.slane %v4609_v29, %v7493_v14  ;;  %v4805_v26 = vcombine.high %v9428_v23, %v12399_v61  ;;  %v4917_v30 = vrot.slane %v4903_v4, %v7493_v14  ;;  %p6975_p12 = pnand %p6974_p8, %p7155_p9 }
 0x342   : > { %v4721_v34 = vrot.slane %v4707_v5, %v7493_v14  ;;  %v5099_v5 = vcombine.high %v9452_v0, %v12399_v61  ;;  %v5001_v29 = vcombine.high %v9464_v60, %v12399_v61  ;;  %v5295_v4 = vcombine.high %v9488_v55, %v12399_v61 }
 0x343   : > { %v9556_v9 = vpop.permute.xlu1 %3397  ;;  %v9561_v46 = vpop.permute.xlu0 %3395  ;;  %v4819_v44 = vrot.slane %v4805_v26, %v7493_v14  ;;  %v5197_v26 = vcombine.high %v9500_v37, %v12399_v61  ;;  %v3954_v37 = vcombine.high %v9539_v41, %v12399_v61  ;;  %p6976_p0 = pneg %p6975_p12 }
 0x344   : > { %12648 = vst [vmem:[#allocation272_spill] sm:$0xff] %v9556_v9  ;;  %12649 = vst [vmem:[#allocation273_spill] sm:$0xff] %v9561_v46  ;;  %v5113_v23 = vrot.slane %v5099_v5, %v7493_v14  ;;  %v5015_v0 = vrot.slane %v5001_v29, %v7493_v14  ;;  %v5309_v60 = vrot.slane %v5295_v4, %v7493_v14 }
 0x345   : > { %5464 = vrot.lane.b32.xlu1 %v4133_v21, %s7062_s7  ;;  %5462 = vrot.lane.b32.xlu0 %v4035_v40, %s7062_s7  ;;  %v5211_v5 = vrot.slane %v5197_v26, %v7493_v14  ;;  %v4150_v26 = vcombine.high %v4133_v21, %v12399_v61 }
 0x347   : > { %v9568_v7 = vpop.permute.xlu1 %3401  ;;  %v9573_v9 = vpop.permute.xlu0 %3399 }
 0x348   : > { %12650 = vst [vmem:[#allocation274_spill] sm:$0xff] %v9568_v7  ;;  %12651 = vst [vmem:[#allocation275_spill] sm:$0xff] %v9573_v9 }
 0x349   : > { %5468 = vrot.lane.b32.xlu1 %v4329_v58, %s7062_s7  ;;  %5466 = vrot.lane.b32.xlu0 %v4231_v42, %s7062_s7 }
 0x34b   : > { %v9580_v46 = vpop.permute.xlu1 %3405  ;;  %v9585_v7 = vpop.permute.xlu0 %3403 }
 0x34c   : > { %12652 = vst [vmem:[#allocation276_spill] sm:$0xff] %v9580_v46  ;;  %12653 = vst [vmem:[#allocation277_spill] sm:$0xff] %v9585_v7 }
 0x34d   : > { %5472 = vrot.lane.b32.xlu1 %v4525_v16, %s7062_s7  ;;  %5470 = vrot.lane.b32.xlu0 %v4427_v18, %s7062_s7 }
 0x34f   : > { %v9592_v9 = vpop.permute.xlu1 %3409  ;;  %v9597_v46 = vpop.permute.xlu0 %3407 }
 0x350   : > { %12654 = vst [vmem:[#allocation278_spill] sm:$0xff] %v9592_v9  ;;  %12655 = vst [vmem:[#allocation279_spill] sm:$0xff] %v9597_v46 }
 0x351   : > { %5476 = vrot.lane.b32.xlu1 %v4721_v34, %s7062_s7  ;;  %5474 = vrot.lane.b32.xlu0 %v4623_v6, %s7062_s7 }
 0x353   : > { %v9604_v7 = vpop.permute.xlu1 %3445  ;;  %v9609_v9 = vpop.permute.xlu0 %3443 }
 0x354   : > { %12656 = vst [vmem:[#allocation280_spill] sm:$0xff] %v9604_v7  ;;  %12657 = vst [vmem:[#allocation281_spill] sm:$0xff] %v9609_v9 }
 0x355   : > { %5480 = vrot.lane.b32.xlu1 %v4917_v30, %s7062_s7  ;;  %5478 = vrot.lane.b32.xlu0 %v4819_v44, %s7062_s7 }
 0x357   : > { %v9616_v46 = vpop.permute.xlu1 %3449  ;;  %v9621_v7 = vpop.permute.xlu0 %3447 }
 0x358   : > { %12658 = vst [vmem:[#allocation282_spill] sm:$0xff] %v9616_v46  ;;  %12659 = vst [vmem:[#allocation283_spill] sm:$0xff] %v9621_v7  ;;  %v3856_v46 = vcombine.high %v3839_v2, %v12399_v61  ;;  %v4346_v2 = vcombine.high %v4329_v58, %v12399_v61 }
 0x359   : > { %5484 = vrot.lane.b32.xlu1 %v5113_v23, %s7062_s7  ;;  %5482 = vrot.lane.b32.xlu0 %v5015_v0, %s7062_s7 }
 0x35b   : > { %v9626_v9 = vpop.permute.xlu1 %3453  ;;  %v9629_v55 = vpop.permute.xlu0 %3451 }
 0x35c   : > { %12660 = vst [vmem:[#allocation284_spill] sm:$0xff] %v9626_v9  ;;  %12661 = vst [vmem:[#allocation285_spill] sm:$0xff] %v9629_v55  ;;  %v4052_v9 = vcombine.high %v4035_v40, %v12399_v61  ;;  %v4542_v40 = vcombine.high %v4525_v16, %v12399_v61 }
 0x35d   : > { %5488 = vrot.lane.b32.xlu1 %v5309_v60, %s7062_s7  ;;  %5486 = vrot.lane.b32.xlu0 %v5211_v5, %s7062_s7 }
 0x35f   : > { %v9633_v29 = vpop.permute.xlu1 %3457  ;;  %v9637_v7 = vpop.permute.xlu0 %3455 }
 0x360   : > { %12662 = vst [vmem:[#allocation286_spill] sm:$0xff] %v9633_v29  ;;  %12663 = vst [vmem:[#allocation287_spill] sm:$0xff] %v9637_v7 }
 0x361   : > { %5524 = vrot.lane.b32.xlu1 %v3954_v37, %s7063_s8  ;;  %5522 = vrot.lane.b32.xlu0 %v3856_v46, %s7063_s8  ;;  %v4248_v46 = vcombine.high %v4231_v42, %v12399_v61  ;;  %v4738_v42 = vcombine.high %v4721_v34, %v12399_v61  ;;  %v3908_v34 = vcombine.high %v9228_v12, %v12399_v61 }
 0x362   : > { %v4104_v12 = vcombine.high %v9254_v54, %v12399_v61 }
 0x363   : > { %v9642_v4 = vpop.permute.xlu1 %3461  ;;  %v9645_v55 = vpop.permute.xlu0 %3459 }
 0x364   : > { %12664 = vst [vmem:[#allocation288_spill] sm:$0xff] %v9642_v4  ;;  %12665 = vst [vmem:[#allocation289_spill] sm:$0xff] %v9645_v55 }
 0x365   : > { %5528 = vrot.lane.b32.xlu1 %v4150_v26, %s7063_s8  ;;  %5526 = vrot.lane.b32.xlu0 %v4052_v9, %s7063_s8  ;;  %v4444_v9 = vcombine.high %v4427_v18, %v12399_v61  ;;  %v4934_v18 = vcombine.high %v4917_v30, %v12399_v61  ;;  %v5032_v30 = vcombine.high %v5015_v0, %v12399_v61 }
 0x366   : > { %v4006_v0 = vcombine.high %v9262_v48, %v12399_v61 }
 0x367   : > { %v9650_v41 = vpop.permute.xlu1 %3465  ;;  %v9653_v7 = vpop.permute.xlu0 %3463 }
 0x368   : > { %12666 = vst [vmem:[#allocation290_spill] sm:$0xff] %v9650_v41  ;;  %12667 = vst [vmem:[#allocation291_spill] sm:$0xff] %v9653_v7  ;;  %v4594_v41 = vcombine.high %v9368_v1, %v12399_v61 }
 0x369   : > { %5532 = vrot.lane.b32.xlu1 %v4346_v2, %s7063_s8  ;;  %5530 = vrot.lane.b32.xlu0 %v4248_v46, %s7063_s8  ;;  %v4640_v2 = vcombine.high %v4623_v6, %v12399_v61 }
 0x36b   : > { %v9658_v21 = vpop.permute.xlu1 %3469  ;;  %v9661_v37 = vpop.permute.xlu0 %3467 }
 0x36c   : > { %12668 = vst [vmem:[#allocation292_spill] sm:$0xff] %v9658_v21  ;;  %12669 = vst [vmem:[#allocation293_spill] sm:$0xff] %v9661_v37 }
 0x36d   : > { %5536 = vrot.lane.b32.xlu1 %v4542_v40, %s7063_s8  ;;  %5534 = vrot.lane.b32.xlu0 %v4444_v9, %s7063_s8  ;;  %v4836_v40 = vcombine.high %v4819_v44, %v12399_v61  ;;  %v5130_v9 = vcombine.high %v5113_v23, %v12399_v61  ;;  %v9695_v44 = vrot.slane %v3908_v34, %v7471_v57 }
 0x36e   : > { %v5326_v23 = vcombine.high %v5309_v60, %v12399_v61  ;;  %v9717_v60 = vrot.slane %v4104_v12, %v7471_v57  ;;  %v4300_v34 = vcombine.high %v9288_v25, %v12399_v61 }
 0x36f   : > { %v9666_v58 = vpop.permute.xlu1 %3473  ;;  %v9669_v26 = vpop.permute.xlu0 %3471  ;;  %v9714_v54 = vrot.slane %v9695_v44, %v7493_v14 }
 0x370   : > { %12670 = vst [vmem:[#allocation294_spill] sm:$0xff] %v9666_v58  ;;  %12671 = vst [vmem:[#allocation295_spill] sm:$0xff] %v9669_v26  ;;  %v9740_v25 = vrot.slane %v9717_v60, %v7493_v14  ;;  %v9743_v12 = vrot.slane %v4300_v34, %v7471_v57  ;;  %v4398_v58 = vcombine.high %v9332_v19, %v12399_v61 }
 0x371   : > { %5540 = vrot.lane.b32.xlu1 %v4738_v42, %s7063_s8  ;;  %5538 = vrot.lane.b32.xlu0 %v4640_v2, %s7063_s8  ;;  %v3810_v42 = vcombine.high %v9236_v22, %v12399_v61 }
 0x372   : > { %v9780_v7 = vrot.slane %v4398_v58, %v7471_v57  ;;  %v4888_v58 = vcombine.high %v9397_v24, %v12399_v61  ;;  %v4151_v10 = vcombine.high %v9740_v25, %v12399_v61 }
 0x373   : > { %v9674_v16 = vpop.permute.xlu1 %3509  ;;  %v9677_v46 = vpop.permute.xlu0 %3507  ;;  %v9703_v22 = vrot.slane %v3810_v42, %v7471_v57 }
 0x374   : > { %12672 = vst [vmem:[#allocation296_spill] sm:$0xff] %v9674_v16  ;;  %12673 = vst [vmem:[#allocation297_spill] sm:$0xff] %v9677_v46  ;;  %v4435_v1 = vrot.slane %v9780_v7, %v7493_v14  ;;  %v3955_v16 = vcombine.high %v9714_v54, %v12399_v61 }
 0x375   : > { %5544 = vrot.lane.b32.xlu1 %v4934_v18, %s7063_s8  ;;  %5542 = vrot.lane.b32.xlu0 %v4836_v40, %s7063_s8  ;;  %v9725_v48 = vrot.slane %v9703_v22, %v7493_v14 }
 0x377   : > { %v9684_v6 = vpop.permute.xlu1 %3513  ;;  %v9689_v2 = vpop.permute.xlu0 %3511  ;;  %v3857_v39 = vcombine.high %v9725_v48, %v12399_v61 }
 0x378   : > { %12674 = vst [vmem:[#allocation298_spill] sm:$0xff] %v9684_v6  ;;  %12675 = vst [vmem:[#allocation299_spill] sm:$0xff] %v9689_v2 }
 0x379   : > { %5548 = vrot.lane.b32.xlu1 %v5130_v9, %s7063_s8  ;;  %5546 = vrot.lane.b32.xlu0 %v5032_v30, %s7063_s8  ;;  %v5228_v9 = vcombine.high %v5211_v5, %v12399_v61  ;;  %v9728_v5 = vrot.slane %v4006_v0, %v7471_v57  ;;  %v4202_v30 = vcombine.high %v9296_v45, %v12399_v61 }
 0x37a   : > { %v4496_v0 = vcombine.high %v9325_v17, %v12399_v61  ;;  %v9766_v17 = vrot.slane %v9743_v12, %v7493_v14 }
 0x37b   : > { %v9699_v18 = vpop.permute.xlu1 %3517  ;;  %v9707_v40 = vpop.permute.xlu0 %3515  ;;  %v9751_v45 = vrot.slane %v9728_v5, %v7493_v14  ;;  %v9754_v26 = vrot.slane %v4202_v30, %v7471_v57  ;;  %v4692_v30 = vcombine.high %v9361_v50, %v12399_v61 }
 0x37c   : > { %12676 = vst [vmem:[#allocation300_spill] sm:$0xff] %v9699_v18  ;;  %12677 = vst [vmem:[#allocation301_spill] sm:$0xff] %v9707_v40  ;;  %v9769_v34 = vrot.slane %v4496_v0, %v7471_v57 }
 0x37d   : > { %5552 = vrot.lane.b32.xlu1 %v5326_v23, %s7063_s8  ;;  %5550 = vrot.lane.b32.xlu0 %v5228_v9, %s7063_s8  ;;  %v9777_v19 = vrot.slane %v9754_v26, %v7493_v14  ;;  %v9795_v0 = vrot.slane %v4692_v30, %v7471_v57  ;;  %v9816_v30 = vrot.slane %v4888_v58, %v7471_v57 }
 0x37e   : > { %v9792_v50 = vrot.slane %v9769_v34, %v7493_v14  ;;  %v4053_v11 = vcombine.high %v9751_v45, %v12399_v61 }
 0x37f   : > { %v9721_v42 = vpop.permute.xlu1 %3521  ;;  %v9732_v23 = vpop.permute.xlu0 %3519  ;;  %v4729_v24 = vrot.slane %v9795_v0, %v7493_v14 }
 0x380   : > { %12678 = vst [vmem:[#allocation302_spill] sm:$0xff] %v9721_v42  ;;  %12679 = vst [vmem:[#allocation303_spill] sm:$0xff] %v9732_v23  ;;  %v4986_v23 = vcombine.high %v9440_v38, %v12399_v61  ;;  %v5182_v42 = vcombine.high %v9476_v27, %v12399_v61 }
 0x381   : > { %5588 = vrot.lane.b32.xlu1 %v9714_v54, %s7064_s9  ;;  %5586 = vrot.lane.b32.xlu0 %v9725_v48, %s7064_s9  ;;  %v4249_v48 = vcombine.high %v9777_v19, %v12399_v61 }
 0x382   : > { %v9863_v29 = vrot.slane %v5182_v42, %v7471_v57 }
 0x383   : > { %v9747_v9 = vpop.permute.xlu1 %3525  ;;  %v9758_v37 = vpop.permute.xlu0 %3523 }
 0x384   : > { %12680 = vst [vmem:[#allocation304_spill] sm:$0xff] %v9747_v9  ;;  %12681 = vst [vmem:[#allocation305_spill] sm:$0xff] %v9758_v37  ;;  %v4790_v9 = vcombine.high %v9404_v13, %v12399_v61 }
 0x385   : > { %5592 = vrot.lane.b32.xlu1 %v9740_v25, %s7064_s9  ;;  %5590 = vrot.lane.b32.xlu0 %v9751_v45, %s7064_s9  ;;  %v4445_v45 = vcombine.high %v4435_v1, %v12399_v61 }
 0x387   : > { %v9773_v21 = vpop.permute.xlu1 %3529  ;;  %v9784_v37 = vpop.permute.xlu0 %3527 }
 0x388   : > { %12682 = vst [vmem:[#allocation306_spill] sm:$0xff] %v9773_v21  ;;  %12683 = vst [vmem:[#allocation307_spill] sm:$0xff] %v9784_v37  ;;  %v9804_v37 = vrot.slane %v4594_v41, %v7471_v57  ;;  %v5084_v41 = vcombine.high %v9433_v53, %v12399_v61  ;;  %v4925_v53 = vrot.slane %v9816_v30, %v7493_v14 }
 0x389   : > { %5596 = vrot.lane.b32.xlu1 %v9766_v17, %s7064_s9  ;;  %5594 = vrot.lane.b32.xlu0 %v9777_v19, %s7064_s9  ;;  %v4739_v19 = vcombine.high %v4729_v24, %v12399_v61 }
 0x38a   : > { %v4631_v13 = vrot.slane %v9804_v37, %v7493_v14  ;;  %v9836_v58 = vrot.slane %v5084_v41, %v7471_v57 }
 0x38b   : > { %v9799_v21 = vpop.permute.xlu1 %3533  ;;  %v9808_v55 = vpop.permute.xlu0 %3531 }
 0x38c   : > { %12684 = vst [vmem:[#allocation308_spill] sm:$0xff] %v9799_v21  ;;  %12685 = vst [vmem:[#allocation309_spill] sm:$0xff] %v9808_v55  ;;  %v9825_v55 = vrot.slane %v4790_v9, %v7471_v57 }
 0x38d   : > { %5600 = vrot.lane.b32.xlu1 %v9792_v50, %s7064_s9  ;;  %5598 = vrot.lane.b32.xlu0 %v4435_v1, %s7064_s9  ;;  %v4935_v1 = vcombine.high %v4925_v53, %v12399_v61 }
 0x38e   : > { %v4827_v38 = vrot.slane %v9825_v55, %v7493_v14 }
 0x38f   : > { %v9820_v21 = vpop.permute.xlu1 %3537  ;;  %v9829_v4 = vpop.permute.xlu0 %3535 }
 0x390   : > { %12686 = vst [vmem:[#allocation310_spill] sm:$0xff] %v9820_v21  ;;  %12687 = vst [vmem:[#allocation311_spill] sm:$0xff] %v9829_v4  ;;  %v5280_v21 = vcombine.high %v9469_v36, %v12399_v61  ;;  %v9845_v4 = vrot.slane %v4986_v23, %v7471_v57  ;;  %v5121_v36 = vrot.slane %v9836_v58, %v7493_v14 }
 0x391   : > { %5604 = vrot.lane.b32.xlu1 %v4729_v24, %s7064_s9  ;;  %5602 = vrot.lane.b32.xlu0 %v4631_v13, %s7064_s9 }
 0x392   : > { %v9856_v41 = vrot.slane %v5280_v21, %v7471_v57  ;;  %v5023_v23 = vrot.slane %v9845_v4, %v7493_v14  ;;  %v5219_v21 = vrot.slane %v9863_v29, %v7493_v14 }
 0x393   : > { %v9840_v9 = vpop.permute.xlu1 %5396  ;;  %v9849_v40 = vpop.permute.xlu0 %5394 }
 0x394   : > { %v5317_v2 = vrot.slane %v9856_v41, %v7493_v14 }
 0x395   : > { %5608 = vrot.lane.b32.xlu1 %v4925_v53, %s7064_s9  ;;  %5606 = vrot.lane.b32.xlu0 %v4827_v38, %s7064_s9  ;;  %v3938_v53 = vcombine.high %v9695_v44, %v12399_v61 }
 0x397   : > { %v9858_v18 = vpop.permute.xlu1 %5400  ;;  %v9865_v27 = vpop.permute.xlu0 %5398  ;;  %v3952_v44 = vrot.slane %v3938_v53, %v7493_v14  ;;  %v4232_v53 = vcombine.high %v9754_v26, %v12399_v61 }
 0x398   : > { %12688 = vst [vmem:[#allocation312_spill] sm:$0xff] %v9865_v27 }
 0x399   : > { %5612 = vrot.lane.b32.xlu1 %v5121_v36, %s7064_s9  ;;  %5610 = vrot.lane.b32.xlu0 %v5023_v23, %s7064_s9  ;;  %v4246_v26 = vrot.slane %v4232_v53, %v7493_v14  ;;  %v4918_v53 = vcombine.high %v9816_v30, %v12399_v61 }
 0x39b   : > { %v9871_v6 = vpop.permute.xlu1 %5404  ;;  %v9875_v46 = vpop.permute.xlu0 %5402  ;;  %v4932_v30 = vrot.slane %v4918_v53, %v7493_v14  ;;  %v5212_v53 = vcombine.high %v9863_v29, %v12399_v61 }
 0x39c   : > { %12689 = vst [vmem:[#allocation313_spill] sm:$0xff] %v9871_v6  ;;  %12690 = vst [vmem:[#allocation314_spill] sm:$0xff] %v9875_v46 }
 0x39d   : > { %5616 = vrot.lane.b32.xlu1 %v5317_v2, %s7064_s9  ;;  %5614 = vrot.lane.b32.xlu0 %v5219_v21, %s7064_s9 }
 0x39f   : > { %v9879_v42 = vpop.permute.xlu1 %5408  ;;  %v9883_v31 = vpop.permute.xlu0 %5406 }
 0x3a0   : > { %12691 = vst [vmem:[#allocation315_spill] sm:$0xff] %v9879_v42  ;;  %12692 = vst [vmem:[#allocation316_spill] sm:$0xff] %v9883_v31  ;;  %v12782_v31 = vld [vmem:[#allocation68_spill] sm:$0xff] }
 0x3a1   : > { %5652 = vrot.lane.b32.xlu1 %v3955_v16, %s7065_s10  ;;  %5650 = vrot.lane.b32.xlu0 %v3857_v39, %s7065_s10  ;;  %v4347_v16 = vcombine.high %v9766_v17, %v12399_v61  ;;  %v10320_v49 = vsel %vm610_vm0, %v12782_v31, %v12781_v35 }
 0x3a2   : > { %v10336_v31 = vrot.slane %v10320_v49, %v7471_v57 }
 0x3a3   : > { %v9889_v56 = vpop.permute.xlu1 %5412  ;;  %v9893_v15 = vpop.permute.xlu0 %5410 }
 0x3a4   : > { %12693 = vst [vmem:[#allocation317_spill] sm:$0xff] %v9889_v56  ;;  %12694 = vst [vmem:[#allocation318_spill] sm:$0xff] %v9893_v15 }
 0x3a5   : > { %5656 = vrot.lane.b32.xlu1 %v4151_v10, %s7065_s10  ;;  %5654 = vrot.lane.b32.xlu0 %v4053_v11, %s7065_s10  ;;  %v4543_v10 = vcombine.high %v9792_v50, %v12399_v61 }
 0x3a7   : > { %v9899_v54 = vpop.permute.xlu1 %5416  ;;  %v9903_v39 = vpop.permute.xlu0 %5414 }
 0x3a8   : > { %12695 = vst [vmem:[#allocation319_spill] sm:$0xff] %v9899_v54  ;;  %12696 = vst [vmem:[#allocation320_spill] sm:$0xff] %v9903_v39  ;;  %v12776_v54 = vld [vmem:[#allocation64_spill] sm:$0xff] }
 0x3a9   : > { %5660 = vrot.lane.b32.xlu1 %v4347_v16, %s7065_s10  ;;  %5658 = vrot.lane.b32.xlu0 %v4249_v48, %s7065_s10  ;;  %v4641_v48 = vcombine.high %v4631_v13, %v12399_v61  ;;  %v5131_v13 = vcombine.high %v5121_v36, %v12399_v61  ;;  %v5229_v36 = vcombine.high %v5219_v21, %v12399_v61 }
 0x3aa   : > { %v4330_v21 = vcombine.high %v9743_v12, %v12399_v61  ;;  %v10292_v33 = vsel %vm610_vm0, %v12776_v54, %v12775_v59  ;;  %v12778_v54 = vld [vmem:[#allocation99_spill] sm:$0xff] }
 0x3ab   : > { %v9909_v25 = vpop.permute.xlu1 %5420  ;;  %v9913_v11 = vpop.permute.xlu0 %5418  ;;  %v10308_v59 = vrot.slane %v10292_v33, %v7471_v57 }
 0x3ac   : > { %12697 = vst [vmem:[#allocation321_spill] sm:$0xff] %v9909_v25  ;;  %12698 = vst [vmem:[#allocation322_spill] sm:$0xff] %v9913_v11  ;;  %v4344_v12 = vrot.slane %v4330_v21, %v7493_v14  ;;  %v4624_v21 = vcombine.high %v9804_v37, %v12399_v61  ;;  %v12770_v11 = vld [vmem:[#allocation60_spill] sm:$0xff] }
 0x3ad   : > { %5664 = vrot.lane.b32.xlu1 %v4543_v10, %s7065_s10  ;;  %5662 = vrot.lane.b32.xlu0 %v4445_v45, %s7065_s10  ;;  %v4837_v10 = vcombine.high %v4827_v38, %v12399_v61  ;;  %v10264_v52 = vsel %vm610_vm0, %v12770_v11, %v12769_v51  ;;  %v12772_v11 = vld [vmem:[#allocation95_spill] sm:$0xff] }
 0x3ae   : > { %v4638_v37 = vrot.slane %v4624_v21, %v7493_v14  ;;  %v5310_v21 = vcombine.high %v9856_v41, %v12399_v61  ;;  %v10280_v51 = vrot.slane %v10264_v52, %v7471_v57 }
 0x3af   : > { %v9918_v17 = vpop.permute.xlu1 %5424  ;;  %v9921_v16 = vpop.permute.xlu0 %5422 }
 0x3b0   : > { %12699 = vst [vmem:[#allocation323_spill] sm:$0xff] %v9918_v17  ;;  %12700 = vst [vmem:[#allocation324_spill] sm:$0xff] %v9921_v16 }
 0x3b1   : > { %5668 = vrot.lane.b32.xlu1 %v4739_v19, %s7065_s10  ;;  %5666 = vrot.lane.b32.xlu0 %v4641_v48, %s7065_s10  ;;  %v5033_v19 = vcombine.high %v5023_v23, %v12399_v61  ;;  %v5327_v48 = vcombine.high %v5317_v2, %v12399_v61  ;;  %v4134_v23 = vcombine.high %v9717_v60, %v12399_v61 }
 0x3b2   : > { %v4036_v2 = vcombine.high %v9728_v5, %v12399_v61 }
 0x3b3   : > { %v9926_v50 = vpop.permute.xlu1 %5460  ;;  %v9929_v32 = vpop.permute.xlu0 %5458  ;;  %v4148_v60 = vrot.slane %v4134_v23, %v7493_v14  ;;  %v4428_v23 = vcombine.high %v9780_v7, %v12399_v61 }
 0x3b4   : > { %12701 = vst [vmem:[#allocation325_spill] sm:$0xff] %v9926_v50  ;;  %12702 = vst [vmem:[#allocation326_spill] sm:$0xff] %v9929_v32  ;;  %v4050_v5 = vrot.slane %v4036_v2, %v7493_v14  ;;  %v4722_v2 = vcombine.high %v9795_v0, %v12399_v61  ;;  %v12767_v50 = vld [vmem:[#allocation62_spill] sm:$0xff] }
 0x3b5   : > { %5672 = vrot.lane.b32.xlu1 %v4935_v1, %s7065_s10  ;;  %5670 = vrot.lane.b32.xlu0 %v4837_v10, %s7065_s10  ;;  %v3840_v1 = vcombine.high %v9703_v22, %v12399_v61  ;;  %v4442_v7 = vrot.slane %v4428_v23, %v7493_v14  ;;  %v5114_v23 = vcombine.high %v9836_v58, %v12399_v61 }
 0x3b6   : > { %v4736_v0 = vrot.slane %v4722_v2, %v7493_v14  ;;  %v5016_v2 = vcombine.high %v9845_v4, %v12399_v61 }
 0x3b7   : > { %v9934_v24 = vpop.permute.xlu1 %5464  ;;  %v9937_v45 = vpop.permute.xlu0 %5462  ;;  %v3854_v22 = vrot.slane %v3840_v1, %v7493_v14  ;;  %v4526_v1 = vcombine.high %v9769_v34, %v12399_v61  ;;  %v5128_v58 = vrot.slane %v5114_v23, %v7493_v14  ;;  %v3956_v23 = vcombine.high %v3952_v44, %v12399_v61 }
 0x3b8   : > { %12703 = vst [vmem:[#allocation327_spill] sm:$0xff] %v9934_v24  ;;  %12704 = vst [vmem:[#allocation328_spill] sm:$0xff] %v9937_v45  ;;  %v5030_v4 = vrot.slane %v5016_v2, %v7493_v14  ;;  %v12763_v45 = vld [vmem:[#allocation85_spill] sm:$0xff] }
 0x3b9   : > { %5676 = vrot.lane.b32.xlu1 %v5131_v13, %s7065_s10  ;;  %5674 = vrot.lane.b32.xlu0 %v5033_v19, %s7065_s10  ;;  %v4540_v34 = vrot.slane %v4526_v1, %v7493_v14  ;;  %v4820_v1 = vcombine.high %v9825_v55, %v12399_v61  ;;  %v12764_v24 = vld [vmem:[#allocation53_spill] sm:$0xff] }
 0x3ba   : > { %v10234_v32 = vsel %vm610_vm0, %v12764_v24, %v12763_v45  ;;  %v12766_v45 = vld [vmem:[#allocation91_spill] sm:$0xff] }
 0x3bb   : > { %v9944_v38 = vpop.permute.xlu1 %5468  ;;  %v9949_v10 = vpop.permute.xlu0 %5466  ;;  %v4834_v55 = vrot.slane %v4820_v1, %v7493_v14  ;;  %v10252_v24 = vrot.slane %v10234_v32, %v7471_v57  ;;  %v10257_v16 = vsel %vm610_vm0, %v12767_v50, %v12766_v45 }
 0x3bc   : > { %12705 = vst [vmem:[#allocation329_spill] sm:$0xff] %v9944_v38  ;;  %12706 = vst [vmem:[#allocation330_spill] sm:$0xff] %v9949_v10  ;;  %v10272_v25 = vrot.slane %v10257_v16, %v7471_v57 }
 0x3bd   : > { %5680 = vrot.lane.b32.xlu1 %v5327_v48, %s7065_s10  ;;  %5678 = vrot.lane.b32.xlu0 %v5229_v36, %s7065_s10  ;;  %v4665_v45 = vrot.slane %v10252_v24, %v7493_v14  ;;  %s12202_s10 = scalar_lea.hbm %s12258_s3, %s6861_s6 }
 0x3bf   : > { %v9956_v13 = vpop.permute.xlu1 %5472  ;;  %v9961_v19 = vpop.permute.xlu0 %5470 }
 0x3c0   : > { %12707 = vst [vmem:[#allocation331_spill] sm:$0xff] %v9956_v13  ;;  %12708 = vst [vmem:[#allocation332_spill] sm:$0xff] %v9961_v19  ;;  %v12761_v13 = vld [vmem:[#allocation57_spill] sm:$0xff] }
 0x3c1   : > { %5716 = vrot.lane.b32.xlu1 %v3952_v44, %s7066_s11  ;;  %5714 = vrot.lane.b32.xlu0 %v3854_v22, %s7066_s11 }
 0x3c3   : > { %v9968_v48 = vpop.permute.xlu1 %5476  ;;  %v9973_v36 = vpop.permute.xlu0 %5474 }
 0x3c4   : > { %12709 = vst [vmem:[#allocation333_spill] sm:$0xff] %v9968_v48  ;;  %12710 = vst [vmem:[#allocation334_spill] sm:$0xff] %v9973_v36 }
 0x3c5   : > { %5720 = vrot.lane.b32.xlu1 %v4148_v60, %s7066_s11  ;;  %5718 = vrot.lane.b32.xlu0 %v4050_v5, %s7066_s11 }
 0x3c7   : > { %v9980_v19 = vpop.permute.xlu1 %5480  ;;  %v9985_v48 = vpop.permute.xlu0 %5478 }
 0x3c8   : > { %12711 = vst [vmem:[#allocation335_spill] sm:$0xff] %v9980_v19  ;;  %12712 = vst [vmem:[#allocation336_spill] sm:$0xff] %v9985_v48 }
 0x3c9   : > { %5724 = vrot.lane.b32.xlu1 %v4344_v12, %s7066_s11  ;;  %5722 = vrot.lane.b32.xlu0 %v4246_v26, %s7066_s11 }
 0x3cb   : > { %v9992_v36 = vpop.permute.xlu1 %5484  ;;  %v9997_v19 = vpop.permute.xlu0 %5482 }
 0x3cc   : > { %12713 = vst [vmem:[#allocation337_spill] sm:$0xff] %v9992_v36  ;;  %12714 = vst [vmem:[#allocation338_spill] sm:$0xff] %v9997_v19 }
 0x3cd   : > { %5728 = vrot.lane.b32.xlu1 %v4540_v34, %s7066_s11  ;;  %5726 = vrot.lane.b32.xlu0 %v4442_v7, %s7066_s11 }
 0x3cf   : > { %v10004_v48 = vpop.permute.xlu1 %5488  ;;  %v10009_v36 = vpop.permute.xlu0 %5486 }
 0x3d0   : > { %12715 = vst [vmem:[#allocation339_spill] sm:$0xff] %v10004_v48  ;;  %12716 = vst [vmem:[#allocation340_spill] sm:$0xff] %v10009_v36 }
 0x3d1   : > { %5732 = vrot.lane.b32.xlu1 %v4736_v0, %s7066_s11  ;;  %5730 = vrot.lane.b32.xlu0 %v4638_v37, %s7066_s11 }
 0x3d3   : > { %v10016_v19 = vpop.permute.xlu1 %5524  ;;  %v10021_v48 = vpop.permute.xlu0 %5522 }
 0x3d4   : > { %12717 = vst [vmem:[#allocation341_spill] sm:$0xff] %v10016_v19  ;;  %12718 = vst [vmem:[#allocation342_spill] sm:$0xff] %v10021_v48  ;;  %v5324_v48 = vrot.slane %v5310_v21, %v7493_v14 }
 0x3d5   : > { %5736 = vrot.lane.b32.xlu1 %v4932_v30, %s7066_s11  ;;  %5734 = vrot.lane.b32.xlu0 %v4834_v55, %s7066_s11 }
 0x3d7   : > { %v10028_v36 = vpop.permute.xlu1 %5528  ;;  %v10033_v19 = vpop.permute.xlu0 %5526 }
 0x3d8   : > { %12719 = vst [vmem:[#allocation343_spill] sm:$0xff] %v10028_v36  ;;  %12720 = vst [vmem:[#allocation344_spill] sm:$0xff] %v10033_v19  ;;  %v5226_v36 = vrot.slane %v5212_v53, %v7493_v14  ;;  %v3858_v19 = vcombine.high %v3854_v22, %v12399_v61  ;;  %v4152_v53 = vcombine.high %v4148_v60, %v12399_v61 }
 0x3d9   : > { %5740 = vrot.lane.b32.xlu1 %v5128_v58, %s7066_s11  ;;  %5738 = vrot.lane.b32.xlu0 %v5030_v4, %s7066_s11  ;;  %v4348_v22 = vcombine.high %v4344_v12, %v12399_v61 }
 0x3db   : > { %v10038_v1 = vpop.permute.xlu1 %5532  ;;  %v10041_v41 = vpop.permute.xlu0 %5530 }
 0x3dc   : > { %12721 = vst [vmem:[#allocation345_spill] sm:$0xff] %v10038_v1  ;;  %12722 = vst [vmem:[#allocation346_spill] sm:$0xff] %v10041_v41  ;;  %v4054_v1 = vcombine.high %v4050_v5, %v12399_v61  ;;  %v4544_v5 = vcombine.high %v4540_v34, %v12399_v61 }
 0x3dd   : > { %5744 = vrot.lane.b32.xlu1 %v5324_v48, %s7066_s11  ;;  %5742 = vrot.lane.b32.xlu0 %v5226_v36, %s7066_s11  ;;  %s6737_s11 = scalar_lea.sflag [#allocation6], %s7188_s24 }
 0x3df   : > { %v10046_v29 = vpop.permute.xlu1 %5536  ;;  %v10049_v2 = vpop.permute.xlu0 %5534 }
 0x3e0   : > { %12723 = vst [vmem:[#allocation347_spill] sm:$0xff] %v10046_v29  ;;  %12724 = vst [vmem:[#allocation348_spill] sm:$0xff] %v10049_v2 }
 0x3e1   : > { %5780 = vrot.lane.b32.xlu1 %v3956_v23, %s7067_s12  ;;  %5778 = vrot.lane.b32.xlu0 %v3858_v19, %s7067_s12  ;;  %v4250_v19 = vcombine.high %v4246_v26, %v12399_v61  ;;  %v4740_v26 = vcombine.high %v4736_v0, %v12399_v61 }
 0x3e3   : > { %v10054_v21 = vpop.permute.xlu1 %5540  ;;  %v10057_v41 = vpop.permute.xlu0 %5538 }
 0x3e4   : > { %12725 = vst [vmem:[#allocation349_spill] sm:$0xff] %v10054_v21  ;;  %12726 = vst [vmem:[#allocation350_spill] sm:$0xff] %v10057_v41  ;;  %v12757_v21 = vld [vmem:[#allocation81_spill] sm:$0xff] }
 0x3e5   : > { %5784 = vrot.lane.b32.xlu1 %v4152_v53, %s7067_s12  ;;  %5782 = vrot.lane.b32.xlu0 %v4054_v1, %s7067_s12  ;;  %v4446_v1 = vcombine.high %v4442_v7, %v12399_v61  ;;  %v4936_v7 = vcombine.high %v4932_v30, %v12399_v61  ;;  %v5034_v30 = vcombine.high %v5030_v4, %v12399_v61 }
 0x3e7   : > { %v10062_v44 = vpop.permute.xlu1 %5544  ;;  %v10065_v2 = vpop.permute.xlu0 %5542 }
 0x3e8   : > { %12727 = vst [vmem:[#allocation351_spill] sm:$0xff] %v10062_v44  ;;  %12728 = vst [vmem:[#allocation352_spill] sm:$0xff] %v10065_v2  ;;  %v12755_v44 = vld [vmem:[#allocation49_spill] sm:$0xff] }
 0x3e9   : > { %5788 = vrot.lane.b32.xlu1 %v4348_v22, %s7067_s12  ;;  %5786 = vrot.lane.b32.xlu0 %v4250_v19, %s7067_s12  ;;  %v4642_v22 = vcombine.high %v4638_v37, %v12399_v61  ;;  %v5132_v37 = vcombine.high %v5128_v58, %v12399_v61 }
 0x3eb   : > { %v10070_v60 = vpop.permute.xlu1 %5548  ;;  %v10073_v23 = vpop.permute.xlu0 %5546 }
 0x3ec   : > { %12729 = vst [vmem:[#allocation353_spill] sm:$0xff] %v10070_v60  ;;  %12730 = vst [vmem:[#allocation354_spill] sm:$0xff] %v10073_v23  ;;  %v12740_v23 = vld [vmem:[#allocation26_spill] sm:$0xff]  ;;  %v12752_v60 = vld [vmem:[#allocation37_spill] sm:$0xff] }
 0x3ed   : > { %5792 = vrot.lane.b32.xlu1 %v4544_v5, %s7067_s12  ;;  %5790 = vrot.lane.b32.xlu0 %v4446_v1, %s7067_s12  ;;  %v4838_v5 = vcombine.high %v4834_v55, %v12399_v61  ;;  %v12736_v1 = vld [vmem:[#allocation73_spill] sm:$0xff] }
 0x3ef   : > { %v10078_v12 = vpop.permute.xlu1 %5552  ;;  %v10081_v53 = vpop.permute.xlu0 %5550 }
 0x3f0   : > { %12731 = vst [vmem:[#allocation355_spill] sm:$0xff] %v10078_v12  ;;  %12732 = vst [vmem:[#allocation356_spill] sm:$0xff] %v10081_v53  ;;  %v12758_v12 = vld [vmem:[#allocation45_spill] sm:$0xff] }
 0x3f1   : > { %5796 = vrot.lane.b32.xlu1 %v4740_v26, %s7067_s12  ;;  %5794 = vrot.lane.b32.xlu0 %v4642_v22, %s7067_s12  ;;  %v12737_v26 = vld [vmem:[#allocation28_spill] sm:$0xff]  ;;  %v10200_v29 = vsel %vm610_vm0, %v12758_v12, %v12757_v21 }
 0x3f2   : > { %v10100_v22 = vsel %vm610_vm0, %v12737_v26, %v12736_v1  ;;  %v12742_v1 = vld [vmem:[#allocation76_spill] sm:$0xff]  ;;  %v12743_v26 = vld [vmem:[#allocation34_spill] sm:$0xff]  ;;  %v10222_v12 = vrot.slane %v10200_v29, %v7471_v57 }
 0x3f3   : > { %v10086_v34 = vpop.permute.xlu1 %5588  ;;  %v10089_v19 = vpop.permute.xlu0 %5586  ;;  %v10114_v58 = vrot.slane %v10100_v22, %v7471_v57 }
 0x3f4   : > { %12733 = vst [vmem:[#allocation357_spill] sm:$0xff] %v10086_v34  ;;  %12734 = vst [vmem:[#allocation358_spill] sm:$0xff] %v10089_v19  ;;  %v12739_v19 = vld [vmem:[#allocation72_spill] sm:$0xff] }
 0x3f5   : > { %5800 = vrot.lane.b32.xlu1 %v4936_v7, %s7067_s12  ;;  %5798 = vrot.lane.b32.xlu0 %v4838_v5, %s7067_s12  ;;  %v10108_v55 = vsel %vm610_vm0, %v12740_v23, %v12739_v19  ;;  %v5328_v5 = vcombine.high %v5324_v48, %v12399_v61  ;;  %v10126_v23 = vsel %vm610_vm0, %v12743_v26, %v12742_v1 }
 0x3f6   : > { %v10121_v4 = vrot.slane %v10108_v55, %v7471_v57  ;;  %v10140_v48 = vrot.slane %v10114_v58, %v7493_v14  ;;  %v10144_v1 = vrot.slane %v10126_v23, %v7471_v57 }
 0x3f7   : > { %v10094_v0 = vpop.permute.xlu1 %5592  ;;  %v10102_v34 = vpop.permute.xlu0 %5590 }
 0x3f8   : > { %12735 = vst [vmem:[#allocation359_spill] sm:$0xff] %v10094_v0  ;;  %12738 = vst [vmem:[#allocation73_spill] sm:$0xff] %v10102_v34  ;;  %v12746_v34 = vld [vmem:[#allocation30_spill] sm:$0xff] }
 0x3f9   : > { %5804 = vrot.lane.b32.xlu1 %v5132_v37, %s7067_s12  ;;  %5802 = vrot.lane.b32.xlu0 %v5034_v30, %s7067_s12  ;;  %v5230_v37 = vcombine.high %v5226_v36, %v12399_v61  ;;  %v12745_v30 = vld [vmem:[#allocation74_spill] sm:$0xff]  ;;  %v10150_v36 = vrot.slane %v10121_v4, %v7493_v14 }
 0x3fa   : > { %v10134_v0 = vsel %vm610_vm0, %v12746_v34, %v12745_v30 }
 0x3fb   : > { %v10116_v7 = vpop.permute.xlu1 %5596  ;;  %v10128_v19 = vpop.permute.xlu0 %5594  ;;  %v10154_v34 = vrot.slane %v10134_v0, %v7471_v57  ;;  %v3904_v6 = vcombine.high %v10150_v36, %v12399_v61 }
 0x3fc   : > { %12741 = vst [vmem:[#allocation28_spill] sm:$0xff] %v10116_v7  ;;  %12744 = vst [vmem:[#allocation72_spill] sm:$0xff] %v10128_v19  ;;  %v12751_v7 = vld [vmem:[#allocation77_spill] sm:$0xff] }
 0x3fd   : > { %5808 = vrot.lane.b32.xlu1 %v5328_v5, %s7067_s12  ;;  %5806 = vrot.lane.b32.xlu0 %v5230_v37, %s7067_s12  ;;  %v12748_v5 = vld [vmem:[#allocation79_spill] sm:$0xff]  ;;  %v12749_v37 = vld [vmem:[#allocation41_spill] sm:$0xff]  ;;  %v10166_v2 = vsel %vm610_vm0, %v12752_v60, %v12751_v7  ;;  %v10184_v60 = vrot.slane %v10154_v34, %v7493_v14  ;;  %s7076_s12 = smov [#allocation7]  }
 0x3fe   : > { %v10159_v30 = vsel %vm610_vm0, %v12749_v37, %v12748_v5  ;;  %v10188_v7 = vrot.slane %v10166_v2, %v7471_v57 }
 0x3ff   : > { %v10146_v26 = vpop.permute.xlu1 %5600  ;;  %v10161_v19 = vpop.permute.xlu0 %5598  ;;  %v10178_v5 = vrot.slane %v10159_v30, %v7471_v57  ;;  %v4100_v27 = vcombine.high %v10184_v60, %v12399_v61 }
 0x400   : > { %12747 = vst [vmem:[#allocation26_spill] sm:$0xff] %v10146_v26  ;;  %12750 = vst [vmem:[#allocation76_spill] sm:$0xff] %v10161_v19  ;;  %v10174_v26 = vrot.slane %v10144_v1, %v7493_v14  ;;  %v12754_v19 = vld [vmem:[#allocation83_spill] sm:$0xff]  ;;  %v10218_v21 = vrot.slane %v10188_v7, %v7493_v14 }
 0x401   : > { %5844 = vrot.lane.b32.xlu1 %v10140_v48, %s7068_s13  ;;  %5842 = vrot.lane.b32.xlu0 %v10150_v36, %s7068_s13  ;;  %v10193_v41 = vsel %vm610_vm0, %v12755_v44, %v12754_v19 }
 0x402   : > { %v10212_v44 = vrot.slane %v10193_v41, %v7471_v57 }
 0x403   : > { %v10180_v37 = vpop.permute.xlu1 %5604  ;;  %v10195_v53 = vpop.permute.xlu0 %5602 }
 0x404   : > { %12753 = vst [vmem:[#allocation34_spill] sm:$0xff] %v10180_v37  ;;  %12756 = vst [vmem:[#allocation74_spill] sm:$0xff] %v10195_v53  ;;  %v10208_v37 = vrot.slane %v10178_v5, %v7493_v14  ;;  %v12760_v53 = vld [vmem:[#allocation87_spill] sm:$0xff] }
 0x405   : > { %5848 = vrot.lane.b32.xlu1 %v10174_v26, %s7068_s13  ;;  %5846 = vrot.lane.b32.xlu0 %v10184_v60, %s7068_s13  ;;  %v10227_v10 = vsel %vm610_vm0, %v12761_v13, %v12760_v53 }
 0x406   : > { %v10244_v13 = vrot.slane %v10227_v10, %v7471_v57  ;;  %v4394_v36 = vcombine.high %v10208_v37, %v12399_v61 }
 0x407   : > { %v10214_v19 = vpop.permute.xlu1 %5608  ;;  %v10229_v38 = vpop.permute.xlu0 %5606 }
 0x408   : > { %12759 = vst [vmem:[#allocation30_spill] sm:$0xff] %v10214_v19  ;;  %12762 = vst [vmem:[#allocation79_spill] sm:$0xff] %v10229_v38  ;;  %v4567_v19 = vrot.slane %v10212_v44, %v7493_v14  ;;  %v4469_v38 = vrot.slane %v10222_v12, %v7493_v14 }
 0x409   : > { %5852 = vrot.lane.b32.xlu1 %v10208_v37, %s7068_s13  ;;  %5850 = vrot.lane.b32.xlu0 %v10218_v21, %s7068_s13 }
 0x40a   : > { %v4590_v60 = vcombine.high %v4567_v19, %v12399_v61 }
 0x40b   : > { %v10246_v53 = vpop.permute.xlu1 %5612  ;;  %v10259_v17 = vpop.permute.xlu0 %5610 }
 0x40c   : > { %12765 = vst [vmem:[#allocation41_spill] sm:$0xff] %v10246_v53  ;;  %12768 = vst [vmem:[#allocation77_spill] sm:$0xff] %v10259_v17  ;;  %v4763_v53 = vrot.slane %v10244_v13, %v7493_v14  ;;  %v12773_v17 = vld [vmem:[#allocation66_spill] sm:$0xff] }
 0x40d   : > { %5856 = vrot.lane.b32.xlu1 %v4567_v19, %s7068_s13  ;;  %5854 = vrot.lane.b32.xlu0 %v4469_v38, %s7068_s13  ;;  %v10285_v3 = vsel %vm610_vm0, %v12773_v17, %v12772_v11  ;;  %v4861_v11 = vrot.slane %v10280_v51, %v7493_v14 }
 0x40e   : > { %v10300_v15 = vrot.slane %v10285_v3, %v7471_v57  ;;  %v4786_v37 = vcombine.high %v4763_v53, %v12399_v61 }
 0x40f   : > { %v10274_v50 = vpop.permute.xlu1 %5616  ;;  %v10287_v39 = vpop.permute.xlu0 %5614 }
 0x410   : > { %12771 = vst [vmem:[#allocation37_spill] sm:$0xff] %v10274_v50  ;;  %12774 = vst [vmem:[#allocation83_spill] sm:$0xff] %v10287_v39  ;;  %v4959_v50 = vrot.slane %v10272_v25, %v7493_v14  ;;  %v12779_v39 = vld [vmem:[#allocation70_spill] sm:$0xff] }
 0x411   : > { %5860 = vrot.lane.b32.xlu1 %v4763_v53, %s7068_s13  ;;  %5858 = vrot.lane.b32.xlu0 %v4665_v45, %s7068_s13  ;;  %v10313_v20 = vsel %vm610_vm0, %v12779_v39, %v12778_v54  ;;  %v5057_v54 = vrot.slane %v10308_v59, %v7493_v14  ;;  %vm6626_vm0 = vcmask 1040384  }
 0x412   : > { %v10328_v42 = vrot.slane %v10313_v20, %v7471_v57 }
 0x413   : > { %v10302_v17 = vpop.permute.xlu1 %5652  ;;  %v10315_v56 = vpop.permute.xlu0 %5650 }
 0x414   : > { %12777 = vst [vmem:[#allocation49_spill] sm:$0xff] %v10302_v17  ;;  %12780 = vst [vmem:[#allocation81_spill] sm:$0xff] %v10315_v56  ;;  %v5155_v17 = vrot.slane %v10300_v15, %v7493_v14  ;;  %v5351_v56 = vrot.slane %v10328_v42, %v7493_v14 }
 0x415   : > { %5864 = vrot.lane.b32.xlu1 %v4959_v50, %s7068_s13  ;;  %5862 = vrot.lane.b32.xlu0 %v4861_v11, %s7068_s13 }
 0x416   : > { %v5178_v53 = vcombine.high %v5155_v17, %v12399_v61 }
 0x417   : > { %v10330_v39 = vpop.permute.xlu1 %5656  ;;  %v10338_v35 = vpop.permute.xlu0 %5654 }
 0x418   : > { %12783 = vst [vmem:[#allocation45_spill] sm:$0xff] %v10330_v39  ;;  %12784 = vst [vmem:[#allocation87_spill] sm:$0xff] %v10338_v35  ;;  %v5253_v39 = vrot.slane %v10336_v31, %v7493_v14  ;;  %v4002_v35 = vcombine.high %v10140_v48, %v12399_v61 }
 0x419   : > { %5868 = vrot.lane.b32.xlu1 %v5155_v17, %s7068_s13  ;;  %5866 = vrot.lane.b32.xlu0 %v5057_v54, %s7068_s13  ;;  %v3874_v17 = vcombine.high %v10121_v4, %v12399_v61  ;;  %v4070_v4 = vcombine.high %v10154_v34, %v12399_v61 }
 0x41b   : > { %v10344_v62 = vpop.permute.xlu1 %5660  ;;  %v10348_v46 = vpop.permute.xlu0 %5658 }
 0x41c   : > { %12785 = vst [vmem:[#allocation57_spill] sm:$0xff] %v10344_v62  ;;  %12786 = vst [vmem:[#allocation85_spill] sm:$0xff] %v10348_v46  ;;  %v4198_v46 = vcombine.high %v10174_v26, %v12399_v61 }
 0x41d   : > { %5872 = vrot.lane.b32.xlu1 %v5351_v56, %s7068_s13  ;;  %5870 = vrot.lane.b32.xlu0 %v5253_v39, %s7068_s13  ;;  %s6977_s13 = sshll.u32 %s7076_s12, 4  ;;  %s6978_s13 = int_to_ptr.vmem [resolvable:$false] %s6977_s13 }
 0x41e   : > { %p6980_p1 = scmp.lt.s32.totalorder %s12204_s26, %s6978_s13 }
 0x41f   : > { %v10354_v63 = vpop.permute.xlu1 %5664  ;;  %v10358_v8 = vpop.permute.xlu0 %5662 }
 0x420   : > { %12787 = vst [vmem:[#allocation53_spill] sm:$0xff] %v10354_v63  ;;  %12788 = vst [vmem:[#allocation91_spill] sm:$0xff] %v10358_v8 }
 0x421   : > { %5908 = vrot.lane.b32.xlu1 %v4002_v35, %s7069_s14  ;;  %5906 = vrot.lane.b32.xlu0 %v3904_v6, %s7069_s14  ;;  %v4296_v6 = vcombine.high %v10218_v21, %v12399_v61 }
 0x423   : > { %v10364_v62 = vpop.permute.xlu1 %5668  ;;  %v10368_v48 = vpop.permute.xlu0 %5666 }
 0x424   : > { %12789 = vst [vmem:[#allocation62_spill] sm:$0xff] %v10364_v62  ;;  %12790 = vst [vmem:[#allocation89_spill] sm:$0xff] %v10368_v48 }
 0x425   : > { %5912 = vrot.lane.b32.xlu1 %v4198_v46, %s7069_s14  ;;  %5910 = vrot.lane.b32.xlu0 %v4100_v27, %s7069_s14  ;;  %v4492_v46 = vcombine.high %v4469_v38, %v12399_v61  ;;  %v4982_v38 = vcombine.high %v4959_v50, %v12399_v61  ;;  %v3972_v50 = vcombine.high %v10114_v58, %v12399_v61 }
 0x426   : > { %v4168_v58 = vcombine.high %v10144_v1, %v12399_v61 }
 0x427   : > { %v10374_v35 = vpop.permute.xlu1 %5672  ;;  %v10378_v26 = vpop.permute.xlu0 %5670 }
 0x428   : > { %12791 = vst [vmem:[#allocation60_spill] sm:$0xff] %v10374_v35  ;;  %12792 = vst [vmem:[#allocation95_spill] sm:$0xff] %v10378_v26 }
 0x429   : > { %5916 = vrot.lane.b32.xlu1 %v4394_v36, %s7069_s14  ;;  %5914 = vrot.lane.b32.xlu0 %v4296_v6, %s7069_s14  ;;  %v4688_v36 = vcombine.high %v4665_v45, %v12399_v61  ;;  %v4884_v6 = vcombine.high %v4861_v11, %v12399_v61  ;;  %v5374_v11 = vcombine.high %v5351_v56, %v12399_v61 }
 0x42b   : > { %v10383_v48 = vpop.permute.xlu1 %5676  ;;  %v10386_v27 = vpop.permute.xlu0 %5674 }
 0x42c   : > { %12793 = vst [vmem:[#allocation66_spill] sm:$0xff] %v10383_v48  ;;  %12794 = vst [vmem:[#allocation93_spill] sm:$0xff] %v10386_v27 }
 0x42d   : > { %5920 = vrot.lane.b32.xlu1 %v4590_v60, %s7069_s14  ;;  %5918 = vrot.lane.b32.xlu0 %v4492_v46, %s7069_s14  ;;  %v5080_v46 = vcombine.high %v5057_v54, %v12399_v61  ;;  %v10427_v54 = vrot.slane %v3972_v50, %v7493_v14  ;;  %v4364_v50 = vcombine.high %v10178_v5, %v12399_v61 }
 0x42f   : > { %v10391_v21 = vpop.permute.xlu1 %5680  ;;  %v10394_v26 = vpop.permute.xlu0 %5678 }
 0x431   : > { %5924 = vrot.lane.b32.xlu1 %v4786_v37, %s7069_s14  ;;  %5922 = vrot.lane.b32.xlu0 %v4688_v36, %s7069_s14 }
 0x433   : > { %v10399_v19 = vpop.permute.xlu1 %5716  ;;  %v10402_v60 = vpop.permute.xlu0 %5714 }
 0x435   : > { %5928 = vrot.lane.b32.xlu1 %v4982_v38, %s7069_s14  ;;  %5926 = vrot.lane.b32.xlu0 %v4884_v6, %s7069_s14  ;;  %v5276_v38 = vcombine.high %v5253_v39, %v12399_v61 }
 0x437   : > { %v10407_v45 = vpop.permute.xlu1 %5720  ;;  %v10410_v37 = vpop.permute.xlu0 %5718 }
 0x438   : > { %12795 = vst [vmem:[#allocation64_spill] sm:$0xff] %v10410_v37 }
 0x439   : > { %5932 = vrot.lane.b32.xlu1 %v5178_v53, %s7069_s14  ;;  %5930 = vrot.lane.b32.xlu0 %v5080_v46, %s7069_s14  ;;  %v3888_v53 = vrot.slane %v3874_v17, %v7493_v14  ;;  %v4182_v46 = vrot.slane %v4168_v58, %v7493_v14  ;;  %v4266_v17 = vcombine.high %v10188_v7, %v12399_v61 }
 0x43a   : > { %v4560_v58 = vcombine.high %v10212_v44, %v12399_v61 }
 0x43b   : > { %v10417_v36 = vpop.permute.xlu1 %5724  ;;  %v10422_v6 = vpop.permute.xlu0 %5722  ;;  %v4280_v5 = vrot.slane %v4266_v17, %v7493_v14  ;;  %v4658_v17 = vcombine.high %v10252_v24, %v12399_v61  ;;  %v3905_v8 = vcombine.high %v3888_v53, %v12399_v61 }
 0x43c   : > { %12796 = vst [vmem:[#allocation99_spill] sm:$0xff] %v10417_v36  ;;  %12797 = vst [vmem:[#allocation70_spill] sm:$0xff] %v10422_v6  ;;  %v4574_v7 = vrot.slane %v4560_v58, %v7493_v14  ;;  %v4952_v58 = vcombine.high %v10272_v25, %v12399_v61 }
 0x43d   : > { %5936 = vrot.lane.b32.xlu1 %v5374_v11, %s7069_s14  ;;  %5934 = vrot.lane.b32.xlu0 %v5276_v38, %s7069_s14  ;;  %v4084_v11 = vrot.slane %v4070_v4, %v7493_v14  ;;  %v4378_v38 = vrot.slane %v4364_v50, %v7493_v14  ;;  %v4462_v4 = vcombine.high %v10222_v12, %v12399_v61  ;;  %s6979_s14 = scalar_lea.vmem %s6978_s13, 1024 }
 0x43e   : > { %v4756_v50 = vcombine.high %v10244_v13, %v12399_v61  ;;  %v4672_v13 = vrot.slane %v4658_v17, %v7493_v14  ;;  %v4966_v24 = vrot.slane %v4952_v58, %v7493_v14  ;;  %v5050_v17 = vcombine.high %v10308_v59, %v12399_v61  ;;  %p6981_p3 = scmp.lt.s32.totalorder %s6979_s14, %s6973_s19 }
 0x43f   : > { %v10431_v56 = vpop.permute.xlu1 %5728  ;;  %v10436_v39 = vpop.permute.xlu0 %5726  ;;  %v4476_v44 = vrot.slane %v4462_v4, %v7493_v14  ;;  %v4854_v4 = vcombine.high %v10280_v51, %v12399_v61  ;;  %v5344_v58 = vcombine.high %v10328_v42, %v12399_v61 }
 0x440   : > { %12798 = vst [vmem:[#allocation97_spill] sm:$0xff] %v10431_v56  ;;  %12799 = vst [vmem:[#allocation68_spill] sm:$0xff] %v10436_v39  ;;  %v4770_v12 = vrot.slane %v4756_v50, %v7493_v14  ;;  %v5148_v50 = vcombine.high %v10300_v15, %v12399_v61  ;;  %v5064_v15 = vrot.slane %v5050_v17, %v7493_v14  ;;  %p6982_p5 = por %p6981_p3, %p6980_p1 }
 0x441   : > { %5972 = vrot.lane.b32.xlu1 %v10427_v54, %s7070_s15  ;;  %5970 = vrot.lane.b32.xlu0 %v3888_v53, %s7070_s15  ;;  %v4868_v25 = vrot.slane %v4854_v4, %v7493_v14  ;;  %v5246_v4 = vcombine.high %v10336_v31, %v12399_v61  ;;  %v5358_v59 = vrot.slane %v5344_v58, %v7493_v14 }
 0x442   : > { %v5162_v51 = vrot.slane %v5148_v50, %v7493_v14  ;;  %v4003_v31 = vcombine.high %v10427_v54, %v12399_v61  ;;  %v4395_v53 = vcombine.high %v4378_v38, %v12399_v61  ;;  %p6983_p6 = pnand %p6982_p5, %p6976_p0 }
 0x443   : > { %v10444_v1 = vpop.permute.xlu1 %5732  ;;  %v10449_v34 = vpop.permute.xlu0 %5730  ;;  %v5260_v50 = vrot.slane %v5246_v4, %v7493_v14  ;;  %v4199_v4 = vcombine.high %v4182_v46, %v12399_v61 }
 0x444   : > { %12800 = vst [vmem:[#allocation360_spill] sm:$0xff] %v10444_v1  ;;  %12801 = vst [vmem:[#allocation361_spill] sm:$0xff] %v10449_v34 }
 0x445   : > { %5976 = vrot.lane.b32.xlu1 %v4182_v46, %s7070_s15  ;;  %5974 = vrot.lane.b32.xlu0 %v4084_v11, %s7070_s15 }
 0x447   : > { %v10456_v27 = vpop.permute.xlu1 %5736  ;;  %v10461_v48 = vpop.permute.xlu0 %5734 }
 0x448   : > { %12802 = vst [vmem:[#allocation362_spill] sm:$0xff] %v10456_v27  ;;  %12803 = vst [vmem:[#allocation363_spill] sm:$0xff] %v10461_v48 }
 0x449   : > { %5980 = vrot.lane.b32.xlu1 %v4378_v38, %s7070_s15  ;;  %5978 = vrot.lane.b32.xlu0 %v4280_v5, %s7070_s15 }
 0x44b   : > { %v10468_v35 = vpop.permute.xlu1 %5740  ;;  %v10473_v27 = vpop.permute.xlu0 %5738 }
 0x44c   : > { %12804 = vst [vmem:[#allocation364_spill] sm:$0xff] %v10468_v35  ;;  %12805 = vst [vmem:[#allocation365_spill] sm:$0xff] %v10473_v27 }
 0x44d   : > { %5984 = vrot.lane.b32.xlu1 %v4574_v7, %s7070_s15  ;;  %5982 = vrot.lane.b32.xlu0 %v4476_v44, %s7070_s15 }
 0x44f   : > { %v10480_v48 = vpop.permute.xlu1 %5744  ;;  %v10485_v35 = vpop.permute.xlu0 %5742 }
 0x451   : > { %5988 = vrot.lane.b32.xlu1 %v4770_v12, %s7070_s15  ;;  %5986 = vrot.lane.b32.xlu0 %v4672_v13, %s7070_s15 }
 0x453   : > { %v10492_v27 = vpop.permute.xlu1 %5780  ;;  %v10497_v34 = vpop.permute.xlu0 %5778 }
 0x455   : > { %5992 = vrot.lane.b32.xlu1 %v4966_v24, %s7070_s15  ;;  %5990 = vrot.lane.b32.xlu0 %v4868_v25, %s7070_s15 }
 0x457   : > { %v10504_v1 = vpop.permute.xlu1 %5784  ;;  %v10509_v62 = vpop.permute.xlu0 %5782 }
 0x458   : > { %12806 = vst [vmem:[#allocation366_spill] sm:$0xff] %v10504_v1  ;;  %12807 = vst [vmem:[#allocation367_spill] sm:$0xff] %v10509_v62 }
 0x459   : > { %5996 = vrot.lane.b32.xlu1 %v5162_v51, %s7070_s15  ;;  %5994 = vrot.lane.b32.xlu0 %v5064_v15, %s7070_s15 }
 0x45b   : > { %v10514_v39 = vpop.permute.xlu1 %5788  ;;  %v10517_v42 = vpop.permute.xlu0 %5786 }
 0x45c   : > { %12808 = vst [vmem:[#allocation368_spill] sm:$0xff] %v10514_v39  ;;  %12809 = vst [vmem:[#allocation369_spill] sm:$0xff] %v10517_v42  ;;  %v4101_v42 = vcombine.high %v4084_v11, %v12399_v61  ;;  %v4591_v11 = vcombine.high %v4574_v7, %v12399_v61  ;;  %v5231_v39 = vcombine.high %v10320_v49, %v12399_v61 }
 0x45d   : > { %6000 = vrot.lane.b32.xlu1 %v5358_v59, %s7070_s15  ;;  %5998 = vrot.lane.b32.xlu0 %v5260_v50, %s7070_s15 }
 0x45e   : > { %v10753_v49 = vrot.slane %v5231_v39, %v7471_v57 }
 0x45f   : > { %v10521_v17 = vpop.permute.xlu1 %5792  ;;  %v10525_v56 = vpop.permute.xlu0 %5790 }
 0x460   : > { %12810 = vst [vmem:[#allocation370_spill] sm:$0xff] %v10521_v17  ;;  %12811 = vst [vmem:[#allocation371_spill] sm:$0xff] %v10525_v56 }
 0x461   : > { %6036 = vrot.lane.b32.xlu1 %v4003_v31, %s7071_s0  ;;  %6034 = vrot.lane.b32.xlu0 %v3905_v8, %s7071_s0  ;;  %v4297_v8 = vcombine.high %v4280_v5, %v12399_v61  ;;  %v4787_v5 = vcombine.high %v4770_v12, %v12399_v61  ;;  %v3957_v12 = vcombine.high %v10100_v22, %v12399_v61 }
 0x462   : > { %v4153_v22 = vcombine.high %v10126_v23, %v12399_v61 }
 0x463   : > { %v10530_v58 = vpop.permute.xlu1 %5796  ;;  %v10533_v63 = vpop.permute.xlu0 %5794 }
 0x464   : > { %12812 = vst [vmem:[#allocation372_spill] sm:$0xff] %v10530_v58  ;;  %12813 = vst [vmem:[#allocation373_spill] sm:$0xff] %v10533_v63  ;;  %v4839_v58 = vcombine.high %v10264_v52, %v12399_v61 }
 0x465   : > { %6040 = vrot.lane.b32.xlu1 %v4199_v4, %s7071_s0  ;;  %6038 = vrot.lane.b32.xlu0 %v4101_v42, %s7071_s0  ;;  %v4493_v42 = vcombine.high %v4476_v44, %v12399_v61  ;;  %v4983_v44 = vcombine.high %v4966_v24, %v12399_v61  ;;  %v5081_v24 = vcombine.high %v5064_v15, %v12399_v61 }
 0x466   : > { %v4055_v15 = vcombine.high %v10134_v0, %v12399_v61 }
 0x467   : > { %v10538_v54 = vpop.permute.xlu1 %5800  ;;  %v10541_v56 = vpop.permute.xlu0 %5798 }
 0x468   : > { %12814 = vst [vmem:[#allocation374_spill] sm:$0xff] %v10538_v54  ;;  %12815 = vst [vmem:[#allocation375_spill] sm:$0xff] %v10541_v56 }
 0x469   : > { %6044 = vrot.lane.b32.xlu1 %v4395_v53, %s7071_s0  ;;  %6042 = vrot.lane.b32.xlu0 %v4297_v8, %s7071_s0  ;;  %v4689_v53 = vcombine.high %v4672_v13, %v12399_v61 }
 0x46b   : > { %v10546_v46 = vpop.permute.xlu1 %5804  ;;  %v10549_v31 = vpop.permute.xlu0 %5802 }
 0x46c   : > { %12816 = vst [vmem:[#allocation376_spill] sm:$0xff] %v10546_v46  ;;  %12817 = vst [vmem:[#allocation377_spill] sm:$0xff] %v10549_v31  ;;  %v4447_v46 = vcombine.high %v10200_v29, %v12399_v61 }
 0x46d   : > { %6048 = vrot.lane.b32.xlu1 %v4591_v11, %s7071_s0  ;;  %6046 = vrot.lane.b32.xlu0 %v4493_v42, %s7071_s0  ;;  %v4885_v11 = vcombine.high %v4868_v25, %v12399_v61  ;;  %v5179_v42 = vcombine.high %v5162_v51, %v12399_v61  ;;  %v10583_v25 = vrot.slane %v3957_v12, %v7471_v57 }
 0x46e   : > { %v5375_v51 = vcombine.high %v5358_v59, %v12399_v61  ;;  %v10605_v59 = vrot.slane %v4153_v22, %v7471_v57  ;;  %v4349_v12 = vcombine.high %v10159_v30, %v12399_v61 }
 0x46f   : > { %v10554_v38 = vpop.permute.xlu1 %5808  ;;  %v10557_v4 = vpop.permute.xlu0 %5806  ;;  %v10602_v23 = vrot.slane %v10583_v25, %v7493_v14 }
 0x470   : > { %v10628_v30 = vrot.slane %v10605_v59, %v7493_v14  ;;  %v10631_v22 = vrot.slane %v4349_v12, %v7471_v57 }
 0x471   : > { %6052 = vrot.lane.b32.xlu1 %v4787_v5, %s7071_s0  ;;  %6050 = vrot.lane.b32.xlu0 %v4689_v53, %s7071_s0  ;;  %v3859_v5 = vcombine.high %v10108_v55, %v12399_v61 }
 0x472   : > { %v4200_v1 = vcombine.high %v10628_v30, %v12399_v61 }
 0x473   : > { %v10562_v7 = vpop.permute.xlu1 %5844  ;;  %v10565_v8 = vpop.permute.xlu0 %5842  ;;  %v10591_v55 = vrot.slane %v3859_v5, %v7471_v57 }
 0x475   : > { %6056 = vrot.lane.b32.xlu1 %v4983_v44, %s7071_s0  ;;  %6054 = vrot.lane.b32.xlu0 %v4885_v11, %s7071_s0  ;;  %v10613_v0 = vrot.slane %v10591_v55, %v7493_v14 }
 0x477   : > { %v10572_v13 = vpop.permute.xlu1 %5848  ;;  %v10577_v53 = vpop.permute.xlu0 %5846 }
 0x478   : > { %12818 = vst [vmem:[#allocation378_spill] sm:$0xff] %v10572_v13  ;;  %12819 = vst [vmem:[#allocation379_spill] sm:$0xff] %v10577_v53 }
 0x479   : > { %6060 = vrot.lane.b32.xlu1 %v5179_v42, %s7071_s0  ;;  %6058 = vrot.lane.b32.xlu0 %v5081_v24, %s7071_s0  ;;  %v5277_v42 = vcombine.high %v5260_v50, %v12399_v61  ;;  %v10616_v50 = vrot.slane %v4055_v15, %v7471_v57  ;;  %v4251_v24 = vcombine.high %v10166_v2, %v12399_v61 }
 0x47a   : > { %v4545_v15 = vcombine.high %v10193_v41, %v12399_v61  ;;  %v10654_v41 = vrot.slane %v10631_v22, %v7493_v14 }
 0x47b   : > { %v10587_v44 = vpop.permute.xlu1 %5852  ;;  %v10595_v11 = vpop.permute.xlu0 %5850  ;;  %v10639_v2 = vrot.slane %v10616_v50, %v7493_v14  ;;  %v10642_v31 = vrot.slane %v4251_v24, %v7471_v57  ;;  %v4741_v24 = vcombine.high %v10227_v10, %v12399_v61 }
 0x47c   : > { %12820 = vst [vmem:[#allocation380_spill] sm:$0xff] %v10587_v44  ;;  %12821 = vst [vmem:[#allocation381_spill] sm:$0xff] %v10595_v11  ;;  %v10657_v12 = vrot.slane %v4545_v15, %v7471_v57  ;;  %v5329_v11 = vcombine.high %v10313_v20, %v12399_v61 }
 0x47d   : > { %6064 = vrot.lane.b32.xlu1 %v5375_v51, %s7071_s0  ;;  %6062 = vrot.lane.b32.xlu0 %v5277_v42, %s7071_s0  ;;  %v10665_v29 = vrot.slane %v10642_v31, %v7493_v14  ;;  %v10683_v15 = vrot.slane %v4741_v24, %v7471_v57 }
 0x47e   : > { %v10680_v10 = vrot.slane %v10657_v12, %v7493_v14 }
 0x47f   : > { %v10609_v5 = vpop.permute.xlu1 %5856  ;;  %v10620_v51 = vpop.permute.xlu0 %5854 }
 0x480   : > { %12822 = vst [vmem:[#allocation382_spill] sm:$0xff] %v10609_v5  ;;  %12823 = vst [vmem:[#allocation383_spill] sm:$0xff] %v10620_v51  ;;  %v5035_v5 = vcombine.high %v10292_v33, %v12399_v61 }
 0x481   : > { %6100 = vrot.lane.b32.xlu1 %v10602_v23, %s7072_s1  ;;  %6098 = vrot.lane.b32.xlu0 %v10613_v0, %s7072_s1 }
 0x482   : > { %v10733_v44 = vrot.slane %v5035_v5, %v7471_v57 }
 0x483   : > { %v10635_v42 = vpop.permute.xlu1 %5860  ;;  %v10646_v56 = vpop.permute.xlu0 %5858 }
 0x484   : > { %12824 = vst [vmem:[#allocation384_spill] sm:$0xff] %v10635_v42  ;;  %12825 = vst [vmem:[#allocation385_spill] sm:$0xff] %v10646_v56  ;;  %v10668_v56 = vrot.slane %v4447_v46, %v7471_v57  ;;  %v4643_v42 = vcombine.high %v10234_v32, %v12399_v61  ;;  %v4937_v46 = vcombine.high %v10257_v16, %v12399_v61 }
 0x485   : > { %6104 = vrot.lane.b32.xlu1 %v10628_v30, %s7072_s1  ;;  %6102 = vrot.lane.b32.xlu0 %v10639_v2, %s7072_s1  ;;  %v4778_v16 = vrot.slane %v10683_v15, %v7493_v14  ;;  %v10750_v5 = vrot.slane %v10733_v44, %v7493_v14 }
 0x486   : > { %v4484_v32 = vrot.slane %v10668_v56, %v7493_v14  ;;  %v10704_v24 = vrot.slane %v4937_v46, %v7471_v57 }
 0x487   : > { %v10661_v54 = vpop.permute.xlu1 %5864  ;;  %v10672_v63 = vpop.permute.xlu0 %5862 }
 0x488   : > { %12826 = vst [vmem:[#allocation386_spill] sm:$0xff] %v10661_v54  ;;  %12827 = vst [vmem:[#allocation387_spill] sm:$0xff] %v10672_v63  ;;  %v10692_v63 = vrot.slane %v4643_v42, %v7471_v57  ;;  %v5133_v42 = vcombine.high %v10285_v3, %v12399_v61  ;;  %v4974_v3 = vrot.slane %v10704_v24, %v7493_v14 }
 0x489   : > { %6108 = vrot.lane.b32.xlu1 %v10654_v41, %s7072_s1  ;;  %6106 = vrot.lane.b32.xlu0 %v10665_v29, %s7072_s1 }
 0x48a   : > { %v4680_v52 = vrot.slane %v10692_v63, %v7493_v14  ;;  %v10724_v46 = vrot.slane %v5133_v42, %v7471_v57  ;;  %v10744_v42 = vrot.slane %v5329_v11, %v7471_v57 }
 0x48b   : > { %v10687_v54 = vpop.permute.xlu1 %5868  ;;  %v10696_v51 = vpop.permute.xlu0 %5866 }
 0x48c   : > { %12828 = vst [vmem:[#allocation388_spill] sm:$0xff] %v10687_v54  ;;  %12829 = vst [vmem:[#allocation389_spill] sm:$0xff] %v10696_v51  ;;  %v10713_v51 = vrot.slane %v4839_v58, %v7471_v57  ;;  %v5170_v20 = vrot.slane %v10724_v46, %v7493_v14  ;;  %v10762_v11 = vrot.slane %v10744_v42, %v7493_v14 }
 0x48d   : > { %6112 = vrot.lane.b32.xlu1 %v10680_v10, %s7072_s1  ;;  %6110 = vrot.lane.b32.xlu0 %v4484_v32, %s7072_s1  ;;  %v4004_v57 = vcombine.high %v10602_v23, %v12399_v61 }
 0x48e   : > { %v4876_v33 = vrot.slane %v10713_v51, %v7493_v14 }
 0x48f   : > { %v10708_v54 = vpop.permute.xlu1 %5872  ;;  %v10717_v17 = vpop.permute.xlu0 %5870 }
 0x491   : > { %6116 = vrot.lane.b32.xlu1 %v4778_v16, %s7072_s1  ;;  %6114 = vrot.lane.b32.xlu0 %v4680_v52, %s7072_s1 }
 0x493   : > { %v10728_v58 = vpop.permute.xlu1 %5908  ;;  %v10737_v6 = vpop.permute.xlu0 %5906 }
 0x495   : > { %6120 = vrot.lane.b32.xlu1 %v4974_v3, %s7072_s1  ;;  %6118 = vrot.lane.b32.xlu0 %v4876_v33, %s7072_s1 }
 0x497   : > { %v10746_v36 = vpop.permute.xlu1 %5912  ;;  %v10755_v53 = vpop.permute.xlu0 %5910 }
 0x498   : > { %12830 = vst [vmem:[#allocation390_spill] sm:$0xff] %v10746_v36  ;;  %12831 = vst [vmem:[#allocation391_spill] sm:$0xff] %v10755_v53  ;;  %v10768_v36 = vrot.slane %v10753_v49, %v7493_v14 }
 0x499   : > { %6124 = vrot.lane.b32.xlu1 %v5170_v20, %s7072_s1  ;;  %6122 = vrot.lane.b32.xlu0 %v10750_v5, %s7072_s1 }
 0x49b   : > { %v10764_v13 = vpop.permute.xlu1 %5916  ;;  %v10770_v62 = vpop.permute.xlu0 %5914 }
 0x49c   : > { %12832 = vst [vmem:[#allocation392_spill] sm:$0xff] %v10764_v13  ;;  %12833 = vst [vmem:[#allocation393_spill] sm:$0xff] %v10770_v62  ;;  %v3906_v13 = vcombine.high %v10613_v0, %v12399_v61  ;;  %v4298_v0 = vcombine.high %v10665_v29, %v12399_v61  ;;  %v4788_v29 = vcombine.high %v4778_v16, %v12399_v61 }
 0x49d   : > { %6128 = vrot.lane.b32.xlu1 %v10762_v11, %s7072_s1  ;;  %6126 = vrot.lane.b32.xlu0 %v10768_v36, %s7072_s1  ;;  %v3987_v16 = vcombine.high %v10583_v25, %v12399_v61  ;;  %v4575_v25 = vcombine.high %v10657_v12, %v12399_v61  ;;  %v5082_v12 = vcombine.high %v10750_v5, %v12399_v61 }
 0x49e   : > { %v5278_v5 = vcombine.high %v10768_v36, %v12399_v61 }
 0x49f   : > { %v10776_v39 = vpop.permute.xlu1 %5920  ;;  %v10780_v53 = vpop.permute.xlu0 %5918  ;;  %v10893_v36 = vrot.slane %v4575_v25, %v7493_v14 }
 0x4a0   : > { %12834 = vst [vmem:[#allocation394_spill] sm:$0xff] %v10776_v39  ;;  %12835 = vst [vmem:[#allocation395_spill] sm:$0xff] %v10780_v53  ;;  %v4102_v39 = vcombine.high %v10639_v2, %v12399_v61 }
 0x4a1   : > { %6164 = vrot.lane.b32.xlu1 %v4004_v57, %s7073_s23  ;;  %6162 = vrot.lane.b32.xlu0 %v3906_v13, %s7073_s23  ;;  %v4396_v57 = vcombine.high %v10654_v41, %v12399_v61 }
 0x4a3   : > { %v10786_v62 = vpop.permute.xlu1 %5924  ;;  %v10790_v37 = vpop.permute.xlu0 %5922 }
 0x4a4   : > { %12836 = vst [vmem:[#allocation396_spill] sm:$0xff] %v10786_v62  ;;  %12837 = vst [vmem:[#allocation397_spill] sm:$0xff] %v10790_v37 }
 0x4a5   : > { %6168 = vrot.lane.b32.xlu1 %v4200_v1, %s7073_s23  ;;  %6166 = vrot.lane.b32.xlu0 %v4102_v39, %s7073_s23  ;;  %v4592_v1 = vcombine.high %v10680_v10, %v12399_v61  ;;  %v4494_v39 = vcombine.high %v4484_v32, %v12399_v61  ;;  %v4984_v32 = vcombine.high %v4974_v3, %v12399_v61 }
 0x4a6   : > { %v4281_v3 = vcombine.high %v10642_v31, %v12399_v61  ;;  %v4771_v31 = vcombine.high %v10683_v15, %v12399_v61  ;;  %v5261_v15 = vcombine.high %v10753_v49, %v12399_v61 }
 0x4a7   : > { %v10796_v23 = vpop.permute.xlu1 %5928  ;;  %v10800_v13 = vpop.permute.xlu0 %5926 }
 0x4a8   : > { %12838 = vst [vmem:[#allocation398_spill] sm:$0xff] %v10796_v23  ;;  %12839 = vst [vmem:[#allocation399_spill] sm:$0xff] %v10800_v13  ;;  %v12855_v13 = vld [vmem:[#allocation42_spill] sm:$0xff] }
 0x4a9   : > { %6172 = vrot.lane.b32.xlu1 %v4396_v57, %s7073_s23  ;;  %6170 = vrot.lane.b32.xlu0 %v4298_v0, %s7073_s23  ;;  %v4690_v0 = vcombine.high %v4680_v52, %v12399_v61  ;;  %v4085_v52 = vcombine.high %v10616_v50, %v12399_v61  ;;  %v4673_v50 = vcombine.high %v10692_v63, %v12399_v61 }
 0x4aa   : > { %v5065_v63 = vcombine.high %v10733_v44, %v12399_v61  ;;  %v4001_v44 = vrot.slane %v3987_v16, %v7493_v14  ;;  %v10899_v16 = vrot.slane %v4771_v31, %v7493_v14 }
 0x4ab   : > { %v10806_v30 = vpop.permute.xlu1 %5932  ;;  %v10810_v2 = vpop.permute.xlu0 %5930 }
 0x4ac   : > { %12840 = vst [vmem:[#allocation400_spill] sm:$0xff] %v10806_v30  ;;  %12841 = vst [vmem:[#allocation401_spill] sm:$0xff] %v10810_v2  ;;  %v10925_v31 = vcombine.high %v4001_v44, %v12399_v61  ;;  %v12854_v30 = vld [vmem:[#allocation312_spill] sm:$0xff] }
 0x4ad   : > { %6176 = vrot.lane.b32.xlu1 %v4592_v1, %s7073_s23  ;;  %6174 = vrot.lane.b32.xlu0 %v4494_v39, %s7073_s23  ;;  %v4886_v1 = vcombine.high %v4876_v33, %v12399_v61  ;;  %v3889_v39 = vcombine.high %v10591_v55, %v12399_v61  ;;  %v4379_v33 = vcombine.high %v10631_v22, %v12399_v61 }
 0x4ae   : > { %v4477_v55 = vcombine.high %v10668_v56, %v12399_v61  ;;  %v4869_v22 = vcombine.high %v10713_v51, %v12399_v61  ;;  %v4967_v56 = vcombine.high %v10704_v24, %v12399_v61  ;;  %v5359_v51 = vcombine.high %v10744_v42, %v12399_v61  ;;  %12847 = vst [vmem:[#allocation407_spill] sm:$0xff] %v10925_v31 }
 0x4af   : > { %v10815_v41 = vpop.permute.xlu1 %5936  ;;  %v10818_v57 = vpop.permute.xlu0 %5934  ;;  %v5376_v24 = vcombine.high %v10762_v11, %v12399_v61  ;;  %v10882_v42 = vrot.slane %v4085_v52, %v7493_v14  ;;  %v10888_v11 = vrot.slane %v4281_v3, %v7493_v14  ;;  %v10902_v52 = vrot.slane %v4673_v50, %v7493_v14 }
 0x4b0   : > { %v10909_v3 = vrot.slane %v4869_v22, %v7493_v14  ;;  %v10919_v25 = vrot.slane %v5359_v51, %v7493_v14  ;;  %v10922_v50 = vrot.slane %v5261_v15, %v7493_v14  ;;  %v6339_v51 = vsel %vm3555_vm1, %v9268_v28, %v9840_v9  ;;  %v12859_v28 = vld [vmem:[#allocation314_spill] sm:$0xff] }
 0x4b1   : > { %6180 = vrot.lane.b32.xlu1 %v4788_v29, %s7073_s23  ;;  %6178 = vrot.lane.b32.xlu0 %v4690_v0, %s7073_s23  ;;  %v4183_v29 = vcombine.high %v10605_v59, %v12399_v61  ;;  %v5180_v59 = vcombine.high %v5170_v20, %v12399_v61  ;;  %v5163_v20 = vcombine.high %v10724_v46, %v12399_v61  ;;  %v12860_v9 = vld [vmem:[#allocation50_spill] sm:$0xff] }
 0x4b2   : > { %v3903_v46 = vrot.slane %v3889_v39, %v7493_v14  ;;  %v10896_v39 = vrot.slane %v4477_v55, %v7493_v14  ;;  %v10915_v55 = vrot.slane %v5065_v63, %v7493_v14  ;;  %12845 = vst [vmem:[#allocation405_spill] sm:$0xff] %v10919_v25  ;;  %12846 = vst [vmem:[#allocation406_spill] sm:$0xff] %v10922_v50 }
 0x4b3   : > { %v10823_v10 = vpop.permute.xlu1 %5972  ;;  %v10826_v2 = vpop.permute.xlu0 %5970  ;;  %v4197_v49 = vrot.slane %v4183_v29, %v7493_v14  ;;  %v10906_v29 = vrot.slane %v4967_v56, %v7493_v14  ;;  %v10945_v15 = vcombine.high %v10888_v11, %v12399_v61 }
 0x4b4   : > { %12844 = vst [vmem:[#allocation404_spill] sm:$0xff] %v10915_v55  ;;  %v10928_v22 = vcombine.high %v3903_v46, %v12399_v61  ;;  %v12888_v55 = vld [vmem:[#allocation331_spill] sm:$0xff] }
 0x4b5   : > { %6184 = vrot.lane.b32.xlu1 %v4984_v32, %s7073_s23  ;;  %6182 = vrot.lane.b32.xlu0 %v4886_v1, %s7073_s23  ;;  %v10933_v63 = vcombine.high %v4197_v49, %v12399_v61  ;;  %12853 = vst [vmem:[#allocation413_spill] sm:$0xff] %v10945_v15  ;;  %v12858_v15 = vld [vmem:[#allocation38_spill] sm:$0xff] }
 0x4b6   : > { %12848 = vst [vmem:[#allocation408_spill] sm:$0xff] %v10928_v22 }
 0x4b7   : > { %v10849_v0 = vpop.permute.xlu1 %5976  ;;  %v10858_v32 = vpop.permute.xlu0 %5974  ;;  %12850 = vst [vmem:[#allocation410_spill] sm:$0xff] %v10933_v63  ;;  %v6342_v63 = vsel %vm3555_vm1, %v12860_v9, %v12859_v28  ;;  %v12869_v28 = vld [vmem:[#allocation319_spill] sm:$0xff]  ;;  %v12870_v9 = vld [vmem:[#allocation61_spill] sm:$0xff] }
 0x4b9   : > { %6188 = vrot.lane.b32.xlu1 %v5180_v59, %s7073_s23  ;;  %6186 = vrot.lane.b32.xlu0 %v5082_v12, %s7073_s23  ;;  %v10885_v59 = vrot.slane %v4379_v33, %v7493_v14  ;;  %v10912_v33 = vrot.slane %v5163_v20, %v7493_v14  ;;  %v10937_v20 = vcombine.high %v10882_v42, %v12399_v61 }
 0x4bb   : > { %v10878_v1 = vpop.permute.xlu1 %5980  ;;  %v10890_v12 = vpop.permute.xlu0 %5978  ;;  %12851 = vst [vmem:[#allocation411_spill] sm:$0xff] %v10937_v20  ;;  %v10941_v14 = vcombine.high %v10885_v59, %v12399_v61  ;;  %v12857_v61 = vld [vmem:[#allocation313_spill] sm:$0xff] }
 0x4bc   : > { %12842 = vst [vmem:[#allocation402_spill] sm:$0xff] %v10878_v1  ;;  %12843 = vst [vmem:[#allocation403_spill] sm:$0xff] %v10890_v12  ;;  %v6343_v23 = vsel %vm3555_vm1, %v12858_v15, %v12857_v61  ;;  %v12867_v61 = vld [vmem:[#allocation318_spill] sm:$0xff]  ;;  %v12868_v15 = vld [vmem:[#allocation63_spill] sm:$0xff] }
 0x4bd   : > { %6192 = vrot.lane.b32.xlu1 %v5376_v24, %s7073_s23  ;;  %6190 = vrot.lane.b32.xlu0 %v5278_v5, %s7073_s23  ;;  %12852 = vst [vmem:[#allocation412_spill] sm:$0xff] %v10941_v14  ;;  %v6338_v24 = vsel %vm3555_vm1, %v9279_v43, %v9849_v40  ;;  %v6341_v5 = vsel %vm3555_vm1, %v9304_v47, %v9858_v18  ;;  %v12861_v43 = vld [vmem:[#allocation315_spill] sm:$0xff]  ;;  %v12862_v40 = vld [vmem:[#allocation46_spill] sm:$0xff]  ;;  %v12863_v47 = vld [vmem:[#allocation316_spill] sm:$0xff] }
 0x4be   : > { %v6340_v14 = vsel %vm3555_vm1, %v12855_v13, %v12854_v30  ;;  %v6345_v37 = vsel %vm3555_vm1, %v12862_v40, %v12861_v43  ;;  %v12864_v18 = vld [vmem:[#allocation58_spill] sm:$0xff]  ;;  %v12865_v13 = vld [vmem:[#allocation317_spill] sm:$0xff]  ;;  %v6346_v31 = vsel %vm3555_vm1, %v12868_v15, %v12867_v61  ;;  %v12871_v43 = vld [vmem:[#allocation320_spill] sm:$0xff] }
 0x4bf   : > { %v10930_v56 = vpop.permute.xlu1 %5984  ;;  %v10959_v20 = vpop.permute.xlu0 %5982  ;;  %v6344_v22 = vsel %vm3555_vm1, %v12864_v18, %v12863_v47  ;;  %v12866_v30 = vld [vmem:[#allocation54_spill] sm:$0xff]  ;;  %v12872_v40 = vld [vmem:[#allocation67_spill] sm:$0xff]  ;;  %v12874_v47 = vld [vmem:[#allocation65_spill] sm:$0xff] }
 0x4c0   : > { %12849 = vst [vmem:[#allocation409_spill] sm:$0xff] %v10930_v56  ;;  %12856 = vst [vmem:[#allocation312_spill] sm:$0xff] %v10959_v20  ;;  %v6347_v62 = vsel %vm3555_vm1, %v12866_v30, %v12865_v13  ;;  %v6349_v20 = vsel %vm3555_vm1, %v12870_v9, %v12869_v28  ;;  %v6348_v56 = vsel %vm3555_vm1, %v12872_v40, %v12871_v43  ;;  %v12875_v13 = vld [vmem:[#allocation322_spill] sm:$0xff]  ;;  %v12876_v30 = vld [vmem:[#allocation71_spill] sm:$0xff] }
 0x4c1   : > { %6228 = vrot.lane.b32.xlu1 %v4001_v44, %s7074_s25  ;;  %6226 = vrot.lane.b32.xlu0 %v3903_v46, %s7074_s25  ;;  %v12873_v44 = vld [vmem:[#allocation321_spill] sm:$0xff]  ;;  %v6350_v53 = vsel %vm3555_vm1, %v12876_v30, %v12875_v13  ;;  %v12877_v61 = vld [vmem:[#allocation323_spill] sm:$0xff]  ;;  %v12879_v28 = vld [vmem:[#allocation324_spill] sm:$0xff] }
 0x4c2   : > { %v6351_v18 = vsel %vm3555_vm1, %v12874_v47, %v12873_v44  ;;  %v12878_v15 = vld [vmem:[#allocation69_spill] sm:$0xff]  ;;  %v12880_v9 = vld [vmem:[#allocation266_spill] sm:$0xff]  ;;  %v12884_v47 = vld [vmem:[#allocation327_spill] sm:$0xff] }
 0x4c3   : > { %v6353_v50 = vsel %vm3555_vm1, %v12878_v15, %v12877_v61  ;;  %v6352_v25 = vsel %vm3555_vm1, %v12880_v9, %v12879_v28  ;;  %v10999_v43 = vpop.permute.xlu1 %5988  ;;  %v12882_v46 = vld [vmem:[#allocation325_spill] sm:$0xff]  ;;  %v12883_v12 = vld [vmem:[#allocation326_spill] sm:$0xff]  ;;  %v6357_v13 = vsel %vm3572_vm2, %v6341_v5, %v12884_v47  ;;  %v12885_v30 = vld [vmem:[#allocation328_spill] sm:$0xff]  ;;  %v11009_v61 = vpop.permute.xlu0 %5986 }
 0x4c4   : > { %12881 = vst [vmem:[#allocation42_spill] sm:$0xff] %v10999_v43  ;;  %v6355_v40 = vsel %vm3572_vm2, %v6339_v51, %v12882_v46  ;;  %v6354_v44 = vsel %vm3572_vm2, %v6338_v24, %v12883_v12  ;;  %v6356_v1 = vsel %vm3572_vm2, %v6340_v14, %v12885_v30  ;;  %v12886_v15 = vld [vmem:[#allocation329_spill] sm:$0xff]  ;;  %v12887_v9 = vld [vmem:[#allocation330_spill] sm:$0xff]  ;;  %v6361_v51 = vsel %vm3572_vm2, %v6345_v37, %v12888_v55  ;;  %v12889_v46 = vld [vmem:[#allocation332_spill] sm:$0xff] }
 0x4c5   : > { %v6359_v28 = vsel %vm3572_vm2, %v6343_v23, %v12886_v15  ;;  %v6358_v43 = vsel %vm3572_vm2, %v6342_v63, %v12887_v9  ;;  %v6360_v12 = vsel %vm3572_vm2, %v6344_v22, %v12889_v46  ;;  %6232 = vrot.lane.b32.xlu1 %v4197_v49, %s7074_s25  ;;  %v12890_v24 = vld [vmem:[#allocation333_spill] sm:$0xff]  ;;  %v12891_v5 = vld [vmem:[#allocation334_spill] sm:$0xff]  ;;  %v12892_v30 = vld [vmem:[#allocation335_spill] sm:$0xff]  ;;  %6230 = vrot.lane.b32.xlu0 %v10882_v42, %s7074_s25 }
 0x4c6   : > { %v6363_v14 = vsel %vm3572_vm2, %v6347_v62, %v12890_v24  ;;  %v6362_v47 = vsel %vm3572_vm2, %v6346_v31, %v12891_v5  ;;  %v6365_v23 = vsel %vm3572_vm2, %v6349_v20, %v12892_v30  ;;  %v12893_v15 = vld [vmem:[#allocation336_spill] sm:$0xff]  ;;  %v12894_v37 = vld [vmem:[#allocation337_spill] sm:$0xff]  ;;  %v12895_v55 = vld [vmem:[#allocation338_spill] sm:$0xff] }
 0x4c7   : > { %v6364_v63 = vsel %vm3572_vm2, %v6348_v56, %v12893_v15  ;;  %v6367_v49 = vsel %vm3572_vm2, %v6351_v18, %v12894_v37  ;;  %v6366_v22 = vsel %vm3572_vm2, %v6350_v53, %v12895_v55  ;;  %v12896_v62 = vld [vmem:[#allocation339_spill] sm:$0xff]  ;;  %v12897_v31 = vld [vmem:[#allocation340_spill] sm:$0xff]  ;;  %v11038_v20 = vpop.permute.xlu1 %5992  ;;  %v12898_v24 = vld [vmem:[#allocation341_spill] sm:$0xff]  ;;  %v11048_v37 = vpop.permute.xlu0 %5990 }
 0x4c8   : > { %v6369_v9 = vsel %vm3572_vm2, %v6353_v50, %v12896_v62  ;;  %v6368_v46 = vsel %vm3572_vm2, %v6352_v25, %v12897_v31  ;;  %v6371_v56 = vsel %vm3589_vm3, %v6355_v40, %v12898_v24  ;;  %v12899_v5 = vld [vmem:[#allocation342_spill] sm:$0xff]  ;;  %v12900_v30 = vld [vmem:[#allocation343_spill] sm:$0xff]  ;;  %v12901_v15 = vld [vmem:[#allocation344_spill] sm:$0xff] }
 0x4c9   : > { %v6370_v42 = vsel %vm3589_vm3, %v6354_v44, %v12899_v5  ;;  %v6373_v18 = vsel %vm3589_vm3, %v6357_v13, %v12900_v30  ;;  %v6372_v53 = vsel %vm3589_vm3, %v6356_v1, %v12901_v15  ;;  %v12902_v50 = vld [vmem:[#allocation345_spill] sm:$0xff]  ;;  %v12903_v25 = vld [vmem:[#allocation346_spill] sm:$0xff]  ;;  %v12904_v31 = vld [vmem:[#allocation347_spill] sm:$0xff]  ;;  %6236 = vrot.lane.b32.xlu1 %v10885_v59, %s7074_s25  ;;  %6234 = vrot.lane.b32.xlu0 %v10888_v11, %s7074_s25 }
 0x4ca   : > { %v6375_v55 = vsel %vm3589_vm3, %v6359_v28, %v12902_v50  ;;  %v11054_v62 = vsel %vm3589_vm3, %v6358_v43, %v12903_v25  ;;  %v11058_v40 = vsel %vm3589_vm3, %v6361_v51, %v12904_v31  ;;  %v12905_v44 = vld [vmem:[#allocation355_spill] sm:$0xff]  ;;  %v12906_v1 = vld [vmem:[#allocation348_spill] sm:$0xff]  ;;  %v12907_v5 = vld [vmem:[#allocation349_spill] sm:$0xff] }
 0x4cb   : > { %v6385_v24 = vsel %vm3589_vm3, %v6369_v9, %v12905_v44  ;;  %v11066_v13 = vsel %vm3589_vm3, %v6360_v12, %v12906_v1  ;;  %v11070_v28 = vsel %vm3589_vm3, %v6363_v14, %v12907_v5  ;;  %v12908_v43 = vld [vmem:[#allocation356_spill] sm:$0xff]  ;;  %v12909_v15 = vld [vmem:[#allocation37_spill] sm:$0xff]  ;;  %v12910_v9 = vld [vmem:[#allocation350_spill] sm:$0xff]  ;;  %v11090_v31 = vpop.permute.xlu1 %5996  ;;  %v11104_v5 = vpop.permute.xlu0 %5994 }
 0x4cc   : > { %v6384_v30 = vsel %vm3589_vm3, %v6368_v46, %v12908_v43  ;;  %v6401_v51 = vsel %vm3606_vm4, %v6385_v24, %v12909_v15  ;;  %v11080_v59 = vsel %vm3589_vm3, %v6362_v47, %v12910_v9  ;;  %v12911_v12 = vld [vmem:[#allocation351_spill] sm:$0xff]  ;;  %v12913_v44 = vld [vmem:[#allocation352_spill] sm:$0xff]  ;;  %v12914_v24 = vld [vmem:[#allocation353_spill] sm:$0xff] }
 0x4cd   : > { %v11084_v50 = vsel %vm3589_vm3, %v6365_v23, %v12911_v12  ;;  %v12912_v14 = vld [vmem:[#allocation83_spill] sm:$0xff]  ;;  %v6417_v46 = vsel %vm3623_vm5, %v6401_v51, %v10391_v21  ;;  %v11094_v11 = vsel %vm3589_vm3, %v6364_v63, %v12913_v44  ;;  %v11098_v47 = vsel %vm3589_vm3, %v6367_v49, %v12914_v24  ;;  %v12915_v43 = vld [vmem:[#allocation354_spill] sm:$0xff]  ;;  %6240 = vrot.lane.b32.xlu1 %v10893_v36, %s7074_s25  ;;  %v12918_v51 = vld [vmem:[#allocation49_spill] sm:$0xff] }
 0x4ce   : > { %v6400_v25 = vsel %vm3606_vm4, %v6384_v30, %v12912_v14  ;;  %v6433_v1 = vsel %vm3640_vm6, %v6417_v46, %v10480_v48  ;;  %v11108_v21 = vsel %vm3589_vm3, %v6366_v22, %v12915_v43  ;;  %v12916_v30 = vld [vmem:[#allocation357_spill] sm:$0xff]  ;;  %6238 = vrot.lane.b32.xlu0 %v10896_v39, %s7074_s25  ;;  %v12920_v24 = vld [vmem:[#allocation359_spill] sm:$0xff] }
 0x4cf   : > { %v6416_v23 = vsel %vm3623_vm5, %v6400_v25, %v10394_v26  ;;  %v6387_v63 = vsel %vm3606_vm4, %v6371_v56, %v12916_v30  ;;  %v6449_v49 = vsel %vm3657_vm7, %v6433_v1, %v10554_v38  ;;  %v12917_v26 = vld [vmem:[#allocation358_spill] sm:$0xff]  ;;  %v6001_v25 = vpop.permute.xlu1 %6000  ;;  %v12922_v1 = vld [vmem:[#allocation45_spill] sm:$0xff] }
 0x4d0   : > { %v6432_v15 = vsel %vm3640_vm6, %v6416_v23, %v10485_v35  ;;  %v6386_v48 = vsel %vm3606_vm4, %v6370_v42, %v12917_v26  ;;  %v6403_v9 = vsel %vm3623_vm5, %v6387_v63, %v12918_v51  ;;  %v6465_v56 = vsel %vm3674_vm8, %v6449_v49, %v10708_v54  ;;  %v12919_v35 = vld [vmem:[#allocation81_spill] sm:$0xff] }
 0x4d1   : > { %v6448_v22 = vsel %vm3657_vm7, %v6432_v15, %v10557_v4  ;;  %v6402_v38 = vsel %vm3623_vm5, %v6386_v48, %v12919_v35  ;;  %v6419_v12 = vsel %vm3640_vm6, %v6403_v9, %v10399_v19  ;;  %v6481_v14 = vsel %vm3691_vm9, %v6465_v56, %v10815_v41  ;;  %v5999_v19 = vpop.permute.xlu0 %5998  ;;  %6244 = vrot.lane.b32.xlu1 %v10899_v16, %s7074_s25  ;;  %v12927_v56 = vld [vmem:[#allocation367_spill] sm:$0xff]  ;;  %v12928_v35 = vld [vmem:[#allocation378_spill] sm:$0xff] }
 0x4d2   : > { %v6464_v42 = vsel %vm3674_vm8, %v6448_v22, %v10717_v17  ;;  %v6418_v4 = vsel %vm3640_vm6, %v6402_v38, %v10402_v60  ;;  %v6435_v54 = vsel %vm3657_vm7, %v6419_v12, %v10492_v27  ;;  %v11143_v44 = vsel %vm3708_vm10, %v6481_v14, %v6001_v25  ;;  %v12921_v27 = vld [vmem:[#allocation73_spill] sm:$0xff]  ;;  %6242 = vrot.lane.b32.xlu0 %v10902_v52, %s7074_s25  ;;  %v12926_v22 = vld [vmem:[#allocation28_spill] sm:$0xff] }
 0x4d3   : > { %v6480_v46 = vsel %vm3691_vm9, %v6464_v42, %v10818_v57  ;;  %v6389_v17 = vsel %vm3606_vm4, %v6373_v18, %v12920_v24  ;;  %v6434_v41 = vsel %vm3657_vm7, %v6418_v4, %v10497_v34  ;;  %v6451_v23 = vsel %vm3674_vm8, %v6435_v54, %v10562_v7  ;;  %v12923_v7 = vld [vmem:[#allocation87_spill] sm:$0xff]  ;;  %v6037_v49 = vpop.permute.xlu1 %6036  ;;  %v12930_v14 = vld [vmem:[#allocation57_spill] sm:$0xff]  ;;  %v12932_v54 = vld [vmem:[#allocation390_spill] sm:$0xff] }
 0x4d4   : > { %v11152_v60 = vsel %vm3708_vm10, %v6480_v46, %v5999_v19  ;;  %v6388_v57 = vsel %vm3606_vm4, %v6372_v53, %v12921_v27  ;;  %v6405_v43 = vsel %vm3623_vm5, %v6389_v17, %v12922_v1  ;;  %v6450_v18 = vsel %vm3674_vm8, %v6434_v41, %v10565_v8  ;;  %v12924_v8 = vld [vmem:[#allocation64_spill] sm:$0xff]  ;;  %v12933_v19 = vld [vmem:[#allocation85_spill] sm:$0xff]  ;;  %v12934_v17 = vld [vmem:[#allocation99_spill] sm:$0xff] }
 0x4d5   : > { %v6467_v34 = vsel %vm3691_vm9, %v6451_v23, %v10728_v58  ;;  %v6404_v30 = vsel %vm3623_vm5, %v6388_v57, %v12923_v7  ;;  %v6421_v63 = vsel %vm3640_vm6, %v6405_v43, %v10407_v45  ;;  %v6466_v53 = vsel %vm3691_vm9, %v6450_v18, %v10737_v6  ;;  %v12925_v58 = vld [vmem:[#allocation366_spill] sm:$0xff]  ;;  %v6035_v45 = vpop.permute.xlu0 %6034  ;;  %6248 = vrot.lane.b32.xlu1 %v10906_v29, %s7074_s25  ;;  %v12935_v23 = vld [vmem:[#allocation391_spill] sm:$0xff]  ;;  %v12937_v18 = vld [vmem:[#allocation368_spill] sm:$0xff] }
 0x4d6   : > { %v6483_v15 = vsel %vm3708_vm10, %v6467_v34, %v10823_v10  ;;  %v6420_v26 = vsel %vm3640_vm6, %v6404_v30, %v12924_v8  ;;  %v6437_v48 = vsel %vm3657_vm7, %v6421_v63, %v12925_v58  ;;  %v6482_v51 = vsel %vm3708_vm10, %v6466_v53, %v10826_v2  ;;  %v12929_v2 = vld [vmem:[#allocation72_spill] sm:$0xff]  ;;  %6246 = vrot.lane.b32.xlu0 %v10909_v3, %s7074_s25  ;;  %v12936_v1 = vld [vmem:[#allocation70_spill] sm:$0xff] }
 0x4d7   : > { %v11181_v9 = vsel %vm3725_vm11, %v6483_v15, %v6037_v49  ;;  %v6391_v6 = vsel %vm3606_vm4, %v6375_v55, %v12926_v22  ;;  %v6436_v10 = vsel %vm3657_vm7, %v6420_v26, %v12927_v56  ;;  %v6453_v38 = vsel %vm3674_vm8, %v6437_v48, %v12928_v35  ;;  %v12931_v55 = vld [vmem:[#allocation379_spill] sm:$0xff]  ;;  %v6041_v57 = vpop.permute.xlu1 %6040  ;;  %v12938_v53 = vld [vmem:[#allocation26_spill] sm:$0xff]  ;;  %v12939_v49 = vld [vmem:[#allocation369_spill] sm:$0xff] }
 0x4d8   : > { %v11190_v12 = vsel %vm3725_vm11, %v6482_v51, %v6035_v45  ;;  %v6390_v42 = vsel %vm3606_vm4, %v11054_v62, %v12929_v2  ;;  %v6407_v25 = vsel %vm3623_vm5, %v6391_v6, %v12930_v14  ;;  %v6452_v4 = vsel %vm3674_vm8, %v6436_v10, %v12931_v55  ;;  %v12940_v8 = vld [vmem:[#allocation380_spill] sm:$0xff]  ;;  %v12942_v51 = vld [vmem:[#allocation53_spill] sm:$0xff]  ;;  %v12946_v35 = vld [vmem:[#allocation91_spill] sm:$0xff] }
 0x4d9   : > { %v6469_v46 = vsel %vm3691_vm9, %v6453_v38, %v12932_v54  ;;  %v6406_v24 = vsel %vm3623_vm5, %v6390_v42, %v12933_v19  ;;  %v6423_v41 = vsel %vm3640_vm6, %v6407_v25, %v12934_v17  ;;  %v6468_v62 = vsel %vm3691_vm9, %v6452_v4, %v12935_v23  ;;  %v6039_v63 = vpop.permute.xlu0 %6038  ;;  %6252 = vrot.lane.b32.xlu1 %v10912_v33, %s7074_s25  ;;  %v12944_v6 = vld [vmem:[#allocation392_spill] sm:$0xff]  ;;  %v12947_v2 = vld [vmem:[#allocation97_spill] sm:$0xff]  ;;  %v12949_v25 = vld [vmem:[#allocation402_spill] sm:$0xff] }
 0x4da   : > { %v6485_v27 = vsel %vm3708_vm10, %v6469_v46, %v10849_v0  ;;  %v6422_v43 = vsel %vm3640_vm6, %v6406_v24, %v12936_v1  ;;  %v6439_v34 = vsel %vm3657_vm7, %v6423_v41, %v12937_v18  ;;  %v6484_v7 = vsel %vm3708_vm10, %v6468_v62, %v10858_v32  ;;  %v12941_v32 = vld [vmem:[#allocation76_spill] sm:$0xff]  ;;  %v12948_v14 = vld [vmem:[#allocation393_spill] sm:$0xff]  ;;  %v12951_v19 = vld [vmem:[#allocation370_spill] sm:$0xff] }
 0x4db   : > { %v11220_v30 = vsel %vm3725_vm11, %v6485_v27, %v6041_v57  ;;  %v6393_v15 = vsel %vm3606_vm4, %v11058_v40, %v12938_v53  ;;  %v6438_v0 = vsel %vm3657_vm7, %v6422_v43, %v12939_v49  ;;  %v6455_v26 = vsel %vm3674_vm8, %v6439_v34, %v12940_v8  ;;  %v12943_v40 = vld [vmem:[#allocation381_spill] sm:$0xff]  ;;  %v12945_v10 = vld [vmem:[#allocation404_spill] sm:$0xff]  ;;  %v6045_v4 = vpop.permute.xlu1 %6044  ;;  %v12952_v17 = vld [vmem:[#allocation403_spill] sm:$0xff] }
 0x4dc   : > { %v11230_v58 = vsel %vm3725_vm11, %v6484_v7, %v6039_v63  ;;  %v6392_v48 = vsel %vm3606_vm4, %v11066_v13, %v12941_v32  ;;  %v6409_v45 = vsel %vm3623_vm5, %v6393_v15, %v12942_v51  ;;  %v6454_v22 = vsel %vm3674_vm8, %v6438_v0, %v12943_v40  ;;  %6250 = vrot.lane.b32.xlu0 %v12945_v10, %s7074_s25  ;;  %v12950_v54 = vld [vmem:[#allocation68_spill] sm:$0xff]  ;;  %v12953_v27 = vld [vmem:[#allocation34_spill] sm:$0xff]  ;;  %v12954_v1 = vld [vmem:[#allocation371_spill] sm:$0xff] }
 0x4dd   : > { %v6471_v56 = vsel %vm3691_vm9, %v6455_v26, %v12944_v6  ;;  %v6408_v38 = vsel %vm3623_vm5, %v6392_v48, %v12946_v35  ;;  %v6425_v42 = vsel %vm3640_vm6, %v6409_v45, %v12947_v2  ;;  %v6470_v13 = vsel %vm3691_vm9, %v6454_v22, %v12948_v14  ;;  %v6043_v62 = vpop.permute.xlu0 %6042  ;;  %v12955_v18 = vld [vmem:[#allocation382_spill] sm:$0xff]  ;;  %v12956_v63 = vld [vmem:[#allocation405_spill] sm:$0xff]  ;;  %v12963_v40 = vld [vmem:[#allocation360_spill] sm:$0xff] }
 0x4de   : > { %v6487_v55 = vsel %vm3708_vm10, %v6471_v56, %v12949_v25  ;;  %v6424_v46 = vsel %vm3640_vm6, %v6408_v38, %v12950_v54  ;;  %v6441_v24 = vsel %vm3657_vm7, %v6425_v42, %v12951_v19  ;;  %v6486_v41 = vsel %vm3708_vm10, %v6470_v13, %v12952_v17  ;;  %6256 = vrot.lane.b32.xlu1 %v12956_v63, %s7074_s25  ;;  %v12957_v53 = vld [vmem:[#allocation74_spill] sm:$0xff]  ;;  %v12962_v51 = vld [vmem:[#allocation89_spill] sm:$0xff]  ;;  %v12964_v6 = vld [vmem:[#allocation395_spill] sm:$0xff] }
 0x4df   : > { %v11260_v23 = vsel %vm3725_vm11, %v6487_v55, %v6045_v4  ;;  %v6395_v57 = vsel %vm3606_vm4, %v11070_v28, %v12953_v27  ;;  %v6440_v43 = vsel %vm3657_vm7, %v6424_v46, %v12954_v1  ;;  %v6457_v34 = vsel %vm3674_vm8, %v6441_v24, %v12955_v18  ;;  %v12958_v49 = vld [vmem:[#allocation62_spill] sm:$0xff]  ;;  %v12959_v28 = vld [vmem:[#allocation383_spill] sm:$0xff]  ;;  %v12965_v56 = vld [vmem:[#allocation409_spill] sm:$0xff]  ;;  %v6049_v38 = vpop.permute.xlu1 %6048 }
 0x4e0   : > { %v11270_v7 = vsel %vm3725_vm11, %v6486_v41, %v6043_v62  ;;  %v6394_v15 = vsel %vm3606_vm4, %v11080_v59, %v12957_v53  ;;  %v6411_v0 = vsel %vm3623_vm5, %v6395_v57, %v12958_v49  ;;  %v6456_v8 = vsel %vm3674_vm8, %v6440_v43, %v12959_v28  ;;  %v12960_v26 = vld [vmem:[#allocation394_spill] sm:$0xff]  ;;  %v12966_v2 = vld [vmem:[#allocation361_spill] sm:$0xff]  ;;  %v12967_v14 = vld [vmem:[#allocation372_spill] sm:$0xff] }
 0x4e1   : > { %v6473_v32 = vsel %vm3691_vm9, %v6457_v34, %v12960_v26  ;;  %v12961_v48 = vld [vmem:[#allocation406_spill] sm:$0xff]  ;;  %v6410_v45 = vsel %vm3623_vm5, %v6394_v15, %v12962_v51  ;;  %v6427_v22 = vsel %vm3640_vm6, %v6411_v0, %v12963_v40  ;;  %v6472_v59 = vsel %vm3691_vm9, %v6456_v8, %v12964_v6  ;;  %v12968_v25 = vld [vmem:[#allocation312_spill] sm:$0xff]  ;;  %v6047_v54 = vpop.permute.xlu0 %6046  ;;  %v12970_v24 = vld [vmem:[#allocation373_spill] sm:$0xff] }
 0x4e2   : > { %6254 = vrot.lane.b32.xlu0 %v12961_v48, %s7074_s25  ;;  %v6489_v35 = vsel %vm3708_vm10, %v6473_v32, %v12965_v56  ;;  %v6426_v42 = vsel %vm3640_vm6, %v6410_v45, %v12966_v2  ;;  %v6443_v13 = vsel %vm3657_vm7, %v6427_v22, %v12967_v14  ;;  %v6488_v55 = vsel %vm3708_vm10, %v6472_v59, %v12968_v25  ;;  %v12969_v46 = vld [vmem:[#allocation30_spill] sm:$0xff]  ;;  %v12971_v41 = vld [vmem:[#allocation384_spill] sm:$0xff]  ;;  %v12972_v57 = vld [vmem:[#allocation407_spill] sm:$0xff] }
 0x4e3   : > { %v11300_v4 = vsel %vm3725_vm11, %v6489_v35, %v6049_v38  ;;  %v6397_v19 = vsel %vm3606_vm4, %v11084_v50, %v12969_v46  ;;  %v6442_v17 = vsel %vm3657_vm7, %v6426_v42, %v12970_v24  ;;  %v6459_v62 = vsel %vm3674_vm8, %v6443_v13, %v12971_v41  ;;  %6292 = vrot.lane.b32.xlu1 %v12972_v57, %s7075_s30  ;;  %v12973_v1 = vld [vmem:[#allocation79_spill] sm:$0xff]  ;;  %v12974_v18 = vld [vmem:[#allocation60_spill] sm:$0xff]  ;;  %v12975_v50 = vld [vmem:[#allocation385_spill] sm:$0xff]  ;;  %v6053_v22 = vpop.permute.xlu1 %6052 }
 0x4e4   : > { %v11310_v27 = vsel %vm3725_vm11, %v6488_v55, %v6047_v54  ;;  %v6396_v43 = vsel %vm3606_vm4, %v11094_v11, %v12973_v1  ;;  %v6413_v34 = vsel %vm3623_vm5, %v6397_v19, %v12974_v18  ;;  %v6458_v53 = vsel %vm3674_vm8, %v6442_v17, %v12975_v50  ;;  %v12976_v15 = vld [vmem:[#allocation396_spill] sm:$0xff]  ;;  %v12978_v28 = vld [vmem:[#allocation95_spill] sm:$0xff]  ;;  %v12979_v26 = vld [vmem:[#allocation362_spill] sm:$0xff] }
 0x4e5   : > { %v6475_v49 = vsel %vm3691_vm9, %v6459_v62, %v12976_v15  ;;  %v12977_v0 = vld [vmem:[#allocation408_spill] sm:$0xff]  ;;  %v6412_v8 = vsel %vm3623_vm5, %v6396_v43, %v12978_v28  ;;  %v6429_v32 = vsel %vm3640_vm6, %v6413_v34, %v12979_v26  ;;  %v12980_v51 = vld [vmem:[#allocation397_spill] sm:$0xff]  ;;  %v12981_v45 = vld [vmem:[#allocation42_spill] sm:$0xff]  ;;  %v6051_v42 = vpop.permute.xlu0 %6050 }
 0x4e6   : > { %6290 = vrot.lane.b32.xlu0 %v12977_v0, %s7075_s30  ;;  %v6474_v11 = vsel %vm3691_vm9, %v6458_v53, %v12980_v51  ;;  %v6491_v40 = vsel %vm3708_vm10, %v6475_v49, %v12981_v45  ;;  %v12982_v6 = vld [vmem:[#allocation363_spill] sm:$0xff]  ;;  %v12983_v56 = vld [vmem:[#allocation374_spill] sm:$0xff]  ;;  %v12984_v14 = vld [vmem:[#allocation41_spill] sm:$0xff] }
 0x4e7   : > { %v6428_v59 = vsel %vm3640_vm6, %v6412_v8, %v12982_v6  ;;  %v6445_v35 = vsel %vm3657_vm7, %v6429_v32, %v12983_v56  ;;  %v6490_v38 = vsel %vm3708_vm10, %v6474_v11, %v11009_v61  ;;  %v11340_v2 = vsel %vm3725_vm11, %v6491_v40, %v6053_v22  ;;  %v12985_v25 = vld [vmem:[#allocation375_spill] sm:$0xff]  ;;  %v12986_v54 = vld [vmem:[#allocation386_spill] sm:$0xff]  ;;  %v12988_v61 = vld [vmem:[#allocation77_spill] sm:$0xff]  ;;  %v6057_v28 = vpop.permute.xlu1 %6056 }
 0x4e8   : > { %v6399_v13 = vsel %vm3606_vm4, %v11098_v47, %v12984_v14  ;;  %v6444_v55 = vsel %vm3657_vm7, %v6428_v59, %v12985_v25  ;;  %v6461_v46 = vsel %vm3674_vm8, %v6445_v35, %v12986_v54  ;;  %v11350_v19 = vsel %vm3725_vm11, %v6490_v38, %v6051_v42  ;;  %v12987_v24 = vld [vmem:[#allocation410_spill] sm:$0xff]  ;;  %v12990_v47 = vld [vmem:[#allocation387_spill] sm:$0xff]  ;;  %v12993_v34 = vld [vmem:[#allocation93_spill] sm:$0xff] }
 0x4e9   : > { %6296 = vrot.lane.b32.xlu1 %v12987_v24, %s7075_s30  ;;  %v6398_v17 = vsel %vm3606_vm4, %v11108_v21, %v12988_v61  ;;  %v12989_v41 = vld [vmem:[#allocation66_spill] sm:$0xff]  ;;  %v6460_v57 = vsel %vm3674_vm8, %v6444_v55, %v12990_v47  ;;  %v12992_v18 = vld [vmem:[#allocation411_spill] sm:$0xff]  ;;  %v12994_v53 = vld [vmem:[#allocation364_spill] sm:$0xff]  ;;  %v6055_v40 = vpop.permute.xlu0 %6054  ;;  %v13005_v24 = vmov 0.0  }
 0x4ea   : > { %v6415_v62 = vsel %vm3623_vm5, %v6399_v13, %v12989_v41  ;;  %v12991_v1 = vld [vmem:[#allocation398_spill] sm:$0xff]  ;;  %6294 = vrot.lane.b32.xlu0 %v12992_v18, %s7075_s30  ;;  %v6414_v50 = vsel %vm3623_vm5, %v6398_v17, %v12993_v34  ;;  %v12995_v49 = vld [vmem:[#allocation399_spill] sm:$0xff]  ;;  %v12996_v8 = vld [vmem:[#allocation365_spill] sm:$0xff]  ;;  %v4593_v61 = vcombine.high %v10893_v36, %v13005_v24  ;;  %v4495_v47 = vcombine.high %v10896_v39, %v13005_v24 }
 0x4eb   : > { %v6477_v43 = vsel %vm3691_vm9, %v6461_v46, %v12991_v1  ;;  %v6431_v15 = vsel %vm3640_vm6, %v6415_v62, %v12994_v53  ;;  %v6476_v21 = vsel %vm3691_vm9, %v6460_v57, %v12995_v49  ;;  %v6430_v26 = vsel %vm3640_vm6, %v6414_v50, %v12996_v8  ;;  %v12997_v32 = vld [vmem:[#allocation376_spill] sm:$0xff]  ;;  %v12998_v22 = vld [vmem:[#allocation377_spill] sm:$0xff]  ;;  %v6061_v46 = vpop.permute.xlu1 %6060 }
 0x4ec   : > { %v6493_v0 = vsel %vm3708_vm10, %v6477_v43, %v11038_v20  ;;  %v6447_v51 = vsel %vm3657_vm7, %v6431_v15, %v12997_v32  ;;  %v6492_v11 = vsel %vm3708_vm10, %v6476_v21, %v11048_v37  ;;  %v6446_v6 = vsel %vm3657_vm7, %v6430_v26, %v12998_v22  ;;  %v12999_v59 = vld [vmem:[#allocation388_spill] sm:$0xff]  ;;  %v13001_v38 = vld [vmem:[#allocation389_spill] sm:$0xff] }
 0x4ed   : > { %v11380_v45 = vsel %vm3725_vm11, %v6493_v0, %v6057_v28  ;;  %v6463_v20 = vsel %vm3674_vm8, %v6447_v51, %v12999_v59  ;;  %v6508_v56 = vsel %vm3725_vm11, %v6492_v11, %v6055_v40  ;;  %v13000_v35 = vld [vmem:[#allocation412_spill] sm:$0xff]  ;;  %v6462_v42 = vsel %vm3674_vm8, %v6446_v6, %v13001_v38  ;;  %v13003_v13 = vld [vmem:[#allocation413_spill] sm:$0xff]  ;;  %v6059_v62 = vpop.permute.xlu0 %6058 }
 0x4ee   : > { %6300 = vrot.lane.b32.xlu1 %v13000_v35, %s7075_s30  ;;  %v13002_v14 = vld [vmem:[#allocation400_spill] sm:$0xff]  ;;  %6298 = vrot.lane.b32.xlu0 %v13003_v13, %s7075_s30  ;;  %v13004_v25 = vld [vmem:[#allocation401_spill] sm:$0xff]  ;;  %v4789_v1 = vcombine.high %v10899_v16, %v13005_v24  ;;  %v4691_v43 = vcombine.high %v10902_v52, %v13005_v24  ;;  %v4985_v34 = vcombine.high %v10906_v29, %v13005_v24 }
 0x4ef   : > { %v6479_v37 = vsel %vm3691_vm9, %v6463_v20, %v13002_v14  ;;  %v6478_v55 = vsel %vm3691_vm9, %v6462_v42, %v13004_v25  ;;  %v4887_v50 = vcombine.high %v10909_v3, %v13005_v24  ;;  %v5181_v53 = vcombine.high %v10912_v33, %v13005_v24 }
 0x4f0   : > { %v6495_v54 = vsel %vm3708_vm10, %v6479_v37, %v11090_v31  ;;  %v6494_v17 = vsel %vm3708_vm10, %v6478_v55, %v11104_v5  ;;  %v6065_v31 = vpop.permute.xlu1 %6064  ;;  %v5083_v15 = vcombine.high %v12945_v10, %v13005_v24  ;;  %v5377_v33 = vcombine.high %v12956_v63, %v13005_v24 }
 0x4f1   : > { %v6511_v41 = vsel %vm3725_vm11, %v6495_v54, %v6061_v46  ;;  %v6510_v57 = vsel %vm3725_vm11, %v6494_v17, %v6059_v62  ;;  %v6513_v36 = vsel %vm3725_vm11, %v11143_v44, %v6065_v31  ;;  %v6063_v5 = vpop.permute.xlu0 %6062  ;;  %v5279_v21 = vcombine.high %v12961_v48, %v13005_v24  ;;  %v13008_v54 = vld [vmem:[#allocation101_spill] sm:$0xff]  ;;  %v13011_v17 = vld [vmem:[#allocation32_spill] sm:$0xff]  ;;  %v13012_v62 = vld [vmem:[#allocation103_spill] sm:$0xff] }
 0x4f2   : > { %6304 = vrot.lane.b32.xlu1 %v4593_v61, %s7075_s30  ;;  %6302 = vrot.lane.b32.xlu0 %v4495_v47, %s7075_s30  ;;  %v6512_v39 = vsel %vm3725_vm11, %v11152_v60, %v6063_v5  ;;  %v13009_v46 = vld [vmem:[#allocation29_spill] sm:$0xff]  ;;  %v13010_v61 = vld [vmem:[#allocation102_spill] sm:$0xff]  ;;  %v13014_v31 = vld [vmem:[#allocation104_spill] sm:$0xff] }
 0x4f3   : > { %v3557_v24 = vsel %vm3555_vm1, %v13009_v46, %v13008_v54  ;;  %v13013_v47 = vld [vmem:[#allocation33_spill] sm:$0xff]  ;;  %v13038_v46 = vld [vmem:[#allocation116_spill] sm:$0xff] }
 0x4f4   : > { %v6101_v18 = vpop.permute.xlu1 %6100 }
 0x4f5   : > { %v6515_v16 = vsel %vm3742_vm12, %v11181_v9, %v6101_v18  ;;  %v6099_v44 = vpop.permute.xlu0 %6098 }
 0x4f6   : > { %6308 = vrot.lane.b32.xlu1 %v4789_v1, %s7075_s30  ;;  %6306 = vrot.lane.b32.xlu0 %v4691_v43, %s7075_s30  ;;  %v6514_v52 = vsel %vm3742_vm12, %v11190_v12, %v6099_v44  ;;  %v13015_v1 = vld [vmem:[#allocation35_spill] sm:$0xff]  ;;  %v13016_v43 = vld [vmem:[#allocation105_spill] sm:$0xff] }
 0x4f8   : > { %v6105_v60 = vpop.permute.xlu1 %6104 }
 0x4f9   : > { %v11433_v29 = vsel %vm3742_vm12, %v11220_v30, %v6105_v60  ;;  %v6103_v9 = vpop.permute.xlu0 %6102 }
 0x4fa   : > { %6312 = vrot.lane.b32.xlu1 %v4985_v34, %s7075_s30  ;;  %6310 = vrot.lane.b32.xlu0 %v4887_v50, %s7075_s30  ;;  %v11439_v3 = vsel %vm3742_vm12, %v11230_v58, %v6103_v9  ;;  %v13018_v34 = vld [vmem:[#allocation106_spill] sm:$0xff]  ;;  %v13020_v50 = vld [vmem:[#allocation107_spill] sm:$0xff] }
 0x4fb   : > { %v13023_v9 = vld [vmem:[#allocation43_spill] sm:$0xff] }
 0x4fc   : > { %v6109_v12 = vpop.permute.xlu1 %6108 }
 0x4fd   : > { %v6519_v30 = vsel %vm3742_vm12, %v11260_v23, %v6109_v12  ;;  %v6107_v49 = vpop.permute.xlu0 %6106  ;;  %v13024_v12 = vld [vmem:[#allocation109_spill] sm:$0xff] }
 0x4fe   : > { %6316 = vrot.lane.b32.xlu1 %v5181_v53, %s7075_s30  ;;  %6314 = vrot.lane.b32.xlu0 %v5083_v15, %s7075_s30  ;;  %v6518_v10 = vsel %vm3742_vm12, %v11270_v7, %v6107_v49  ;;  %v13022_v53 = vld [vmem:[#allocation108_spill] sm:$0xff]  ;;  %v13026_v49 = vld [vmem:[#allocation110_spill] sm:$0xff] }
 0x4ff   : > { %v3562_v15 = vsel %vm3555_vm1, %v13023_v9, %v13022_v53  ;;  %v13044_v9 = vld [vmem:[#allocation121_spill] sm:$0xff] }
 0x500   : > { %v6113_v58 = vpop.permute.xlu1 %6112 }
 0x501   : > { %v11455_v0 = vsel %vm3742_vm12, %v11300_v4, %v6113_v58  ;;  %v6111_v63 = vpop.permute.xlu0 %6110  ;;  %v13028_v58 = vld [vmem:[#allocation111_spill] sm:$0xff] }
 0x502   : > { %6320 = vrot.lane.b32.xlu1 %v5377_v33, %s7075_s30  ;;  %6318 = vrot.lane.b32.xlu0 %v5279_v21, %s7075_s30  ;;  %v11459_v23 = vsel %vm3742_vm12, %v11310_v27, %v6111_v63  ;;  %v13025_v33 = vld [vmem:[#allocation44_spill] sm:$0xff]  ;;  %v13027_v21 = vld [vmem:[#allocation47_spill] sm:$0xff] }
 0x503   : > { %v13029_v63 = vld [vmem:[#allocation48_spill] sm:$0xff] }
 0x504   : > { %v6117_v28 = vpop.permute.xlu1 %6116 }
 0x505   : > { %v6523_v48 = vsel %vm3742_vm12, %v11340_v2, %v6117_v28  ;;  %v6115_v8 = vpop.permute.xlu0 %6114  ;;  %v3567_v28 = vsel %vm3555_vm1, %v13029_v63, %v13028_v58  ;;  %v13048_v58 = vld [vmem:[#allocation125_spill] sm:$0xff] }
 0x506   : > { %v6522_v7 = vsel %vm3742_vm12, %v11350_v19, %v6115_v8  ;;  %v13030_v8 = vld [vmem:[#allocation112_spill] sm:$0xff] }
 0x508   : > { %v6121_v26 = vpop.permute.xlu1 %6120 }
 0x509   : > { %v11467_v32 = vsel %vm3742_vm12, %v11380_v45, %v6121_v26  ;;  %v6119_v4 = vpop.permute.xlu0 %6118  ;;  %v13031_v26 = vld [vmem:[#allocation51_spill] sm:$0xff] }
 0x50a   : > { %v11470_v51 = vsel %vm3742_vm12, %v6508_v56, %v6119_v4  ;;  %v3566_v4 = vsel %vm3555_vm1, %v13031_v26, %v13030_v8  ;;  %v13049_v8 = vld [vmem:[#allocation126_spill] sm:$0xff]  ;;  %v13050_v26 = vld [vmem:[#allocation127_spill] sm:$0xff] }
 0x50c   : > { %v6125_v11 = vpop.permute.xlu1 %6124 }
 0x50d   : > { %v11473_v27 = vsel %vm3742_vm12, %v6511_v41, %v6125_v11  ;;  %v6123_v40 = vpop.permute.xlu0 %6122  ;;  %v3556_v41 = vsel %vm3555_vm1, %v13011_v17, %v13010_v61  ;;  %v13032_v11 = vld [vmem:[#allocation113_spill] sm:$0xff]  ;;  %v13039_v61 = vld [vmem:[#allocation59_spill] sm:$0xff] }
 0x50e   : > { %v11476_v2 = vsel %vm3742_vm12, %v6510_v57, %v6123_v40  ;;  %v3559_v57 = vsel %vm3555_vm1, %v13013_v47, %v13012_v62  ;;  %v13033_v40 = vld [vmem:[#allocation52_spill] sm:$0xff]  ;;  %v3570_v17 = vsel %vm3555_vm1, %v13039_v61, %v13038_v46  ;;  %v13040_v47 = vld [vmem:[#allocation117_spill] sm:$0xff]  ;;  %v13057_v46 = vld [vmem:[#allocation134_spill] sm:$0xff] }
 0x510   : > { %v6129_v22 = vpop.permute.xlu1 %6128 }
 0x511   : > { %v11479_v19 = vsel %vm3742_vm12, %v6513_v36, %v6129_v22  ;;  %v6127_v6 = vpop.permute.xlu0 %6126  ;;  %v3558_v36 = vsel %vm3555_vm1, %v13015_v1, %v13014_v31  ;;  %v3569_v22 = vsel %vm3555_vm1, %v13033_v40, %v13032_v11  ;;  %v3574_v31 = vsel %vm3572_vm2, %v3557_v24, %v13040_v47  ;;  %v13041_v1 = vld [vmem:[#allocation118_spill] sm:$0xff]  ;;  %v13051_v11 = vld [vmem:[#allocation128_spill] sm:$0xff] }
 0x512   : > { %13006 = vst [vmem:[#allocation313_spill] sm:$0xff] %v11479_v19  ;;  %v11482_v45 = vsel %vm3742_vm12, %v6512_v39, %v6127_v6  ;;  %v13017_v39 = vld [vmem:[#allocation36_spill] sm:$0xff]  ;;  %v13034_v6 = vld [vmem:[#allocation114_spill] sm:$0xff] }
 0x513   : > { %13007 = vst [vmem:[#allocation38_spill] sm:$0xff] %v11482_v45  ;;  %v3561_v18 = vsel %vm3555_vm1, %v13017_v39, %v13016_v43  ;;  %v3573_v43 = vsel %vm3572_vm2, %v3556_v41, %v13041_v1  ;;  %v13042_v39 = vld [vmem:[#allocation119_spill] sm:$0xff]  ;;  %v13060_v1 = vld [vmem:[#allocation137_spill] sm:$0xff]  ;;  %v13178_v45 = vld [vmem:[#allocation236_spill] sm:$0xff] }
 0x514   : > { %v6165_v59 = vpop.permute.xlu1 %6164  ;;  %v13046_v41 = vld [vmem:[#allocation123_spill] sm:$0xff]  ;;  %v13194_v19 = vld [vmem:[#allocation252_spill] sm:$0xff] }
 0x515   : > { %v11485_v20 = vsel %vm3759_vm13, %v6515_v16, %v6165_v59  ;;  %v6163_v56 = vpop.permute.xlu0 %6162  ;;  %v13019_v16 = vld [vmem:[#allocation39_spill] sm:$0xff] }
 0x516   : > { %v11488_v35 = vsel %vm3759_vm13, %v6514_v52, %v6163_v56  ;;  %v3560_v44 = vsel %vm3555_vm1, %v13019_v16, %v13018_v34  ;;  %v13021_v52 = vld [vmem:[#allocation40_spill] sm:$0xff]  ;;  %v13035_v59 = vld [vmem:[#allocation55_spill] sm:$0xff]  ;;  %v3576_v34 = vsel %vm3572_vm2, %v3559_v57, %v13042_v39  ;;  %v13061_v39 = vld [vmem:[#allocation138_spill] sm:$0xff] }
 0x517   : > { %v3563_v60 = vsel %vm3555_vm1, %v13021_v52, %v13020_v50  ;;  %v3568_v56 = vsel %vm3555_vm1, %v13035_v59, %v13034_v6  ;;  %v13043_v52 = vld [vmem:[#allocation120_spill] sm:$0xff]  ;;  %v13053_v6 = vld [vmem:[#allocation130_spill] sm:$0xff] }
 0x518   : > { %v11490_v38 = vpop.permute.xlu1 %6168  ;;  %v3575_v53 = vsel %vm3572_vm2, %v3558_v36, %v13043_v52  ;;  %v13047_v57 = vld [vmem:[#allocation124_spill] sm:$0xff] }
 0x519   : > { %v11492_v42 = vpop.permute.xlu0 %6166  ;;  %v13063_v52 = vld [vmem:[#allocation140_spill] sm:$0xff] }
 0x51c   : > { %v6173_v14 = vpop.permute.xlu1 %6172 }
 0x51d   : > { %v11495_v37 = vsel %vm3759_vm13, %v6519_v30, %v6173_v14  ;;  %v6171_v13 = vpop.permute.xlu0 %6170  ;;  %v3565_v30 = vsel %vm3555_vm1, %v13025_v33, %v13024_v12  ;;  %v13036_v14 = vld [vmem:[#allocation115_spill] sm:$0xff]  ;;  %v3578_v12 = vsel %vm3572_vm2, %v3561_v18, %v13044_v9  ;;  %v13045_v33 = vld [vmem:[#allocation122_spill] sm:$0xff]  ;;  %v3584_v18 = vsel %vm3572_vm2, %v3567_v28, %v13050_v26  ;;  %v13064_v9 = vld [vmem:[#allocation141_spill] sm:$0xff] }
 0x51e   : > { %v11498_v25 = vsel %vm3759_vm13, %v6518_v10, %v6171_v13  ;;  %v3564_v10 = vsel %vm3555_vm1, %v13027_v21, %v13026_v49  ;;  %v13037_v13 = vld [vmem:[#allocation56_spill] sm:$0xff]  ;;  %v3577_v49 = vsel %vm3572_vm2, %v3560_v44, %v13045_v33  ;;  %v3580_v21 = vsel %vm3572_vm2, %v3563_v60, %v13046_v41  ;;  %v13065_v41 = vld [vmem:[#allocation142_spill] sm:$0xff] }
 0x51f   : > { %v3571_v54 = vsel %vm3555_vm1, %v13037_v13, %v13036_v14  ;;  %v3582_v63 = vsel %vm3572_vm2, %v3565_v30, %v13048_v58  ;;  %v3581_v36 = vsel %vm3572_vm2, %v3564_v10, %v13049_v8  ;;  %v3583_v44 = vsel %vm3572_vm2, %v3566_v4, %v13051_v11  ;;  %v13055_v14 = vld [vmem:[#allocation132_spill] sm:$0xff]  ;;  %v13056_v13 = vld [vmem:[#allocation133_spill] sm:$0xff]  ;;  %v13069_v26 = vld [vmem:[#allocation146_spill] sm:$0xff] }
 0x520   : > { %v11500_v55 = vpop.permute.xlu1 %6176  ;;  %v3585_v60 = vsel %vm3572_vm2, %v3568_v56, %v13053_v6  ;;  %v3587_v10 = vsel %vm3572_vm2, %v3570_v17, %v13055_v14  ;;  %v3591_v28 = vsel %vm3589_vm3, %v3574_v31, %v13056_v13  ;;  %v3590_v4 = vsel %vm3589_vm3, %v3573_v43, %v13057_v46  ;;  %v13059_v56 = vld [vmem:[#allocation136_spill] sm:$0xff]  ;;  %v13068_v8 = vld [vmem:[#allocation145_spill] sm:$0xff]  ;;  %v13073_v14 = vld [vmem:[#allocation150_spill] sm:$0xff] }
 0x521   : > { %v11514_v5 = vpop.permute.xlu0 %6174  ;;  %v3592_v47 = vsel %vm3589_vm3, %v3575_v53, %v13059_v56  ;;  %v3594_v17 = vsel %vm3589_vm3, %v3577_v49, %v13061_v39  ;;  %v3599_v33 = vsel %vm3589_vm3, %v3582_v63, %v13064_v9  ;;  %v13067_v58 = vld [vmem:[#allocation144_spill] sm:$0xff]  ;;  %v13074_v13 = vld [vmem:[#allocation151_spill] sm:$0xff]  ;;  %v13078_v56 = vld [vmem:[#allocation154_spill] sm:$0xff]  ;;  %vm6731_vm1 = vcmask 261120  }
 0x522   : > { %v13071_v63 = vld [vmem:[#allocation148_spill] sm:$0xff] }
 0x523   : > { %v3604_v6 = vsel %vm3589_vm3, %v3587_v10, %v13071_v63  ;;  %v13075_v46 = vld [vmem:[#allocation152_spill] sm:$0xff] }
 0x524   : > { %v6181_v62 = vpop.permute.xlu1 %6180 }
 0x525   : > { %v11559_v16 = vsel %vm3759_vm13, %v6523_v48, %v6181_v62  ;;  %v6179_v50 = vpop.permute.xlu0 %6178  ;;  %v3579_v48 = vsel %vm3572_vm2, %v3562_v15, %v13047_v57  ;;  %v13054_v15 = vld [vmem:[#allocation131_spill] sm:$0xff] }
 0x526   : > { %v11568_v24 = vsel %vm3759_vm13, %v6522_v7, %v6179_v50  ;;  %v13052_v7 = vld [vmem:[#allocation129_spill] sm:$0xff]  ;;  %v3588_v30 = vsel %vm3572_vm2, %v3571_v54, %v13054_v15  ;;  %v3595_v54 = vsel %vm3589_vm3, %v3578_v12, %v13060_v1  ;;  %v13062_v50 = vld [vmem:[#allocation139_spill] sm:$0xff]  ;;  %v3596_v43 = vsel %vm3589_vm3, %v3579_v48, %v13063_v52 }
 0x527   : > { %v3586_v40 = vsel %vm3572_vm2, %v3569_v22, %v13052_v7  ;;  %v13058_v22 = vld [vmem:[#allocation135_spill] sm:$0xff]  ;;  %v3597_v31 = vsel %vm3589_vm3, %v3580_v21, %v13062_v50  ;;  %v3600_v12 = vsel %vm3589_vm3, %v3583_v44, %v13067_v58  ;;  %v3602_v21 = vsel %vm3589_vm3, %v3585_v60, %v13069_v26 }
 0x528   : > { %v11586_v59 = vpop.permute.xlu1 %6184  ;;  %v3593_v62 = vsel %vm3589_vm3, %v3576_v34, %v13058_v22  ;;  %v3598_v34 = vsel %vm3589_vm3, %v3581_v36, %v13065_v41  ;;  %v13066_v57 = vld [vmem:[#allocation143_spill] sm:$0xff]  ;;  %v3603_v49 = vsel %vm3589_vm3, %v3586_v40, %v13068_v8  ;;  %v13072_v36 = vld [vmem:[#allocation149_spill] sm:$0xff]  ;;  %v3607_v40 = vsel %vm3606_vm4, %v3590_v4, %v13073_v14  ;;  %v13080_v4 = vld [vmem:[#allocation156_spill] sm:$0xff] }
 0x529   : > { %v11596_v61 = vpop.permute.xlu0 %6182  ;;  %v3601_v53 = vsel %vm3589_vm3, %v3584_v18, %v13066_v57  ;;  %v13070_v48 = vld [vmem:[#allocation147_spill] sm:$0xff]  ;;  %v3608_v15 = vsel %vm3606_vm4, %v3591_v28, %v13072_v36  ;;  %v3610_v60 = vsel %vm3606_vm4, %v3593_v62, %v13074_v13  ;;  %v13077_v22 = vld [vmem:[#allocation153_spill] sm:$0xff]  ;;  %v3613_v50 = vsel %vm3606_vm4, %v3596_v43, %v13080_v4  ;;  %v13084_v57 = vld [vmem:[#allocation20_spill] sm:$0xff] }
 0x52a   : > { %v3605_v7 = vsel %vm3589_vm3, %v3588_v30, %v13070_v48  ;;  %v3609_v30 = vsel %vm3606_vm4, %v3592_v47, %v13075_v46  ;;  %v3612_v28 = vsel %vm3606_vm4, %v3595_v54, %v13077_v22  ;;  %v13079_v1 = vld [vmem:[#allocation155_spill] sm:$0xff]  ;;  %v13081_v62 = vld [vmem:[#allocation157_spill] sm:$0xff]  ;;  %v13082_v47 = vld [vmem:[#allocation158_spill] sm:$0xff]  ;;  %v3617_v54 = vsel %vm3606_vm4, %v3600_v12, %v13084_v57 }
 0x52b   : > { %v3614_v39 = vsel %vm3606_vm4, %v3597_v31, %v13079_v1  ;;  %v3616_v52 = vsel %vm3606_vm4, %v3599_v33, %v13081_v62  ;;  %v3615_v9 = vsel %vm3606_vm4, %v3598_v34, %v13082_v47  ;;  %v13087_v8 = vld [vmem:[#allocation19_spill] sm:$0xff]  ;;  %v13092_v12 = vld [vmem:[#allocation21_spill] sm:$0xff]  ;;  %v13094_v14 = vld [vmem:[#allocation24_spill] sm:$0xff] }
 0x52c   : > { %v6189_v11 = vpop.permute.xlu1 %6188  ;;  %v3619_v43 = vsel %vm3606_vm4, %v3602_v21, %v13087_v8  ;;  %v13088_v26 = vld [vmem:[#allocation11_spill] sm:$0xff]  ;;  %v3624_v36 = vsel %vm3623_vm5, %v3607_v40, %v13092_v12  ;;  %v3626_v21 = vsel %vm3623_vm5, %v3609_v30, %v13094_v14  ;;  %v13095_v13 = vld [vmem:[#allocation16_spill] sm:$0xff]  ;;  %v13098_v1 = vld [vmem:[#allocation18_spill] sm:$0xff] }
 0x52d   : > { %v11630_v18 = vsel %vm3759_vm13, %v11473_v27, %v6189_v11  ;;  %v6187_v44 = vpop.permute.xlu0 %6186  ;;  %v3611_v27 = vsel %vm3606_vm4, %v3594_v17, %v13078_v56  ;;  %v13086_v17 = vld [vmem:[#allocation12_spill] sm:$0xff]  ;;  %v3622_v33 = vsel %vm3606_vm4, %v3605_v7, %v13088_v26  ;;  %v13089_v11 = vld [vmem:[#allocation22_spill] sm:$0xff]  ;;  %v3629_v7 = vsel %vm3623_vm5, %v3612_v28, %v13095_v13  ;;  %v13096_v46 = vld [vmem:[#allocation23_spill] sm:$0xff] }
 0x52e   : > { %v11640_v10 = vsel %vm3759_vm13, %v11476_v2, %v6187_v44  ;;  %v13083_v2 = vld [vmem:[#allocation10_spill] sm:$0xff]  ;;  %v3620_v31 = vsel %vm3606_vm4, %v3603_v49, %v13086_v17  ;;  %v3621_v34 = vsel %vm3606_vm4, %v3604_v6, %v13089_v11  ;;  %v13093_v44 = vld [vmem:[#allocation13_spill] sm:$0xff]  ;;  %v3628_v6 = vsel %vm3623_vm5, %v3611_v27, %v13096_v46  ;;  %v13097_v22 = vld [vmem:[#allocation15_spill] sm:$0xff] }
 0x52f   : > { %13076 = vst [vmem:[#allocation314_spill] sm:$0xff] %v11640_v10  ;;  %v3618_v41 = vsel %vm3606_vm4, %v3601_v53, %v13083_v2  ;;  %v13091_v53 = vld [vmem:[#allocation14_spill] sm:$0xff]  ;;  %v3627_v49 = vsel %vm3623_vm5, %v3610_v60, %v13093_v44  ;;  %v3631_v56 = vsel %vm3623_vm5, %v3614_v39, %v13097_v22  ;;  %v13099_v4 = vld [vmem:[#allocation25_spill] sm:$0xff]  ;;  %v13101_v47 = vld [vmem:[#allocation159_spill] sm:$0xff] }
 0x530   : > { %v11658_v58 = vpop.permute.xlu1 %6192  ;;  %v3625_v63 = vsel %vm3623_vm5, %v3608_v15, %v13091_v53  ;;  %v3630_v15 = vsel %vm3623_vm5, %v3613_v50, %v13098_v1  ;;  %v3633_v40 = vsel %vm3623_vm5, %v3616_v52, %v13099_v4  ;;  %v13100_v62 = vld [vmem:[#allocation17_spill] sm:$0xff]  ;;  %v3635_v30 = vsel %vm3623_vm5, %v3618_v41, %v13101_v47  ;;  %v13102_v2 = vld [vmem:[#allocation160_spill] sm:$0xff]  ;;  %v13104_v17 = vld [vmem:[#allocation162_spill] sm:$0xff] }
 0x531   : > { %13085 = vst [vmem:[#allocation50_spill] sm:$0xff] %v11658_v58  ;;  %v11668_v48 = vpop.permute.xlu0 %6190  ;;  %v3632_v60 = vsel %vm3623_vm5, %v3615_v9, %v13100_v62  ;;  %v3634_v28 = vsel %vm3623_vm5, %v3617_v54, %v13102_v2  ;;  %v13103_v27 = vld [vmem:[#allocation161_spill] sm:$0xff]  ;;  %v3636_v50 = vsel %vm3623_vm5, %v3619_v43, %v13104_v17  ;;  %v13105_v8 = vld [vmem:[#allocation163_spill] sm:$0xff]  ;;  %v13106_v26 = vld [vmem:[#allocation164_spill] sm:$0xff] }
 0x532   : > { %13090 = vst [vmem:[#allocation315_spill] sm:$0xff] %v11668_v48  ;;  %v3637_v39 = vsel %vm3623_vm5, %v3620_v31, %v13103_v27  ;;  %v3639_v52 = vsel %vm3623_vm5, %v3622_v33, %v13105_v8  ;;  %v3638_v9 = vsel %vm3623_vm5, %v3621_v34, %v13106_v26  ;;  %v13107_v41 = vld [vmem:[#allocation165_spill] sm:$0xff]  ;;  %v13108_v54 = vld [vmem:[#allocation166_spill] sm:$0xff]  ;;  %v13109_v44 = vld [vmem:[#allocation167_spill] sm:$0xff] }
 0x533   : > { %v3642_v53 = vsel %vm3640_vm6, %v3625_v63, %v13107_v41  ;;  %v3641_v12 = vsel %vm3640_vm6, %v3624_v36, %v13108_v54  ;;  %v3644_v31 = vsel %vm3640_vm6, %v3627_v49, %v13109_v44  ;;  %v13110_v14 = vld [vmem:[#allocation168_spill] sm:$0xff]  ;;  %v13111_v13 = vld [vmem:[#allocation169_spill] sm:$0xff]  ;;  %v13112_v46 = vld [vmem:[#allocation170_spill] sm:$0xff] }
 0x534   : > { %v11694_v57 = vpop.permute.xlu1 %6228  ;;  %v3643_v43 = vsel %vm3640_vm6, %v3626_v21, %v13110_v14  ;;  %v3646_v33 = vsel %vm3640_vm6, %v3629_v7, %v13111_v13  ;;  %v3645_v34 = vsel %vm3640_vm6, %v3628_v6, %v13112_v46  ;;  %v13113_v22 = vld [vmem:[#allocation171_spill] sm:$0xff]  ;;  %v13114_v4 = vld [vmem:[#allocation172_spill] sm:$0xff]  ;;  %v13115_v62 = vld [vmem:[#allocation173_spill] sm:$0xff] }
 0x535   : > { %v11704_v11 = vpop.permute.xlu0 %6226  ;;  %v3648_v1 = vsel %vm3640_vm6, %v3631_v56, %v13113_v22  ;;  %v3647_v63 = vsel %vm3640_vm6, %v3630_v15, %v13114_v4  ;;  %v3650_v36 = vsel %vm3640_vm6, %v3633_v40, %v13115_v62  ;;  %v13116_v47 = vld [vmem:[#allocation174_spill] sm:$0xff]  ;;  %v13117_v2 = vld [vmem:[#allocation175_spill] sm:$0xff]  ;;  %v13118_v27 = vld [vmem:[#allocation176_spill] sm:$0xff] }
 0x536   : > { %v3649_v49 = vsel %vm3640_vm6, %v3632_v60, %v13116_v47  ;;  %v3652_v21 = vsel %vm3640_vm6, %v3635_v30, %v13117_v2  ;;  %v3651_v7 = vsel %vm3640_vm6, %v3634_v28, %v13118_v27  ;;  %v13119_v6 = vld [vmem:[#allocation177_spill] sm:$0xff]  ;;  %v13120_v8 = vld [vmem:[#allocation178_spill] sm:$0xff]  ;;  %v13121_v26 = vld [vmem:[#allocation179_spill] sm:$0xff] }
 0x537   : > { %v3654_v56 = vsel %vm3640_vm6, %v3637_v39, %v13119_v6  ;;  %v3653_v15 = vsel %vm3640_vm6, %v3636_v50, %v13120_v8  ;;  %v3656_v40 = vsel %vm3640_vm6, %v3639_v52, %v13121_v26  ;;  %v13122_v41 = vld [vmem:[#allocation180_spill] sm:$0xff]  ;;  %v13123_v30 = vld [vmem:[#allocation181_spill] sm:$0xff]  ;;  %v13124_v28 = vld [vmem:[#allocation182_spill] sm:$0xff] }
 0x538   : > { %v11730_v17 = vpop.permute.xlu1 %6232  ;;  %v3655_v60 = vsel %vm3640_vm6, %v3638_v9, %v13122_v41  ;;  %v3659_v44 = vsel %vm3657_vm7, %v3642_v53, %v13123_v30  ;;  %v3658_v14 = vsel %vm3657_vm7, %v3641_v12, %v13124_v28  ;;  %v13125_v13 = vld [vmem:[#allocation183_spill] sm:$0xff]  ;;  %v13126_v46 = vld [vmem:[#allocation184_spill] sm:$0xff]  ;;  %v13127_v22 = vld [vmem:[#allocation185_spill] sm:$0xff] }
 0x539   : > { %v11740_v54 = vpop.permute.xlu0 %6230  ;;  %v3661_v39 = vsel %vm3657_vm7, %v3644_v31, %v13125_v13  ;;  %v3660_v50 = vsel %vm3657_vm7, %v3643_v43, %v13126_v46  ;;  %v3663_v52 = vsel %vm3657_vm7, %v3646_v33, %v13127_v22  ;;  %v13128_v4 = vld [vmem:[#allocation186_spill] sm:$0xff]  ;;  %v13129_v62 = vld [vmem:[#allocation187_spill] sm:$0xff]  ;;  %v13130_v2 = vld [vmem:[#allocation188_spill] sm:$0xff] }
 0x53a   : > { %v3662_v9 = vsel %vm3657_vm7, %v3645_v34, %v13128_v4  ;;  %v3665_v47 = vsel %vm3657_vm7, %v3648_v1, %v13129_v62  ;;  %v3664_v53 = vsel %vm3657_vm7, %v3647_v63, %v13130_v2  ;;  %v13131_v27 = vld [vmem:[#allocation189_spill] sm:$0xff]  ;;  %v13132_v6 = vld [vmem:[#allocation190_spill] sm:$0xff]  ;;  %v13133_v8 = vld [vmem:[#allocation191_spill] sm:$0xff] }
 0x53b   : > { %v3667_v12 = vsel %vm3657_vm7, %v3650_v36, %v13131_v27  ;;  %v3666_v31 = vsel %vm3657_vm7, %v3649_v49, %v13132_v6  ;;  %v3669_v43 = vsel %vm3657_vm7, %v3652_v21, %v13133_v8  ;;  %v13134_v26 = vld [vmem:[#allocation192_spill] sm:$0xff]  ;;  %v13135_v34 = vld [vmem:[#allocation193_spill] sm:$0xff]  ;;  %v13136_v30 = vld [vmem:[#allocation194_spill] sm:$0xff] }
 0x53c   : > { %v3668_v33 = vsel %vm3657_vm7, %v3651_v7, %v13134_v26  ;;  %v11766_v41 = vpop.permute.xlu1 %6236  ;;  %v3671_v1 = vsel %vm3657_vm7, %v3654_v56, %v13135_v34  ;;  %v3670_v63 = vsel %vm3657_vm7, %v3653_v15, %v13136_v30  ;;  %v13137_v28 = vld [vmem:[#allocation195_spill] sm:$0xff]  ;;  %v13138_v13 = vld [vmem:[#allocation196_spill] sm:$0xff]  ;;  %v13139_v21 = vld [vmem:[#allocation197_spill] sm:$0xff] }
 0x53d   : > { %v3673_v36 = vsel %vm3657_vm7, %v3656_v40, %v13137_v28  ;;  %v3672_v49 = vsel %vm3657_vm7, %v3655_v60, %v13138_v13  ;;  %v11776_v46 = vpop.permute.xlu0 %6234  ;;  %v3676_v22 = vsel %vm3674_vm8, %v3659_v44, %v13139_v21  ;;  %v13140_v7 = vld [vmem:[#allocation198_spill] sm:$0xff]  ;;  %v13141_v62 = vld [vmem:[#allocation199_spill] sm:$0xff]  ;;  %v13142_v2 = vld [vmem:[#allocation200_spill] sm:$0xff] }
 0x53e   : > { %v3675_v4 = vsel %vm3674_vm8, %v3658_v14, %v13140_v7  ;;  %v3678_v56 = vsel %vm3674_vm8, %v3661_v39, %v13141_v62  ;;  %v3677_v15 = vsel %vm3674_vm8, %v3660_v50, %v13142_v2  ;;  %v13143_v27 = vld [vmem:[#allocation201_spill] sm:$0xff]  ;;  %v13144_v6 = vld [vmem:[#allocation202_spill] sm:$0xff]  ;;  %v13145_v8 = vld [vmem:[#allocation203_spill] sm:$0xff] }
 0x53f   : > { %v3680_v40 = vsel %vm3674_vm8, %v3663_v52, %v13143_v27  ;;  %v3679_v60 = vsel %vm3674_vm8, %v3662_v9, %v13144_v6  ;;  %v3682_v26 = vsel %vm3674_vm8, %v3665_v47, %v13145_v8  ;;  %v13146_v34 = vld [vmem:[#allocation204_spill] sm:$0xff]  ;;  %v13147_v30 = vld [vmem:[#allocation205_spill] sm:$0xff]  ;;  %v13148_v28 = vld [vmem:[#allocation206_spill] sm:$0xff] }
 0x540   : > { %v3681_v44 = vsel %vm3674_vm8, %v3664_v53, %v13146_v34  ;;  %v3684_v14 = vsel %vm3674_vm8, %v3667_v12, %v13147_v30  ;;  %v3683_v39 = vsel %vm3674_vm8, %v3666_v31, %v13148_v28  ;;  %v13149_v13 = vld [vmem:[#allocation207_spill] sm:$0xff]  ;;  %v13150_v21 = vld [vmem:[#allocation208_spill] sm:$0xff]  ;;  %v11802_v7 = vpop.permute.xlu1 %6240  ;;  %v13151_v9 = vld [vmem:[#allocation209_spill] sm:$0xff] }
 0x541   : > { %v3686_v50 = vsel %vm3674_vm8, %v3669_v43, %v13149_v13  ;;  %v3685_v52 = vsel %vm3674_vm8, %v3668_v33, %v13150_v21  ;;  %v3688_v47 = vsel %vm3674_vm8, %v3671_v1, %v13151_v9  ;;  %v13152_v62 = vld [vmem:[#allocation210_spill] sm:$0xff]  ;;  %v13153_v2 = vld [vmem:[#allocation211_spill] sm:$0xff]  ;;  %v13154_v27 = vld [vmem:[#allocation212_spill] sm:$0xff]  ;;  %v11812_v6 = vpop.permute.xlu0 %6238 }
 0x542   : > { %v3687_v53 = vsel %vm3674_vm8, %v3670_v63, %v13152_v62  ;;  %v3690_v12 = vsel %vm3674_vm8, %v3673_v36, %v13153_v2  ;;  %v3689_v31 = vsel %vm3674_vm8, %v3672_v49, %v13154_v27  ;;  %v13155_v43 = vld [vmem:[#allocation213_spill] sm:$0xff]  ;;  %v13156_v33 = vld [vmem:[#allocation214_spill] sm:$0xff]  ;;  %v13157_v30 = vld [vmem:[#allocation215_spill] sm:$0xff] }
 0x543   : > { %v3693_v8 = vsel %vm3691_vm9, %v3676_v22, %v13155_v43  ;;  %v3692_v34 = vsel %vm3691_vm9, %v3675_v4, %v13156_v33  ;;  %v3695_v1 = vsel %vm3691_vm9, %v3678_v56, %v13157_v30  ;;  %v13158_v28 = vld [vmem:[#allocation216_spill] sm:$0xff]  ;;  %v13159_v13 = vld [vmem:[#allocation217_spill] sm:$0xff]  ;;  %v13160_v21 = vld [vmem:[#allocation218_spill] sm:$0xff] }
 0x544   : > { %v3694_v63 = vsel %vm3691_vm9, %v3677_v15, %v13158_v28  ;;  %v3697_v36 = vsel %vm3691_vm9, %v3680_v40, %v13159_v13  ;;  %v3696_v49 = vsel %vm3691_vm9, %v3679_v60, %v13160_v21  ;;  %v13161_v9 = vld [vmem:[#allocation219_spill] sm:$0xff]  ;;  %v13162_v2 = vld [vmem:[#allocation220_spill] sm:$0xff]  ;;  %v13163_v27 = vld [vmem:[#allocation221_spill] sm:$0xff]  ;;  %v11838_v28 = vpop.permute.xlu1 %6244 }
 0x545   : > { %v3699_v62 = vsel %vm3691_vm9, %v3682_v26, %v13161_v9  ;;  %v3698_v22 = vsel %vm3691_vm9, %v3681_v44, %v13162_v2  ;;  %v3701_v4 = vsel %vm3691_vm9, %v3684_v14, %v13163_v27  ;;  %v13164_v43 = vld [vmem:[#allocation222_spill] sm:$0xff]  ;;  %v13165_v33 = vld [vmem:[#allocation223_spill] sm:$0xff]  ;;  %v13166_v30 = vld [vmem:[#allocation224_spill] sm:$0xff]  ;;  %v11848_v2 = vpop.permute.xlu0 %6242 }
 0x546   : > { %v3700_v56 = vsel %vm3691_vm9, %v3683_v39, %v13164_v43  ;;  %v3703_v15 = vsel %vm3691_vm9, %v3686_v50, %v13165_v33  ;;  %v3702_v40 = vsel %vm3691_vm9, %v3685_v52, %v13166_v30  ;;  %v13167_v60 = vld [vmem:[#allocation225_spill] sm:$0xff]  ;;  %v13168_v13 = vld [vmem:[#allocation226_spill] sm:$0xff]  ;;  %v13169_v21 = vld [vmem:[#allocation227_spill] sm:$0xff] }
 0x547   : > { %v3705_v26 = vsel %vm3691_vm9, %v3688_v47, %v13167_v60  ;;  %v3704_v44 = vsel %vm3691_vm9, %v3687_v53, %v13168_v13  ;;  %v3707_v14 = vsel %vm3691_vm9, %v3690_v12, %v13169_v21  ;;  %v13170_v9 = vld [vmem:[#allocation228_spill] sm:$0xff]  ;;  %v13171_v50 = vld [vmem:[#allocation229_spill] sm:$0xff]  ;;  %v13172_v52 = vld [vmem:[#allocation230_spill] sm:$0xff] }
 0x548   : > { %v3706_v39 = vsel %vm3691_vm9, %v3689_v31, %v13170_v9  ;;  %v3710_v27 = vsel %vm3708_vm10, %v3693_v8, %v13171_v50  ;;  %v3709_v43 = vsel %vm3708_vm10, %v3692_v34, %v13172_v52  ;;  %v13173_v33 = vld [vmem:[#allocation231_spill] sm:$0xff]  ;;  %v13174_v30 = vld [vmem:[#allocation232_spill] sm:$0xff]  ;;  %v13175_v60 = vld [vmem:[#allocation233_spill] sm:$0xff]  ;;  %v3715_v8 = vsel %vm3708_vm10, %v3698_v22, %v13178_v45 }
 0x549   : > { %v3712_v47 = vsel %vm3708_vm10, %v3695_v1, %v13173_v33  ;;  %v3711_v53 = vsel %vm3708_vm10, %v3694_v63, %v13174_v30  ;;  %v3714_v12 = vsel %vm3708_vm10, %v3697_v36, %v13175_v60  ;;  %v13176_v13 = vld [vmem:[#allocation234_spill] sm:$0xff]  ;;  %v13177_v21 = vld [vmem:[#allocation235_spill] sm:$0xff]  ;;  %v13179_v50 = vld [vmem:[#allocation237_spill] sm:$0xff]  ;;  %v11874_v60 = vpop.permute.xlu1 %6248 }
 0x54a   : > { %v3713_v31 = vsel %vm3708_vm10, %v3696_v49, %v13176_v13  ;;  %v3716_v9 = vsel %vm3708_vm10, %v3699_v62, %v13177_v21  ;;  %v3718_v34 = vsel %vm3708_vm10, %v3701_v4, %v13179_v50  ;;  %v13180_v52 = vld [vmem:[#allocation238_spill] sm:$0xff]  ;;  %v13181_v33 = vld [vmem:[#allocation239_spill] sm:$0xff]  ;;  %v13182_v30 = vld [vmem:[#allocation240_spill] sm:$0xff]  ;;  %v11884_v50 = vpop.permute.xlu0 %6246 }
 0x54b   : > { %v3717_v1 = vsel %vm3708_vm10, %v3700_v56, %v13180_v52  ;;  %v3720_v63 = vsel %vm3708_vm10, %v3703_v15, %v13181_v33  ;;  %v3719_v36 = vsel %vm3708_vm10, %v3702_v40, %v13182_v30  ;;  %v13183_v49 = vld [vmem:[#allocation241_spill] sm:$0xff]  ;;  %v13184_v13 = vld [vmem:[#allocation242_spill] sm:$0xff]  ;;  %v13185_v22 = vld [vmem:[#allocation243_spill] sm:$0xff] }
 0x54c   : > { %v3722_v62 = vsel %vm3708_vm10, %v3705_v26, %v13183_v49  ;;  %v3721_v45 = vsel %vm3708_vm10, %v3704_v44, %v13184_v13  ;;  %v3724_v4 = vsel %vm3708_vm10, %v3707_v14, %v13185_v22  ;;  %v13186_v21 = vld [vmem:[#allocation244_spill] sm:$0xff]  ;;  %v13187_v15 = vld [vmem:[#allocation245_spill] sm:$0xff]  ;;  %v13188_v40 = vld [vmem:[#allocation246_spill] sm:$0xff] }
 0x54d   : > { %v3723_v56 = vsel %vm3708_vm10, %v3706_v39, %v13186_v21  ;;  %v3727_v52 = vsel %vm3725_vm11, %v3710_v27, %v13187_v15  ;;  %v3726_v33 = vsel %vm3725_vm11, %v3709_v43, %v13188_v40  ;;  %v13189_v30 = vld [vmem:[#allocation247_spill] sm:$0xff]  ;;  %v13190_v49 = vld [vmem:[#allocation248_spill] sm:$0xff]  ;;  %v13191_v13 = vld [vmem:[#allocation249_spill] sm:$0xff]  ;;  %v3732_v27 = vsel %vm3725_vm11, %v3715_v8, %v13194_v19 }
 0x54e   : > { %v3729_v26 = vsel %vm3725_vm11, %v3712_v47, %v13189_v30  ;;  %v3728_v44 = vsel %vm3725_vm11, %v3711_v53, %v13190_v49  ;;  %v3731_v14 = vsel %vm3725_vm11, %v3714_v12, %v13191_v13  ;;  %v13192_v22 = vld [vmem:[#allocation250_spill] sm:$0xff]  ;;  %v13193_v21 = vld [vmem:[#allocation251_spill] sm:$0xff]  ;;  %v13195_v43 = vld [vmem:[#allocation253_spill] sm:$0xff] }
 0x54f   : > { %v3730_v39 = vsel %vm3725_vm11, %v3713_v31, %v13192_v22  ;;  %v3733_v48 = vsel %vm3725_vm11, %v3716_v9, %v13193_v21  ;;  %v3735_v15 = vsel %vm3725_vm11, %v3718_v34, %v13195_v43  ;;  %v13196_v47 = vld [vmem:[#allocation254_spill] sm:$0xff]  ;;  %v13197_v53 = vld [vmem:[#allocation255_spill] sm:$0xff]  ;;  %v13198_v12 = vld [vmem:[#allocation256_spill] sm:$0xff]  ;;  %v11910_v31 = vpop.permute.xlu1 %6252  ;;  %v11920_v43 = vpop.permute.xlu0 %6250 }
 0x550   : > { %v3734_v40 = vsel %vm3725_vm11, %v3717_v1, %v13196_v47  ;;  %v3737_v30 = vsel %vm3725_vm11, %v3720_v63, %v13197_v53  ;;  %v3736_v49 = vsel %vm3725_vm11, %v3719_v36, %v13198_v12  ;;  %v13199_v9 = vld [vmem:[#allocation257_spill] sm:$0xff]  ;;  %v13200_v19 = vld [vmem:[#allocation258_spill] sm:$0xff]  ;;  %v13201_v22 = vld [vmem:[#allocation259_spill] sm:$0xff] }
 0x551   : > { %v3739_v13 = vsel %vm3725_vm11, %v3722_v62, %v13199_v9  ;;  %v3738_v8 = vsel %vm3725_vm11, %v3721_v45, %v13200_v19  ;;  %v3741_v34 = vsel %vm3725_vm11, %v3724_v4, %v13201_v22  ;;  %v13202_v21 = vld [vmem:[#allocation260_spill] sm:$0xff]  ;;  %v13203_v63 = vld [vmem:[#allocation261_spill] sm:$0xff]  ;;  %v13204_v47 = vld [vmem:[#allocation262_spill] sm:$0xff] }
 0x552   : > { %v3740_v1 = vsel %vm3725_vm11, %v3723_v56, %v13202_v21  ;;  %v3744_v36 = vsel %vm3742_vm12, %v3727_v52, %v13203_v63  ;;  %v3743_v53 = vsel %vm3742_vm12, %v3726_v33, %v13204_v47  ;;  %v13205_v12 = vld [vmem:[#allocation263_spill] sm:$0xff]  ;;  %v13206_v9 = vld [vmem:[#allocation264_spill] sm:$0xff]  ;;  %v13210_v10 = vld [vmem:[#allocation78_spill] sm:$0xff] }
 0x553   : > { %v3746_v62 = vsel %vm3742_vm12, %v3729_v26, %v13205_v12  ;;  %v3745_v45 = vsel %vm3742_vm12, %v3728_v44, %v13206_v9  ;;  %v13207_v19 = vld [vmem:[#allocation75_spill] sm:$0xff]  ;;  %v13209_v21 = vld [vmem:[#allocation80_spill] sm:$0xff]  ;;  %v3749_v52 = vsel %vm3742_vm12, %v3732_v27, %v13210_v10  ;;  %v13212_v47 = vld [vmem:[#allocation82_spill] sm:$0xff] }
 0x554   : > { %v3748_v4 = vsel %vm3742_vm12, %v3731_v14, %v13207_v19  ;;  %v13208_v22 = vld [vmem:[#allocation31_spill] sm:$0xff]  ;;  %v3750_v58 = vsel %vm3742_vm12, %v3733_v48, %v13209_v21  ;;  %v13211_v63 = vld [vmem:[#allocation84_spill] sm:$0xff]  ;;  %v3751_v26 = vsel %vm3742_vm12, %v3734_v40, %v13212_v47  ;;  %v13214_v9 = vld [vmem:[#allocation86_spill] sm:$0xff]  ;;  %v11946_v19 = vpop.permute.xlu1 %6256 }
 0x555   : > { %v3747_v56 = vsel %vm3742_vm12, %v3730_v39, %v13208_v22  ;;  %v3752_v33 = vsel %vm3742_vm12, %v3735_v15, %v13211_v63  ;;  %v13213_v12 = vld [vmem:[#allocation88_spill] sm:$0xff]  ;;  %v3753_v14 = vsel %vm3742_vm12, %v3736_v49, %v13214_v9  ;;  %13215 = vst [vmem:[#allocation46_spill] sm:$0xff] %v11946_v19  ;;  %v13217_v22 = vld [vmem:[#allocation90_spill] sm:$0xff]  ;;  %v13228_v19 = vld [vmem:[#allocation271_spill] sm:$0xff] }
 0x556   : > { %v3754_v44 = vsel %vm3742_vm12, %v3737_v30, %v13213_v12  ;;  %v13216_v39 = vld [vmem:[#allocation92_spill] sm:$0xff]  ;;  %v3755_v10 = vsel %vm3742_vm12, %v3738_v8, %v13217_v22  ;;  %v13219_v21 = vld [vmem:[#allocation94_spill] sm:$0xff]  ;;  %v11960_v30 = vpop.permute.xlu0 %6254  ;;  %v13224_v8 = vld [vmem:[#allocation267_spill] sm:$0xff] }
 0x557   : > { %v3756_v48 = vsel %vm3742_vm12, %v3739_v13, %v13216_v39  ;;  %v13218_v27 = vld [vmem:[#allocation96_spill] sm:$0xff]  ;;  %v11958_v40 = vsel %vm3742_vm12, %v3740_v1, %v13219_v21  ;;  %13220 = vst [vmem:[#allocation316_spill] sm:$0xff] %v11960_v30  ;;  %v13222_v47 = vld [vmem:[#allocation98_spill] sm:$0xff]  ;;  %v13223_v13 = vld [vmem:[#allocation265_spill] sm:$0xff]  ;;  %v3762_v39 = vsel %vm3759_vm13, %v3745_v45, %v13224_v8 }
 0x558   : > { %v11954_v15 = vsel %vm3742_vm12, %v3741_v34, %v13218_v27  ;;  %v13221_v63 = vld [vmem:[#allocation100_spill] sm:$0xff]  ;;  %v3760_v12 = vsel %vm3759_vm13, %v3743_v53, %v13222_v47  ;;  %v3763_v9 = vsel %vm3759_vm13, %v3746_v62, %v13223_v13  ;;  %v13226_v27 = vld [vmem:[#allocation269_spill] sm:$0xff]  ;;  %v13227_v21 = vld [vmem:[#allocation270_spill] sm:$0xff] }
 0x559   : > { %v3761_v49 = vsel %vm3759_vm13, %v3744_v36, %v13221_v63  ;;  %v13225_v34 = vld [vmem:[#allocation268_spill] sm:$0xff]  ;;  %v3764_v1 = vsel %vm3759_vm13, %v3747_v56, %v13226_v27  ;;  %v3767_v30 = vsel %vm3759_vm13, %v3750_v58, %v13227_v21  ;;  %v11978_v36 = vsel %vm3759_vm13, %v3749_v52, %v13228_v19  ;;  %v13230_v62 = vld [vmem:[#allocation273_spill] sm:$0xff]  ;;  %v13231_v47 = vld [vmem:[#allocation274_spill] sm:$0xff]  ;;  %v6293_v56 = vpop.permute.xlu1 %6292 }
 0x55a   : > { %v3765_v22 = vsel %vm3759_vm13, %v3748_v4, %v13225_v34  ;;  %v13229_v53 = vld [vmem:[#allocation272_spill] sm:$0xff]  ;;  %v11986_v45 = vsel %vm3759_vm13, %v3751_v26, %v13230_v62  ;;  %v11990_v4 = vsel %vm3759_vm13, %v3754_v44, %v13231_v47  ;;  %v6547_v58 = vsel %vm3776_vm14, %v11485_v20, %v11694_v57  ;;  %v13232_v13 = vld [vmem:[#allocation275_spill] sm:$0xff]  ;;  %v6291_v19 = vpop.permute.xlu0 %6290  ;;  %v13237_v47 = vld [vmem:[#allocation297_spill] sm:$0xff] }
 0x55b   : > { %v11982_v63 = vsel %vm3759_vm13, %v3752_v33, %v13229_v53  ;;  %v11997_v52 = vsel %vm3759_vm13, %v3753_v14, %v13232_v13  ;;  %v6546_v33 = vsel %vm3776_vm14, %v11488_v35, %v11704_v11  ;;  %v6563_v26 = vsel %vm3793_vm15, %v6547_v58, %v6293_v56  ;;  %v13233_v8 = vld [vmem:[#allocation276_spill] sm:$0xff]  ;;  %v13235_v14 = vld [vmem:[#allocation281_spill] sm:$0xff] }
 0x55c   : > { %v12005_v44 = vsel %vm3759_vm13, %v3756_v48, %v13233_v8  ;;  %v13234_v34 = vld [vmem:[#allocation280_spill] sm:$0xff]  ;;  %v6595_v57 = vrot.slane %v6563_v26, 7  ;;  %v6562_v27 = vsel %vm3793_vm15, %v6546_v33, %v6291_v19  ;;  %v3777_v21 = vsel %vm3776_vm14, %v3760_v12, %v13235_v14  ;;  %v13238_v13 = vld [vmem:[#allocation277_spill] sm:$0xff]  ;;  %v13239_v8 = vld [vmem:[#allocation282_spill] sm:$0xff] }
 0x55d   : > { %v3778_v20 = vsel %vm3776_vm14, %v3761_v49, %v13234_v34  ;;  %v13236_v53 = vld [vmem:[#allocation296_spill] sm:$0xff]  ;;  %v6533_v11 = vsel %vm3759_vm13, %v11433_v29, %v11490_v38  ;;  %v6594_v62 = vrot.slane %v6562_v27, 7  ;;  %v3794_v48 = vsel %vm3793_vm15, %v3777_v21, %v13237_v47  ;;  %v6297_v56 = vpop.permute.xlu1 %6296 }
 0x55e   : > { %v3795_v35 = vsel %vm3793_vm15, %v3778_v20, %v13236_v53  ;;  %v6532_v49 = vsel %vm3759_vm13, %v11439_v3, %v11492_v42  ;;  %v6549_v58 = vsel %vm3776_vm14, %v6533_v11, %v11730_v17  ;;  %v12027_v33 = vsel %vm3759_vm13, %v3755_v10, %v13238_v13  ;;  %v6295_v19 = vpop.permute.xlu0 %6294  ;;  %v13240_v20 = vld [vmem:[#allocation283_spill] sm:$0xff]  ;;  %v13243_v53 = vld [vmem:[#allocation285_spill] sm:$0xff] }
 0x55f   : > { %v6628_v12 = vsel %vm6626_vm0, %v3795_v35, %v6595_v57  ;;  %v6548_v29 = vsel %vm3776_vm14, %v6532_v49, %v11740_v54  ;;  %v6627_v38 = vsel %vm6626_vm0, %v3794_v48, %v6594_v62  ;;  %v6565_v26 = vsel %vm3793_vm15, %v6549_v58, %v6297_v56  ;;  %v13241_v57 = vld [vmem:[#allocation284_spill] sm:$0xff]  ;;  %v13242_v54 = vld [vmem:[#allocation298_spill] sm:$0xff]  ;;  %v13244_v11 = vld [vmem:[#allocation299_spill] sm:$0xff] }
 0x560   : > { %v3780_v3 = vsel %vm3776_vm14, %v3763_v9, %v13239_v8  ;;  %v6659_v42 = vcombine.low %v6627_v38, %v6628_v12  ;;  %v6597_v17 = vrot.slane %v6565_v26, 7  ;;  %v6564_v34 = vsel %vm3793_vm15, %v6548_v29, %v6295_v19  ;;  %v13245_v48 = vld [vmem:[#allocation286_spill] sm:$0xff]  ;;  %v13246_v56 = vld [vmem:[#allocation300_spill] sm:$0xff]  ;;  %v13247_v38 = vld [vmem:[#allocation301_spill] sm:$0xff] }
 0x561   : > { %v3779_v10 = vsel %vm3776_vm14, %v3762_v39, %v13240_v20  ;;  %v3782_v27 = vsel %vm3776_vm14, %v3765_v22, %v13241_v57  ;;  %v3797_v14 = vsel %vm3793_vm15, %v3780_v3, %v13242_v54  ;;  %v6596_v21 = vrot.slane %v6564_v34, 7  ;;  %v6301_v39 = vpop.permute.xlu1 %6300  ;;  %v13248_v8 = vld [vmem:[#allocation27_spill] sm:$0xff] }
 0x562   : > { %v3781_v35 = vsel %vm3776_vm14, %v3764_v1, %v13243_v53  ;;  %v3796_v9 = vsel %vm3793_vm15, %v3779_v10, %v13244_v11  ;;  %v6551_v62 = vsel %vm3776_vm14, %v11495_v37, %v11766_v41  ;;  %v6630_v47 = vsel %vm6626_vm0, %v3797_v14, %v6597_v17  ;;  %v6299_v12 = vpop.permute.xlu0 %6298  ;;  %v13250_v14 = vld [vmem:[#allocation287_spill] sm:$0xff]  ;;  %v13252_v11 = vld [vmem:[#allocation288_spill] sm:$0xff] }
 0x563   : > { %v3784_v22 = vsel %vm3776_vm14, %v3767_v30, %v13245_v48  ;;  %v6550_v49 = vsel %vm3776_vm14, %v11498_v25, %v11776_v46  ;;  %v6629_v58 = vsel %vm6626_vm0, %v3796_v9, %v6596_v21  ;;  %v6567_v1 = vsel %vm3793_vm15, %v6551_v62, %v6301_v39  ;;  %v13251_v21 = vld [vmem:[#allocation302_spill] sm:$0xff]  ;;  %v13253_v62 = vld [vmem:[#allocation303_spill] sm:$0xff]  ;;  %v13254_v48 = vld [vmem:[#allocation289_spill] sm:$0xff] }
 0x564   : > { %v3799_v13 = vsel %vm3793_vm15, %v3782_v27, %v13246_v56  ;;  %v6660_v37 = vcombine.low %v6629_v58, %v6630_v47  ;;  %v6599_v41 = vrot.slane %v6567_v1, 7  ;;  %v6566_v29 = vsel %vm3793_vm15, %v6550_v49, %v6299_v12  ;;  %v13255_v58 = vld [vmem:[#allocation304_spill] sm:$0xff] }
 0x565   : > { %v3798_v30 = vsel %vm3793_vm15, %v3781_v35, %v13247_v38  ;;  %v6537_v25 = vsel %vm3759_vm13, %v11455_v0, %v11500_v55  ;;  %v6536_v46 = vsel %vm3759_vm13, %v11459_v23, %v11514_v5  ;;  %v6598_v26 = vrot.slane %v6566_v29, 7  ;;  %v6305_v20 = vpop.permute.xlu1 %6304 }
 0x566   : > { %v6553_v19 = vsel %vm3776_vm14, %v6537_v25, %v11802_v7  ;;  %v6667_v3 = vrot.slane %v6659_v42, %v13248_v8  ;;  %v6674_v17 = vrot.slane %v6660_v37, %v13248_v8  ;;  %v6632_v34 = vsel %vm6626_vm0, %v3799_v13, %v6599_v41  ;;  %v6303_v23 = vpop.permute.xlu0 %6302  ;;  %v13249_v42 = vld [vmem:[#allocation278_spill] sm:$0xff]  ;;  %v13256_v37 = vld [vmem:[#allocation305_spill] sm:$0xff] }
 0x567   : > { %v6552_v10 = vsel %vm3776_vm14, %v6536_v46, %v11812_v6  ;;  %v6631_v0 = vsel %vm6626_vm0, %v3798_v30, %v6598_v26  ;;  %v6569_v55 = vsel %vm3793_vm15, %v6553_v19, %v6305_v20  ;;  %v12082_v54 = vsel %vm3759_vm13, %v11954_v15, %v13249_v42  ;;  %v13257_v26 = vld [vmem:[#allocation290_spill] sm:$0xff]  ;;  %v13258_v20 = vld [vmem:[#allocation279_spill] sm:$0xff] }
 0x568   : > { %v6675_v5 = vcombine.low %v6667_v3, %v6674_v17  ;;  %v6676_v57 = vcombine.low %v6631_v0, %v6632_v34  ;;  %v6601_v27 = vrot.slane %v6569_v55, 7  ;;  %v6568_v7 = vsel %vm3793_vm15, %v6552_v10, %v6303_v23  ;;  %v13259_v0 = vld [vmem:[#allocation291_spill] sm:$0xff]  ;;  %v13260_v55 = vld [vmem:[#allocation306_spill] sm:$0xff] }
 0x569   : > { %v3783_v6 = vsel %vm3776_vm14, %v11978_v36, %v13250_v14  ;;  %v3801_v53 = vsel %vm3793_vm15, %v3784_v22, %v13251_v21  ;;  %v6600_v35 = vrot.slane %v6568_v7, 7  ;;  %v3786_v9 = vsel %vm3776_vm14, %v11982_v63, %v13252_v11  ;;  %v6309_v39 = vpop.permute.xlu1 %6308  ;;  %v13263_v14 = vld [vmem:[#allocation293_spill] sm:$0xff]  ;;  %v13264_v21 = vld [vmem:[#allocation314_spill] sm:$0xff] }
 0x56a   : > { %v3800_v47 = vsel %vm3793_vm15, %v3783_v6, %v13253_v62  ;;  %v6555_v15 = vsel %vm3776_vm14, %v11559_v16, %v11838_v28  ;;  %6732 = vst.msk [vmem:[%s12097_s5] sm:$0xff] %vm6731_vm1, %v6675_v5  ;;  %v6634_v36 = vsel %vm6626_vm0, %v3801_v53, %v6601_v27  ;;  %v3785_v22 = vsel %vm3776_vm14, %v11986_v45, %v13254_v48  ;;  %v6307_v28 = vpop.permute.xlu0 %6306  ;;  %v13261_v5 = vld [vmem:[#allocation292_spill] sm:$0xff]  ;;  %v13262_v27 = vld [vmem:[#allocation307_spill] sm:$0xff] }
 0x56b   : > { %v6554_v63 = vsel %vm3776_vm14, %v11568_v24, %v11848_v2  ;;  %v6633_v49 = vsel %vm6626_vm0, %v3800_v47, %v6600_v35  ;;  %v6571_v16 = vsel %vm3793_vm15, %v6555_v15, %v6309_v39  ;;  %v3803_v1 = vsel %vm3793_vm15, %v3786_v9, %v13255_v58  ;;  %v13265_v9 = vld [vmem:[#allocation308_spill] sm:$0xff]  ;;  %v13266_v15 = vld [vmem:[#allocation309_spill] sm:$0xff] }
 0x56c   : > { %v6677_v12 = vcombine.low %v6633_v49, %v6634_v36  ;;  %v6603_v56 = vrot.slane %v6571_v16, 7  ;;  %v6570_v13 = vsel %vm3793_vm15, %v6554_v63, %v6307_v28  ;;  %v3802_v41 = vsel %vm3793_vm15, %v3785_v22, %v13256_v37  ;;  %v13268_v39 = vld [vmem:[#allocation313_spill] sm:$0xff]  ;;  %v13270_v22 = vld [vmem:[#allocation38_spill] sm:$0xff] }
 0x56d   : > { %v6541_v45 = vsel %vm3759_vm13, %v11467_v32, %v11586_v59  ;;  %v6540_v24 = vsel %vm3759_vm13, %v11470_v51, %v11596_v61  ;;  %v6602_v2 = vrot.slane %v6570_v13, 7  ;;  %v6684_v38 = vrot.slane %v6676_v57, %v13248_v8  ;;  %v6313_v46 = vpop.permute.xlu1 %6312  ;;  %v13271_v16 = vld [vmem:[#allocation46_spill] sm:$0xff] }
 0x56e   : > { %v6557_v29 = vsel %vm3776_vm14, %v6541_v45, %v11874_v60  ;;  %v6691_v30 = vrot.slane %v6677_v12, %v13248_v8  ;;  %v6636_v25 = vsel %vm6626_vm0, %v3803_v1, %v6603_v56  ;;  %v3788_v19 = vsel %vm3776_vm14, %v11990_v4, %v13257_v26  ;;  %v6311_v61 = vpop.permute.xlu0 %6310  ;;  %v13272_v13 = vld [vmem:[#allocation294_spill] sm:$0xff]  ;;  %v13274_v26 = vld [vmem:[#allocation295_spill] sm:$0xff] }
 0x56f   : > { %v6556_v32 = vsel %vm3776_vm14, %v6540_v24, %v11884_v50  ;;  %v6635_v51 = vsel %vm6626_vm0, %v3802_v41, %v6602_v2  ;;  %v6573_v59 = vsel %vm3793_vm15, %v6557_v29, %v6313_v46  ;;  %v3774_v10 = vsel %vm3759_vm13, %v11958_v40, %v13258_v20  ;;  %v13273_v41 = vld [vmem:[#allocation316_spill] sm:$0xff] }
 0x570   : > { %v6692_v60 = vcombine.low %v6684_v38, %v6691_v30  ;;  %v6693_v3 = vcombine.low %v6635_v51, %v6636_v25  ;;  %v6605_v17 = vrot.slane %v6573_v59, 7  ;;  %v6572_v34 = vsel %vm3793_vm15, %v6556_v32, %v6311_v61  ;;  %v13276_v59 = vld [vmem:[#allocation311_spill] sm:$0xff] }
 0x571   : > { %v3787_v4 = vsel %vm3776_vm14, %v11997_v52, %v13259_v0  ;;  %v3805_v50 = vsel %vm3793_vm15, %v3788_v19, %v13260_v55  ;;  %v6604_v23 = vrot.slane %v6572_v34, 7  ;;  %v3790_v57 = vsel %vm3776_vm14, %v12005_v44, %v13261_v5  ;;  %v6317_v52 = vpop.permute.xlu1 %6316 }
 0x572   : > { %v3804_v7 = vsel %vm3793_vm15, %v3787_v4, %v13262_v27  ;;  %v6559_v42 = vsel %vm3776_vm14, %v11630_v18, %v11910_v31  ;;  %6733 = vst.msk [vmem:[%s12097_s5 + $0x8] sm:$0xff] %vm6731_vm1, %v6692_v60  ;;  %v6638_v40 = vsel %vm6626_vm0, %v3805_v50, %v6605_v17  ;;  %v3789_v6 = vsel %vm3776_vm14, %v12027_v33, %v13263_v14  ;;  %v6315_v11 = vpop.permute.xlu0 %6314  ;;  %v13267_v33 = vld [vmem:[#allocation50_spill] sm:$0xff] }
 0x573   : > { %v6558_v44 = vsel %vm3776_vm14, %v13264_v21, %v11920_v43  ;;  %v6637_v53 = vsel %vm6626_vm0, %v3804_v7, %v6604_v23  ;;  %v6575_v35 = vsel %vm3793_vm15, %v6559_v42, %v6317_v52  ;;  %v3807_v18 = vsel %vm3793_vm15, %v3790_v57, %v13265_v9  ;;  %v13269_v43 = vld [vmem:[#allocation315_spill] sm:$0xff] }
 0x574   : > { %v6694_v31 = vcombine.low %v6637_v53, %v6638_v40  ;;  %v6607_v62 = vrot.slane %v6575_v35, 7  ;;  %v6574_v47 = vsel %vm3793_vm15, %v6558_v44, %v6315_v11  ;;  %v3806_v36 = vsel %vm3793_vm15, %v3789_v6, %v13266_v15 }
 0x575   : > { %v6545_v48 = vsel %vm3759_vm13, %v13268_v39, %v13267_v33  ;;  %v6544_v63 = vsel %vm3759_vm13, %v13270_v22, %v13269_v43  ;;  %v6606_v49 = vrot.slane %v6574_v47, 7  ;;  %v6701_v58 = vrot.slane %v6693_v3, %v13248_v8  ;;  %v6321_v56 = vpop.permute.xlu1 %6320 }
 0x576   : > { %v6561_v28 = vsel %vm3776_vm14, %v6545_v48, %v13271_v16  ;;  %v6708_v1 = vrot.slane %v6694_v31, %v13248_v8  ;;  %v6640_v12 = vsel %vm6626_vm0, %v3807_v18, %v6607_v62  ;;  %v3792_v37 = vsel %vm3776_vm14, %v12082_v54, %v13272_v13  ;;  %v6319_v29 = vpop.permute.xlu0 %6318  ;;  %v13275_v54 = vld [vmem:[#allocation310_spill] sm:$0xff] }
 0x577   : > { %v6560_v45 = vsel %vm3776_vm14, %v6544_v63, %v13273_v41  ;;  %v6639_v24 = vsel %vm6626_vm0, %v3806_v36, %v6606_v49  ;;  %v6577_v2 = vsel %vm3793_vm15, %v6561_v28, %v6321_v56  ;;  %v3791_v19 = vsel %vm3776_vm14, %v3774_v10, %v13274_v26 }
 0x578   : > { %v6709_v38 = vcombine.low %v6701_v58, %v6708_v1  ;;  %v6710_v30 = vcombine.low %v6639_v24, %v6640_v12  ;;  %v6609_v25 = vrot.slane %v6577_v2, 7  ;;  %v6576_v46 = vsel %vm3793_vm15, %v6560_v45, %v6319_v29 }
 0x579   : > { %v3809_v32 = vsel %vm3793_vm15, %v3792_v37, %v13275_v54  ;;  %v6608_v51 = vrot.slane %v6576_v46, 7  ;;  %v3808_v61 = vsel %vm3793_vm15, %v3791_v19, %v13276_v59 }
 0x57a   : > { %6734 = vst.msk [vmem:[%s12097_s5 + $0x10] sm:$0xff] %vm6731_vm1, %v6709_v38  ;;  %v6642_v60 = vsel %vm6626_vm0, %v3809_v32, %v6609_v25  ;;  %v6718_v34 = vrot.slane %v6710_v30, %v13248_v8 }
 0x57b   : > { %v6641_v3 = vsel %vm6626_vm0, %v3808_v61, %v6608_v51 }
 0x57c   : > { %v6711_v17 = vcombine.low %v6641_v3, %v6642_v60 }
 0x57e   : > { %v6725_v20 = vrot.slane %v6711_v17, %v13248_v8 }
 0x580   : > { %v6726_v10 = vcombine.low %v6718_v34, %v6725_v20 }
 0x582   : > { %6735 = vst.msk [vmem:[%s12097_s5 + $0x18] sm:$0xff] %vm6731_vm1, %v6726_v10 }
 0x583   : > { %6986 = shalt.err (!%p6983_p6)
}
 0x584   : > { %s6987_s15 = scalar_lea.hbm %s12202_s10, 512  ;;  %s6991_s23 = scalar_lea.hbm %s12258_s3, 1024 }
 0x585   : > { %p6988_p7 = scmp.ne.s32.totalorder %s12202_s10, %s6987_s15  ;;  %p6992_p13 = scmp.lt.s32.totalorder %s12202_s10, %s12258_s3 }
 0x586   : > { %p6993_p2 = scmp.lt.s32.totalorder %s6991_s23, %s6987_s15 }
 0x587   : > { %p6989_p10 = pnand %p6988_p7, %p7155_p9 }
 0x588   : > { %p6994_p8 = por %p6993_p2, %p6992_p13 }
 0x589   : > { %p6990_p4 = pneg %p6989_p10 }
 0x58b   : > { %p6995_p12 = pnand %p6994_p8, %p6990_p4 }
 0x58d   : > { %6998 = shalt.err (!%p6995_p12)
}
 0x58e   : > { %s7077_s4 = smov 128  }
 0x58f   : > { %6864 = dma.vmem_to_hbm [thread:$0]  (%p7155_p9), %s12204_s26, 512, %s12202_s10, %s6737_s11, %s7077_s4, %s7077_s4, %s7064_s9  }
 0x590 PF: > { %s6767_s5 = sand.u32 1, %s7033_s16   ;;  %p13277_p0 = scmp.ge.s32.totalorder %s7053_s21, 2 }
 0x591   : > { %s6768_s6 = scalar_lea.sflag [#allocation6], %s6767_s5 }
 0x592   : > { %p6871_p1 = pnand %p13277_p0, %p7162_p11 }
 0x594   : > { %p6872_p3 = pneg %p6871_p1 }
 0x596   : > { %7028 = dma.done.wait (%p6872_p3), %s6768_s6, 512  }
 0x597   : > { %7030 = vsyncadd (%p6872_p3), %s6768_s6, 4294966784  ;;  %s21_s21 = sadd.s32 1, %s7053_s21   ;;  %s13278_s16 = smov %s7037_s17 }
 0x598   : > { %p18_p5 = scmp.ge.s32.totalorder %s21_s21, 4   ;;  %s13279_s17 = smov %s7041_s18 }
 0x599   : > { %s13280_s18 = smov %s7160_s28  ;;  %s13281_s19 = smov %s7049_s20 }
 0x59a   : > { %s13282_s20 = smov %s13284_s22  ;;  %20 = sbr.rel (!%p18_p5) target bundleno = 9 (0x9), region = 80 }
 0x59f   :  { %6773 = vsyncpa [#allocation5], 1 }
 0x5a0   :  { %6775 = vsyncpa [#allocation5 + $0x1], 1 }
 0x5a1   :  { %6776 = vsyncpa [#allocation6], 1 }
 0x5a2   :  { %6778 = vsyncpa [#allocation6 + $0x1], 1 }

// kernel: _niwt_impl.1
= control target key start
LH: loop header
LB: loop body
LE: loop exit
PB: predicated region body
PF: predicated region fallthrough
CT: control target
= control target key end

     0   :  { %s675_s0 = inlined_call_operand.<no memory space> [shape: f32[1], index: 0, kind: input, shape index: {}]   ;;  %s676_s1 = inlined_call_operand.<no memory space> [shape: f32[1], index: 1, kind: input, shape index: {}]   ;;  %s677_s2 = inlined_call_operand.hbm [shape: f32[2,4,16,16], index: 2, kind: input, shape index: {}]   ;;  %s678_s3 = inlined_call_operand.vmem [shape: f32[2,2,2,16,16], index: 3, kind: output, shape index: {}]  }
   0x1   :  { %8 = sst [smem:[#allocation2]] %s675_s0 }
   0x2   :  { %9 = sst [smem:[#allocation3]] %s676_s1 }
   0x3   :  { %10 = vsyncpa [#allocation5], 0 }
   0x4   :  { %12 = vsyncpa [#allocation5 + $0x1], 0  ;;  %s568_s16 = smov 0   ;;  %s570_s17 = smov 0  }
   0x5   :  { %s572_s18 = smov 0   ;;  %s574_s19 = smov 0  }
   0x6   :  { %s576_s20 = smov 0   ;;  %s578_s21 = smov 0  }
   0x7 LB: > { %s375_s0 = sadd.s32 4294967295, %s537_s21   ;;  %s30_s1 = sadd.s32 1, %s533_s20  ;;  %s537_s21 = sphi %s578_s21, %s18_s21   ;;  %s533_s20 = sphi %s576_s20, %s686_s20   ;;  %s529_s19 = sphi %s574_s19, %s685_s19   ;;  %s525_s18 = sphi %s572_s18, %s684_s18   ;;  %s521_s17 = sphi %s570_s17, %s683_s17   ;;  %s517_s16 = sphi %s568_s16, %s682_s16  }
   0x8   : > { %p32_p0 = scmp.ge.s32.totalorder %s30_s1, 2  ;;  %s81_s22 = sadd.s32 1, %s525_s18 }
   0x9   : > { %p88_p1 = scmp.ne.s32.totalorder %s525_s18, %s521_s17  ;;  %p89_p2 = scmp.eq.s32.totalorder %s537_s21, 0 }
   0xa   : > { %s688_s1 = smov (%p32_p0, %s30_s1), 0  ;;  %p94_p4 = scmp.ne.s32.totalorder %s521_s17, %s517_s16 }
   0xb   : > { %p604_p3 = por %p89_p2, %p88_p1  ;;  %s76_s24 = ssub.s32 %s533_s20, %s688_s1 }
   0xc   : > { %p95_p5 = scmp.eq.s32.totalorder %s375_s0, 0  ;;  %p79_p6 = scmp.eq.s32.totalorder %s76_s24, 0 }
   0xd   : > { %p408_p8 = scmp.lt.s32.totalorder %s537_s21, 2  ;;  %s152_s27 = sand.u32 1, %s525_s18  }
   0xe   : > { %p611_p7 = por %p95_p5, %p94_p4  ;;  %s400_s28 = sshll.u32 %s533_s20, 10 }
   0xf   : > { %s617_s26 = scalar_select %p79_p6, %s525_s18, %s81_s22  }
  0x10   : > { %s379_s29 = sshll.u32 %s152_s27, 6  ;;  %s164_s5 = scalar_lea.hbm %s677_s2, %s400_s28 }
  0x11   : > { %s156_s6 = scalar_lea.vmem [#allocation4], %s379_s29  ;;  %p626_p9 = pnand %p408_p8, %p604_p3 }
  0x12   : > { %s165_s7 = sshll.u32 %s156_s6, 4  ;;  %s153_s9 = scalar_lea.sflag [#allocation5], %s152_s27  ;;  %s166_s7 = int_to_ptr.vmem [resolvable:$true] %s165_s7 }
  0x13   : > { %p461_p10 = pneg %p626_p9  ;;  %s472_s10 = scalar_lea.vmem %s166_s7, 1024 }
  0x14   : > { %p473_p11 = scmp.ne.s32.totalorder %s166_s7, %s472_s10  ;;  %s539_s11 = smov [#allocation4]  }
  0x15   : > { %s477_s12 = sshll.u32 %s539_s11, 4  ;;  %s478_s12 = int_to_ptr.vmem [resolvable:$false] %s477_s12 }
  0x16   : > { %p475_p12 = pnand %p473_p11, %p461_p10  ;;  %s479_s13 = scalar_lea.vmem %s478_s12, 2048 }
  0x17   : > { %p480_p0 = scmp.lt.s32.totalorder %s166_s7, %s478_s12  ;;  %p481_p1 = scmp.lt.s32.totalorder %s479_s13, %s472_s10 }
  0x18   : > { %p476_p13 = pneg %p475_p12 }
  0x19   : > { %p482_p2 = por %p481_p1, %p480_p0 }
  0x1b   : > { %p483_p3 = pnand %p482_p2, %p476_p13 }
  0x1d   : > { %486 = shalt.err (!%p483_p3)
}
  0x1e   : > { %s540_s14 = smov 128   ;;  %s541_s15 = smov 8  }
  0x1f   : > { %407 = dma.hbm_to_vmem [thread:$0]  (!%p626_p9), %s164_s5, 1024, %s166_s7, %s153_s9, %s540_s14, %s540_s14, %s541_s15  }
  0x20   : > { %p382_p4 = scmp.ge.s32.totalorder %s537_s21, 1  ;;  %p173_p5 = scmp.lt.s32.totalorder %s537_s21, 3 }
  0x22   : > { %p174_p6 = pnand %p382_p4, %p173_p5 }
  0x23   : > { %s179_s16 = sand.u32 (!%p174_p6), 1, %s521_s17  }
  0x24   : > { %177 = sbr.rel (%p174_p6) target bundleno = 59 (0x3b), region = 32  ;;  %s383_s0 = sshll.u32 (!%p174_p6), %s179_s16, 6 }
  0x25   : > { %s180_s22 = scalar_lea.sflag (!%p174_p6), [#allocation5], %s179_s16  ;;  %s183_s23 = scalar_lea.vmem (!%p174_p6), [#allocation4], %s383_s0 }
  0x29   : > { %512 = dma.done.wait (%p611_p7), %s180_s22, 1024  }
  0x2a   : > { %514 = vsyncadd (%p611_p7), %s180_s22, 4294966272  ;;  %p212_p8 = scmp.lt.s32.totalorder %s529_s19, 1  ;;  %s222_s24 = sld [smem:[#allocation3]]  ;;  %v223_v0 = vld [vmem:[%s183_s23] sm:$0xff]  ;;  %v386_v1 = vld [vmem:[%s183_s23 + $0x10] sm:$0xff]  ;;  %vm268_vm0 = vcmask 130048  }
  0x2b   : > { %s221_s27 = sld [smem:[#allocation2]]  ;;  %v388_v2 = vld [vmem:[%s183_s23 + $0x20] sm:$0xff]  ;;  %v390_v3 = vld [vmem:[%s183_s23 + $0x30] sm:$0xff]  ;;  %v224_v5 = vld [vmem:[%s183_s23 + $0x8] sm:$0xff] }
  0x2c   : > { %s690_s19 = smov (!%p212_p8, %s529_s19), 1  ;;  %v243_v4 = vadd.f32 %v388_v2, %v386_v1  ;;  %v387_v6 = vld [vmem:[%s183_s23 + $0x18] sm:$0xff]  ;;  %v247_v7 = vsub.f32 %v386_v1, %v388_v2  ;;  %v234_v8 = vadd.f32 %v390_v3, %v223_v0  ;;  %v389_v10 = vld [vmem:[%s183_s23 + $0x28] sm:$0xff]  ;;  %v239_v12 = vsub.f32 %v223_v0, %v390_v3 }
  0x2d   : > { %v391_v11 = vld [vmem:[%s183_s23 + $0x38] sm:$0xff]  ;;  %v244_v15 = vadd.f32 %v389_v10, %v387_v6  ;;  %s401_s25 = sshll.u32 %s690_s19, 6  ;;  %v248_v20 = vsub.f32 %v387_v6, %v389_v10 }
  0x2e   : > { %v235_v14 = vadd.f32 %v391_v11, %v224_v5  ;;  %v240_v19 = vsub.f32 %v224_v5, %v391_v11  ;;  %s219_s30 = scalar_lea.vmem %s678_s3, %s401_s25 }
  0x30   : > { %v236_v9 = vstv %s222_s24 }
  0x31   : > { %v245_v13 = vmul.f32 %v243_v4, %v236_v9  ;;  %v249_v16 = vmul.f32 %v247_v7, %v236_v9  ;;  %v237_v17 = vmul.f32 %v236_v9, %v234_v8  ;;  %v241_v18 = vmul.f32 %v239_v12, %v236_v9 }
  0x32   : > { %v253_v21 = vstv %s221_s27  ;;  %v238_v22 = vmul.f32 %v236_v9, %v235_v14  ;;  %v246_v23 = vmul.f32 %v244_v15, %v236_v9  ;;  %v242_v26 = vmul.f32 %v240_v19, %v236_v9 }
  0x33   : > { %v251_v24 = vsub.f32 %v237_v17, %v245_v13  ;;  %v256_v25 = vadd.f32 %v249_v16, %v241_v18  ;;  %v250_v27 = vmul.f32 %v248_v20, %v236_v9  ;;  %v260_v29 = vsub.f32 %v241_v18, %v249_v16 }
  0x34   : > { %v252_v28 = vsub.f32 %v238_v22, %v246_v23  ;;  %v264_v30 = vadd.f32 %v245_v13, %v237_v17  ;;  %v265_v31 = vadd.f32 %v246_v23, %v238_v22 }
  0x35   : > { %v254_v32 = vadd.f32 %v253_v21, %v251_v24  ;;  %v258_v33 = vadd.f32 %v256_v25, %v253_v21  ;;  %v257_v34 = vadd.f32 %v250_v27, %v242_v26  ;;  %v261_v35 = vsub.f32 %v242_v26, %v250_v27 }
  0x36   : > { %v255_v36 = vadd.f32 %v253_v21, %v252_v28  ;;  %v262_v37 = vadd.f32 %v260_v29, %v253_v21  ;;  %v266_v38 = vadd.f32 %v264_v30, %v253_v21  ;;  %v267_v39 = vadd.f32 %v265_v31, %v253_v21 }
  0x37   : > { %269 = vst.msk [vmem:[%s219_s30] sm:$0xff] %vm268_vm0, %v254_v32  ;;  %392 = vst.msk [vmem:[%s219_s30 + $0x10] sm:$0xff] %vm268_vm0, %v258_v33  ;;  %v259_v40 = vadd.f32 %v257_v34, %v253_v21  ;;  %v263_v41 = vadd.f32 %v261_v35, %v253_v21 }
  0x38   : > { %270 = vst.msk [vmem:[%s219_s30 + $0x8] sm:$0xff] %vm268_vm0, %v255_v36  ;;  %394 = vst.msk [vmem:[%s219_s30 + $0x20] sm:$0xff] %vm268_vm0, %v262_v37 }
  0x39   : > { %396 = vst.msk [vmem:[%s219_s30 + $0x30] sm:$0xff] %vm268_vm0, %v266_v38  ;;  %397 = vst.msk [vmem:[%s219_s30 + $0x38] sm:$0xff] %vm268_vm0, %v267_v39 }
  0x3a   : > { %393 = vst.msk [vmem:[%s219_s30 + $0x18] sm:$0xff] %vm268_vm0, %v259_v40  ;;  %395 = vst.msk [vmem:[%s219_s30 + $0x28] sm:$0xff] %vm268_vm0, %v263_v41 }
  0x3b PF: > { %s18_s21 = sadd.s32 1, %s537_s21   ;;  %s682_s16 = smov %s521_s17 }
  0x3c   : > { %p15_p7 = scmp.ge.s32.totalorder %s18_s21, 4   ;;  %s683_s17 = smov %s525_s18 }
  0x3d   : > { %s684_s18 = smov %s617_s26  ;;  %s685_s19 = smov %s533_s20 }
  0x3e   : > { %s686_s20 = smov %s688_s1  ;;  %17 = sbr.rel (!%p15_p7) target bundleno = 7 (0x7), region = 78 }
  0x43   :  { %310 = vsyncpa [#allocation5], 1 }
  0x44   :  { %312 = vsyncpa [#allocation5 + $0x1], 1 }

</bundles_post_ra>
